<compile_context>
chip_gen: v5e
topology: v5e:2x2
jax: 0.10.0
libtpu: 0.0.40
codegen_flags: <defaults>
</compile_context>

<pallas_src>
import math

import jax
import jax.numpy as jnp
from jax.experimental import pallas as pl
from jax.experimental.pallas import tpu as pltpu


def _stage(x, pad_ref, z_ref, w_ref, b_ref):
    """Fused conv3x3(SAME) + bias + ReLU + maxpool2x2/2, fully in VMEM.

    x:       (H, W, Cin)          activation value
    pad_ref: (H+2, W+2, Cin)      VMEM scratch: zero-padded input
    z_ref:   (H+2, W+2, 9*Cout)   VMEM scratch: per-tap partial products
    w_ref:   (Cin, 9*Cout)        packed weights [ci, (ki*3+kj)*Cout + co]
    b_ref:   (1, Cout)            bias
    returns  (H//2, W//2, Cout)
    """
    H, W, Cin = x.shape
    Hp, Wp = H + 2, W + 2
    Cout = b_ref.shape[-1]

    # --- zero-pad inside VMEM (no host-side jnp.pad / extra HBM pass) ---
    pad_ref[...] = jnp.zeros_like(pad_ref)
    pad_ref[1:H + 1, 1:W + 1, :] = x

    # --- ONE MXU matmul: every padded pixel times all 9 taps' weights ---
    z = jnp.dot(pad_ref[...].reshape(Hp * Wp, Cin), w_ref[...],
                preferred_element_type=jnp.float32)        # (Hp*Wp, 9*Cout)
    z_ref[...] = z.reshape(Hp, Wp, 9 * Cout)

    # --- combine the 9 tap contributions via static shifted slices (VPU) ---
    acc = z_ref[0:H, 0:W, 0:Cout]
    for t in range(1, 9):
        ki, kj = t // 3, t % 3
        acc = acc + z_ref[ki:ki + H, kj:kj + W, t * Cout:(t + 1) * Cout]

    # --- bias + ReLU ---
    acc = jnp.maximum(acc + b_ref[...], 0.0)               # (H, W, Cout)

    # --- 2x2 max-pool, stride 2 (leading-dim reshapes keep the lane dim) ---
    y = acc.reshape(H, W // 2, 2, Cout)
    y = jnp.maximum(y[:, :, 0, :], y[:, :, 1, :])          # (H, W//2, Cout)
    y = y.reshape(H // 2, 2, W // 2, Cout)
    return jnp.maximum(y[:, 0], y[:, 1])                   # (H//2, W//2, Cout)


def encoder_kernel(x_ref, w1_ref, b1_ref, w2_ref, b2_ref, w3_ref, b3_ref,
                   o_ref, pad1, z1, pad2, z2, pad3, z3):
    """All three encoder stages for one batch element, VMEM-resident."""
    y = _stage(x_ref[0], pad1, z1, w1_ref, b1_ref)   # (H/2, W/2, 16)
    y = _stage(y,        pad2, z2, w2_ref, b2_ref)   # (H/4, W/4, 32)
    y = _stage(y,        pad3, z3, w3_ref, b3_ref)   # (H/8, W/8, 64)
    o_ref[0] = y.astype(o_ref.dtype)


def _pack_weight(w):
    """(3,3,Cin,Cout) HWIO -> (Cin, 9*Cout), lane index = (ki*3+kj)*Cout + co."""
    cin, cout = w.shape[2], w.shape[3]
    return jnp.transpose(w, (2, 0, 1, 3)).reshape(cin, 9 * cout)


@jax.jit
def encoder_forward(x_nchw, params):
    """PyTorch-equivalent forward: NCHW in, NCHW out."""
    N, C, H, W = x_nchw.shape
    (wa, ba), (wb, bb), (wc, bc) = params
    c1, c2, c3 = wa.shape[3], wb.shape[3], wc.shape[3]
    assert wa.shape[2] == C

    x = jnp.transpose(x_nchw, (0, 2, 3, 1))          # -> NHWC
    h1, v1 = H // 2, W // 2
    h2, v2 = H // 4, W // 4
    h3, v3 = H // 8, W // 8
    pw1, pw2, pw3 = _pack_weight(wa), _pack_weight(wb), _pack_weight(wc)

    out_nhwc = pl.pallas_call(
        encoder_kernel,
        out_shape=jax.ShapeDtypeStruct((N, h3, v3, c3), x.dtype),
        grid=(N,),
        in_specs=[
            pl.BlockSpec((1, H, W, C), lambda n: (n, 0, 0, 0)),
            pl.BlockSpec(pw1.shape, lambda n: (0, 0)),
            pl.BlockSpec(ba.shape, lambda n: (0, 0)),
            pl.BlockSpec(pw2.shape, lambda n: (0, 0)),
            pl.BlockSpec(bb.shape, lambda n: (0, 0)),
            pl.BlockSpec(pw3.shape, lambda n: (0, 0)),
            pl.BlockSpec(bc.shape, lambda n: (0, 0)),
        ],
        out_specs=pl.BlockSpec((1, h3, v3, c3), lambda n: (n, 0, 0, 0)),
        scratch_shapes=[
            pltpu.VMEM((H + 2, W + 2, C), jnp.float32),        # pad1
            pltpu.VMEM((H + 2, W + 2, 9 * c1), jnp.float32),   # z1
            pltpu.VMEM((h1 + 2, v1 + 2, c1), jnp.float32),     # pad2
            pltpu.VMEM((h1 + 2, v1 + 2, 9 * c2), jnp.float32), # z2
            pltpu.VMEM((h2 + 2, v2 + 2, c2), jnp.float32),     # pad3
            pltpu.VMEM((h2 + 2, v2 + 2, 9 * c3), jnp.float32), # z3
        ],
        compiler_params=pltpu.CompilerParams(
            dimension_semantics=("parallel",)),
    )(x, pw1, ba, pw2, bb, pw3, bc)

    return jnp.transpose(out_nhwc, (0, 3, 1, 2))     # -> NCHW


def init_conv_params(key, cin, cout):
    """Deterministic PyTorch-Conv2d-like init (kaiming-uniform bounds), HWIO."""
    kw, kb = jax.random.split(key)
    fan_in = cin * 3 * 3
    bound = 1.0 / math.sqrt(fan_in)
    w = jax.random.uniform(kw, (3, 3, cin, cout), jnp.float32, -bound, bound)
    b = jax.random.uniform(kb, (1, cout), jnp.float32, -bound, bound)
    return w, b


def make_encoder_params(seed=0):
    key = jax.random.PRNGKey(seed)
    k1, k2, k3 = jax.random.split(key, 3)
    return [init_conv_params(k1, 3, 16),
            init_conv_params(k2, 16, 32),
            init_conv_params(k3, 32, 64)]


def reference_forward(x_nchw, params):
    """Pure-JAX reference (lax conv + reduce_window) for correctness check."""
    x = jnp.transpose(x_nchw, (0, 2, 3, 1))
    for w, b in params:
        y = jax.lax.conv_general_dilated(
            x, w, window_strides=(1, 1), padding="SAME",
            dimension_numbers=("NHWC", "HWIO", "NHWC"))
        y = jnp.maximum(y + b.reshape(1, 1, 1, -1), 0.0)
        x = jax.lax.reduce_window(y, -jnp.inf, jax.lax.max,
                                  (1, 2, 2, 1), (1, 2, 2, 1), "VALID")
    return jnp.transpose(x, (0, 3, 1, 2))


if __name__ == "__main__":
    params = make_encoder_params(seed=0)

    key = jax.random.PRNGKey(0)
    x = jax.random.normal(key, (2, 3, 16, 16), dtype=jnp.float32)   # NCHW

    out = jax.block_until_ready(encoder_forward(x, params))
    assert out.shape == (2, 64, 2, 2), out.shape

    ref = reference_forward(x, params)
    assert jnp.allclose(out, ref, atol=1e-4, rtol=1e-4), \
        float(jnp.max(jnp.abs(out - ref)))

    print("KERNEL_OK")
</pallas_src>

<mosaic_0001>
module attributes {stable_mosaic.version = 11 : i64} {
  func.func @encoder_kernel(%arg0: i32, %arg1: memref<1x16x16x3xf32, #tpu.memory_space<vmem>>, %arg2: memref<3x144xf32, #tpu.memory_space<vmem>>, %arg3: memref<1x16xf32, #tpu.memory_space<vmem>>, %arg4: memref<16x288xf32, #tpu.memory_space<vmem>>, %arg5: memref<1x32xf32, #tpu.memory_space<vmem>>, %arg6: memref<32x576xf32, #tpu.memory_space<vmem>>, %arg7: memref<1x64xf32, #tpu.memory_space<vmem>>, %arg8: memref<1x2x2x64xf32, #tpu.memory_space<vmem>>, %arg9: memref<18x18x3xf32, #tpu.memory_space<vmem>>, %arg10: memref<18x18x144xf32, #tpu.memory_space<vmem>>, %arg11: memref<10x10x16xf32, #tpu.memory_space<vmem>>, %arg12: memref<10x10x288xf32, #tpu.memory_space<vmem>>, %arg13: memref<6x6x32xf32, #tpu.memory_space<vmem>>, %arg14: memref<6x6x576xf32, #tpu.memory_space<vmem>>) attributes {dimension_semantics = [#tpu.dimension_semantics<parallel>], iteration_bounds = array<i64: 2>, scalar_prefetch = 0 : i64, scratch_operands = 6 : i64, tpu.core_type = #tpu.core_type<tc>, window_params = [{transform_indices = @transform_0, window_bounds = array<i64: 1, 16, 16, 3>}, {pipeline_mode = #tpu.pipeline_mode<synchronous>, transform_indices = @transform_1, window_bounds = array<i64: 3, 144>}, {pipeline_mode = #tpu.pipeline_mode<synchronous>, transform_indices = @transform_2, window_bounds = array<i64: 1, 16>}, {pipeline_mode = #tpu.pipeline_mode<synchronous>, transform_indices = @transform_3, window_bounds = array<i64: 16, 288>}, {pipeline_mode = #tpu.pipeline_mode<synchronous>, transform_indices = @transform_4, window_bounds = array<i64: 1, 32>}, {pipeline_mode = #tpu.pipeline_mode<synchronous>, transform_indices = @transform_5, window_bounds = array<i64: 32, 576>}, {pipeline_mode = #tpu.pipeline_mode<synchronous>, transform_indices = @transform_6, window_bounds = array<i64: 1, 64>}, {transform_indices = @transform_7, window_bounds = array<i64: 1, 2, 2, 64>}]} {
    %c0 = arith.constant 0 : index
    %c0_0 = arith.constant 0 : index
    %c0_1 = arith.constant 0 : index
    %c0_2 = arith.constant 0 : index
    %0 = vector.load %arg1[%c0, %c0_0, %c0_1, %c0_2] : memref<1x16x16x3xf32, #tpu.memory_space<vmem>>, vector<1x16x16x3xf32>
    %1 = vector.shape_cast %0 : vector<1x16x16x3xf32> to vector<16x16x3xf32>
    %cst = arith.constant 0.000000e+00 : f32
    %2 = vector.broadcast %cst : f32 to vector<18x18x3xf32>
    %c0_3 = arith.constant 0 : index
    %c0_4 = arith.constant 0 : index
    %c0_5 = arith.constant 0 : index
    %3 = vector.load %arg9[%c0_3, %c0_4, %c0_5] : memref<18x18x3xf32, #tpu.memory_space<vmem>>, vector<18x18x3xf32>
    tpu.vector_store %arg9[%c0_3, %c0_4, %c0_5], %2 {strides = array<i32>} : memref<18x18x3xf32, #tpu.memory_space<vmem>>, vector<18x18x3xf32>,
    %c1 = arith.constant 1 : index
    %c1_6 = arith.constant 1 : index
    %c0_7 = arith.constant 0 : index
    %4 = vector.load %arg9[%c1, %c1_6, %c0_7] : memref<18x18x3xf32, #tpu.memory_space<vmem>>, vector<16x16x3xf32>
    tpu.vector_store %arg9[%c1, %c1_6, %c0_7], %1 {strides = array<i32>} : memref<18x18x3xf32, #tpu.memory_space<vmem>>, vector<16x16x3xf32>,
    %c0_8 = arith.constant 0 : index
    %c0_9 = arith.constant 0 : index
    %c0_10 = arith.constant 0 : index
    %5 = vector.load %arg9[%c0_8, %c0_9, %c0_10] : memref<18x18x3xf32, #tpu.memory_space<vmem>>, vector<18x18x3xf32>
    %6 = vector.shape_cast %5 : vector<18x18x3xf32> to vector<324x3xf32>
    %c0_11 = arith.constant 0 : index
    %c0_12 = arith.constant 0 : index
    %7 = vector.load %arg2[%c0_11, %c0_12] : memref<3x144xf32, #tpu.memory_space<vmem>>, vector<3x144xf32>
    %cst_13 = arith.constant dense<0.000000e+00> : vector<324x144xf32>
    %8 = tpu.matmul %6, %7, %cst_13 {dimension_numbers = #tpu.dot_dimension_numbers<[1], [0], [0], [1], [0, 0, 1, 1], [], []>} : vector<324x3xf32>, vector<3x144xf32>, vector<324x144xf32> -> vector<324x144xf32>
    %9 = vector.shape_cast %8 : vector<324x144xf32> to vector<18x18x144xf32>
    %c0_14 = arith.constant 0 : index
    %c0_15 = arith.constant 0 : index
    %c0_16 = arith.constant 0 : index
    %10 = vector.load %arg10[%c0_14, %c0_15, %c0_16] : memref<18x18x144xf32, #tpu.memory_space<vmem>>, vector<18x18x144xf32>
    tpu.vector_store %arg10[%c0_14, %c0_15, %c0_16], %9 {strides = array<i32>} : memref<18x18x144xf32, #tpu.memory_space<vmem>>, vector<18x18x144xf32>,
    %c0_17 = arith.constant 0 : index
    %c0_18 = arith.constant 0 : index
    %c0_19 = arith.constant 0 : index
    %11 = vector.load %arg10[%c0_17, %c0_18, %c0_19] : memref<18x18x144xf32, #tpu.memory_space<vmem>>, vector<16x16x16xf32>
    %c0_20 = arith.constant 0 : index
    %c1_21 = arith.constant 1 : index
    %c16 = arith.constant 16 : index
    %12 = vector.load %arg10[%c0_20, %c1_21, %c16] : memref<18x18x144xf32, #tpu.memory_space<vmem>>, vector<16x16x16xf32>
    %13 = arith.addf %11, %12 : vector<16x16x16xf32>
    %c0_22 = arith.constant 0 : index
    %c2 = arith.constant 2 : index
    %c32 = arith.constant 32 : index
    %14 = vector.load %arg10[%c0_22, %c2, %c32] : memref<18x18x144xf32, #tpu.memory_space<vmem>>, vector<16x16x16xf32>
    %15 = arith.addf %13, %14 : vector<16x16x16xf32>
    %c1_23 = arith.constant 1 : index
    %c0_24 = arith.constant 0 : index
    %c48 = arith.constant 48 : index
    %16 = vector.load %arg10[%c1_23, %c0_24, %c48] : memref<18x18x144xf32, #tpu.memory_space<vmem>>, vector<16x16x16xf32>
    %17 = arith.addf %15, %16 : vector<16x16x16xf32>
    %c1_25 = arith.constant 1 : index
    %c1_26 = arith.constant 1 : index
    %c64 = arith.constant 64 : index
    %18 = vector.load %arg10[%c1_25, %c1_26, %c64] : memref<18x18x144xf32, #tpu.memory_space<vmem>>, vector<16x16x16xf32>
    %19 = arith.addf %17, %18 : vector<16x16x16xf32>
    %c1_27 = arith.constant 1 : index
    %c2_28 = arith.constant 2 : index
    %c80 = arith.constant 80 : index
    %20 = vector.load %arg10[%c1_27, %c2_28, %c80] : memref<18x18x144xf32, #tpu.memory_space<vmem>>, vector<16x16x16xf32>
    %21 = arith.addf %19, %20 : vector<16x16x16xf32>
    %c2_29 = arith.constant 2 : index
    %c0_30 = arith.constant 0 : index
    %c96 = arith.constant 96 : index
    %22 = vector.load %arg10[%c2_29, %c0_30, %c96] : memref<18x18x144xf32, #tpu.memory_space<vmem>>, vector<16x16x16xf32>
    %23 = arith.addf %21, %22 : vector<16x16x16xf32>
    %c2_31 = arith.constant 2 : index
    %c1_32 = arith.constant 1 : index
    %c112 = arith.constant 112 : index
    %24 = vector.load %arg10[%c2_31, %c1_32, %c112] : memref<18x18x144xf32, #tpu.memory_space<vmem>>, vector<16x16x16xf32>
    %25 = arith.addf %23, %24 : vector<16x16x16xf32>
    %c2_33 = arith.constant 2 : index
    %c2_34 = arith.constant 2 : index
    %c128 = arith.constant 128 : index
    %26 = vector.load %arg10[%c2_33, %c2_34, %c128] : memref<18x18x144xf32, #tpu.memory_space<vmem>>, vector<16x16x16xf32>
    %27 = arith.addf %25, %26 : vector<16x16x16xf32>
    %c0_35 = arith.constant 0 : index
    %c0_36 = arith.constant 0 : index
    %28 = vector.load %arg3[%c0_35, %c0_36] : memref<1x16xf32, #tpu.memory_space<vmem>>, vector<1x16xf32>
    %29 = vector.shape_cast %28 : vector<1x16xf32> to vector<1x1x16xf32>
    %30 = vector.broadcast %29 : vector<1x1x16xf32> to vector<16x16x16xf32>
    %31 = arith.addf %27, %30 : vector<16x16x16xf32>
    %cst_37 = arith.constant 0.000000e+00 : f32
    %32 = vector.broadcast %cst_37 : f32 to vector<16x16x16xf32>
    %33 = arith.maximumf %31, %32 : vector<16x16x16xf32>
    %34 = vector.shape_cast %33 : vector<16x16x16xf32> to vector<16x8x2x16xf32>
    %35 = vector.extract_strided_slice %34 {offsets = [0, 0, 0, 0], sizes = [16, 8, 1, 16], strides = [1, 1, 1, 1]} : vector<16x8x2x16xf32> to vector<16x8x1x16xf32>
    %36 = vector.shape_cast %35 : vector<16x8x1x16xf32> to vector<16x8x16xf32>
    %37 = vector.extract_strided_slice %34 {offsets = [0, 0, 1, 0], sizes = [16, 8, 1, 16], strides = [1, 1, 1, 1]} : vector<16x8x2x16xf32> to vector<16x8x1x16xf32>
    %38 = vector.shape_cast %37 : vector<16x8x1x16xf32> to vector<16x8x16xf32>
    %39 = arith.maximumf %36, %38 : vector<16x8x16xf32>
    %40 = vector.shape_cast %39 : vector<16x8x16xf32> to vector<8x2x8x16xf32>
    %41 = vector.extract_strided_slice %40 {offsets = [0, 0, 0, 0], sizes = [8, 1, 8, 16], strides = [1, 1, 1, 1]} : vector<8x2x8x16xf32> to vector<8x1x8x16xf32>
    %42 = vector.shape_cast %41 : vector<8x1x8x16xf32> to vector<8x8x16xf32>
    %43 = vector.extract_strided_slice %40 {offsets = [0, 1, 0, 0], sizes = [8, 1, 8, 16], strides = [1, 1, 1, 1]} : vector<8x2x8x16xf32> to vector<8x1x8x16xf32>
    %44 = vector.shape_cast %43 : vector<8x1x8x16xf32> to vector<8x8x16xf32>
    %45 = arith.maximumf %42, %44 : vector<8x8x16xf32>
    %cst_38 = arith.constant 0.000000e+00 : f32
    %46 = vector.broadcast %cst_38 : f32 to vector<10x10x16xf32>
    %c0_39 = arith.constant 0 : index
    %c0_40 = arith.constant 0 : index
    %c0_41 = arith.constant 0 : index
    %47 = vector.load %arg11[%c0_39, %c0_40, %c0_41] : memref<10x10x16xf32, #tpu.memory_space<vmem>>, vector<10x10x16xf32>
    tpu.vector_store %arg11[%c0_39, %c0_40, %c0_41], %46 {strides = array<i32>} : memref<10x10x16xf32, #tpu.memory_space<vmem>>, vector<10x10x16xf32>,
    %c1_42 = arith.constant 1 : index
    %c1_43 = arith.constant 1 : index
    %c0_44 = arith.constant 0 : index
    %48 = vector.load %arg11[%c1_42, %c1_43, %c0_44] : memref<10x10x16xf32, #tpu.memory_space<vmem>>, vector<8x8x16xf32>
    tpu.vector_store %arg11[%c1_42, %c1_43, %c0_44], %45 {strides = array<i32>} : memref<10x10x16xf32, #tpu.memory_space<vmem>>, vector<8x8x16xf32>,
    %c0_45 = arith.constant 0 : index
    %c0_46 = arith.constant 0 : index
    %c0_47 = arith.constant 0 : index
    %49 = vector.load %arg11[%c0_45, %c0_46, %c0_47] : memref<10x10x16xf32, #tpu.memory_space<vmem>>, vector<10x10x16xf32>
    %50 = vector.shape_cast %49 : vector<10x10x16xf32> to vector<100x16xf32>
    %c0_48 = arith.constant 0 : index
    %c0_49 = arith.constant 0 : index
    %51 = vector.load %arg4[%c0_48, %c0_49] : memref<16x288xf32, #tpu.memory_space<vmem>>, vector<16x288xf32>
    %cst_50 = arith.constant dense<0.000000e+00> : vector<100x288xf32>
    %52 = tpu.matmul %50, %51, %cst_50 {dimension_numbers = #tpu.dot_dimension_numbers<[1], [0], [0], [1], [0, 0, 1, 1], [], []>} : vector<100x16xf32>, vector<16x288xf32>, vector<100x288xf32> -> vector<100x288xf32>
    %53 = vector.shape_cast %52 : vector<100x288xf32> to vector<10x10x288xf32>
    %c0_51 = arith.constant 0 : index
    %c0_52 = arith.constant 0 : index
    %c0_53 = arith.constant 0 : index
    %54 = vector.load %arg12[%c0_51, %c0_52, %c0_53] : memref<10x10x288xf32, #tpu.memory_space<vmem>>, vector<10x10x288xf32>
    tpu.vector_store %arg12[%c0_51, %c0_52, %c0_53], %53 {strides = array<i32>} : memref<10x10x288xf32, #tpu.memory_space<vmem>>, vector<10x10x288xf32>,
    %c0_54 = arith.constant 0 : index
    %c0_55 = arith.constant 0 : index
    %c0_56 = arith.constant 0 : index
    %55 = vector.load %arg12[%c0_54, %c0_55, %c0_56] : memref<10x10x288xf32, #tpu.memory_space<vmem>>, vector<8x8x32xf32>
    %c0_57 = arith.constant 0 : index
    %c1_58 = arith.constant 1 : index
    %c32_59 = arith.constant 32 : index
    %56 = vector.load %arg12[%c0_57, %c1_58, %c32_59] : memref<10x10x288xf32, #tpu.memory_space<vmem>>, vector<8x8x32xf32>
    %57 = arith.addf %55, %56 : vector<8x8x32xf32>
    %c0_60 = arith.constant 0 : index
    %c2_61 = arith.constant 2 : index
    %c64_62 = arith.constant 64 : index
    %58 = vector.load %arg12[%c0_60, %c2_61, %c64_62] : memref<10x10x288xf32, #tpu.memory_space<vmem>>, vector<8x8x32xf32>
    %59 = arith.addf %57, %58 : vector<8x8x32xf32>
    %c1_63 = arith.constant 1 : index
    %c0_64 = arith.constant 0 : index
    %c96_65 = arith.constant 96 : index
    %60 = vector.load %arg12[%c1_63, %c0_64, %c96_65] : memref<10x10x288xf32, #tpu.memory_space<vmem>>, vector<8x8x32xf32>
    %61 = arith.addf %59, %60 : vector<8x8x32xf32>
    %c1_66 = arith.constant 1 : index
    %c1_67 = arith.constant 1 : index
    %c128_68 = arith.constant 128 : index
    %62 = vector.load %arg12[%c1_66, %c1_67, %c128_68] : memref<10x10x288xf32, #tpu.memory_space<vmem>>, vector<8x8x32xf32>
    %63 = arith.addf %61, %62 : vector<8x8x32xf32>
    %c1_69 = arith.constant 1 : index
    %c2_70 = arith.constant 2 : index
    %c160 = arith.constant 160 : index
    %64 = vector.load %arg12[%c1_69, %c2_70, %c160] : memref<10x10x288xf32, #tpu.memory_space<vmem>>, vector<8x8x32xf32>
    %65 = arith.addf %63, %64 : vector<8x8x32xf32>
    %c2_71 = arith.constant 2 : index
    %c0_72 = arith.constant 0 : index
    %c192 = arith.constant 192 : index
    %66 = vector.load %arg12[%c2_71, %c0_72, %c192] : memref<10x10x288xf32, #tpu.memory_space<vmem>>, vector<8x8x32xf32>
    %67 = arith.addf %65, %66 : vector<8x8x32xf32>
    %c2_73 = arith.constant 2 : index
    %c1_74 = arith.constant 1 : index
    %c224 = arith.constant 224 : index
    %68 = vector.load %arg12[%c2_73, %c1_74, %c224] : memref<10x10x288xf32, #tpu.memory_space<vmem>>, vector<8x8x32xf32>
    %69 = arith.addf %67, %68 : vector<8x8x32xf32>
    %c2_75 = arith.constant 2 : index
    %c2_76 = arith.constant 2 : index
    %c256 = arith.constant 256 : index
    %70 = vector.load %arg12[%c2_75, %c2_76, %c256] : memref<10x10x288xf32, #tpu.memory_space<vmem>>, vector<8x8x32xf32>
    %71 = arith.addf %69, %70 : vector<8x8x32xf32>
    %c0_77 = arith.constant 0 : index
    %c0_78 = arith.constant 0 : index
    %72 = vector.load %arg5[%c0_77, %c0_78] : memref<1x32xf32, #tpu.memory_space<vmem>>, vector<1x32xf32>
    %73 = vector.shape_cast %72 : vector<1x32xf32> to vector<1x1x32xf32>
    %74 = vector.broadcast %73 : vector<1x1x32xf32> to vector<8x8x32xf32>
    %75 = arith.addf %71, %74 : vector<8x8x32xf32>
    %cst_79 = arith.constant 0.000000e+00 : f32
    %76 = vector.broadcast %cst_79 : f32 to vector<8x8x32xf32>
    %77 = arith.maximumf %75, %76 : vector<8x8x32xf32>
    %78 = vector.shape_cast %77 : vector<8x8x32xf32> to vector<8x4x2x32xf32>
    %79 = vector.extract_strided_slice %78 {offsets = [0, 0, 0, 0], sizes = [8, 4, 1, 32], strides = [1, 1, 1, 1]} : vector<8x4x2x32xf32> to vector<8x4x1x32xf32>
    %80 = vector.shape_cast %79 : vector<8x4x1x32xf32> to vector<8x4x32xf32>
    %81 = vector.extract_strided_slice %78 {offsets = [0, 0, 1, 0], sizes = [8, 4, 1, 32], strides = [1, 1, 1, 1]} : vector<8x4x2x32xf32> to vector<8x4x1x32xf32>
    %82 = vector.shape_cast %81 : vector<8x4x1x32xf32> to vector<8x4x32xf32>
    %83 = arith.maximumf %80, %82 : vector<8x4x32xf32>
    %84 = vector.shape_cast %83 : vector<8x4x32xf32> to vector<4x2x4x32xf32>
    %85 = vector.extract_strided_slice %84 {offsets = [0, 0, 0, 0], sizes = [4, 1, 4, 32], strides = [1, 1, 1, 1]} : vector<4x2x4x32xf32> to vector<4x1x4x32xf32>
    %86 = vector.shape_cast %85 : vector<4x1x4x32xf32> to vector<4x4x32xf32>
    %87 = vector.extract_strided_slice %84 {offsets = [0, 1, 0, 0], sizes = [4, 1, 4, 32], strides = [1, 1, 1, 1]} : vector<4x2x4x32xf32> to vector<4x1x4x32xf32>
    %88 = vector.shape_cast %87 : vector<4x1x4x32xf32> to vector<4x4x32xf32>
    %89 = arith.maximumf %86, %88 : vector<4x4x32xf32>
    %cst_80 = arith.constant 0.000000e+00 : f32
    %90 = vector.broadcast %cst_80 : f32 to vector<6x6x32xf32>
    %c0_81 = arith.constant 0 : index
    %c0_82 = arith.constant 0 : index
    %c0_83 = arith.constant 0 : index
    %91 = vector.load %arg13[%c0_81, %c0_82, %c0_83] : memref<6x6x32xf32, #tpu.memory_space<vmem>>, vector<6x6x32xf32>
    tpu.vector_store %arg13[%c0_81, %c0_82, %c0_83], %90 {strides = array<i32>} : memref<6x6x32xf32, #tpu.memory_space<vmem>>, vector<6x6x32xf32>,
    %c1_84 = arith.constant 1 : index
    %c1_85 = arith.constant 1 : index
    %c0_86 = arith.constant 0 : index
    %92 = vector.load %arg13[%c1_84, %c1_85, %c0_86] : memref<6x6x32xf32, #tpu.memory_space<vmem>>, vector<4x4x32xf32>
    tpu.vector_store %arg13[%c1_84, %c1_85, %c0_86], %89 {strides = array<i32>} : memref<6x6x32xf32, #tpu.memory_space<vmem>>, vector<4x4x32xf32>,
    %c0_87 = arith.constant 0 : index
    %c0_88 = arith.constant 0 : index
    %c0_89 = arith.constant 0 : index
    %93 = vector.load %arg13[%c0_87, %c0_88, %c0_89] : memref<6x6x32xf32, #tpu.memory_space<vmem>>, vector<6x6x32xf32>
    %94 = vector.shape_cast %93 : vector<6x6x32xf32> to vector<36x32xf32>
    %c0_90 = arith.constant 0 : index
    %c0_91 = arith.constant 0 : index
    %95 = vector.load %arg6[%c0_90, %c0_91] : memref<32x576xf32, #tpu.memory_space<vmem>>, vector<32x576xf32>
    %cst_92 = arith.constant dense<0.000000e+00> : vector<36x576xf32>
    %96 = tpu.matmul %94, %95, %cst_92 {dimension_numbers = #tpu.dot_dimension_numbers<[1], [0], [0], [1], [0, 0, 1, 1], [], []>} : vector<36x32xf32>, vector<32x576xf32>, vector<36x576xf32> -> vector<36x576xf32>
    %97 = vector.shape_cast %96 : vector<36x576xf32> to vector<6x6x576xf32>
    %c0_93 = arith.constant 0 : index
    %c0_94 = arith.constant 0 : index
    %c0_95 = arith.constant 0 : index
    %98 = vector.load %arg14[%c0_93, %c0_94, %c0_95] : memref<6x6x576xf32, #tpu.memory_space<vmem>>, vector<6x6x576xf32>
    tpu.vector_store %arg14[%c0_93, %c0_94, %c0_95], %97 {strides = array<i32>} : memref<6x6x576xf32, #tpu.memory_space<vmem>>, vector<6x6x576xf32>,
    %c0_96 = arith.constant 0 : index
    %c0_97 = arith.constant 0 : index
    %c0_98 = arith.constant 0 : index
    %99 = vector.load %arg14[%c0_96, %c0_97, %c0_98] : memref<6x6x576xf32, #tpu.memory_space<vmem>>, vector<4x4x64xf32>
    %c0_99 = arith.constant 0 : index
    %c1_100 = arith.constant 1 : index
    %c64_101 = arith.constant 64 : index
    %100 = vector.load %arg14[%c0_99, %c1_100, %c64_101] : memref<6x6x576xf32, #tpu.memory_space<vmem>>, vector<4x4x64xf32>
    %101 = arith.addf %99, %100 : vector<4x4x64xf32>
    %c0_102 = arith.constant 0 : index
    %c2_103 = arith.constant 2 : index
    %c128_104 = arith.constant 128 : index
    %102 = vector.load %arg14[%c0_102, %c2_103, %c128_104] : memref<6x6x576xf32, #tpu.memory_space<vmem>>, vector<4x4x64xf32>
    %103 = arith.addf %101, %102 : vector<4x4x64xf32>
    %c1_105 = arith.constant 1 : index
    %c0_106 = arith.constant 0 : index
    %c192_107 = arith.constant 192 : index
    %104 = vector.load %arg14[%c1_105, %c0_106, %c192_107] : memref<6x6x576xf32, #tpu.memory_space<vmem>>, vector<4x4x64xf32>
    %105 = arith.addf %103, %104 : vector<4x4x64xf32>
    %c1_108 = arith.constant 1 : index
    %c1_109 = arith.constant 1 : index
    %c256_110 = arith.constant 256 : index
    %106 = vector.load %arg14[%c1_108, %c1_109, %c256_110] : memref<6x6x576xf32, #tpu.memory_space<vmem>>, vector<4x4x64xf32>
    %107 = arith.addf %105, %106 : vector<4x4x64xf32>
    %c1_111 = arith.constant 1 : index
    %c2_112 = arith.constant 2 : index
    %c320 = arith.constant 320 : index
    %108 = vector.load %arg14[%c1_111, %c2_112, %c320] : memref<6x6x576xf32, #tpu.memory_space<vmem>>, vector<4x4x64xf32>
    %109 = arith.addf %107, %108 : vector<4x4x64xf32>
    %c2_113 = arith.constant 2 : index
    %c0_114 = arith.constant 0 : index
    %c384 = arith.constant 384 : index
    %110 = vector.load %arg14[%c2_113, %c0_114, %c384] : memref<6x6x576xf32, #tpu.memory_space<vmem>>, vector<4x4x64xf32>
    %111 = arith.addf %109, %110 : vector<4x4x64xf32>
    %c2_115 = arith.constant 2 : index
    %c1_116 = arith.constant 1 : index
    %c448 = arith.constant 448 : index
    %112 = vector.load %arg14[%c2_115, %c1_116, %c448] : memref<6x6x576xf32, #tpu.memory_space<vmem>>, vector<4x4x64xf32>
    %113 = arith.addf %111, %112 : vector<4x4x64xf32>
    %c2_117 = arith.constant 2 : index
    %c2_118 = arith.constant 2 : index
    %c512 = arith.constant 512 : index
    %114 = vector.load %arg14[%c2_117, %c2_118, %c512] : memref<6x6x576xf32, #tpu.memory_space<vmem>>, vector<4x4x64xf32>
    %115 = arith.addf %113, %114 : vector<4x4x64xf32>
    %c0_119 = arith.constant 0 : index
    %c0_120 = arith.constant 0 : index
    %116 = vector.load %arg7[%c0_119, %c0_120] : memref<1x64xf32, #tpu.memory_space<vmem>>, vector<1x64xf32>
    %117 = vector.shape_cast %116 : vector<1x64xf32> to vector<1x1x64xf32>
    %118 = vector.broadcast %117 : vector<1x1x64xf32> to vector<4x4x64xf32>
    %119 = arith.addf %115, %118 : vector<4x4x64xf32>
    %cst_121 = arith.constant 0.000000e+00 : f32
    %120 = vector.broadcast %cst_121 : f32 to vector<4x4x64xf32>
    %121 = arith.maximumf %119, %120 : vector<4x4x64xf32>
    %122 = vector.shape_cast %121 : vector<4x4x64xf32> to vector<4x2x2x64xf32>
    %123 = vector.extract_strided_slice %122 {offsets = [0, 0, 0, 0], sizes = [4, 2, 1, 64], strides = [1, 1, 1, 1]} : vector<4x2x2x64xf32> to vector<4x2x1x64xf32>
    %124 = vector.shape_cast %123 : vector<4x2x1x64xf32> to vector<4x2x64xf32>
    %125 = vector.extract_strided_slice %122 {offsets = [0, 0, 1, 0], sizes = [4, 2, 1, 64], strides = [1, 1, 1, 1]} : vector<4x2x2x64xf32> to vector<4x2x1x64xf32>
    %126 = vector.shape_cast %125 : vector<4x2x1x64xf32> to vector<4x2x64xf32>
    %127 = arith.maximumf %124, %126 : vector<4x2x64xf32>
    %128 = vector.shape_cast %127 : vector<4x2x64xf32> to vector<2x2x2x64xf32>
    %129 = vector.extract_strided_slice %128 {offsets = [0, 0, 0, 0], sizes = [2, 1, 2, 64], strides = [1, 1, 1, 1]} : vector<2x2x2x64xf32> to vector<2x1x2x64xf32>
    %130 = vector.shape_cast %129 : vector<2x1x2x64xf32> to vector<2x2x64xf32>
    %131 = vector.extract_strided_slice %128 {offsets = [0, 1, 0, 0], sizes = [2, 1, 2, 64], strides = [1, 1, 1, 1]} : vector<2x2x2x64xf32> to vector<2x1x2x64xf32>
    %132 = vector.shape_cast %131 : vector<2x1x2x64xf32> to vector<2x2x64xf32>
    %133 = arith.maximumf %130, %132 : vector<2x2x64xf32>
    %c0_122 = arith.constant 0 : index
    %c0_123 = arith.constant 0 : index
    %c0_124 = arith.constant 0 : index
    %c0_125 = arith.constant 0 : index
    %134 = vector.load %arg8[%c0_122, %c0_123, %c0_124, %c0_125] : memref<1x2x2x64xf32, #tpu.memory_space<vmem>>, vector<1x2x2x64xf32>
    %135 = vector.shape_cast %134 : vector<1x2x2x64xf32> to vector<2x2x64xf32>
    %136 = vector.shape_cast %133 : vector<2x2x64xf32> to vector<1x2x2x64xf32>
    tpu.vector_store %arg8[%c0_122, %c0_123, %c0_124, %c0_125], %136 {strides = array<i32>} : memref<1x2x2x64xf32, #tpu.memory_space<vmem>>, vector<1x2x2x64xf32>,
    return
  }
  func.func @transform_0(%arg0: i32) -> (i32, i32, i32, i32) {
    %c0_i32 = arith.constant 0 : i32
    %c0_i32_0 = arith.constant 0 : i32
    %c0_i32_1 = arith.constant 0 : i32
    %c0_i32_2 = arith.constant 0 : i32
    return %arg0, %c0_i32, %c0_i32_0, %c0_i32_1 : i32, i32, i32, i32
  }
  func.func @transform_1(%arg0: i32) -> (i32, i32) {
    %c0_i32 = arith.constant 0 : i32
    %c0_i32_0 = arith.constant 0 : i32
    %c0_i32_1 = arith.constant 0 : i32
    return %c0_i32, %c0_i32_0 : i32, i32
  }
  func.func @transform_2(%arg0: i32) -> (i32, i32) {
    %c0_i32 = arith.constant 0 : i32
    %c0_i32_0 = arith.constant 0 : i32
    %c0_i32_1 = arith.constant 0 : i32
    return %c0_i32, %c0_i32_0 : i32, i32
  }
  func.func @transform_3(%arg0: i32) -> (i32, i32) {
    %c0_i32 = arith.constant 0 : i32
    %c0_i32_0 = arith.constant 0 : i32
    %c0_i32_1 = arith.constant 0 : i32
    return %c0_i32, %c0_i32_0 : i32, i32
  }
  func.func @transform_4(%arg0: i32) -> (i32, i32) {
    %c0_i32 = arith.constant 0 : i32
    %c0_i32_0 = arith.constant 0 : i32
    %c0_i32_1 = arith.constant 0 : i32
    return %c0_i32, %c0_i32_0 : i32, i32
  }
  func.func @transform_5(%arg0: i32) -> (i32, i32) {
    %c0_i32 = arith.constant 0 : i32
    %c0_i32_0 = arith.constant 0 : i32
    %c0_i32_1 = arith.constant 0 : i32
    return %c0_i32, %c0_i32_0 : i32, i32
  }
  func.func @transform_6(%arg0: i32) -> (i32, i32) {
    %c0_i32 = arith.constant 0 : i32
    %c0_i32_0 = arith.constant 0 : i32
    %c0_i32_1 = arith.constant 0 : i32
    return %c0_i32, %c0_i32_0 : i32, i32
  }
  func.func @transform_7(%arg0: i32) -> (i32, i32, i32, i32) {
    %c0_i32 = arith.constant 0 : i32
    %c0_i32_0 = arith.constant 0 : i32
    %c0_i32_1 = arith.constant 0 : i32
    %c0_i32_2 = arith.constant 0 : i32
    return %arg0, %c0_i32, %c0_i32_0, %c0_i32_1 : i32, i32, i32, i32
  }
}

</mosaic_0001>

<bundles_post_ra>
// kernel: encoder_forward.1
= control target key start
LH: loop header
LB: loop body
LE: loop exit
PB: predicated region body
PF: predicated region fallthrough
CT: control target
= control target key end

     0   :  { %12 = vsyncpa [#allocation9], 0  ;;  %s11592_s0 = inlined_call_operand.vmem [shape: f32[2,16,16,3], index: 0, kind: input, shape index: {}]   ;;  %s11593_s1 = inlined_call_operand.vmem [shape: f32[3,144], index: 1, kind: input, shape index: {}]   ;;  %s11594_s2 = inlined_call_operand.vmem [shape: f32[1,16], index: 2, kind: input, shape index: {}]   ;;  %s11595_s3 = inlined_call_operand.vmem [shape: f32[16,288], index: 3, kind: input, shape index: {}]   ;;  %s11596_s4 = inlined_call_operand.vmem [shape: f32[1,32], index: 4, kind: input, shape index: {}]   ;;  %s11597_s5 = inlined_call_operand.vmem [shape: f32[32,576], index: 5, kind: input, shape index: {}]   ;;  %s11598_s6 = inlined_call_operand.vmem [shape: f32[1,64], index: 6, kind: input, shape index: {}]   ;;  %s11599_s7 = inlined_call_operand.hbm [shape: f32[2,2,2,64], index: 7, kind: output, shape index: {}]  }
   0x1   :  { %14 = vsyncpa [#allocation9 + $0x1], 0  ;;  %s8247_s24 = smov 0   ;;  %s8249_s25 = smov 0  }
   0x2   :  { %s8251_s26 = smov 0   ;;  %s8253_s27 = smov 0  }
   0x3 LB: > { %s8268_s28 = sadd.s32 4294967295, %s8196_s27   ;;  %s7726_s29 = sadd.s32 4294967294, %s8196_s27   ;;  %s8196_s27 = sphi %s8253_s27, %s11605_s27   ;;  %s8192_s26 = sphi %s8251_s26, %s11604_s26   ;;  %s8188_s25 = sphi %s8249_s25, %s11603_s25   ;;  %s8184_s24 = sphi %s8247_s24, %s11602_s24  }
   0x4   : > { %s8272_s30 = sadd.s32 1, %s8196_s27   ;;  %s179_s8 = sadd.s32 1, %s8192_s26 }
   0x5   : > { %s176_s9 = ssub.s32 %s8196_s27, %s8272_s30  ;;  %p189_p0 = scmp.ne.s32.totalorder %s8192_s26, %s8188_s25 }
   0x6   : > { %p177_p1 = scmp.eq.s32.totalorder %s176_s9, 0  ;;  %p190_p2 = scmp.eq.s32.totalorder %s8268_s28, 1 }
   0x7   : > { %p195_p3 = scmp.ne.s32.totalorder %s8188_s25, %s8184_s24  ;;  %p196_p4 = scmp.eq.s32.totalorder %s7726_s29, 1 }
   0x8   : > { %s8283_s10 = scalar_select %p177_p1, %s8192_s26, %s179_s8  }
   0x9   : > { %p8285_p5 = por %p190_p2, %p189_p0  ;;  %p8289_p6 = por %p196_p4, %p195_p3 }
   0xa   : > { %p7729_p7 = scmp.ge.s32.totalorder %s8196_s27, 1  ;;  %p240_p8 = scmp.lt.s32.totalorder %s8196_s27, 3 }
   0xc   : > { %p241_p9 = pnand %p7729_p7, %p240_p8 }
   0xd   : > { %p272_p10 = scmp.lt.s32.totalorder (!%p241_p9), %s8268_s28, 1  ;;  %s8199_s20 = smov (!%p241_p9), 112  }
   0xe   : > { %244 = sbr.rel (%p241_p9) target bundleno = 2183 (0x887), region = 48  ;;  %s8200_s21 = smov (!%p241_p9), 96  }
   0xf   : > { %s8201_s22 = smov (!%p241_p9), 80   ;;  %s8202_s23 = smov (!%p241_p9), 64  }
  0x10   : > { %s8203_s29 = smov (!%p241_p9), 48   ;;  %s8204_s8 = smov (!%p241_p9), 32  }
  0x11   : > { %s8205_s9 = smov (!%p241_p9), 16  }
  0x13   : > { %vm309_vm0 = vcmask 23552   ;;  %vm312_vm1 = vcmask 17408   ;;  %v8198_v0 = vmov 0.0   ;;  %s273_s13 = scalar_select %p272_p10, %s8268_s28, 1  ;;  %vm911_vm2 = vcmask 1042432  }
  0x14   : > { %310 = vst.msk [vmem:[#allocation2] sm:$0xff] %vm309_vm0, %v8198_v0  ;;  %vm1992_vm3 = vcmask 130048   ;;  %vm1319_vm4 = vcmask 1041408   ;;  %vm1321_vm5 = vcmask 1043458   ;;  %vm1324_vm6 = vcmask 1045508  }
  0x15   : > { %311 = vst.msk [vmem:[#allocation2 + $0x8] sm:$0xff] %vm309_vm0, %v8198_v0  ;;  %s8054_s14 = sshll.u32 %s273_s13, 8  ;;  %vm1327_vm7 = vcmask 1045504   ;;  %vm1997_vm8 = vcmask 123904   ;;  %vm2213_vm9 = vcmask 1046528   ;;  %vm5152_vm10 = vcmask 1041409  }
  0x16   : > { %313 = vst.msk [vmem:[#allocation2 + $0x10] sm:$0x3] %vm312_vm1, %v8198_v0  ;;  %s8396_s17 = scalar_lea.vmem %s11592_s0, %s8054_s14  ;;  %vm5154_vm11 = vcmask 1042434   ;;  %vm5156_vm12 = vcmask 1043459   ;;  %vm5158_vm13 = vcmask 1044484   ;;  %vm5160_vm14 = vcmask 1045509  }
  0x17   : > { %314 = vst.msk [vmem:[#allocation2 + $0x18] sm:$0xff] %vm309_vm0, %v8198_v0  ;;  %v277_v1 = vld [vmem:[%s8396_s17] sm:$0xff]  ;;  %v278_v2 = vld [vmem:[%s8396_s17 + $0x8] sm:$0xff]  ;;  %v279_v3 = vld [vmem:[%s8396_s17 + $0x10] sm:$0xff]  ;;  %vm5162_vm15 = vcmask 1046534   ;;  %s269_s13 = sand.u32 1, %s8188_s25  }
  0x18   : > { %315 = vst.msk [vmem:[#allocation2 + $0x20] sm:$0xff] %vm309_vm0, %v8198_v0  ;;  %v280_v4 = vld [vmem:[%s8396_s17 + $0x18] sm:$0xff]  ;;  %v281_v5 = vld [vmem:[%s8396_s17 + $0x20] sm:$0xff]  ;;  %v282_v6 = vld [vmem:[%s8396_s17 + $0x28] sm:$0xff] }
  0x19   : > { %316 = vst.msk [vmem:[#allocation2 + $0x28] sm:$0x3] %vm312_vm1, %v8198_v0  ;;  %v283_v7 = vld [vmem:[%s8396_s17 + $0x30] sm:$0xff]  ;;  %v284_v8 = vld [vmem:[%s8396_s17 + $0x38] sm:$0xff]  ;;  %v285_v9 = vld [vmem:[%s8396_s17 + $0x40] sm:$0xff] }
  0x1a   : > { %317 = vst.msk [vmem:[#allocation2 + $0x30] sm:$0xff] %vm309_vm0, %v8198_v0  ;;  %v286_v10 = vld [vmem:[%s8396_s17 + $0x48] sm:$0xff]  ;;  %v287_v11 = vld [vmem:[%s8396_s17 + $0x50] sm:$0xff]  ;;  %v288_v12 = vld [vmem:[%s8396_s17 + $0x58] sm:$0xff] }
  0x1b   : > { %318 = vst.msk [vmem:[#allocation2 + $0x38] sm:$0xff] %vm309_vm0, %v8198_v0  ;;  %v289_v13 = vld [vmem:[%s8396_s17 + $0x60] sm:$0xff]  ;;  %v290_v14 = vld [vmem:[%s8396_s17 + $0x68] sm:$0xff]  ;;  %v291_v15 = vld [vmem:[%s8396_s17 + $0x70] sm:$0xff] }
  0x1c   : > { %319 = vst.msk [vmem:[#allocation2 + $0x40] sm:$0x3] %vm312_vm1, %v8198_v0  ;;  %v292_v16 = vld [vmem:[%s8396_s17 + $0x78] sm:$0xff]  ;;  %v293_v17 = vld [vmem:[%s8396_s17 + $0x80] sm:$0xff]  ;;  %v294_v18 = vld [vmem:[%s8396_s17 + $0x88] sm:$0xff] }
  0x1d   : > { %320 = vst.msk [vmem:[#allocation2 + $0x48] sm:$0xff] %vm309_vm0, %v8198_v0  ;;  %v295_v19 = vld [vmem:[%s8396_s17 + $0x90] sm:$0xff]  ;;  %v296_v20 = vld [vmem:[%s8396_s17 + $0x98] sm:$0xff]  ;;  %v297_v21 = vld [vmem:[%s8396_s17 + $0xa0] sm:$0xff] }
  0x1e   : > { %321 = vst.msk [vmem:[#allocation2 + $0x50] sm:$0xff] %vm309_vm0, %v8198_v0  ;;  %v298_v22 = vld [vmem:[%s8396_s17 + $0xa8] sm:$0xff]  ;;  %v299_v23 = vld [vmem:[%s8396_s17 + $0xb0] sm:$0xff]  ;;  %v300_v24 = vld [vmem:[%s8396_s17 + $0xb8] sm:$0xff] }
  0x1f   : > { %322 = vst.msk [vmem:[#allocation2 + $0x58] sm:$0x3] %vm312_vm1, %v8198_v0  ;;  %v301_v25 = vld [vmem:[%s8396_s17 + $0xc0] sm:$0xff]  ;;  %v302_v26 = vld [vmem:[%s8396_s17 + $0xc8] sm:$0xff]  ;;  %v303_v27 = vld [vmem:[%s8396_s17 + $0xd0] sm:$0xff] }
  0x20   : > { %323 = vst.msk [vmem:[#allocation2 + $0x60] sm:$0xff] %vm309_vm0, %v8198_v0  ;;  %v304_v28 = vld [vmem:[%s8396_s17 + $0xd8] sm:$0xff]  ;;  %v305_v29 = vld [vmem:[%s8396_s17 + $0xe0] sm:$0xff]  ;;  %v306_v30 = vld [vmem:[%s8396_s17 + $0xe8] sm:$0xff] }
  0x21   : > { %324 = vst.msk [vmem:[#allocation2 + $0x68] sm:$0xff] %vm309_vm0, %v8198_v0  ;;  %v398_v31 = vld [vmem:[#allocation2] sm:$0xff]  ;;  %v307_v32 = vld [vmem:[%s8396_s17 + $0xf0] sm:$0xff]  ;;  %v308_v33 = vld [vmem:[%s8396_s17 + $0xf8] sm:$0xff]  ;;  %s7649_s17 = scalar_lea.sflag [#allocation9], %s269_s13 }
  0x22   : > { %325 = vst.msk [vmem:[#allocation2 + $0x70] sm:$0x3] %vm312_vm1, %v8198_v0  ;;  %v506_v34 = vrot.slane %v398_v31, 2  ;;  %v399_v35 = vld [vmem:[#allocation2 + $0x8] sm:$0xff]  ;;  %v507_v36 = vrot.slane %v398_v31, 4  ;;  %v508_v37 = vrot.slane %v398_v31, 6 }
  0x23   : > { %326 = vst.msk [vmem:[#allocation2 + $0x78] sm:$0xff] %vm309_vm0, %v8198_v0  ;;  %v509_v38 = vrot.slane %v399_v35, 2  ;;  %v510_v39 = vrot.slane %v399_v35, 4  ;;  %v511_v40 = vrot.slane %v399_v35, 6  ;;  %v400_v42 = vld [vmem:[#allocation2 + $0x10] sm:$0x3] }
  0x24   : > { %327 = vst.msk [vmem:[#allocation2 + $0x80] sm:$0xff] %vm309_vm0, %v8198_v0 }
  0x25   : > { %328 = vst.msk [vmem:[#allocation2 + $0x88] sm:$0x3] %vm312_vm1, %v8198_v0 }
  0x26   : > { %329 = vst.msk [vmem:[#allocation2 + $0x90] sm:$0xff] %vm309_vm0, %v8198_v0 }
  0x27   : > { %330 = vst.msk [vmem:[#allocation2 + $0x98] sm:$0xff] %vm309_vm0, %v8198_v0 }
  0x28   : > { %331 = vst.msk [vmem:[#allocation2 + $0xa0] sm:$0x3] %vm312_vm1, %v8198_v0 }
  0x29   : > { %332 = vst.msk [vmem:[#allocation2 + $0xa8] sm:$0xff] %vm309_vm0, %v8198_v0 }
  0x2a   : > { %333 = vst.msk [vmem:[#allocation2 + $0xb0] sm:$0xff] %vm309_vm0, %v8198_v0 }
  0x2b   : > { %334 = vst.msk [vmem:[#allocation2 + $0xb8] sm:$0x3] %vm312_vm1, %v8198_v0 }
  0x2c   : > { %335 = vst.msk [vmem:[#allocation2 + $0xc0] sm:$0xff] %vm309_vm0, %v8198_v0 }
  0x2d   : > { %336 = vst.msk [vmem:[#allocation2 + $0xc8] sm:$0xff] %vm309_vm0, %v8198_v0 }
  0x2e   : > { %337 = vst.msk [vmem:[#allocation2 + $0xd0] sm:$0x3] %vm312_vm1, %v8198_v0 }
  0x2f   : > { %338 = vst.msk [vmem:[#allocation2 + $0xd8] sm:$0xff] %vm309_vm0, %v8198_v0 }
  0x30   : > { %339 = vst.msk [vmem:[#allocation2 + $0xe0] sm:$0xff] %vm309_vm0, %v8198_v0 }
  0x31   : > { %340 = vst.msk [vmem:[#allocation2 + $0xe8] sm:$0x3] %vm312_vm1, %v8198_v0 }
  0x32   : > { %341 = vst.msk [vmem:[#allocation2 + $0xf0] sm:$0xff] %vm309_vm0, %v8198_v0 }
  0x33   : > { %342 = vst.msk [vmem:[#allocation2 + $0xf8] sm:$0xff] %vm309_vm0, %v8198_v0 }
  0x34   : > { %343 = vst.msk [vmem:[#allocation2 + $0x100] sm:$0x3] %vm312_vm1, %v8198_v0 }
  0x35   : > { %344 = vst.msk [vmem:[#allocation2 + $0x108] sm:$0xff] %vm309_vm0, %v8198_v0 }
  0x36   : > { %345 = vst.msk [vmem:[#allocation2 + $0x110] sm:$0xff] %vm309_vm0, %v8198_v0 }
  0x37   : > { %346 = vst.msk [vmem:[#allocation2 + $0x118] sm:$0x3] %vm312_vm1, %v8198_v0 }
  0x38   : > { %347 = vst.msk [vmem:[#allocation2 + $0x120] sm:$0xff] %vm309_vm0, %v8198_v0 }
  0x39   : > { %348 = vst.msk [vmem:[#allocation2 + $0x128] sm:$0xff] %vm309_vm0, %v8198_v0 }
  0x3a   : > { %349 = vst.msk [vmem:[#allocation2 + $0x130] sm:$0x3] %vm312_vm1, %v8198_v0 }
  0x3b   : > { %350 = vst.msk [vmem:[#allocation2 + $0x138] sm:$0xff] %vm309_vm0, %v8198_v0 }
  0x3c   : > { %351 = vst.msk [vmem:[#allocation2 + $0x140] sm:$0xff] %vm309_vm0, %v8198_v0 }
  0x3d   : > { %352 = vst.msk [vmem:[#allocation2 + $0x148] sm:$0x3] %vm312_vm1, %v8198_v0 }
  0x3e   : > { %353 = vst.msk [vmem:[#allocation2 + $0x150] sm:$0xff] %vm309_vm0, %v8198_v0 }
  0x3f   : > { %354 = vst.msk [vmem:[#allocation2 + $0x158] sm:$0xff] %vm309_vm0, %v8198_v0 }
  0x40   : > { %355 = vst.msk [vmem:[#allocation2 + $0x160] sm:$0x3] %vm312_vm1, %v8198_v0 }
  0x41   : > { %356 = vst.msk [vmem:[#allocation2 + $0x168] sm:$0xff] %vm309_vm0, %v8198_v0 }
  0x42   : > { %357 = vst.msk [vmem:[#allocation2 + $0x170] sm:$0xff] %vm309_vm0, %v8198_v0 }
  0x43   : > { %358 = vst.msk [vmem:[#allocation2 + $0x178] sm:$0x3] %vm312_vm1, %v8198_v0 }
  0x44   : > { %359 = vst.msk [vmem:[#allocation2 + $0x180] sm:$0xff] %vm309_vm0, %v8198_v0 }
  0x45   : > { %360 = vst.msk [vmem:[#allocation2 + $0x188] sm:$0xff] %vm309_vm0, %v8198_v0 }
  0x46   : > { %361 = vst.msk [vmem:[#allocation2 + $0x190] sm:$0x3] %vm312_vm1, %v8198_v0 }
  0x47   : > { %362 = vst.msk [vmem:[#allocation2 + $0x198] sm:$0xff] %vm309_vm0, %v8198_v0 }
  0x48   : > { %363 = vst.msk [vmem:[#allocation2 + $0x1a0] sm:$0xff] %vm309_vm0, %v8198_v0 }
  0x49   : > { %364 = vst.msk [vmem:[#allocation2 + $0x1a8] sm:$0x3] %vm312_vm1, %v8198_v0  ;;  %vm5638_vm1 = vcmask 1043456  }
  0x4a   : > { %366 = vst.msk [vmem:[#allocation2 + $0x19] sm:$0xff] %vm309_vm0, %v277_v1 }
  0x4b   : > { %367 = vst.msk [vmem:[#allocation2 + $0x21] sm:$0xff] %vm309_vm0, %v278_v2 }
  0x4c   : > { %368 = vst.msk [vmem:[#allocation2 + $0x31] sm:$0xff] %vm309_vm0, %v279_v3 }
  0x4d   : > { %369 = vst.msk [vmem:[#allocation2 + $0x39] sm:$0xff] %vm309_vm0, %v280_v4 }
  0x4e   : > { %370 = vst.msk [vmem:[#allocation2 + $0x49] sm:$0xff] %vm309_vm0, %v281_v5 }
  0x4f   : > { %371 = vst.msk [vmem:[#allocation2 + $0x51] sm:$0xff] %vm309_vm0, %v282_v6 }
  0x50   : > { %372 = vst.msk [vmem:[#allocation2 + $0x61] sm:$0xff] %vm309_vm0, %v283_v7 }
  0x51   : > { %373 = vst.msk [vmem:[#allocation2 + $0x69] sm:$0xff] %vm309_vm0, %v284_v8  ;;  %v401_v41 = vld [vmem:[#allocation2 + $0x18] sm:$0xff] }
  0x52   : > { %374 = vst.msk [vmem:[#allocation2 + $0x79] sm:$0xff] %vm309_vm0, %v285_v9  ;;  %v512_v43 = vrot.slane %v401_v41, 2  ;;  %v513_v44 = vrot.slane %v401_v41, 4  ;;  %v514_v46 = vrot.slane %v401_v41, 6  ;;  %v402_v47 = vld [vmem:[#allocation2 + $0x20] sm:$0xff] }
  0x53   : > { %375 = vst.msk [vmem:[#allocation2 + $0x81] sm:$0xff] %vm309_vm0, %v286_v10  ;;  %v515_v48 = vrot.slane %v402_v47, 2  ;;  %v516_v49 = vrot.slane %v402_v47, 4  ;;  %v404_v51 = vld [vmem:[#allocation2 + $0x30] sm:$0xff]  ;;  %v517_v52 = vrot.slane %v402_v47, 6 }
  0x54   : > { %376 = vst.msk [vmem:[#allocation2 + $0x91] sm:$0xff] %vm309_vm0, %v287_v11  ;;  %v403_v53 = vld [vmem:[#allocation2 + $0x28] sm:$0x3]  ;;  %v518_v54 = vrot.slane %v404_v51, 2  ;;  %v519_v56 = vrot.slane %v404_v51, 4  ;;  %v520_v57 = vrot.slane %v404_v51, 6 }
  0x55   : > { %377 = vst.msk [vmem:[#allocation2 + $0x99] sm:$0xff] %vm309_vm0, %v288_v12  ;;  %v405_v58 = vld [vmem:[#allocation2 + $0x38] sm:$0xff]  ;;  %v406_v63 = vld [vmem:[#allocation2 + $0x40] sm:$0x3]  ;;  %v407_v2 = vld [vmem:[#allocation2 + $0x48] sm:$0xff] }
  0x56   : > { %378 = vst.msk [vmem:[#allocation2 + $0xa9] sm:$0xff] %vm309_vm0, %v289_v13  ;;  %v521_v59 = vrot.slane %v405_v58, 2  ;;  %v522_v61 = vrot.slane %v405_v58, 4  ;;  %v523_v62 = vrot.slane %v405_v58, 6  ;;  %v524_v3 = vrot.slane %v407_v2, 2  ;;  %v408_v6 = vld [vmem:[#allocation2 + $0x50] sm:$0xff] }
  0x57   : > { %379 = vst.msk [vmem:[#allocation2 + $0xb1] sm:$0xff] %vm309_vm0, %v290_v14  ;;  %v525_v4 = vrot.slane %v407_v2, 4  ;;  %v526_v5 = vrot.slane %v407_v2, 6  ;;  %v527_v8 = vrot.slane %v408_v6, 2  ;;  %v528_v9 = vrot.slane %v408_v6, 4  ;;  %v410_v11 = vld [vmem:[#allocation2 + $0x60] sm:$0xff] }
  0x58   : > { %380 = vst.msk [vmem:[#allocation2 + $0xc1] sm:$0xff] %vm309_vm0, %v291_v15  ;;  %v529_v10 = vrot.slane %v408_v6, 6  ;;  %v409_v13 = vld [vmem:[#allocation2 + $0x58] sm:$0x3]  ;;  %v530_v14 = vrot.slane %v410_v11, 2  ;;  %v531_v15 = vrot.slane %v410_v11, 4 }
  0x59   : > { %381 = vst.msk [vmem:[#allocation2 + $0xc9] sm:$0xff] %vm309_vm0, %v292_v16  ;;  %v532_v16 = vrot.slane %v410_v11, 6 }
  0x5a   : > { %382 = vst.msk [vmem:[#allocation2 + $0xd9] sm:$0xff] %vm309_vm0, %v293_v17 }
  0x5b   : > { %383 = vst.msk [vmem:[#allocation2 + $0xe1] sm:$0xff] %vm309_vm0, %v294_v18  ;;  %v411_v18 = vld [vmem:[#allocation2 + $0x68] sm:$0xff] }
  0x5c   : > { %384 = vst.msk [vmem:[#allocation2 + $0xf1] sm:$0xff] %vm309_vm0, %v295_v19  ;;  %v533_v19 = vrot.slane %v411_v18, 2 }
  0x5d   : > { %385 = vst.msk [vmem:[#allocation2 + $0xf9] sm:$0xff] %vm309_vm0, %v296_v20  ;;  %v534_v20 = vrot.slane %v411_v18, 4 }
  0x5e   : > { %386 = vst.msk [vmem:[#allocation2 + $0x109] sm:$0xff] %vm309_vm0, %v297_v21  ;;  %v535_v21 = vrot.slane %v411_v18, 6 }
  0x5f   : > { %387 = vst.msk [vmem:[#allocation2 + $0x111] sm:$0xff] %vm309_vm0, %v298_v22 }
  0x60   : > { %388 = vst.msk [vmem:[#allocation2 + $0x121] sm:$0xff] %vm309_vm0, %v299_v23  ;;  %v412_v23 = vld [vmem:[#allocation2 + $0x70] sm:$0x3] }
  0x61   : > { %389 = vst.msk [vmem:[#allocation2 + $0x129] sm:$0xff] %vm309_vm0, %v300_v24  ;;  %v413_v24 = vld [vmem:[#allocation2 + $0x78] sm:$0xff] }
  0x62   : > { %390 = vst.msk [vmem:[#allocation2 + $0x139] sm:$0xff] %vm309_vm0, %v301_v25  ;;  %v536_v25 = vrot.slane %v413_v24, 2 }
  0x63   : > { %391 = vst.msk [vmem:[#allocation2 + $0x141] sm:$0xff] %vm309_vm0, %v302_v26  ;;  %v537_v26 = vrot.slane %v413_v24, 4 }
  0x64   : > { %392 = vst.msk [vmem:[#allocation2 + $0x151] sm:$0xff] %vm309_vm0, %v303_v27 }
  0x65   : > { %393 = vst.msk [vmem:[#allocation2 + $0x159] sm:$0xff] %vm309_vm0, %v304_v28  ;;  %v414_v28 = vld [vmem:[#allocation2 + $0x80] sm:$0xff] }
  0x66   : > { %394 = vst.msk [vmem:[#allocation2 + $0x169] sm:$0xff] %vm309_vm0, %v305_v29  ;;  %v538_v29 = vrot.slane %v413_v24, 6 }
  0x67   : > { %395 = vst.msk [vmem:[#allocation2 + $0x171] sm:$0xff] %vm309_vm0, %v306_v30  ;;  %v539_v30 = vrot.slane %v414_v28, 2 }
  0x68   : > { %396 = vst.msk [vmem:[#allocation2 + $0x181] sm:$0xff] %vm309_vm0, %v307_v32 }
  0x69   : > { %397 = vst.msk [vmem:[#allocation2 + $0x189] sm:$0xff] %vm309_vm0, %v308_v33  ;;  %v541_v33 = vrot.slane %v414_v28, 6 }
  0x6a   : > { %615 = vst [vmem:[#allocation1] ss:$4 sm:$0xff] %v398_v31  ;;  %v540_v31 = vrot.slane %v414_v28, 4 }
  0x6b   : > { %617 = vst [vmem:[#allocation1 + $0x1] ss:$4 sm:$0xff] %v506_v34  ;;  %v415_v34 = vld [vmem:[#allocation2 + $0x88] sm:$0x3] }
  0x6c   : > { %619 = vst [vmem:[#allocation1 + $0x2] ss:$4 sm:$0xff] %v507_v36 }
  0x6d   : > { %621 = vst [vmem:[#allocation1 + $0x3] ss:$4 sm:$0xff] %v508_v37 }
  0x6e   : > { %623 = vst [vmem:[#allocation1 + $0x20] ss:$4 sm:$0xff] %v399_v35  ;;  %v416_v35 = vld [vmem:[#allocation2 + $0x90] sm:$0xff] }
  0x6f   : > { %625 = vst [vmem:[#allocation1 + $0x21] ss:$4 sm:$0xff] %v509_v38  ;;  %v542_v36 = vrot.slane %v416_v35, 2  ;;  %v417_v38 = vld [vmem:[#allocation2 + $0x98] sm:$0xff] }
  0x70   : > { %627 = vst [vmem:[#allocation1 + $0x22] ss:$4 sm:$0xff] %v510_v39  ;;  %v543_v39 = vrot.slane %v416_v35, 4 }
  0x71   : > { %629 = vst [vmem:[#allocation1 + $0x23] ss:$4 sm:$0xff] %v511_v40  ;;  %v544_v40 = vrot.slane %v416_v35, 6 }
  0x72   : > { %5004 = vst.msk [vmem:[#allocation4] sm:$0xff] %vm1992_vm3, %v8198_v0 }
  0x73   : > { %5006 = vst.msk [vmem:[#allocation4 + $0x10] sm:$0xff] %vm1992_vm3, %v8198_v0 }
  0x74   : > { %v8474_v45 = vld.sshfl [vmem:[#allocation1] sm:$0xff pattern:$0x73625140]  ;;  %5008 = vst.msk [vmem:[#allocation4 + $0x20] sm:$0xff] %vm1992_vm3, %v8198_v0 }
  0x75   : > { %632 = vst [vmem:[#allocation1] ss:$4 sm:$0xff] %v400_v42 }
  0x76   : > { %633 = vst [vmem:[#allocation1 + $0x1] ss:$4 sm:$0xff] %v401_v41  ;;  %v545_v41 = vrot.slane %v417_v38, 2 }
  0x77   : > { %634 = vst [vmem:[#allocation1 + $0x2] ss:$4 sm:$0xff] %v512_v43  ;;  %v546_v43 = vrot.slane %v417_v38, 4 }
  0x78   : > { %635 = vst [vmem:[#allocation1 + $0x3] ss:$4 sm:$0xff] %v513_v44  ;;  %v8476_v50 = vld.sshfl [vmem:[#allocation1 + $0x20] sm:$0xff pattern:$0x73625140]  ;;  %v547_v44 = vrot.slane %v417_v38, 6 }
  0x79   : > { %636 = vst [vmem:[#allocation1 + $0x20] ss:$4 sm:$0xff] %v514_v46  ;;  %v418_v46 = vld [vmem:[#allocation2 + $0xa0] sm:$0x3] }
  0x7a   : > { %637 = vst [vmem:[#allocation1 + $0x21] ss:$4 sm:$0xff] %v402_v47  ;;  %v419_v47 = vld [vmem:[#allocation2 + $0xa8] sm:$0xff] }
  0x7b   : > { %638 = vst [vmem:[#allocation1 + $0x22] ss:$4 sm:$0xff] %v515_v48 }
  0x7c   : > { %639 = vst [vmem:[#allocation1 + $0x23] ss:$4 sm:$0xff] %v516_v49  ;;  %v548_v49 = vrot.slane %v419_v47, 2 }
  0x7d   : > { %5010 = vst.msk [vmem:[#allocation4 + $0x30] sm:$0xff] %vm1992_vm3, %v8198_v0 }
  0x7e   : > { %5012 = vst.msk [vmem:[#allocation4 + $0x40] sm:$0xff] %vm1992_vm3, %v8198_v0 }
  0x7f   : > { %v8478_v55 = vld.sshfl [vmem:[#allocation1] sm:$0xff pattern:$0x73625140]  ;;  %5014 = vst.msk [vmem:[#allocation4 + $0x50] sm:$0xff] %vm1992_vm3, %v8198_v0 }
  0x80   : > { %642 = vst [vmem:[#allocation1] ss:$4 sm:$0xff] %v517_v52  ;;  %v550_v52 = vrot.slane %v419_v47, 6 }
  0x81   : > { %643 = vst [vmem:[#allocation1 + $0x1] ss:$4 sm:$0xff] %v403_v53 }
  0x82   : > { %644 = vst [vmem:[#allocation1 + $0x2] ss:$4 sm:$0xff] %v404_v51  ;;  %v549_v51 = vrot.slane %v419_v47, 4 }
  0x83   : > { %645 = vst [vmem:[#allocation1 + $0x3] ss:$4 sm:$0xff] %v518_v54  ;;  %v8480_v60 = vld.sshfl [vmem:[#allocation1 + $0x20] sm:$0xff pattern:$0x73625140]  ;;  %v8504_v54 = vld [vmem:[#allocation2 + $0xb0] sm:$0xff] }
  0x84   : > { %646 = vst [vmem:[#allocation1 + $0x20] ss:$4 sm:$0xff] %v519_v56  ;;  %v422_v56 = vld [vmem:[#allocation2 + $0xc0] sm:$0xff] }
  0x85   : > { %647 = vst [vmem:[#allocation1 + $0x21] ss:$4 sm:$0xff] %v520_v57  ;;  %v554_v57 = vrot.slane %v422_v56, 2 }
  0x86   : > { %648 = vst [vmem:[#allocation1 + $0x22] ss:$4 sm:$0xff] %v405_v58  ;;  %v555_v58 = vrot.slane %v422_v56, 4 }
  0x87   : > { %649 = vst [vmem:[#allocation1 + $0x23] ss:$4 sm:$0xff] %v521_v59  ;;  %v556_v59 = vrot.slane %v422_v56, 6 }
  0x88   : > { %5016 = vst.msk [vmem:[#allocation4 + $0x60] sm:$0xff] %vm1992_vm3, %v8198_v0 }
  0x89   : > { %5018 = vst.msk [vmem:[#allocation4 + $0x70] sm:$0xff] %vm1992_vm3, %v8198_v0 }
  0x8a   : > { %v8482_v1 = vld.sshfl [vmem:[#allocation1] sm:$0xff pattern:$0x73625140]  ;;  %5020 = vst.msk [vmem:[#allocation4 + $0x80] sm:$0xff] %vm1992_vm3, %v8198_v0 }
  0x8b   : > { %652 = vst [vmem:[#allocation1] ss:$4 sm:$0xff] %v522_v61 }
  0x8c   : > { %653 = vst [vmem:[#allocation1 + $0x1] ss:$4 sm:$0xff] %v523_v62  ;;  %v8509_v62 = vld [vmem:[#allocation2 + $0xd8] sm:$0xff] }
  0x8d   : > { %654 = vst [vmem:[#allocation1 + $0x2] ss:$4 sm:$0xff] %v406_v63  ;;  %v424_v63 = vld [vmem:[#allocation2 + $0xd0] sm:$0x3] }
  0x8e   : > { %655 = vst [vmem:[#allocation1 + $0x3] ss:$4 sm:$0xff] %v407_v2  ;;  %v8484_v7 = vld.sshfl [vmem:[#allocation1 + $0x20] sm:$0xff pattern:$0x73625140]  ;;  %v560_v2 = vrot.slane %v8509_v62, 2 }
  0x8f   : > { %656 = vst [vmem:[#allocation1 + $0x20] ss:$4 sm:$0xff] %v524_v3  ;;  %v561_v3 = vrot.slane %v8509_v62, 4 }
  0x90   : > { %657 = vst [vmem:[#allocation1 + $0x21] ss:$4 sm:$0xff] %v525_v4 }
  0x91   : > { %658 = vst [vmem:[#allocation1 + $0x22] ss:$4 sm:$0xff] %v526_v5  ;;  %v8516_v5 = vld [vmem:[#allocation2 + $0xe0] sm:$0xff] }
  0x92   : > { %659 = vst [vmem:[#allocation1 + $0x23] ss:$4 sm:$0xff] %v408_v6  ;;  %v8518_v6 = vld [vmem:[#allocation2 + $0xf0] sm:$0xff] }
  0x93   : > { %5022 = vst.msk [vmem:[#allocation4 + $0x90] sm:$0xff] %vm1992_vm3, %v8198_v0 }
  0x94   : > { %5005 = vst.msk [vmem:[#allocation4 + $0x8] sm:$0x3] %vm1997_vm8, %v8198_v0 }
  0x95   : > { %v8486_v12 = vld.sshfl [vmem:[#allocation1] sm:$0xff pattern:$0x73625140]  ;;  %5007 = vst.msk [vmem:[#allocation4 + $0x18] sm:$0x3] %vm1997_vm8, %v8198_v0 }
  0x96   : > { %662 = vst [vmem:[#allocation1] ss:$4 sm:$0xff] %v527_v8  ;;  %v565_v8 = vrot.slane %v8516_v5, 6 }
  0x97   : > { %663 = vst [vmem:[#allocation1 + $0x1] ss:$4 sm:$0xff] %v528_v9  ;;  %v427_v9 = vld [vmem:[#allocation2 + $0xe8] sm:$0x3] }
  0x98   : > { %664 = vst [vmem:[#allocation1 + $0x2] ss:$4 sm:$0xff] %v529_v10  ;;  %v566_v10 = vrot.slane %v8518_v6, 2 }
  0x99   : > { %665 = vst [vmem:[#allocation1 + $0x3] ss:$4 sm:$0xff] %v409_v13  ;;  %v8488_v17 = vld.sshfl [vmem:[#allocation1 + $0x20] sm:$0xff pattern:$0x73625140] }
  0x9a   : > { %666 = vst [vmem:[#allocation1 + $0x20] ss:$4 sm:$0xff] %v410_v11  ;;  %v8525_v13 = vld [vmem:[#allocation2 + $0xf8] sm:$0xff] }
  0x9b   : > { %667 = vst [vmem:[#allocation1 + $0x21] ss:$4 sm:$0xff] %v530_v14  ;;  %v570_v14 = vrot.slane %v8525_v13, 4 }
  0x9c   : > { %668 = vst [vmem:[#allocation1 + $0x22] ss:$4 sm:$0xff] %v531_v15  ;;  %v571_v15 = vrot.slane %v8525_v13, 6 }
  0x9d   : > { %669 = vst [vmem:[#allocation1 + $0x23] ss:$4 sm:$0xff] %v532_v16  ;;  %v430_v16 = vld [vmem:[#allocation2 + $0x100] sm:$0x3] }
  0x9e   : > { %5009 = vst.msk [vmem:[#allocation4 + $0x28] sm:$0x3] %vm1997_vm8, %v8198_v0 }
  0x9f   : > { %5011 = vst.msk [vmem:[#allocation4 + $0x38] sm:$0x3] %vm1997_vm8, %v8198_v0 }
  0xa0   : > { %v8490_v22 = vld.sshfl [vmem:[#allocation1] sm:$0xff pattern:$0x73625140]  ;;  %5013 = vst.msk [vmem:[#allocation4 + $0x48] sm:$0x3] %vm1997_vm8, %v8198_v0 }
  0xa1   : > { %672 = vst [vmem:[#allocation1] ss:$4 sm:$0xff] %v411_v18 }
  0xa2   : > { %673 = vst [vmem:[#allocation1 + $0x1] ss:$4 sm:$0xff] %v533_v19  ;;  %v8531_v19 = vld [vmem:[#allocation2 + $0x108] sm:$0xff] }
  0xa3   : > { %674 = vst [vmem:[#allocation1 + $0x2] ss:$4 sm:$0xff] %v534_v20  ;;  %v8534_v20 = vld [vmem:[#allocation2 + $0x110] sm:$0xff] }
  0xa4   : > { %675 = vst [vmem:[#allocation1 + $0x3] ss:$4 sm:$0xff] %v535_v21  ;;  %v8492_v27 = vld.sshfl [vmem:[#allocation1 + $0x20] sm:$0xff pattern:$0x73625140]  ;;  %v575_v21 = vrot.slane %v8534_v20, 2 }
  0xa5   : > { %676 = vst [vmem:[#allocation1 + $0x20] ss:$4 sm:$0xff] %v412_v23  ;;  %v576_v23 = vrot.slane %v8534_v20, 4 }
  0xa6   : > { %677 = vst [vmem:[#allocation1 + $0x21] ss:$4 sm:$0xff] %v413_v24  ;;  %v577_v24 = vrot.slane %v8534_v20, 6 }
  0xa7   : > { %678 = vst [vmem:[#allocation1 + $0x22] ss:$4 sm:$0xff] %v536_v25 }
  0xa8   : > { %679 = vst [vmem:[#allocation1 + $0x23] ss:$4 sm:$0xff] %v537_v26  ;;  %v433_v26 = vld [vmem:[#allocation2 + $0x118] sm:$0x3] }
  0xa9   : > { %5015 = vst.msk [vmem:[#allocation4 + $0x58] sm:$0x3] %vm1997_vm8, %v8198_v0 }
  0xaa   : > { %5017 = vst.msk [vmem:[#allocation4 + $0x68] sm:$0x3] %vm1997_vm8, %v8198_v0 }
  0xab   : > { %v8494_v32 = vld.sshfl [vmem:[#allocation1] sm:$0xff pattern:$0x73625140]  ;;  %5019 = vst.msk [vmem:[#allocation4 + $0x78] sm:$0x3] %vm1997_vm8, %v8198_v0 }
  0xac   : > { %682 = vst [vmem:[#allocation1] ss:$4 sm:$0xff] %v538_v29 }
  0xad   : > { %683 = vst [vmem:[#allocation1 + $0x1] ss:$4 sm:$0xff] %v414_v28  ;;  %v435_v28 = vld [vmem:[#allocation2 + $0x128] sm:$0xff] }
  0xae   : > { %684 = vst [vmem:[#allocation1 + $0x2] ss:$4 sm:$0xff] %v539_v30  ;;  %v581_v29 = vrot.slane %v435_v28, 2  ;;  %v582_v30 = vrot.slane %v435_v28, 4 }
  0xaf   : > { %685 = vst [vmem:[#allocation1 + $0x3] ss:$4 sm:$0xff] %v540_v31  ;;  %v8496_v37 = vld.sshfl [vmem:[#allocation1 + $0x20] sm:$0xff pattern:$0x73625140]  ;;  %v583_v31 = vrot.slane %v435_v28, 6 }
  0xb0   : > { %686 = vst [vmem:[#allocation1 + $0x20] ss:$4 sm:$0xff] %v541_v33 }
  0xb1   : > { %687 = vst [vmem:[#allocation1 + $0x21] ss:$4 sm:$0xff] %v415_v34  ;;  %v8543_v34 = vld [vmem:[#allocation2 + $0x138] sm:$0xff] }
  0xb2   : > { %688 = vst [vmem:[#allocation1 + $0x22] ss:$4 sm:$0xff] %v416_v35  ;;  %v8545_v35 = vld [vmem:[#allocation2 + $0x140] sm:$0xff] }
  0xb3   : > { %689 = vst [vmem:[#allocation1 + $0x23] ss:$4 sm:$0xff] %v542_v36  ;;  %v586_v36 = vrot.slane %v8543_v34, 6 }
  0xb4   : > { %5021 = vst.msk [vmem:[#allocation4 + $0x88] sm:$0x3] %vm1997_vm8, %v8198_v0 }
  0xb5   : > { %5023 = vst.msk [vmem:[#allocation4 + $0x98] sm:$0x3] %vm1997_vm8, %v8198_v0 }
  0xb6   : > { %v8498_v42 = vld.sshfl [vmem:[#allocation1] sm:$0xff pattern:$0x73625140] }
  0xb7   : > { %692 = vst [vmem:[#allocation1] ss:$4 sm:$0xff] %v543_v39  ;;  %v588_v39 = vrot.slane %v8545_v35, 4 }
  0xb8   : > { %693 = vst [vmem:[#allocation1 + $0x1] ss:$4 sm:$0xff] %v544_v40 }
  0xb9   : > { %694 = vst [vmem:[#allocation1 + $0x2] ss:$4 sm:$0xff] %v417_v38  ;;  %v587_v38 = vrot.slane %v8545_v35, 2 }
  0xba   : > { %695 = vst [vmem:[#allocation1 + $0x3] ss:$4 sm:$0xff] %v545_v41  ;;  %v8500_v48 = vld.sshfl [vmem:[#allocation1 + $0x20] sm:$0xff pattern:$0x73625140]  ;;  %v8553_v41 = vld [vmem:[#allocation2 + $0x150] sm:$0xff] }
  0xbb   : > { %696 = vst [vmem:[#allocation1 + $0x20] ss:$4 sm:$0xff] %v546_v43  ;;  %v8555_v43 = vld [vmem:[#allocation2 + $0x158] sm:$0xff] }
  0xbc   : > { %697 = vst [vmem:[#allocation1 + $0x21] ss:$4 sm:$0xff] %v547_v44  ;;  %v591_v44 = vrot.slane %v8553_v41, 4 }
  0xbd   : > { %698 = vst [vmem:[#allocation1 + $0x22] ss:$4 sm:$0xff] %v418_v46  ;;  %v592_v46 = vrot.slane %v8553_v41, 6 }
  0xbe   : > { %699 = vst [vmem:[#allocation1 + $0x23] ss:$4 sm:$0xff] %v419_v47  ;;  %v593_v47 = vrot.slane %v8555_v43, 2 }
  0xc1   : > { %v8502_v53 = vld.sshfl [vmem:[#allocation1] sm:$0xff pattern:$0x73625140] }
  0xc2   : > { %702 = vst [vmem:[#allocation1] ss:$4 sm:$0xff] %v548_v49 }
  0xc3   : > { %703 = vst [vmem:[#allocation1 + $0x1] ss:$4 sm:$0xff] %v549_v51  ;;  %v8563_v51 = vld [vmem:[#allocation2 + $0x168] sm:$0xff] }
  0xc4   : > { %704 = vst [vmem:[#allocation1 + $0x2] ss:$4 sm:$0xff] %v550_v52  ;;  %v596_v52 = vrot.slane %v8563_v51, 2 }
  0xc5   : > { %705 = vst [vmem:[#allocation1 + $0x3] ss:$4 sm:$0xff] %v8504_v54 }
  0xcc   : > { %v8507_v61 = vld.sshfl [vmem:[#allocation1] sm:$0xff pattern:$0x73625140] }
  0xcd   : > { %712 = vst [vmem:[#allocation1] ss:$4 sm:$0xff] %v422_v56  ;;  %v597_v56 = vrot.slane %v8563_v51, 4 }
  0xce   : > { %713 = vst [vmem:[#allocation1 + $0x1] ss:$4 sm:$0xff] %v554_v57  ;;  %v598_v57 = vrot.slane %v8563_v51, 6 }
  0xcf   : > { %714 = vst [vmem:[#allocation1 + $0x2] ss:$4 sm:$0xff] %v555_v58 }
  0xd0   : > { %715 = vst [vmem:[#allocation1 + $0x3] ss:$4 sm:$0xff] %v556_v59  ;;  %v8570_v59 = vld [vmem:[#allocation2 + $0x170] sm:$0xff] }
  0xd7   : > { %v8513_v4 = vld.sshfl [vmem:[#allocation1] sm:$0xff pattern:$0x73625140] }
  0xd8   : > { %722 = vst [vmem:[#allocation1] ss:$4 sm:$0xff] %v424_v63  ;;  %v446_v63 = vld [vmem:[#allocation2 + $0x180] sm:$0xff] }
  0xd9   : > { %723 = vst [vmem:[#allocation1 + $0x1] ss:$4 sm:$0xff] %v8509_v62 }
  0xda   : > { %724 = vst [vmem:[#allocation1 + $0x2] ss:$4 sm:$0xff] %v560_v2  ;;  %v602_v2 = vrot.slane %v446_v63, 2 }
  0xdb   : > { %725 = vst [vmem:[#allocation1 + $0x3] ss:$4 sm:$0xff] %v561_v3  ;;  %v603_v3 = vrot.slane %v446_v63, 4 }
  0xe2   : > { %v8522_v11 = vld.sshfl [vmem:[#allocation1] sm:$0xff pattern:$0x73625140] }
  0xe3   : > { %732 = vst [vmem:[#allocation1] ss:$4 sm:$0xff] %v565_v8  ;;  %v604_v8 = vrot.slane %v446_v63, 6 }
  0xe4   : > { %733 = vst [vmem:[#allocation1 + $0x1] ss:$4 sm:$0xff] %v427_v9 }
  0xe5   : > { %734 = vst [vmem:[#allocation1 + $0x2] ss:$4 sm:$0xff] %v8518_v6 }
  0xe6   : > { %735 = vst [vmem:[#allocation1 + $0x3] ss:$4 sm:$0xff] %v566_v10  ;;  %v8575_v10 = vld [vmem:[#allocation2 + $0x198] sm:$0xff] }
  0xed   : > { %v8529_v18 = vld.sshfl [vmem:[#allocation1] sm:$0xff pattern:$0x73625140] }
  0xee   : > { %742 = vst [vmem:[#allocation1] ss:$4 sm:$0xff] %v570_v14  ;;  %v448_v14 = vld [vmem:[#allocation2 + $0x190] sm:$0x3] }
  0xef   : > { %743 = vst [vmem:[#allocation1 + $0x1] ss:$4 sm:$0xff] %v571_v15  ;;  %v608_v15 = vrot.slane %v8575_v10, 2 }
  0xf0   : > { %744 = vst [vmem:[#allocation1 + $0x2] ss:$4 sm:$0xff] %v430_v16  ;;  %v609_v16 = vrot.slane %v8575_v10, 4 }
  0xf1   : > { %745 = vst [vmem:[#allocation1 + $0x3] ss:$4 sm:$0xff] %v8531_v19 }
  0xf8   : > { %v8539_v25 = vld.sshfl [vmem:[#allocation1] sm:$0xff pattern:$0x73625140] }
  0xf9   : > { %752 = vst [vmem:[#allocation1] ss:$4 sm:$0xff] %v575_v21 }
  0xfa   : > { %753 = vst [vmem:[#allocation1 + $0x1] ss:$4 sm:$0xff] %v576_v23  ;;  %v8582_v23 = vld [vmem:[#allocation2 + $0x1a0] sm:$0xff] }
  0xfb   : > { %754 = vst [vmem:[#allocation1 + $0x2] ss:$4 sm:$0xff] %v577_v24  ;;  %v613_v24 = vrot.slane %v8582_v23, 6 }
  0xfc   : > { %755 = vst [vmem:[#allocation1 + $0x3] ss:$4 sm:$0xff] %v433_v26  ;;  %v451_v26 = vld [vmem:[#allocation2 + $0x1a8] sm:$0x3] }
 0x103   : > { %v8541_v33 = vld.sshfl [vmem:[#allocation1] sm:$0xff pattern:$0x73625140] }
 0x104   : > { %762 = vst [vmem:[#allocation1] ss:$4 sm:$0xff] %v435_v28 }
 0x105   : > { %763 = vst [vmem:[#allocation1 + $0x1] ss:$4 sm:$0xff] %v581_v29  ;;  %v614_v29 = vld [vmem:[%s11593_s1] sm:$0x77] }
 0x106   : > { %764 = vst [vmem:[#allocation1 + $0x2] ss:$4 sm:$0xff] %v582_v30 }
 0x107   : > { %765 = vst [vmem:[#allocation1 + $0x3] ss:$4 sm:$0xff] %v583_v31 }
 0x10e   : > { %v8550_v40 = vld.sshfl [vmem:[#allocation1] sm:$0xff pattern:$0x73625140] }
 0x10f   : > { %772 = vst [vmem:[#allocation1] ss:$4 sm:$0xff] %v586_v36 }
 0x110   : > { %773 = vst [vmem:[#allocation1 + $0x1] ss:$4 sm:$0xff] %v8545_v35 }
 0x111   : > { %774 = vst [vmem:[#allocation1 + $0x2] ss:$4 sm:$0xff] %v587_v38  ;;  %v8596_v38 = vld.sshfl [vmem:[#allocation1 + $0x20] sm:$0xff pattern:$0x73625140] }
 0x112   : > { %775 = vst [vmem:[#allocation1 + $0x3] ss:$4 sm:$0xff] %v588_v39  ;;  %v551_v39 = vrot.slane %v8504_v54, 2 }
 0x114   : > { %706 = vst [vmem:[#allocation1 + $0x20] ss:$4 sm:$0xff] %v551_v39 }
 0x119   : > { %v8560_v49 = vld.sshfl [vmem:[#allocation1] sm:$0xff pattern:$0x73625140] }
 0x11a   : > { %782 = vst [vmem:[#allocation1] ss:$4 sm:$0xff] %v591_v44  ;;  %v552_v44 = vrot.slane %v8504_v54, 4 }
 0x11b   : > { %783 = vst [vmem:[#allocation1 + $0x1] ss:$4 sm:$0xff] %v592_v46  ;;  %v553_v46 = vrot.slane %v8504_v54, 6  ;;  %v562_v54 = vrot.slane %v8509_v62, 6  ;;  %v568_v62 = vrot.slane %v8518_v6, 6 }
 0x11c   : > { %784 = vst [vmem:[#allocation1 + $0x2] ss:$4 sm:$0xff] %v8555_v43 }
 0x11d   : > { %785 = vst [vmem:[#allocation1 + $0x3] ss:$4 sm:$0xff] %v593_v47  ;;  %v421_v47 = vld [vmem:[#allocation2 + $0xb8] sm:$0x3] }
 0x11e   : > { %707 = vst [vmem:[#allocation1 + $0x21] ss:$4 sm:$0xff] %v552_v44 }
 0x11f   : > { %708 = vst [vmem:[#allocation1 + $0x22] ss:$4 sm:$0xff] %v553_v46 }
 0x120   : > { %709 = vst [vmem:[#allocation1 + $0x23] ss:$4 sm:$0xff] %v421_v47 }
 0x124   : > { %v8568_v58 = vld.sshfl [vmem:[#allocation1] sm:$0xff pattern:$0x73625140] }
 0x125   : > { %792 = vst [vmem:[#allocation1] ss:$4 sm:$0xff] %v596_v52 }
 0x126   : > { %793 = vst [vmem:[#allocation1 + $0x1] ss:$4 sm:$0xff] %v597_v56 }
 0x127   : > { %794 = vst [vmem:[#allocation1 + $0x2] ss:$4 sm:$0xff] %v598_v57  ;;  %v8609_v57 = vld.sshfl [vmem:[#allocation1 + $0x20] sm:$0xff pattern:$0x73625140] }
 0x128   : > { %795 = vst [vmem:[#allocation1 + $0x3] ss:$4 sm:$0xff] %v8570_v59 }
 0x12f   : > { %v8573_v9 = vld.sshfl [vmem:[#allocation1] sm:$0xff pattern:$0x73625140] }
 0x130   : > { %802 = vst [vmem:[#allocation1] ss:$4 sm:$0xff] %v446_v63  ;;  %v564_v63 = vrot.slane %v8516_v5, 4 }
 0x131   : > { %803 = vst [vmem:[#allocation1 + $0x1] ss:$4 sm:$0xff] %v602_v2 }
 0x132   : > { %804 = vst [vmem:[#allocation1 + $0x2] ss:$4 sm:$0xff] %v603_v3 }
 0x133   : > { %805 = vst [vmem:[#allocation1 + $0x3] ss:$4 sm:$0xff] %v604_v8 }
 0x13a   : > { %v8579_v21 = vld.sshfl [vmem:[#allocation1] sm:$0xff pattern:$0x73625140] }
 0x13b   : > { %812 = vst [vmem:[#allocation1] ss:$4 sm:$0xff] %v448_v14 }
 0x13c   : > { %813 = vst [vmem:[#allocation1 + $0x1] ss:$4 sm:$0xff] %v8575_v10 }
 0x13d   : > { %814 = vst [vmem:[#allocation1 + $0x2] ss:$4 sm:$0xff] %v608_v15 }
 0x13e   : > { %815 = vst [vmem:[#allocation1 + $0x3] ss:$4 sm:$0xff] %v609_v16  ;;  %v585_v16 = vrot.slane %v8543_v34, 4 }
 0x145   : > { %v8585_v28 = vld.sshfl [vmem:[#allocation1] sm:$0xff pattern:$0x73625140] }
 0x146   : > { %822 = vst [vmem:[#allocation1] ss:$4 sm:$0xff] %v613_v24  ;;  %v439_v24 = vld [vmem:[#allocation2 + $0x148] sm:$0x3] }
 0x147   : > { %823 = vst [vmem:[#allocation1 + $0x1] ss:$4 sm:$0xff] %v451_v26  ;;  %v590_v26 = vrot.slane %v8553_v41, 2 }
 0x14e   : > { %v8590_v30 = vld.sshfl [vmem:[#allocation1] sm:$0xff pattern:$0x73625140] }
 0x14f   : > { %826 = vst [vmem:[#allocation1] ss:$2 sm:$0xff] %v614_v29 }
 0x156   : > { %v828_v31 = vld.sshfl [vmem:[#allocation1 + $0x8] sm:$0xff pattern:$0x75316420]  ;;  %v827_v36 = vld.sshfl [vmem:[#allocation1] sm:$0xff pattern:$0x75316420] }
 0x157   : > { %7775 = vmatpush.msk.msra.mxu1 %vm911_vm2, %v828_v31  ;;  %7733 = vmatpush.msk.msra.mxu0 %vm911_vm2, %v827_v36 }
 0x158   : > { %7776 = vmatmul.msk.f32.vlgmr.msra.gmra.mxu1 %vm309_vm0, %v8474_v45  ;;  %7734 = vmatmul.msk.f32.vlgmr.msra.gmra.mxu0 %vm309_vm0, %v8474_v45  ;;  %v423_v45 = vld [vmem:[#allocation2 + $0xc8] sm:$0xff] }
 0x159   : > { %8057 = vmatpush.msk.msra.mxu3 %vm911_vm2, %v828_v31  ;;  %8056 = vmatpush.msk.msra.mxu2 %vm911_vm2, %v827_v36  ;;  %v557_v52 = vrot.slane %v423_v45, 2  ;;  %v559_v56 = vrot.slane %v423_v45, 6  ;;  %716 = vst [vmem:[#allocation1 + $0x20] ss:$4 sm:$0xff] %v423_v45  ;;  %v445_v36 = vld [vmem:[#allocation2 + $0x178] sm:$0x3] }
 0x15a   : > { %vm5641_vm2 = vcmask 1045506  }
 0x15b   : > { %717 = vst [vmem:[#allocation1 + $0x21] ss:$4 sm:$0xff] %v557_v52 }
 0x15c   : > { %719 = vst [vmem:[#allocation1 + $0x23] ss:$4 sm:$0xff] %v559_v56 }
 0x160   : > { %7777 = vmatmul.msk.f32.gmra.mxu1 %vm309_vm0, %v8476_v50  ;;  %7735 = vmatmul.msk.f32.gmra.mxu0 %vm309_vm0, %v8476_v50  ;;  %v558_v50 = vrot.slane %v423_v45, 4 }
 0x162   : > { %718 = vst [vmem:[#allocation1 + $0x22] ss:$4 sm:$0xff] %v558_v50 }
 0x168   : > { %7778 = vmatmul.msk.f32.gmra.mxu1 %vm309_vm0, %v8478_v55  ;;  %7736 = vmatmul.msk.f32.gmra.mxu0 %vm309_vm0, %v8478_v55  ;;  %v563_v55 = vrot.slane %v8516_v5, 2 }
 0x169   : > { %v8622_v2 = vld.sshfl [vmem:[#allocation1 + $0x20] sm:$0xff pattern:$0x73625140] }
 0x16a   : > { %726 = vst [vmem:[#allocation1 + $0x20] ss:$4 sm:$0xff] %v562_v54 }
 0x16b   : > { %727 = vst [vmem:[#allocation1 + $0x21] ss:$4 sm:$0xff] %v8516_v5  ;;  %v573_v5 = vrot.slane %v8531_v19, 4 }
 0x16c   : > { %728 = vst [vmem:[#allocation1 + $0x22] ss:$4 sm:$0xff] %v563_v55 }
 0x16d   : > { %729 = vst [vmem:[#allocation1 + $0x23] ss:$4 sm:$0xff] %v564_v63  ;;  %v610_v63 = vrot.slane %v8575_v10, 6 }
 0x170   : > { %7779 = vmatmul.msk.f32.gmra.mxu1 %vm309_vm0, %v8480_v60  ;;  %7737 = vmatmul.msk.f32.gmra.mxu0 %vm309_vm0, %v8480_v60  ;;  %v567_v60 = vrot.slane %v8518_v6, 4  ;;  %v574_v6 = vrot.slane %v8531_v19, 6 }
 0x174   : > { %v8632_v3 = vld.sshfl [vmem:[#allocation1 + $0x20] sm:$0xff pattern:$0x73625140] }
 0x175   : > { %736 = vst [vmem:[#allocation1 + $0x20] ss:$4 sm:$0xff] %v567_v60 }
 0x176   : > { %737 = vst [vmem:[#allocation1 + $0x21] ss:$4 sm:$0xff] %v568_v62  ;;  %v611_v62 = vrot.slane %v8582_v23, 2 }
 0x177   : > { %738 = vst [vmem:[#allocation1 + $0x22] ss:$4 sm:$0xff] %v8525_v13 }
 0x178   : > { %7780 = vmatmul.msk.f32.gmra.mxu1 %vm309_vm0, %v8482_v1  ;;  %7738 = vmatmul.msk.f32.gmra.mxu0 %vm309_vm0, %v8482_v1  ;;  %v569_v1 = vrot.slane %v8525_v13, 2 }
 0x17a   : > { %739 = vst [vmem:[#allocation1 + $0x23] ss:$4 sm:$0xff] %v569_v1 }
 0x180   : > { %7781 = vmatmul.msk.f32.gmra.mxu1 %vm309_vm0, %v8484_v7  ;;  %7739 = vmatmul.msk.f32.gmra.mxu0 %vm309_vm0, %v8484_v7  ;;  %v572_v7 = vrot.slane %v8531_v19, 2 }
 0x181   : > { %v8642_v8 = vld.sshfl [vmem:[#allocation1 + $0x20] sm:$0xff pattern:$0x73625140] }
 0x182   : > { %746 = vst [vmem:[#allocation1 + $0x20] ss:$4 sm:$0xff] %v572_v7  ;;  %v612_v7 = vrot.slane %v8582_v23, 4 }
 0x183   : > { %747 = vst [vmem:[#allocation1 + $0x21] ss:$4 sm:$0xff] %v573_v5 }
 0x184   : > { %748 = vst [vmem:[#allocation1 + $0x22] ss:$4 sm:$0xff] %v574_v6 }
 0x185   : > { %749 = vst [vmem:[#allocation1 + $0x23] ss:$4 sm:$0xff] %v8534_v20  ;;  %v584_v20 = vrot.slane %v8543_v34, 2 }
 0x188   : > { %7782 = vmatmul.msk.f32.gmra.mxu1 %vm309_vm0, %v8486_v12  ;;  %7740 = vmatmul.msk.f32.gmra.mxu0 %vm309_vm0, %v8486_v12  ;;  %v434_v12 = vld [vmem:[#allocation2 + $0x120] sm:$0xff] }
 0x189   : > { %v578_v13 = vrot.slane %v434_v12, 2  ;;  %v579_v19 = vrot.slane %v434_v12, 4  ;;  %v580_v14 = vrot.slane %v434_v12, 6 }
 0x18c   : > { %v8653_v15 = vld.sshfl [vmem:[#allocation1 + $0x20] sm:$0xff pattern:$0x73625140] }
 0x18d   : > { %756 = vst [vmem:[#allocation1 + $0x20] ss:$4 sm:$0xff] %v434_v12 }
 0x18e   : > { %757 = vst [vmem:[#allocation1 + $0x21] ss:$4 sm:$0xff] %v578_v13 }
 0x18f   : > { %758 = vst [vmem:[#allocation1 + $0x22] ss:$4 sm:$0xff] %v579_v19 }
 0x190   : > { %7783 = vmatmul.msk.f32.gmra.mxu1 %vm309_vm0, %v8488_v17  ;;  %7741 = vmatmul.msk.f32.gmra.mxu0 %vm309_vm0, %v8488_v17  ;;  %759 = vst [vmem:[#allocation1 + $0x23] ss:$4 sm:$0xff] %v580_v14  ;;  %v436_v17 = vld [vmem:[#allocation2 + $0x130] sm:$0x3] }
 0x198   : > { %7784 = vmatmul.msk.f32.gmra.mxu1 %vm309_vm0, %v8490_v22  ;;  %7742 = vmatmul.msk.f32.gmra.mxu0 %vm309_vm0, %v8490_v22  ;;  %v8661_v22 = vld.sshfl [vmem:[#allocation1 + $0x20] sm:$0xff pattern:$0x73625140] }
 0x199   : > { %766 = vst [vmem:[#allocation1 + $0x20] ss:$4 sm:$0xff] %v436_v17 }
 0x19a   : > { %767 = vst [vmem:[#allocation1 + $0x21] ss:$4 sm:$0xff] %v8543_v34  ;;  %v595_v34 = vrot.slane %v8555_v43, 6 }
 0x19b   : > { %768 = vst [vmem:[#allocation1 + $0x22] ss:$4 sm:$0xff] %v584_v20 }
 0x19c   : > { %769 = vst [vmem:[#allocation1 + $0x23] ss:$4 sm:$0xff] %v585_v16 }
 0x1a0   : > { %7785 = vmatmul.msk.f32.gmra.mxu1 %vm309_vm0, %v8492_v27  ;;  %7743 = vmatmul.msk.f32.gmra.mxu0 %vm309_vm0, %v8492_v27  ;;  %v589_v27 = vrot.slane %v8545_v35, 6  ;;  %v442_v35 = vld [vmem:[#allocation2 + $0x160] sm:$0x3] }
 0x1a3   : > { %v8670_v29 = vld.sshfl [vmem:[#allocation1 + $0x20] sm:$0xff pattern:$0x73625140] }
 0x1a4   : > { %776 = vst [vmem:[#allocation1 + $0x20] ss:$4 sm:$0xff] %v589_v27 }
 0x1a5   : > { %777 = vst [vmem:[#allocation1 + $0x21] ss:$4 sm:$0xff] %v439_v24 }
 0x1a6   : > { %778 = vst [vmem:[#allocation1 + $0x22] ss:$4 sm:$0xff] %v8553_v41  ;;  %v601_v41 = vrot.slane %v8570_v59, 6 }
 0x1a7   : > { %779 = vst [vmem:[#allocation1 + $0x23] ss:$4 sm:$0xff] %v590_v26 }
 0x1a8   : > { %7786 = vmatmul.msk.f32.gmra.mxu1 %vm309_vm0, %v8494_v32  ;;  %7744 = vmatmul.msk.f32.gmra.mxu0 %vm309_vm0, %v8494_v32  ;;  %v594_v32 = vrot.slane %v8555_v43, 4 }
 0x1ae   : > { %v8683_v31 = vld.sshfl [vmem:[#allocation1 + $0x20] sm:$0xff pattern:$0x73625140] }
 0x1af   : > { %786 = vst [vmem:[#allocation1 + $0x20] ss:$4 sm:$0xff] %v594_v32 }
 0x1b0   : > { %7787 = vmatmul.msk.f32.gmra.mxu1 %vm309_vm0, %v8496_v37  ;;  %7745 = vmatmul.msk.f32.gmra.mxu0 %vm309_vm0, %v8496_v37  ;;  %787 = vst [vmem:[#allocation1 + $0x21] ss:$4 sm:$0xff] %v595_v34  ;;  %v599_v37 = vrot.slane %v8570_v59, 2 }
 0x1b1   : > { %788 = vst [vmem:[#allocation1 + $0x22] ss:$4 sm:$0xff] %v442_v35 }
 0x1b2   : > { %789 = vst [vmem:[#allocation1 + $0x23] ss:$4 sm:$0xff] %v8563_v51 }
 0x1b8   : > { %7788 = vmatmul.msk.f32.gmra.mxu1 %vm309_vm0, %v8498_v42  ;;  %7746 = vmatmul.msk.f32.gmra.mxu0 %vm309_vm0, %v8498_v42  ;;  %v600_v42 = vrot.slane %v8570_v59, 4 }
 0x1b9   : > { %v8693_v43 = vld.sshfl [vmem:[#allocation1 + $0x20] sm:$0xff pattern:$0x73625140] }
 0x1ba   : > { %796 = vst [vmem:[#allocation1 + $0x20] ss:$4 sm:$0xff] %v599_v37 }
 0x1bb   : > { %797 = vst [vmem:[#allocation1 + $0x21] ss:$4 sm:$0xff] %v600_v42 }
 0x1bc   : > { %798 = vst [vmem:[#allocation1 + $0x22] ss:$4 sm:$0xff] %v601_v41 }
 0x1bd   : > { %799 = vst [vmem:[#allocation1 + $0x23] ss:$4 sm:$0xff] %v445_v36 }
 0x1c0   : > { %7789 = vmatmul.msk.f32.gmra.mxu1 %vm309_vm0, %v8500_v48  ;;  %7747 = vmatmul.msk.f32.gmra.mxu0 %vm309_vm0, %v8500_v48  ;;  %v447_v48 = vld [vmem:[#allocation2 + $0x188] sm:$0xff] }
 0x1c1   : > { %v605_v51 = vrot.slane %v447_v48, 2  ;;  %v606_v39 = vrot.slane %v447_v48, 4  ;;  %v607_v59 = vrot.slane %v447_v48, 6 }
 0x1c4   : > { %v8703_v44 = vld.sshfl [vmem:[#allocation1 + $0x20] sm:$0xff pattern:$0x73625140] }
 0x1c5   : > { %806 = vst [vmem:[#allocation1 + $0x20] ss:$4 sm:$0xff] %v447_v48 }
 0x1c6   : > { %807 = vst [vmem:[#allocation1 + $0x21] ss:$4 sm:$0xff] %v605_v51 }
 0x1c7   : > { %808 = vst [vmem:[#allocation1 + $0x22] ss:$4 sm:$0xff] %v606_v39 }
 0x1c8   : > { %7790 = vmatmul.msk.f32.gmra.mxu1 %vm309_vm0, %v8502_v53  ;;  %7748 = vmatmul.msk.f32.gmra.mxu0 %vm309_vm0, %v8502_v53  ;;  %809 = vst [vmem:[#allocation1 + $0x23] ss:$4 sm:$0xff] %v607_v59 }
 0x1cf   : > { %v811_v60 = vld.sshfl [vmem:[#allocation1 + $0x20] sm:$0xff pattern:$0x73625140] }
 0x1d0   : > { %7791 = vmatmul.msk.f32.gmra.mxu1 %vm309_vm0, %v8596_v38  ;;  %7749 = vmatmul.msk.f32.gmra.mxu0 %vm309_vm0, %v8596_v38  ;;  %816 = vst [vmem:[#allocation1 + $0x20] ss:$4 sm:$0xff] %v610_v63 }
 0x1d1   : > { %7813 = vmatmul.msk.f32.vlgmr.msra.gmra.mxu3 %vm309_vm0, %v811_v60  ;;  %7771 = vmatmul.msk.f32.vlgmr.msra.gmra.mxu2 %vm309_vm0, %v811_v60  ;;  %817 = vst [vmem:[#allocation1 + $0x21] ss:$4 sm:$0xff] %v8582_v23 }
 0x1d2   : > { %818 = vst [vmem:[#allocation1 + $0x22] ss:$4 sm:$0xff] %v611_v62 }
 0x1d3   : > { %819 = vst [vmem:[#allocation1 + $0x23] ss:$4 sm:$0xff] %v612_v7 }
 0x1d5   : > { %v1073_v53 = vpop.f32.mrf.mxu1  ;;  %v933_v46 = vpop.f32.mrf.mxu0 }
 0x1d6   : > { %v1278_v47 = vrot.slane %v1073_v53, 6 }
 0x1d8   : > { %v1320_v38 = vsel %vm1319_vm4, %v933_v46, %v1278_v47  ;;  %v1322_v45 = vsel %vm1321_vm5, %v933_v46, %v1278_v47  ;;  %v1325_v52 = vsel %vm1324_vm6, %v933_v46, %v1278_v47  ;;  %v1328_v50 = vsel %vm1327_vm7, %v1278_v47, %v933_v46  ;;  %7792 = vmatmul.msk.f32.gmra.mxu1 %vm309_vm0, %v8507_v61 }
 0x1d9   : > { %v1323_v56 = vrot.slane %v1322_v45, 2  ;;  %v1326_v54 = vrot.slane %v1325_v52, 4  ;;  %v1329_v55 = vrot.slane %v1328_v50, 6  ;;  %1606 = vst [vmem:[#allocation1] ss:$4 sm:$0xff] %v1320_v38  ;;  %7750 = vmatmul.msk.f32.gmra.mxu0 %vm309_vm0, %v8507_v61  ;;  %7814 = vmatmul.msk.f32.gmra.mxu3 %vm309_vm0, %v8585_v28 }
 0x1da   : > { %7772 = vmatmul.msk.f32.gmra.mxu2 %vm309_vm0, %v8585_v28  ;;  %v821_v16 = vld.sshfl [vmem:[#allocation1 + $0x20] sm:$0xff pattern:$0x73625140] }
 0x1db   : > { %1608 = vst [vmem:[#allocation1 + $0x1] ss:$4 sm:$0xff] %v1323_v56 }
 0x1dc   : > { %1610 = vst [vmem:[#allocation1 + $0x2] ss:$4 sm:$0xff] %v1326_v54 }
 0x1dd   : > { %1612 = vst [vmem:[#allocation1 + $0x3] ss:$4 sm:$0xff] %v1329_v55  ;;  %v1076_v1 = vpop.f32.mrf.mxu1  ;;  %v936_v5 = vpop.f32.mrf.mxu0 }
 0x1de   : > { %v1279_v61 = vrot.slane %v1076_v1, 6 }
 0x1e0   : > { %7793 = vmatmul.msk.f32.gmra.mxu1 %vm309_vm0, %v8609_v57  ;;  %v1331_v10 = vsel %vm1321_vm5, %v936_v5, %v1279_v61  ;;  %v1333_v12 = vsel %vm1324_vm6, %v936_v5, %v1279_v61  ;;  %v1335_v23 = vsel %vm1327_vm7, %v1279_v61, %v936_v5  ;;  %v1330_v19 = vsel %vm1319_vm4, %v936_v5, %v1279_v61 }
 0x1e1   : > { %7751 = vmatmul.msk.f32.gmra.mxu0 %vm309_vm0, %v8609_v57  ;;  %v1332_v14 = vrot.slane %v1331_v10, 2  ;;  %v1334_v20 = vrot.slane %v1333_v12, 4  ;;  %v1336_v27 = vrot.slane %v1335_v23, 6  ;;  %1614 = vst [vmem:[#allocation1 + $0x20] ss:$4 sm:$0xff] %v1330_v19  ;;  %7815 = vmatmul.msk.f32.gmra.mxu3 %vm309_vm0, %v821_v16 }
 0x1e2   : > { %7773 = vmatmul.msk.f32.gmra.mxu2 %vm309_vm0, %v821_v16 }
 0x1e3   : > { %1616 = vst [vmem:[#allocation1 + $0x21] ss:$4 sm:$0xff] %v1332_v14 }
 0x1e4   : > { %v1621_v6 = vld.sshfl [vmem:[#allocation1] sm:$0xff pattern:$0x73625140]  ;;  %1618 = vst [vmem:[#allocation1 + $0x22] ss:$4 sm:$0xff] %v1334_v20 }
 0x1e5   : > { %1991 = vst [vmem:[#allocation3] sm:$0xff] %v1621_v6  ;;  %v1079_v57 = vpop.f32.mrf.mxu1  ;;  %v939_v13 = vpop.f32.mrf.mxu0 }
 0x1e6   : > { %v1280_v17 = vrot.slane %v1079_v57, 6  ;;  %1620 = vst [vmem:[#allocation1 + $0x23] ss:$4 sm:$0xff] %v1336_v27 }
 0x1e8   : > { %7794 = vmatmul.msk.f32.gmra.mxu1 %vm309_vm0, %v8513_v4  ;;  %v1337_v28 = vsel %vm1319_vm4, %v939_v13, %v1280_v17  ;;  %v1338_v32 = vsel %vm1321_vm5, %v939_v13, %v1280_v17  ;;  %v1340_v34 = vsel %vm1324_vm6, %v939_v13, %v1280_v17 }
 0x1e9   : > { %7752 = vmatmul.msk.f32.gmra.mxu0 %vm309_vm0, %v8513_v4  ;;  %1625 = vst [vmem:[#allocation1] ss:$4 sm:$0xff] %v1337_v28  ;;  %v1342_v4 = vsel %vm1327_vm7, %v1280_v17, %v939_v13  ;;  %v1339_v42 = vrot.slane %v1338_v32, 2  ;;  %v1341_v41 = vrot.slane %v1340_v34, 4  ;;  %7816 = vmatmul.msk.f32.gmra.mxu3 %vm309_vm0, %v8590_v30 }
 0x1ea   : > { %v1343_v36 = vrot.slane %v1342_v4, 6  ;;  %7774 = vmatmul.msk.f32.gmra.mxu2 %vm309_vm0, %v8590_v30 }
 0x1ec   : > { %v2133_v37 = vld [vmem:[#allocation3] sm:$0xfe] }
 0x1ed   : > { %v1082_v24 = vpop.f32.mrf.mxu1  ;;  %v942_v26 = vpop.f32.mrf.mxu0  ;;  %v2214_v48 = vrot.slane %v2133_v37, 1  ;;  %v8771_v51 = vld.sshfl [vmem:[#allocation1 + $0x20] sm:$0xff pattern:$0x73625140]  ;;  %v2422_v30 = vld [vmem:[#allocation3] sm:$0xfc] }
 0x1ee   : > { %v1281_v35 = vrot.slane %v1082_v24, 6  ;;  %1994 = vst [vmem:[#allocation3 + $0x10] sm:$0xff] %v8771_v51  ;;  %v2487_v60 = vrot.slane %v8771_v51, 2  ;;  %v2486_v62 = vrot.slane %v2422_v30, 2 }
 0x1ef   : > { %1628 = vst [vmem:[#allocation1 + $0x20] ss:$4 sm:$0xff] %v1339_v42 }
 0x1f0   : > { %7795 = vmatmul.msk.f32.gmra.mxu1 %vm309_vm0, %v8622_v2  ;;  %v1345_v39 = vsel %vm1321_vm5, %v942_v26, %v1281_v35  ;;  %v1347_v59 = vsel %vm1324_vm6, %v942_v26, %v1281_v35  ;;  %v1626_v53 = vld.sshfl [vmem:[#allocation1] sm:$0xff pattern:$0x73625140]  ;;  %v1349_v46 = vsel %vm1327_vm7, %v1281_v35, %v942_v26  ;;  %1629 = vst [vmem:[#allocation1 + $0x21] ss:$4 sm:$0xff] %v1341_v41 }
 0x1f1   : > { %7753 = vmatmul.msk.f32.gmra.mxu0 %vm309_vm0, %v8622_v2  ;;  %v2215_v2 = vrot.slane %v8771_v51, 1  ;;  %v1344_v45 = vsel %vm1319_vm4, %v942_v26, %v1281_v35  ;;  %v1346_v52 = vrot.slane %v1345_v39, 2  ;;  %1630 = vst [vmem:[#allocation1 + $0x22] ss:$4 sm:$0xff] %v1343_v36  ;;  %v1348_v54 = vrot.slane %v1347_v59, 4 }
 0x1f2   : > { %1996 = vst [vmem:[#allocation3 + $0x20] sm:$0x3] %v1626_v53  ;;  %v1350_v55 = vrot.slane %v1349_v46, 6  ;;  %v2488_v6 = vsel %vm1327_vm7, %v2486_v62, %v2487_v60 }
 0x1f3   : > { %v2216_v56 = vsel %vm2213_vm9, %v2214_v48, %v2215_v2  ;;  %1631 = vst [vmem:[#allocation1 + $0x23] ss:$4 sm:$0xff] %v1344_v45 }
 0x1f4   : > { %2294 = vrot.lane.b32.xlu0 %v2216_v56, %s8199_s20  ;;  %1634 = vst [vmem:[#allocation1] ss:$4 sm:$0xff] %v1346_v52 }
 0x1f5   : > { %v1085_v47 = vpop.f32.mrf.mxu1  ;;  %v945_v38 = vpop.f32.mrf.mxu0  ;;  %1635 = vst [vmem:[#allocation1 + $0x1] ss:$4 sm:$0xff] %v1348_v54 }
 0x1f6   : > { %v1282_v50 = vrot.slane %v1085_v47, 6  ;;  %1636 = vst [vmem:[#allocation1 + $0x2] ss:$4 sm:$0xff] %v1350_v55 }
 0x1f8   : > { %7796 = vmatmul.msk.f32.gmra.mxu1 %vm309_vm0, %v8522_v11  ;;  %v1351_v63 = vsel %vm1319_vm4, %v945_v38, %v1282_v50  ;;  %v1352_v1 = vsel %vm1321_vm5, %v945_v38, %v1282_v50  ;;  %v1354_v57 = vsel %vm1324_vm6, %v945_v38, %v1282_v50  ;;  %v1356_v13 = vsel %vm1327_vm7, %v1282_v50, %v945_v38 }
 0x1f9   : > { %7754 = vmatmul.msk.f32.gmra.mxu0 %vm309_vm0, %v8522_v11  ;;  %1637 = vst [vmem:[#allocation1 + $0x3] ss:$4 sm:$0xff] %v1351_v63  ;;  %v1353_v61 = vrot.slane %v1352_v1, 2  ;;  %v2423_v12 = vld [vmem:[#allocation3 + $0x20] sm:$0x3]  ;;  %v1355_v17 = vrot.slane %v1354_v57, 4 }
 0x1fa   : > { %v2134_v11 = vld [vmem:[#allocation3 + $0x20] sm:$0x1]  ;;  %v1632_v23 = vld.sshfl [vmem:[#allocation1 + $0x20] sm:$0xff pattern:$0x73625140]  ;;  %v2489_v19 = vrot.slane %v2423_v12, 2 }
 0x1fb   : > { %1999 = vst [vmem:[#allocation3 + $0x30] sm:$0xff] %v1632_v23  ;;  %2759 = vrot.lane.b32.xlu2 %v1632_v23, %s8201_s22  ;;  %v2217_v14 = vrot.slane %v2134_v11, 1  ;;  %v1357_v20 = vrot.slane %v1356_v13, 6 }
 0x1fc   : > { %2566 = vrot.lane.b32.xlu0 %v2488_v6, %s8200_s21  ;;  %1638 = vst [vmem:[#allocation1 + $0x20] ss:$4 sm:$0xff] %v1353_v61  ;;  %v2490_v16 = vsel %vm1327_vm7, %v2487_v60, %v2489_v19 }
 0x1fd   : > { %v1088_v7 = vpop.f32.mrf.mxu1  ;;  %v948_v5 = vpop.f32.mrf.mxu0  ;;  %2568 = vrot.lane.b32.xlu1 %v2490_v16, %s8200_s21  ;;  %v2218_v35 = vsel %vm2213_vm9, %v2215_v2, %v2217_v14 }
 0x1fe   : > { %v1283_v10 = vrot.slane %v1088_v7, 6 }
 0x200   : > { %7797 = vmatmul.msk.f32.gmra.mxu1 %vm309_vm0, %v8632_v3  ;;  %v1639_v27 = vld.sshfl [vmem:[#allocation1] sm:$0xff pattern:$0x73625140]  ;;  %v1359_v28 = vsel %vm1321_vm5, %v948_v5, %v1283_v10  ;;  %v1361_v24 = vsel %vm1324_vm6, %v948_v5, %v1283_v10  ;;  %v1358_v26 = vsel %vm1319_vm4, %v948_v5, %v1283_v10 }
 0x201   : > { %7755 = vmatmul.msk.f32.gmra.mxu0 %vm309_vm0, %v8632_v3  ;;  %1643 = vst [vmem:[#allocation1] ss:$4 sm:$0xff] %v1355_v17  ;;  %v1363_v3 = vsel %vm1327_vm7, %v1283_v10, %v948_v5  ;;  %v1360_v37 = vrot.slane %v1359_v28, 2  ;;  %v1362_v42 = vrot.slane %v1361_v24, 4  ;;  %v8813_v41 = vrot.slane %v1639_v27, 1 }
 0x202   : > { %1644 = vst [vmem:[#allocation1 + $0x1] ss:$4 sm:$0xff] %v1357_v20  ;;  %v2135_v48 = vld [vmem:[#allocation3 + $0x30] sm:$0xfe]  ;;  %v1364_v53 = vrot.slane %v1363_v3, 6  ;;  %v8830_v63 = vrot.slane %v1639_v27, 2 }
 0x203   : > { %2001 = vst [vmem:[#allocation3 + $0x40] sm:$0xff] %v1639_v27  ;;  %v2887_v39 = vld [vmem:[#allocation3 + $0x30] sm:$0xfe]  ;;  %v1641_v59 = vld.sshfl [vmem:[#allocation1 + $0x20] sm:$0xff pattern:$0x73625140]  ;;  %2761 = vrot.lane.b32.xlu2 %v1639_v27, %s8201_s22 }
 0x204   : > { %2296 = vrot.lane.b32.xlu0 %v2218_v35, %s8199_s20  ;;  %1645 = vst [vmem:[#allocation1 + $0x2] ss:$4 sm:$0xff] %v1358_v26  ;;  %v2219_v51 = vrot.slane %v2135_v48, 1  ;;  %v2951_v47 = vrot.slane %v2887_v39, 1  ;;  %v2424_v56 = vld [vmem:[#allocation3 + $0x30] sm:$0xfc] }
 0x205   : > { %v1091_v32 = vpop.f32.mrf.mxu1  ;;  %v951_v34 = vpop.f32.mrf.mxu0  ;;  %2003 = vst [vmem:[#allocation3 + $0x50] sm:$0x3] %v1641_v59  ;;  %v2491_v60 = vrot.slane %v2424_v56, 2  ;;  %v3159_v19 = vld [vmem:[#allocation3 + $0x30] sm:$0xfc] }
 0x206   : > { %v1284_v4 = vrot.slane %v1091_v32, 6  ;;  %1646 = vst [vmem:[#allocation1 + $0x3] ss:$4 sm:$0xff] %v1360_v37  ;;  %v2221_v38 = vsel %vm2213_vm9, %v2219_v51, %v8813_v41  ;;  %v2953_v54 = vsel %vm2213_vm9, %v2951_v47, %v8813_v41  ;;  %v3223_v28 = vrot.slane %v3159_v19, 2 }
 0x207   : > { %1647 = vst [vmem:[#allocation1 + $0x20] ss:$4 sm:$0xff] %v1362_v42  ;;  %2298 = vrot.lane.b32.xlu1 %v2221_v38, %s8199_s20  ;;  %v2493_v6 = vsel %vm1327_vm7, %v2491_v60, %v8830_v63 }
 0x208   : > { %v1366_v36 = vsel %vm1321_vm5, %v951_v34, %v1284_v4  ;;  %7798 = vmatmul.msk.f32.gmra.mxu1 %vm309_vm0, %v8529_v18  ;;  %v1365_v2 = vsel %vm1319_vm4, %v951_v34, %v1284_v4  ;;  %1648 = vst [vmem:[#allocation1 + $0x21] ss:$4 sm:$0xff] %v1364_v53  ;;  %v1368_v45 = vsel %vm1324_vm6, %v951_v34, %v1284_v4 }
 0x209   : > { %7756 = vmatmul.msk.f32.gmra.mxu0 %vm309_vm0, %v8529_v18  ;;  %v1367_v46 = vrot.slane %v1366_v36, 2  ;;  %1649 = vst [vmem:[#allocation1 + $0x22] ss:$4 sm:$0xff] %v1365_v2  ;;  %v1369_v30 = vrot.slane %v1368_v45, 4  ;;  %v1370_v55 = vsel %vm1327_vm7, %v1284_v4, %v951_v34  ;;  %v3225_v42 = vsel %vm1327_vm7, %v3223_v28, %v8830_v63 }
 0x20a   : > { %v1371_v61 = vrot.slane %v1370_v55, 6 }
 0x20b   : > { %1650 = vst [vmem:[#allocation1 + $0x23] ss:$4 sm:$0xff] %v1367_v46 }
 0x20c   : > { %3031 = vrot.lane.b32.xlu0 %v2953_v54, %s8202_s23  ;;  %v2425_v62 = vld [vmem:[#allocation3 + $0x50] sm:$0x3] }
 0x20d   : > { %v1094_v52 = vpop.f32.mrf.mxu1  ;;  %v954_v50 = vpop.f32.mrf.mxu0  ;;  %v8834_v1 = vld.sshfl [vmem:[#allocation1] sm:$0xff pattern:$0x73625140]  ;;  %v1652_v7 = vld.sshfl [vmem:[#allocation1 + $0x8] sm:$0xff pattern:$0x73625140] }
 0x20e   : > { %v1285_v18 = vrot.slane %v1094_v52, 6  ;;  %2005 = vst [vmem:[#allocation3 + $0x60] sm:$0xff] %v8834_v1  ;;  %v2494_v10 = vrot.slane %v2425_v62, 2  ;;  %v2888_v13 = vld [vmem:[#allocation3 + $0x50] sm:$0x1] }
 0x20f   : > { %1655 = vst [vmem:[#allocation1] ss:$4 sm:$0xff] %v1369_v30  ;;  %2570 = vrot.lane.b32.xlu1 %v2493_v6, %s8200_s21  ;;  %v2954_v32 = vrot.slane %v2888_v13, 1  ;;  %v2136_v36 = vld [vmem:[#allocation3 + $0x50] sm:$0x1] }
 0x210   : > { %7799 = vmatmul.msk.f32.gmra.mxu1 %vm309_vm0, %v8642_v8  ;;  %v1373_v5 = vsel %vm1321_vm5, %v954_v50, %v1285_v18  ;;  %v2495_v11 = vsel %vm1327_vm7, %v8830_v63, %v2494_v10  ;;  %2006 = vst.msk [vmem:[#allocation3 + $0x68] sm:$0xff] %vm1992_vm3, %v1652_v7  ;;  %v1372_v17 = vsel %vm1319_vm4, %v954_v50, %v1285_v18  ;;  %v3160_v51 = vld [vmem:[#allocation3 + $0x50] sm:$0x3]  ;;  %v2222_v38 = vrot.slane %v2136_v36, 1 }
 0x211   : > { %7757 = vmatmul.msk.f32.gmra.mxu0 %vm309_vm0, %v8642_v8  ;;  %v1374_v12 = vrot.slane %v1373_v5, 2  ;;  %v1375_v20 = vsel %vm1324_vm6, %v954_v50, %v1285_v18  ;;  %2572 = vrot.lane.b32.xlu2 %v2495_v11, %s8200_s21  ;;  %v1377_v16 = vsel %vm1327_vm7, %v1285_v18, %v954_v50  ;;  %v2955_v59 = vsel %vm2213_vm9, %v8813_v41, %v2954_v32 }
 0x212   : > { %v8846_v8 = vld.sshfl [vmem:[#allocation1 + $0x20] sm:$0xff pattern:$0x73625140]  ;;  %v1654_v14 = vld.sshfl [vmem:[#allocation1 + $0x28] sm:$0xff pattern:$0x73625140]  ;;  %v2223_v55 = vsel %vm2213_vm9, %v8813_v41, %v2222_v38 }
 0x213   : > { %1658 = vst [vmem:[#allocation1 + $0x20] ss:$4 sm:$0xff] %v1371_v61  ;;  %v1376_v24 = vrot.slane %v1375_v20, 4  ;;  %v1378_v34 = vrot.slane %v1377_v16, 6  ;;  %v3226_v45 = vrot.slane %v3160_v51, 2  ;;  %v8874_v50 = vrot.slane %v8846_v8, 2 }
 0x214   : > { %2763 = vrot.lane.b32.xlu0 %v8834_v1, %s8201_s22  ;;  %2007 = vst [vmem:[#allocation3 + $0x70] sm:$0xff] %v8846_v8  ;;  %v8902_v13 = vrot.slane %v8846_v8, 1 }
 0x215   : > { %v1097_v23 = vpop.f32.mrf.mxu1  ;;  %v957_v57 = vpop.f32.mrf.mxu0  ;;  %1659 = vst [vmem:[#allocation1 + $0x21] ss:$4 sm:$0xff] %v1372_v17  ;;  %v2426_v46 = vld [vmem:[#allocation3 + $0x60] sm:$0xfc]  ;;  %v3227_v62 = vsel %vm1327_vm7, %v8830_v63, %v3226_v45 }
 0x216   : > { %v1286_v27 = vrot.slane %v1097_v23, 6  ;;  %1660 = vst [vmem:[#allocation1 + $0x22] ss:$4 sm:$0xff] %v1374_v12  ;;  %v1656_v4 = vld.sshfl [vmem:[#allocation1] sm:$0xff pattern:$0x73625140] }
 0x217   : > { %2009 = vst [vmem:[#allocation3 + $0x80] sm:$0x3] %v1656_v4  ;;  %v8864_v48 = vld.sshfl [vmem:[#allocation1 + $0x8] sm:$0xff pattern:$0x73625140]  ;;  %3303 = vrot.lane.b32.xlu1 %v3225_v42, %s8203_s29  ;;  %v2496_v56 = vrot.slane %v2426_v46, 2 }
 0x218   : > { %v1380_v26 = vsel %vm1321_vm5, %v957_v57, %v1286_v27  ;;  %v1382_v3 = vsel %vm1324_vm6, %v957_v57, %v1286_v27  ;;  %7800 = vmatmul.msk.f32.gmra.mxu1 %vm309_vm0, %v8539_v25  ;;  %v1379_v35 = vsel %vm1319_vm4, %v957_v57, %v1286_v27  ;;  %1661 = vst [vmem:[#allocation1 + $0x23] ss:$4 sm:$0xff] %v1376_v24  ;;  %v2137_v10 = vld [vmem:[#allocation3 + $0x60] sm:$0xfe] }
 0x219   : > { %7758 = vmatmul.msk.f32.gmra.mxu0 %vm309_vm0, %v8539_v25  ;;  %v1381_v37 = vrot.slane %v1380_v26, 2  ;;  %v1383_v39 = vrot.slane %v1382_v3, 4  ;;  %1664 = vst [vmem:[#allocation1] ss:$4 sm:$0xff] %v1378_v34  ;;  %3033 = vrot.lane.b32.xlu2 %v2955_v59, %s8202_s23  ;;  %v1384_v2 = vsel %vm1327_vm7, %v1286_v27, %v957_v57  ;;  %v2498_v61 = vsel %vm1327_vm7, %v2496_v56, %v8874_v50  ;;  %v2889_v38 = vld [vmem:[#allocation3 + $0x60] sm:$0xfe] }
 0x21a   : > { %1665 = vst [vmem:[#allocation1 + $0x1] ss:$4 sm:$0xff] %v1379_v35  ;;  %v1385_v52 = vrot.slane %v1384_v2, 6  ;;  %v2224_v19 = vrot.slane %v2137_v10, 1 }
 0x21b   : > { %1666 = vst [vmem:[#allocation1 + $0x2] ss:$4 sm:$0xff] %v1381_v37 }
 0x21c   : > { %2765 = vrot.lane.b32.xlu0 %v8846_v8, %s8201_s22  ;;  %1667 = vst [vmem:[#allocation1 + $0x3] ss:$4 sm:$0xff] %v1383_v39  ;;  %v2226_v32 = vsel %vm2213_vm9, %v2224_v19, %v8902_v13  ;;  %v3624_v19 = vld [vmem:[#allocation3 + $0x60] sm:$0xfe] }
 0x21d   : > { %v1100_v25 = vpop.f32.mrf.mxu1  ;;  %v960_v53 = vpop.f32.mrf.mxu0  ;;  %2008 = vst.msk [vmem:[#allocation3 + $0x78] sm:$0xff] %vm1992_vm3, %v1654_v14 }
 0x21e   : > { %v1287_v47 = vrot.slane %v1100_v25, 6  ;;  %v2890_v12 = vld [vmem:[#allocation3 + $0x80] sm:$0x1]  ;;  %2010 = vst.msk [vmem:[#allocation3 + $0x88] sm:$0x3] %vm1997_vm8, %v8864_v48 }
 0x21f   : > { %v8881_v18 = vld.sshfl [vmem:[#allocation1 + $0x20] sm:$0xff pattern:$0x73625140]  ;;  %v1663_v54 = vld.sshfl [vmem:[#allocation1 + $0x28] sm:$0xff pattern:$0x73625140]  ;;  %2300 = vrot.lane.b32.xlu1 %v2223_v55, %s8199_s20 }
 0x220   : > { %7801 = vmatmul.msk.f32.gmra.mxu1 %vm309_vm0, %v8653_v15  ;;  %v1387_v30 = vsel %vm1321_vm5, %v960_v53, %v1287_v47  ;;  %2011 = vst [vmem:[#allocation3 + $0x90] sm:$0xff] %v8881_v18  ;;  %v1389_v60 = vsel %vm1324_vm6, %v960_v53, %v1287_v47  ;;  %v1386_v41 = vsel %vm1319_vm4, %v960_v53, %v1287_v47  ;;  %v2959_v17 = vrot.slane %v2890_v12, 1  ;;  %v2138_v3 = vld [vmem:[#allocation3 + $0x80] sm:$0x1] }
 0x221   : > { %7759 = vmatmul.msk.f32.gmra.mxu0 %vm309_vm0, %v8653_v15  ;;  %1668 = vst [vmem:[#allocation1 + $0x20] ss:$4 sm:$0xff] %v1385_v52  ;;  %3305 = vrot.lane.b32.xlu2 %v3227_v62, %s8203_s29  ;;  %v1388_v6 = vrot.slane %v1387_v30, 2  ;;  %v1390_v11 = vrot.slane %v1389_v60, 4  ;;  %v1391_v23 = vsel %vm1327_vm7, %v1287_v47, %v960_v53  ;;  %v3162_v37 = vld [vmem:[#allocation3 + $0x80] sm:$0x3] }
 0x222   : > { %2012 = vst.msk [vmem:[#allocation3 + $0x98] sm:$0xff] %vm1992_vm3, %v1663_v54  ;;  %v1392_v20 = vrot.slane %v1391_v23, 6  ;;  %v2960_v35 = vsel %vm2213_vm9, %v8902_v13, %v2959_v17  ;;  %v2227_v39 = vrot.slane %v2138_v3, 1  ;;  %v3231_v59 = vrot.slane %v3162_v37, 2  ;;  %v3161_v47 = vld [vmem:[#allocation3 + $0x60] sm:$0xfc] }
 0x223   : > { %v8897_v63 = vld.sshfl [vmem:[#allocation1] sm:$0xff pattern:$0x73625140]  ;;  %v1670_v57 = vld.sshfl [vmem:[#allocation1 + $0x8] sm:$0xff pattern:$0x73625140] }
 0x224   : > { %2574 = vrot.lane.b32.xlu0 %v2498_v61, %s8200_s21  ;;  %2013 = vst [vmem:[#allocation3 + $0xa0] sm:$0xff] %v8897_v63  ;;  %v2228_v51 = vsel %vm2213_vm9, %v8902_v13, %v2227_v39  ;;  %v3232_v56 = vsel %vm1327_vm7, %v8874_v50, %v3231_v59  ;;  %v2956_v55 = vrot.slane %v2889_v38, 1  ;;  %v3625_v3 = vld [vmem:[#allocation3 + $0x80] sm:$0x1] }
 0x225   : > { %v1103_v15 = vpop.f32.mrf.mxu1  ;;  %v963_v7 = vpop.f32.mrf.mxu0  ;;  %1673 = vst [vmem:[#allocation1] ss:$4 sm:$0xff] %v1386_v41  ;;  %v3691_v39 = vrot.slane %v3625_v3, 1 }
 0x226   : > { %v1288_v5 = vrot.slane %v1103_v15, 6  ;;  %1674 = vst [vmem:[#allocation1 + $0x1] ss:$4 sm:$0xff] %v1388_v6  ;;  %v3228_v15 = vrot.slane %v3161_v47, 2  ;;  %v2958_v12 = vsel %vm2213_vm9, %v2956_v55, %v8902_v13 }
 0x227   : > { %1675 = vst [vmem:[#allocation1 + $0x2] ss:$4 sm:$0xff] %v1390_v11  ;;  %3496 = vrot.lane.b32.xlu1 %v8834_v1, %s8204_s8 }
 0x228   : > { %v1394_v14 = vsel %vm1321_vm5, %v963_v7, %v1288_v5  ;;  %7802 = vmatmul.msk.f32.gmra.mxu1 %vm309_vm0, %v8541_v33  ;;  %v1396_v16 = vsel %vm1324_vm6, %v963_v7, %v1288_v5  ;;  %v1398_v27 = vsel %vm1327_vm7, %v1288_v5, %v963_v7  ;;  %v1671_v28 = vld.sshfl [vmem:[#allocation1 + $0x20] sm:$0xff pattern:$0x73625140]  ;;  %v1393_v24 = vsel %vm1319_vm4, %v963_v7, %v1288_v5  ;;  %v8919_v42 = vld.sshfl [vmem:[#allocation1 + $0x28] sm:$0xff pattern:$0x73625140] }
 0x229   : > { %7760 = vmatmul.msk.f32.gmra.mxu0 %vm309_vm0, %v8541_v33  ;;  %v1395_v26 = vrot.slane %v1394_v14, 2  ;;  %2015 = vst [vmem:[#allocation3 + $0xb0] sm:$0x3] %v1671_v28  ;;  %v1397_v4 = vrot.slane %v1396_v16, 4  ;;  %2302 = vrot.lane.b32.xlu2 %v2226_v32, %s8199_s20  ;;  %v1399_v36 = vrot.slane %v1398_v27, 6  ;;  %v3230_v23 = vsel %vm1327_vm7, %v3228_v15, %v8874_v50 }
 0x22a   : > { %1676 = vst [vmem:[#allocation1 + $0x3] ss:$4 sm:$0xff] %v1392_v20 }
 0x22b   : > { %1677 = vst [vmem:[#allocation1 + $0x20] ss:$4 sm:$0xff] %v1393_v24 }
 0x22c   : > { %3037 = vrot.lane.b32.xlu0 %v2960_v35, %s8202_s23  ;;  %1678 = vst [vmem:[#allocation1 + $0x21] ss:$4 sm:$0xff] %v1395_v26  ;;  %v3688_v26 = vrot.slane %v3624_v19, 1  ;;  %v2891_v19 = vld [vmem:[#allocation3 + $0x90] sm:$0xfe] }
 0x22d   : > { %v1106_v33 = vpop.f32.mrf.mxu1  ;;  %v966_v34 = vpop.f32.mrf.mxu0  ;;  %1679 = vst [vmem:[#allocation1 + $0x22] ss:$4 sm:$0xff] %v1397_v4 }
 0x22e   : > { %v1289_v1 = vrot.slane %v1106_v33, 6  ;;  %1680 = vst [vmem:[#allocation1 + $0x23] ss:$4 sm:$0xff] %v1399_v36 }
 0x22f   : > { %2014 = vst.msk [vmem:[#allocation3 + $0xa8] sm:$0xff] %vm1992_vm3, %v1670_v57  ;;  %3498 = vrot.lane.b32.xlu1 %v8846_v8, %s8204_s8  ;;  %v2427_v8 = vld [vmem:[#allocation3 + $0x80] sm:$0x3] }
 0x230   : > { %7803 = vmatmul.msk.f32.gmra.mxu1 %vm309_vm0, %v8661_v22  ;;  %v1400_v25 = vsel %vm1319_vm4, %v966_v34, %v1289_v1  ;;  %v1401_v53 = vsel %vm1321_vm5, %v966_v34, %v1289_v1  ;;  %v1403_v52 = vsel %vm1324_vm6, %v966_v34, %v1289_v1  ;;  %v1405_v54 = vsel %vm1327_vm7, %v1289_v1, %v966_v34 }
 0x231   : > { %7761 = vmatmul.msk.f32.gmra.mxu0 %vm309_vm0, %v8661_v22  ;;  %v8933_v45 = vld.sshfl [vmem:[#allocation1] sm:$0xff pattern:$0x73625140]  ;;  %v1682_v22 = vld.sshfl [vmem:[#allocation1 + $0x8] sm:$0xff pattern:$0x73625140]  ;;  %2304 = vrot.lane.b32.xlu2 %v2228_v51, %s8199_s20  ;;  %v3690_v34 = vsel %vm2213_vm9, %v3688_v26, %v8902_v13 }
 0x232   : > { %2017 = vst [vmem:[#allocation3 + $0xc0] sm:$0xff] %v8933_v45  ;;  %v1402_v30 = vrot.slane %v1401_v53, 2  ;;  %v1404_v60 = vrot.slane %v1403_v52, 4  ;;  %v1406_v5 = vrot.slane %v1405_v54, 6  ;;  %v2499_v61 = vrot.slane %v2427_v8, 2 }
 0x233   : > { %1685 = vst [vmem:[#allocation1] ss:$4 sm:$0xff] %v1400_v25  ;;  %v2140_v52 = vld [vmem:[#allocation3 + $0xb0] sm:$0x1]  ;;  %v3626_v8 = vld [vmem:[#allocation3 + $0x90] sm:$0xfe] }
 0x234   : > { %3309 = vrot.lane.b32.xlu0 %v3232_v56, %s8203_s29  ;;  %2018 = vst.msk [vmem:[#allocation3 + $0xc8] sm:$0xff] %vm1992_vm3, %v1682_v22  ;;  %v2500_v20 = vsel %vm1327_vm7, %v8874_v50, %v2499_v61  ;;  %v9009_v61 = vrot.slane %v8897_v63, 1 }
 0x235   : > { %v1109_v2 = vpop.f32.mrf.mxu1  ;;  %v969_v46 = vpop.f32.mrf.mxu0  ;;  %v8943_v7 = vld.sshfl [vmem:[#allocation1 + $0x20] sm:$0xff pattern:$0x73625140]  ;;  %v1684_v10 = vld.sshfl [vmem:[#allocation1 + $0x28] sm:$0xff pattern:$0x73625140] }
 0x236   : > { %v1290_v62 = vrot.slane %v1109_v2, 6  ;;  %2019 = vst [vmem:[#allocation3 + $0xd0] sm:$0xff] %v8943_v7 }
 0x237   : > { %1688 = vst [vmem:[#allocation1 + $0x20] ss:$4 sm:$0xff] %v1402_v30  ;;  %3035 = vrot.lane.b32.xlu1 %v2958_v12, %s8202_s23  ;;  %v2139_v30 = vld [vmem:[#allocation3 + $0x90] sm:$0xfe] }
 0x238   : > { %7804 = vmatmul.msk.f32.gmra.mxu1 %vm309_vm0, %v8550_v40  ;;  %v1408_v41 = vsel %vm1321_vm5, %v969_v46, %v1290_v62  ;;  %v1410_v6 = vsel %vm1324_vm6, %v969_v46, %v1290_v62  ;;  %1689 = vst [vmem:[#allocation1 + $0x21] ss:$4 sm:$0xff] %v1404_v60  ;;  %v1412_v11 = vsel %vm1327_vm7, %v1290_v62, %v969_v46 }
 0x239   : > { %7762 = vmatmul.msk.f32.gmra.mxu0 %vm309_vm0, %v8550_v40  ;;  %1690 = vst [vmem:[#allocation1 + $0x22] ss:$4 sm:$0xff] %v1406_v5  ;;  %v1407_v14 = vsel %vm1319_vm4, %v969_v46, %v1290_v62  ;;  %v1409_v17 = vrot.slane %v1408_v41, 2  ;;  %3307 = vrot.lane.b32.xlu2 %v3230_v23, %s8203_s29  ;;  %v1411_v27 = vrot.slane %v1410_v6, 4  ;;  %v1413_v24 = vrot.slane %v1412_v11, 6 }
 0x23a   : > { %v1686_v16 = vld.sshfl [vmem:[#allocation1] sm:$0xff pattern:$0x73625140]  ;;  %v8963_v32 = vld.sshfl [vmem:[#allocation1 + $0x8] sm:$0xff pattern:$0x73625140]  ;;  %v3692_v46 = vsel %vm2213_vm9, %v8902_v13, %v3691_v39 }
 0x23b   : > { %2021 = vst [vmem:[#allocation3 + $0xe0] sm:$0x3] %v1686_v16  ;;  %v2232_v62 = vrot.slane %v2140_v52, 1  ;;  %v2229_v41 = vrot.slane %v2139_v30, 1  ;;  %v3163_v39 = vld [vmem:[#allocation3 + $0x90] sm:$0xfc] }
 0x23c   : > { %2576 = vrot.lane.b32.xlu0 %v2500_v20, %s8200_s21  ;;  %1691 = vst [vmem:[#allocation1 + $0x23] ss:$4 sm:$0xff] %v1407_v14  ;;  %v2428_v14 = vld [vmem:[#allocation3 + $0x90] sm:$0xfc]  ;;  %v3164_v52 = vld [vmem:[#allocation3 + $0xb0] sm:$0x3] }
 0x23d   : > { %v1112_v40 = vpop.f32.mrf.mxu1  ;;  %v972_v57 = vpop.f32.mrf.mxu0  ;;  %1694 = vst [vmem:[#allocation1] ss:$4 sm:$0xff] %v1409_v17  ;;  %v2233_v23 = vsel %vm2213_vm9, %v9009_v61, %v2232_v62  ;;  %v2231_v20 = vsel %vm2213_vm9, %v2229_v41, %v9009_v61 }
 0x23e   : > { %v1291_v28 = vrot.slane %v1112_v40, 6  ;;  %1695 = vst [vmem:[#allocation1 + $0x1] ss:$4 sm:$0xff] %v1411_v27  ;;  %v2892_v27 = vld [vmem:[#allocation3 + $0xb0] sm:$0x1] }
 0x23f   : > { %1696 = vst [vmem:[#allocation1 + $0x2] ss:$4 sm:$0xff] %v1413_v24  ;;  %3768 = vrot.lane.b32.xlu1 %v3690_v34, %s8205_s9  ;;  %v2964_v34 = vrot.slane %v2892_v27, 1 }
 0x240   : > { %v1414_v33 = vsel %vm1319_vm4, %v972_v57, %v1291_v28  ;;  %7805 = vmatmul.msk.f32.gmra.mxu1 %vm309_vm0, %v8670_v29  ;;  %v1415_v50 = vsel %vm1321_vm5, %v972_v57, %v1291_v28  ;;  %v1417_v36 = vsel %vm1324_vm6, %v972_v57, %v1291_v28  ;;  %2020 = vst.msk [vmem:[#allocation3 + $0xd8] sm:$0xff] %vm1992_vm3, %v1684_v10  ;;  %v3693_v10 = vrot.slane %v3626_v8, 1 }
 0x241   : > { %7763 = vmatmul.msk.f32.gmra.mxu0 %vm309_vm0, %v8670_v29  ;;  %1697 = vst [vmem:[#allocation1 + $0x3] ss:$4 sm:$0xff] %v1414_v33  ;;  %v1416_v37 = vrot.slane %v1415_v50, 2  ;;  %3500 = vrot.lane.b32.xlu2 %v8881_v18, %s8204_s8  ;;  %v1419_v29 = vsel %vm1327_vm7, %v1291_v28, %v972_v57  ;;  %v1418_v53 = vrot.slane %v1417_v36, 4  ;;  %v3234_v28 = vrot.slane %v8897_v63, 2 }
 0x242   : > { %v1420_v51 = vrot.slane %v1419_v29, 6  ;;  %v3695_v57 = vsel %vm2213_vm9, %v3693_v10, %v9009_v61  ;;  %v2501_v33 = vrot.slane %v2428_v14, 2  ;;  %v2961_v50 = vrot.slane %v2891_v19, 1  ;;  %2016 = vst.msk [vmem:[#allocation3 + $0xb8] sm:$0x3] %vm1997_vm8, %v8919_v42 }
 0x243   : > { %v8983_v59 = vld.sshfl [vmem:[#allocation1 + $0x20] sm:$0xff pattern:$0x73625140]  ;;  %v1693_v25 = vld.sshfl [vmem:[#allocation1 + $0x28] sm:$0xff pattern:$0x73625140] }
 0x244   : > { %2767 = vrot.lane.b32.xlu0 %v8881_v18, %s8201_s22  ;;  %2023 = vst [vmem:[#allocation3 + $0xf0] sm:$0xff] %v8983_v59  ;;  %v2963_v29 = vsel %vm2213_vm9, %v2961_v50, %v9009_v61 }
 0x245   : > { %v1115_v4 = vpop.f32.mrf.mxu1  ;;  %v975_v35 = vpop.f32.mrf.mxu0  ;;  %1698 = vst [vmem:[#allocation1 + $0x20] ss:$4 sm:$0xff] %v1416_v37  ;;  %v2503_v37 = vsel %vm1327_vm7, %v2501_v33, %v3234_v28 }
 0x246   : > { %v1292_v1 = vrot.slane %v1115_v4, 6  ;;  %2024 = vst.msk [vmem:[#allocation3 + $0xf8] sm:$0xff] %vm1992_vm3, %v1693_v25  ;;  %v2429_v25 = vld [vmem:[#allocation3 + $0xb0] sm:$0x3] }
 0x247   : > { %3770 = vrot.lane.b32.xlu1 %v3692_v46, %s8205_s9  ;;  %2022 = vst.msk [vmem:[#allocation3 + $0xe8] sm:$0x3] %vm1997_vm8, %v8963_v32 }
 0x248   : > { %7806 = vmatmul.msk.f32.gmra.mxu1 %vm309_vm0, %v8560_v49  ;;  %v8991_v18 = vld.sshfl [vmem:[#allocation1] sm:$0xff pattern:$0x73625140]  ;;  %v8993_v2 = vld.sshfl [vmem:[#allocation1 + $0x8] sm:$0xff pattern:$0x73625140]  ;;  %v1422_v48 = vsel %vm1321_vm5, %v975_v35, %v1292_v1  ;;  %v1421_v47 = vsel %vm1319_vm4, %v975_v35, %v1292_v1  ;;  %v1424_v38 = vsel %vm1324_vm6, %v975_v35, %v1292_v1  ;;  %v1426_v56 = vsel %vm1327_vm7, %v1292_v1, %v975_v35 }
 0x249   : > { %7764 = vmatmul.msk.f32.gmra.mxu0 %vm309_vm0, %v8560_v49  ;;  %1703 = vst [vmem:[#allocation1] ss:$4 sm:$0xff] %v1418_v53  ;;  %3502 = vrot.lane.b32.xlu2 %v8897_v63, %s8204_s8  ;;  %v1423_v13 = vrot.slane %v1422_v48, 2  ;;  %v1425_v55 = vrot.slane %v1424_v38, 4  ;;  %v1427_v5 = vrot.slane %v1426_v56, 6  ;;  %v2504_v56 = vrot.slane %v2429_v25, 2 }
 0x24a   : > { %1704 = vst [vmem:[#allocation1 + $0x1] ss:$4 sm:$0xff] %v1420_v51 }
 0x24b   : > { %2025 = vst [vmem:[#allocation3 + $0x100] sm:$0xff] %v8991_v18  ;;  %v2505_v41 = vsel %vm1327_vm7, %v3234_v28, %v2504_v56 }
 0x24c   : > { %2769 = vrot.lane.b32.xlu0 %v8897_v63, %s8201_s22  ;;  %1705 = vst [vmem:[#allocation1 + $0x2] ss:$4 sm:$0xff] %v1421_v47  ;;  %v1701_v15 = vld.sshfl [vmem:[#allocation1 + $0x20] sm:$0xff pattern:$0x73625140]  ;;  %v2965_v47 = vsel %vm2213_vm9, %v9009_v61, %v2964_v34 }
 0x24d   : > { %v1118_v22 = vpop.f32.mrf.mxu1  ;;  %v978_v49 = vpop.f32.mrf.mxu0  ;;  %2027 = vst [vmem:[#allocation3 + $0x110] sm:$0x3] %v1701_v15  ;;  %v9015_v6 = vld.sshfl [vmem:[#allocation1 + $0x28] sm:$0xff pattern:$0x73625140] }
 0x24e   : > { %v1293_v54 = vrot.slane %v1118_v22, 6  ;;  %1706 = vst [vmem:[#allocation1 + $0x3] ss:$4 sm:$0xff] %v1423_v13  ;;  %v3233_v13 = vrot.slane %v3163_v39, 2 }
 0x24f   : > { %1707 = vst [vmem:[#allocation1 + $0x20] ss:$4 sm:$0xff] %v1425_v55  ;;  %2308 = vrot.lane.b32.xlu1 %v2233_v23, %s8199_s20 }
 0x250   : > { %v1429_v60 = vsel %vm1321_vm5, %v978_v49, %v1293_v54  ;;  %7807 = vmatmul.msk.f32.gmra.mxu1 %vm309_vm0, %v8683_v31  ;;  %v1428_v12 = vsel %vm1319_vm4, %v978_v49, %v1293_v54  ;;  %1708 = vst [vmem:[#allocation1 + $0x21] ss:$4 sm:$0xff] %v1427_v5  ;;  %v1431_v40 = vsel %vm1324_vm6, %v978_v49, %v1293_v54 }
 0x251   : > { %7765 = vmatmul.msk.f32.gmra.mxu0 %vm309_vm0, %v8683_v31  ;;  %v1430_v11 = vrot.slane %v1429_v60, 2  ;;  %1709 = vst [vmem:[#allocation1 + $0x22] ss:$4 sm:$0xff] %v1428_v12  ;;  %3772 = vrot.lane.b32.xlu2 %v3695_v57, %s8205_s9  ;;  %v1432_v24 = vrot.slane %v1431_v40, 4  ;;  %v1433_v26 = vsel %vm1327_vm7, %v1293_v54, %v978_v49  ;;  %v3236_v60 = vrot.slane %v3164_v52, 2 }
 0x252   : > { %v1434_v63 = vrot.slane %v1433_v26, 6  ;;  %v3627_v57 = vld [vmem:[#allocation3 + $0xb0] sm:$0x1]  ;;  %2026 = vst.msk [vmem:[#allocation3 + $0x108] sm:$0xff] %vm1992_vm3, %v8993_v2  ;;  %v2430_v52 = vld [vmem:[#allocation3 + $0xc0] sm:$0xfc] }
 0x253   : > { %1710 = vst [vmem:[#allocation1 + $0x23] ss:$4 sm:$0xff] %v1430_v11  ;;  %v3235_v11 = vsel %vm1327_vm7, %v3233_v13, %v3234_v28  ;;  %v3237_v23 = vsel %vm1327_vm7, %v3234_v28, %v3236_v60  ;;  %v2141_v60 = vld [vmem:[#allocation3 + $0xc0] sm:$0xfe] }
 0x254   : > { %2306 = vrot.lane.b32.xlu0 %v2231_v20, %s8199_s20  ;;  %v3696_v20 = vrot.slane %v3627_v57, 1  ;;  %2028 = vst.msk [vmem:[#allocation3 + $0x118] sm:$0x3] %vm1997_vm8, %v9015_v6 }
 0x255   : > { %v1121_v31 = vpop.f32.mrf.mxu1  ;;  %v9030_v3 = vld.sshfl [vmem:[#allocation1] sm:$0xff pattern:$0x73625140]  ;;  %v9032_v4 = vld.sshfl [vmem:[#allocation1 + $0x8] sm:$0xff pattern:$0x73625140]  ;;  %v9043_v1 = vpop.permute.xlu2 %2759 }
 0x256   : > { %v1294_v17 = vrot.slane %v1121_v31, 6  ;;  %v981_v16 = vpop.f32.mrf.mxu0  ;;  %2029 = vst [vmem:[#allocation3 + $0x120] sm:$0xff] %v9030_v3  ;;  %v3697_v33 = vsel %vm2213_vm9, %v9009_v61, %v3696_v20 }
 0x257   : > { %1715 = vst [vmem:[#allocation1] ss:$4 sm:$0xff] %v1432_v24  ;;  %2578 = vrot.lane.b32.xlu1 %v2503_v37, %s8200_s21  ;;  %v2893_v37 = vld [vmem:[#allocation3 + $0xc0] sm:$0xfe] }
 0x258   : > { %v1436_v35 = vsel %vm1321_vm5, %v981_v16, %v1294_v17  ;;  %7808 = vmatmul.msk.f32.gmra.mxu1 %vm309_vm0, %v8568_v58  ;;  %v1438_v48 = vsel %vm1324_vm6, %v981_v16, %v1294_v17  ;;  %v1440_v22 = vsel %vm1327_vm7, %v1294_v17, %v981_v16  ;;  %2030 = vst.msk [vmem:[#allocation3 + $0x128] sm:$0xff] %vm1992_vm3, %v9032_v4 }
 0x259   : > { %7766 = vmatmul.msk.f32.gmra.mxu0 %vm309_vm0, %v8568_v58  ;;  %v1437_v36 = vrot.slane %v1436_v35, 2  ;;  %v1435_v58 = vsel %vm1319_vm4, %v981_v16, %v1294_v17  ;;  %3039 = vrot.lane.b32.xlu2 %v2963_v29, %s8202_s23  ;;  %v1439_v54 = vrot.slane %v1438_v48, 4  ;;  %v1441_v30 = vrot.slane %v1440_v22, 6 }
 0x25a   : > { %v9046_v53 = vld.sshfl [vmem:[#allocation1 + $0x20] sm:$0xff pattern:$0x73625140]  ;;  %v9048_v51 = vld.sshfl [vmem:[#allocation1 + $0x28] sm:$0xff pattern:$0x73625140] }
 0x25b   : > { %1718 = vst [vmem:[#allocation1 + $0x20] ss:$4 sm:$0xff] %v1434_v63  ;;  %v9105_v48 = vrot.slane %v8943_v7, 1 }
 0x25c   : > { %3041 = vrot.lane.b32.xlu0 %v2965_v47, %s8202_s23  ;;  %2031 = vst [vmem:[#allocation3 + $0x130] sm:$0xff] %v9046_v53 }
 0x25d   : > { %v1124_v46 = vpop.f32.mrf.mxu1  ;;  %1719 = vst [vmem:[#allocation1 + $0x21] ss:$4 sm:$0xff] %v1435_v58  ;;  %v9074_v19 = vpop.permute.xlu2 %2761 }
 0x25e   : > { %v984_v38 = vpop.f32.mrf.mxu0  ;;  %v1295_v49 = vrot.slane %v1124_v46, 6  ;;  %1720 = vst [vmem:[#allocation1 + $0x22] ss:$4 sm:$0xff] %v1437_v36  ;;  %v1716_v62 = vld.sshfl [vmem:[#allocation1] sm:$0xff pattern:$0x73625140] }
 0x25f   : > { %v9064_v15 = vld.sshfl [vmem:[#allocation1 + $0x8] sm:$0xff pattern:$0x73625140]  ;;  %2033 = vst [vmem:[#allocation3 + $0x140] sm:$0x3] %v1716_v62  ;;  %2580 = vrot.lane.b32.xlu1 %v2505_v41, %s8200_s21  ;;  %v2966_v46 = vrot.slane %v2893_v37, 1 }
 0x260   : > { %v1443_v8 = vsel %vm1321_vm5, %v984_v38, %v1295_v49  ;;  %v1445_v55 = vsel %vm1324_vm6, %v984_v38, %v1295_v49  ;;  %7809 = vmatmul.msk.f32.gmra.mxu1 %vm309_vm0, %v8693_v43  ;;  %v1442_v5 = vsel %vm1319_vm4, %v984_v38, %v1295_v49  ;;  %1721 = vst [vmem:[#allocation1 + $0x23] ss:$4 sm:$0xff] %v1439_v54 }
 0x261   : > { %7767 = vmatmul.msk.f32.gmra.mxu0 %vm309_vm0, %v8693_v43  ;;  %v1444_v10 = vrot.slane %v1443_v8, 2  ;;  %v1446_v12 = vrot.slane %v1445_v55, 4  ;;  %1724 = vst [vmem:[#allocation1] ss:$4 sm:$0xff] %v1441_v30  ;;  %3311 = vrot.lane.b32.xlu2 %v3235_v11, %s8203_s29  ;;  %v1447_v31 = vsel %vm1327_vm7, %v1295_v49, %v984_v38  ;;  %v2968_v55 = vsel %vm2213_vm9, %v2966_v46, %v9105_v48 }
 0x262   : > { %1725 = vst [vmem:[#allocation1 + $0x1] ss:$4 sm:$0xff] %v1442_v5  ;;  %v1448_v16 = vrot.slane %v1447_v31, 6  ;;  %v2506_v11 = vrot.slane %v2430_v52, 2 }
 0x263   : > { %1726 = vst [vmem:[#allocation1 + $0x2] ss:$4 sm:$0xff] %v1444_v10  ;;  %v3165_v10 = vld [vmem:[#allocation3 + $0xc0] sm:$0xfc] }
 0x264   : > { %3313 = vrot.lane.b32.xlu0 %v3237_v23, %s8203_s29  ;;  %1727 = vst [vmem:[#allocation1 + $0x3] ss:$4 sm:$0xff] %v1446_v12  ;;  %v9128_v12 = vrot.slane %v8943_v7, 2 }
 0x265   : > { %v1127_v43 = vpop.f32.mrf.mxu1  ;;  %2032 = vst.msk [vmem:[#allocation3 + $0x138] sm:$0xff] %vm1992_vm3, %v9048_v51 }
 0x266   : > { %v987_v40 = vpop.f32.mrf.mxu0  ;;  %v1296_v14 = vrot.slane %v1127_v43, 6  ;;  %v9076_v17 = vpop.permute.xlu0 %2294  ;;  %v2234_v43 = vrot.slane %v2141_v60, 1  ;;  %v2508_v57 = vsel %vm1327_vm7, %v2506_v11, %v9128_v12  ;;  %2034 = vst.msk [vmem:[#allocation3 + $0x148] sm:$0x3] %vm1997_vm8, %v9064_v15 }
 0x267   : > { %v1722_v27 = vld.sshfl [vmem:[#allocation1 + $0x20] sm:$0xff pattern:$0x73625140]  ;;  %v9084_v28 = vld.sshfl [vmem:[#allocation1 + $0x28] sm:$0xff pattern:$0x73625140]  ;;  %2771 = vrot.lane.b32.xlu1 %v8933_v45, %s8201_s22 }
 0x268   : > { %7810 = vmatmul.msk.f32.gmra.mxu1 %vm309_vm0, %v8573_v9  ;;  %v1450_v24 = vsel %vm1321_vm5, %v987_v40, %v1296_v14  ;;  %v1452_v26 = vsel %vm1324_vm6, %v987_v40, %v1296_v14  ;;  %2035 = vst [vmem:[#allocation3 + $0x150] sm:$0xff] %v1722_v27  ;;  %v1449_v2 = vsel %vm1319_vm4, %v987_v40, %v1296_v14 }
 0x269   : > { %7768 = vmatmul.msk.f32.gmra.mxu0 %vm309_vm0, %v8573_v9  ;;  %1728 = vst [vmem:[#allocation1 + $0x20] ss:$4 sm:$0xff] %v1448_v16  ;;  %3774 = vrot.lane.b32.xlu2 %v3697_v33, %s8205_s9  ;;  %v1451_v34 = vrot.slane %v1450_v24, 2  ;;  %v1453_v35 = vrot.slane %v1452_v26, 4  ;;  %v1454_v61 = vsel %vm1327_vm7, %v1296_v14, %v987_v40  ;;  %v3238_v40 = vrot.slane %v3165_v10, 2 }
 0x26a   : > { %v1455_v47 = vrot.slane %v1454_v61, 6  ;;  %v2236_v20 = vsel %vm2213_vm9, %v2234_v43, %v9105_v48  ;;  %v2894_v16 = vld [vmem:[#allocation3 + $0xe0] sm:$0x1]  ;;  %2036 = vst.msk [vmem:[#allocation3 + $0x158] sm:$0xff] %vm1992_vm3, %v9084_v28 }
 0x26b   : > { %v1729_v36 = vld.sshfl [vmem:[#allocation1] sm:$0xff pattern:$0x73625140]  ;;  %v9096_v29 = vld.sshfl [vmem:[#allocation1 + $0x8] sm:$0xff pattern:$0x73625140]  ;;  %v9099_v39 = vpop.permute.xlu2 %2572 }
 0x26c   : > { %3506 = vrot.lane.b32.xlu0 %v8943_v7, %s8204_s8  ;;  %2037 = vst [vmem:[#allocation3 + $0x160] sm:$0xff] %v1729_v36  ;;  %v3629_v10 = vld [vmem:[#allocation3 + $0xe0] sm:$0x1] }
 0x26d   : > { %v1130_v9 = vpop.f32.mrf.mxu1  ;;  %1733 = vst [vmem:[#allocation1] ss:$4 sm:$0xff] %v1449_v2 }
 0x26e   : > { %v990_v50 = vpop.f32.mrf.mxu0  ;;  %v1297_v63 = vrot.slane %v1130_v9, 6  ;;  %v9102_v58 = vpop.permute.xlu0 %2566  ;;  %1734 = vst [vmem:[#allocation1 + $0x1] ss:$4 sm:$0xff] %v1451_v34  ;;  %v3240_v9 = vsel %vm1327_vm7, %v3238_v40, %v9128_v12 }
 0x26f   : > { %1735 = vst [vmem:[#allocation1 + $0x2] ss:$4 sm:$0xff] %v1453_v35  ;;  %2773 = vrot.lane.b32.xlu1 %v8943_v7, %s8201_s22  ;;  %v3628_v7 = vld [vmem:[#allocation3 + $0xc0] sm:$0xfe] }
 0x270   : > { %v1457_v25 = vsel %vm1321_vm5, %v990_v50, %v1297_v63  ;;  %7811 = vmatmul.msk.f32.gmra.mxu1 %vm309_vm0, %v8703_v44  ;;  %v1459_v38 = vsel %vm1324_vm6, %v990_v50, %v1297_v63  ;;  %v1461_v49 = vsel %vm1327_vm7, %v1297_v63, %v990_v50  ;;  %v1731_v56 = vld.sshfl [vmem:[#allocation1 + $0x20] sm:$0xff pattern:$0x73625140]  ;;  %v9113_v54 = vld.sshfl [vmem:[#allocation1 + $0x28] sm:$0xff pattern:$0x73625140]  ;;  %v1456_v8 = vsel %vm1319_vm4, %v990_v50, %v1297_v63 }
 0x271   : > { %7769 = vmatmul.msk.f32.gmra.mxu0 %vm309_vm0, %v8703_v44  ;;  %v1458_v22 = vrot.slane %v1457_v25, 2  ;;  %2039 = vst [vmem:[#allocation3 + $0x170] sm:$0x3] %v1731_v56  ;;  %v9118_v44 = vpop.permute.xlu1 %2568  ;;  %v1460_v13 = vrot.slane %v1459_v38, 4  ;;  %3504 = vrot.lane.b32.xlu2 %v8933_v45, %s8204_s8  ;;  %v1462_v62 = vrot.slane %v1461_v49, 6  ;;  %v3698_v35 = vrot.slane %v3628_v7, 1 }
 0x272   : > { %1736 = vst [vmem:[#allocation1 + $0x3] ss:$4 sm:$0xff] %v1455_v47  ;;  %v2969_v63 = vrot.slane %v2894_v16, 1 }
 0x273   : > { %1737 = vst [vmem:[#allocation1 + $0x20] ss:$4 sm:$0xff] %v1456_v8  ;;  %v9125_v41 = vpop.permute.xlu2 %3033  ;;  %v3700_v28 = vsel %vm2213_vm9, %v3698_v35, %v9105_v48  ;;  %v2431_v8 = vld [vmem:[#allocation3 + $0xe0] sm:$0x3] }
 0x274   : > { %3043 = vrot.lane.b32.xlu0 %v2968_v55, %s8202_s23  ;;  %1738 = vst [vmem:[#allocation1 + $0x21] ss:$4 sm:$0xff] %v1458_v22  ;;  %v2970_v52 = vsel %vm2213_vm9, %v9105_v48, %v2969_v63 }
 0x275   : > { %v1133_v30 = vpop.f32.mrf.mxu1  ;;  %1739 = vst [vmem:[#allocation1 + $0x22] ss:$4 sm:$0xff] %v1460_v13  ;;  %v3166_v13 = vld [vmem:[#allocation3 + $0xe0] sm:$0x3] }
 0x276   : > { %v993_v5 = vpop.f32.mrf.mxu0  ;;  %v1298_v45 = vrot.slane %v1133_v30, 6  ;;  %v9132_v23 = vpop.permute.xlu0 %2296  ;;  %1740 = vst [vmem:[#allocation1 + $0x23] ss:$4 sm:$0xff] %v1462_v62 }
 0x277   : > { %2582 = vrot.lane.b32.xlu1 %v2508_v57, %s8200_s21  ;;  %2038 = vst.msk [vmem:[#allocation3 + $0x168] sm:$0xff] %vm1992_vm3, %v9096_v29 }
 0x278   : > { %7812 = vmatmul.msk.f32.gmra.mxu1 %vm309_vm0, %v8579_v21  ;;  %v1463_v31 = vsel %vm1319_vm4, %v993_v5, %v1298_v45  ;;  %v1464_v14 = vsel %vm1321_vm5, %v993_v5, %v1298_v45  ;;  %v1466_v26 = vsel %vm1324_vm6, %v993_v5, %v1298_v45  ;;  %v1468_v4 = vsel %vm1327_vm7, %v1298_v45, %v993_v5 }
 0x279   : > { %7770 = vmatmul.msk.f32.gmra.mxu0 %vm309_vm0, %v8579_v21  ;;  %v2142_v21 = vld [vmem:[#allocation3 + $0xe0] sm:$0x1]  ;;  %v1741_v27 = vld.sshfl [vmem:[#allocation1] sm:$0xff pattern:$0x73625140]  ;;  %2310 = vrot.lane.b32.xlu2 %v2236_v20, %s8199_s20  ;;  %v9154_v50 = vpop.permute.xlu1 %2298  ;;  %v1465_v51 = vrot.slane %v1464_v14, 2 }
 0x27a   : > { %v9147_v24 = vld.sshfl [vmem:[#allocation1 + $0x8] sm:$0xff pattern:$0x73625140]  ;;  %2041 = vst [vmem:[#allocation3 + $0x180] sm:$0xff] %v1741_v27  ;;  %v1467_v37 = vrot.slane %v1466_v26, 4  ;;  %v1469_v36 = vrot.slane %v1468_v4, 6 }
 0x27b   : > { %1745 = vst [vmem:[#allocation1] ss:$4 sm:$0xff] %v1463_v31  ;;  %v9157_v34 = vpop.permute.xlu2 %3305  ;;  %v2237_v25 = vrot.slane %v2142_v21, 1  ;;  %v3241_v14 = vrot.slane %v3166_v13, 2  ;;  %v2509_v20 = vrot.slane %v2431_v8, 2  ;;  %v3701_v21 = vrot.slane %v3629_v10, 1 }
 0x27c   : > { %3315 = vrot.lane.b32.xlu0 %v3240_v9, %s8203_s29  ;;  %2042 = vst.msk [vmem:[#allocation3 + $0x188] sm:$0xff] %vm1992_vm3, %v9147_v24  ;;  %v2432_v8 = vld [vmem:[#allocation3 + $0xf0] sm:$0xfc]  ;;  %v9220_v13 = vrot.slane %v8991_v18, 2  ;;  %vm5164_vm0 = vcmask 1047559  }
 0x27d   : > { %v1136_v33 = vpop.f32.mrf.mxu1  ;;  %v1743_v46 = vld.sshfl [vmem:[#allocation1 + $0x20] sm:$0xff pattern:$0x73625140]  ;;  %v9161_v47 = vld.sshfl [vmem:[#allocation1 + $0x28] sm:$0xff pattern:$0x73625140]  ;;  %v2238_v5 = vsel %vm2213_vm9, %v9105_v48, %v2237_v25  ;;  %v3242_v26 = vsel %vm1327_vm7, %v9128_v12, %v3241_v14  ;;  %v2510_v4 = vsel %vm1327_vm7, %v9128_v12, %v2509_v20  ;;  %v3702_v35 = vsel %vm2213_vm9, %v9105_v48, %v3701_v21 }
 0x27e   : > { %v996_v2 = vpop.f32.mrf.mxu0  ;;  %v1299_v61 = vrot.slane %v1136_v33, 6  ;;  %2043 = vst [vmem:[#allocation3 + $0x190] sm:$0xff] %v1743_v46  ;;  %v9165_v49 = vpop.permute.xlu0 %3031 }
 0x27f   : > { %1748 = vst [vmem:[#allocation1 + $0x20] ss:$4 sm:$0xff] %v1465_v51  ;;  %3045 = vrot.lane.b32.xlu1 %v2970_v52, %s8202_s23 }
 0x280   : > { %v1471_v38 = vsel %vm1321_vm5, %v996_v2, %v1299_v61  ;;  %v1473_v22 = vsel %vm1324_vm6, %v996_v2, %v1299_v61  ;;  %1749 = vst [vmem:[#allocation1 + $0x21] ss:$4 sm:$0xff] %v1467_v37  ;;  %v1475_v56 = vsel %vm1327_vm7, %v1299_v61, %v996_v2  ;;  %v1470_v30 = vsel %vm1319_vm4, %v996_v2, %v1299_v61 }
 0x281   : > { %1750 = vst [vmem:[#allocation1 + $0x22] ss:$4 sm:$0xff] %v1469_v36  ;;  %v1472_v55 = vrot.slane %v1471_v38, 2  ;;  %v1474_v60 = vrot.slane %v1473_v22, 4  ;;  %3776 = vrot.lane.b32.xlu2 %v3700_v28, %s8205_s9  ;;  %v9179_v43 = vpop.permute.xlu1 %2570  ;;  %v1476_v57 = vrot.slane %v1475_v56, 6 }
 0x282   : > { %v1746_v11 = vld.sshfl [vmem:[#allocation1] sm:$0xff pattern:$0x73625140]  ;;  %v9177_v45 = vld.sshfl [vmem:[#allocation1 + $0x8] sm:$0xff pattern:$0x73625140] }
 0x283   : > { %2045 = vst [vmem:[#allocation3 + $0x1a0] sm:$0x3] %v1746_v11  ;;  %v9182_v7 = vpop.permute.xlu2 %2302 }
 0x284   : > { %2312 = vrot.lane.b32.xlu0 %v2238_v5, %s8199_s20  ;;  %1751 = vst [vmem:[#allocation1 + $0x23] ss:$4 sm:$0xff] %v1470_v30 }
 0x285   : > { %v1139_v62 = vpop.f32.mrf.mxu1  ;;  %1754 = vst [vmem:[#allocation1] ss:$4 sm:$0xff] %v1472_v55 }
 0x286   : > { %v999_v40 = vpop.f32.mrf.mxu0  ;;  %v1300_v31 = vrot.slane %v1139_v62, 6  ;;  %1755 = vst [vmem:[#allocation1 + $0x1] ss:$4 sm:$0xff] %v1474_v60  ;;  %v9192_v2 = vpop.permute.xlu0 %2763  ;;  %v3630_v60 = vld [vmem:[#allocation3 + $0xf0] sm:$0xfe] }
 0x287   : > { %1756 = vst [vmem:[#allocation1 + $0x2] ss:$4 sm:$0xff] %v1476_v57  ;;  %3317 = vrot.lane.b32.xlu1 %v3242_v26, %s8203_s29  ;;  %v2511_v57 = vrot.slane %v2432_v8, 2  ;;  %v3703_v21 = vrot.slane %v3630_v60, 1 }
 0x288   : > { %v1477_v16 = vsel %vm1319_vm4, %v999_v40, %v1300_v31  ;;  %v1478_v27 = vsel %vm1321_vm5, %v999_v40, %v1300_v31  ;;  %v1480_v9 = vsel %vm1324_vm6, %v999_v40, %v1300_v31  ;;  %v1482_v63 = vsel %vm1327_vm7, %v1300_v31, %v999_v40  ;;  %2044 = vst.msk [vmem:[#allocation3 + $0x198] sm:$0xff] %vm1992_vm3, %v9161_v47 }
 0x289   : > { %1757 = vst [vmem:[#allocation1 + $0x3] ss:$4 sm:$0xff] %v1477_v16  ;;  %v1479_v33 = vrot.slane %v1478_v27, 2  ;;  %2584 = vrot.lane.b32.xlu2 %v2510_v4, %s8200_s21  ;;  %v9200_v12 = vpop.permute.xlu1 %3303  ;;  %v1481_v48 = vrot.slane %v1480_v9, 4  ;;  %v1483_v38 = vrot.slane %v1482_v63, 6  ;;  %v9233_v16 = vrot.slane %v8991_v18, 1 }
 0x28a   : > { %v2143_v9 = vld [vmem:[#allocation3 + $0xf0] sm:$0xfe]  ;;  %2040 = vst.msk [vmem:[#allocation3 + $0x178] sm:$0x3] %vm1997_vm8, %v9113_v54 }
 0x28b   : > { %v1752_v61 = vld.sshfl [vmem:[#allocation1 + $0x20] sm:$0xff pattern:$0x73625140]  ;;  %v9205_v25 = vld.sshfl [vmem:[#allocation1 + $0x28] sm:$0xff pattern:$0x73625140]  ;;  %v9207_v46 = vpop.permute.xlu2 %2304 }
 0x28c   : > { %3778 = vrot.lane.b32.xlu0 %v3702_v35, %s8205_s9  ;;  %2047 = vst [vmem:[#allocation3 + $0x1b0] sm:$0xff] %v1752_v61  ;;  %v2144_v35 = vld [vmem:[#allocation3 + $0x110] sm:$0x1] }
 0x28d   : > { %v1142_v51 = vpop.f32.mrf.mxu1  ;;  %1758 = vst [vmem:[#allocation1 + $0x20] ss:$4 sm:$0xff] %v1479_v33  ;;  %v2513_v33 = vsel %vm1327_vm7, %v2511_v57, %v9220_v13  ;;  %v2433_v63 = vld [vmem:[#allocation3 + $0x110] sm:$0x3] }
 0x28e   : > { %v1301_v37 = vrot.slane %v1142_v51, 6  ;;  %v1002_v36 = vpop.f32.mrf.mxu0  ;;  %v9230_v20 = vpop.permute.xlu0 %2765  ;;  %v3705_v51 = vsel %vm2213_vm9, %v3703_v21, %v9233_v16  ;;  %2048 = vst.msk [vmem:[#allocation3 + $0x1b8] sm:$0xff] %vm1992_vm3, %v9205_v25 }
 0x28f   : > { %2775 = vrot.lane.b32.xlu1 %v8983_v59, %s8201_s22  ;;  %2046 = vst.msk [vmem:[#allocation3 + $0x1a8] sm:$0x3] %vm1997_vm8, %v9177_v45 }
 0x290   : > { %v1759_v29 = vld.sshfl [vmem:[#allocation1] sm:$0xff pattern:$0x73625140]  ;;  %v1760_v22 = vld.sshfl [vmem:[#allocation1 + $0x8] sm:$0xff pattern:$0x73625140]  ;;  %v1485_v52 = vsel %vm1321_vm5, %v1002_v36, %v1301_v37  ;;  %v1484_v56 = vsel %vm1319_vm4, %v1002_v36, %v1301_v37  ;;  %v1487_v24 = vsel %vm1324_vm6, %v1002_v36, %v1301_v37  ;;  %v1489_v28 = vsel %vm1327_vm7, %v1301_v37, %v1002_v36 }
 0x291   : > { %1763 = vst [vmem:[#allocation1] ss:$4 sm:$0xff] %v1481_v48  ;;  %2777 = vrot.lane.b32.xlu2 %v8991_v18, %s8201_s22  ;;  %v1486_v47 = vrot.slane %v1485_v52, 2  ;;  %v9222_v55 = vpop.permute.xlu1 %2300  ;;  %v1488_v62 = vrot.slane %v1487_v24, 4  ;;  %v1490_v5 = vrot.slane %v1489_v28, 6  ;;  %v2239_v52 = vrot.slane %v2143_v9, 1 }
 0x292   : > { %1764 = vst [vmem:[#allocation1 + $0x1] ss:$4 sm:$0xff] %v1483_v38  ;;  %v2514_v24 = vrot.slane %v2433_v63, 2 }
 0x293   : > { %2049 = vst [vmem:[#allocation3 + $0x1c0] sm:$0xff] %v1759_v29  ;;  %v9226_v10 = vpop.permute.xlu2 %3307 }
 0x294   : > { %3508 = vrot.lane.b32.xlu0 %v8983_v59, %s8204_s8  ;;  %1765 = vst [vmem:[#allocation1 + $0x2] ss:$4 sm:$0xff] %v1484_v56  ;;  %v1761_v31 = vld.sshfl [vmem:[#allocation1 + $0x20] sm:$0xff pattern:$0x73625140]  ;;  %v2242_v56 = vrot.slane %v2144_v35, 1 }
 0x295   : > { %v1145_v30 = vpop.f32.mrf.mxu1  ;;  %v9228_v14 = vld.sshfl [vmem:[#allocation1 + $0x28] sm:$0xff pattern:$0x73625140]  ;;  %2051 = vst [vmem:[#allocation3 + $0x1d0] sm:$0x3] %v1761_v31 }
 0x296   : > { %v1302_v11 = vrot.slane %v1145_v30, 6  ;;  %v1005_v40 = vpop.f32.mrf.mxu0  ;;  %1766 = vst [vmem:[#allocation1 + $0x3] ss:$4 sm:$0xff] %v1486_v47  ;;  %v9255_v60 = vpop.permute.xlu0 %2574  ;;  %v2243_v25 = vsel %vm2213_vm9, %v9233_v16, %v2242_v56 }
 0x297   : > { %1767 = vst [vmem:[#allocation1 + $0x20] ss:$4 sm:$0xff] %v1488_v62  ;;  %3510 = vrot.lane.b32.xlu1 %v8991_v18, %s8204_s8  ;;  %v2241_v62 = vsel %vm2213_vm9, %v2239_v52, %v9233_v16 }
 0x298   : > { %v1492_v59 = vsel %vm1321_vm5, %v1005_v40, %v1302_v11  ;;  %v1491_v27 = vsel %vm1319_vm4, %v1005_v40, %v1302_v11  ;;  %1768 = vst [vmem:[#allocation1 + $0x21] ss:$4 sm:$0xff] %v1490_v5  ;;  %v1494_v4 = vsel %vm1324_vm6, %v1005_v40, %v1302_v11  ;;  %v1496_v48 = vsel %vm1327_vm7, %v1302_v11, %v1005_v40  ;;  %v2895_v11 = vld [vmem:[#allocation3 + $0xf0] sm:$0xfe] }
 0x299   : > { %v1493_v26 = vrot.slane %v1492_v59, 2  ;;  %1769 = vst [vmem:[#allocation1 + $0x22] ss:$4 sm:$0xff] %v1491_v27  ;;  %2586 = vrot.lane.b32.xlu2 %v2513_v33, %s8200_s21  ;;  %v9245_v36 = vpop.permute.xlu1 %3496  ;;  %v1495_v61 = vrot.slane %v1494_v4, 4  ;;  %v1497_v30 = vrot.slane %v1496_v48, 6  ;;  %v2515_v59 = vsel %vm1327_vm7, %v9220_v13, %v2514_v24  ;;  %v2101_v33 = vld [vmem:[#allocation3] sm:$0xff] }
 0x29a   : > { %2050 = vst.msk [vmem:[#allocation3 + $0x1c8] sm:$0xff] %vm1992_vm3, %v1760_v22  ;;  %v2896_v4 = vld [vmem:[#allocation3 + $0x110] sm:$0x1]  ;;  %v2971_v63 = vrot.slane %v2895_v11, 1 }
 0x29b   : > { %1770 = vst [vmem:[#allocation1 + $0x23] ss:$4 sm:$0xff] %v1493_v26  ;;  %v9249_v38 = vpop.permute.xlu2 %3500  ;;  %v2974_v52 = vrot.slane %v2896_v4, 1 }
 0x29c   : > { %3780 = vrot.lane.b32.xlu0 %v3705_v51, %s8205_s9  ;;  %2052 = vst.msk [vmem:[#allocation3 + $0x1d8] sm:$0x3] %vm1997_vm8, %v9228_v14 }
 0x29d   : > { %v1148_v37 = vpop.f32.mrf.mxu1  ;;  %v1771_v28 = vld.sshfl [vmem:[#allocation1] sm:$0xff pattern:$0x73625140]  ;;  %v1772_v8 = vld.sshfl [vmem:[#allocation1 + $0x8] sm:$0xff pattern:$0x73625140] }
 0x29e   : > { %v1303_v18 = vrot.slane %v1148_v37, 6  ;;  %v1008_v29 = vpop.f32.mrf.mxu0  ;;  %2053 = vst [vmem:[#allocation3 + $0x1e0] sm:$0xff] %v1771_v28  ;;  %v2390_v37 = vadd.f32 %v9076_v17, %v2101_v33 }
 0x29f   : > { %1775 = vst [vmem:[#allocation1] ss:$4 sm:$0xff] %v1495_v61  ;;  %2314 = vrot.lane.b32.xlu1 %v2241_v62, %s8199_s20  ;;  %v2973_v62 = vsel %vm2213_vm9, %v2971_v63, %v9233_v16 }
 0x2a0   : > { %v1499_v47 = vsel %vm1321_vm5, %v1008_v29, %v1303_v18  ;;  %2054 = vst.msk [vmem:[#allocation3 + $0x1e8] sm:$0xff] %vm1992_vm3, %v1772_v8  ;;  %v1498_v57 = vsel %vm1319_vm4, %v1008_v29, %v1303_v18  ;;  %v1501_v31 = vsel %vm1324_vm6, %v1008_v29, %v1303_v18  ;;  %v1503_v21 = vsel %vm1327_vm7, %v1303_v18, %v1008_v29  ;;  %v8109_v8 = vld [vmem:[#allocation3 + $0x10] sm:$0xff] }
 0x2a1   : > { %v1500_v5 = vrot.slane %v1499_v47, 2  ;;  %2316 = vrot.lane.b32.xlu2 %v2243_v25, %s8199_s20  ;;  %v9269_v26 = vpop.permute.xlu1 %3498  ;;  %v1502_v61 = vrot.slane %v1501_v31, 4  ;;  %v1504_v48 = vrot.slane %v1503_v21, 6  ;;  %v2662_v56 = vadd.f32 %v9102_v58, %v2390_v37  ;;  %v9284_v25 = vpop.permute.xlu0 %3037  ;;  %v2103_v58 = vld [vmem:[#allocation3 + $0x30] sm:$0xff] }
 0x2a2   : > { %v1773_v22 = vld.sshfl [vmem:[#allocation1 + $0x20] sm:$0xff pattern:$0x73625140]  ;;  %v1774_v40 = vld.sshfl [vmem:[#allocation1 + $0x28] sm:$0xff pattern:$0x73625140]  ;;  %v2391_v47 = vadd.f32 %v8109_v8, %v9132_v23  ;;  %v2975_v23 = vsel %vm2213_vm9, %v9233_v16, %v2974_v52 }
 0x2a3   : > { %1778 = vst [vmem:[#allocation1 + $0x20] ss:$4 sm:$0xff] %v1497_v30  ;;  %v9272_v9 = vpop.permute.xlu2 %3502  ;;  %v2855_v4 = vadd.f32 %v9043_v1, %v2662_v56 }
 0x2a4   : > { %2588 = vrot.lane.b32.xlu0 %v2515_v59, %s8200_s21  ;;  %2055 = vst [vmem:[#allocation3 + $0x1f0] sm:$0xff] %v1773_v22  ;;  %v2392_v22 = vadd.f32 %v9154_v50, %v2103_v58 }
 0x2a5   : > { %v1151_v27 = vpop.f32.mrf.mxu1  ;;  %1779 = vst [vmem:[#allocation1 + $0x21] ss:$4 sm:$0xff] %v1498_v57 }
 0x2a6   : > { %v1304_v51 = vrot.slane %v1151_v27, 6  ;;  %v1011_v35 = vpop.f32.mrf.mxu0  ;;  %1780 = vst [vmem:[#allocation1 + $0x22] ss:$4 sm:$0xff] %v1500_v5  ;;  %v1776_v24 = vld.sshfl [vmem:[#allocation1] sm:$0xff pattern:$0x73625140]  ;;  %v2663_v27 = vadd.f32 %v9118_v44, %v2391_v47  ;;  %v2664_v50 = vadd.f32 %v9179_v43, %v2392_v22 }
 0x2a7   : > { %v9278_v28 = vld.sshfl [vmem:[#allocation1 + $0x8] sm:$0xff pattern:$0x73625140]  ;;  %2057 = vst [vmem:[#allocation3 + $0x200] sm:$0x3] %v1776_v24  ;;  %3047 = vrot.lane.b32.xlu1 %v2973_v62, %s8202_s23 }
 0x2a8   : > { %v1506_v18 = vsel %vm1321_vm5, %v1011_v35, %v1304_v51  ;;  %v1508_v29 = vsel %vm1324_vm6, %v1011_v35, %v1304_v51  ;;  %v1505_v17 = vsel %vm1319_vm4, %v1011_v35, %v1304_v51  ;;  %v3167_v5 = vld [vmem:[#allocation3 + $0xf0] sm:$0xfc]  ;;  %1781 = vst [vmem:[#allocation1 + $0x23] ss:$4 sm:$0xff] %v1502_v61  ;;  %v1510_v57 = vsel %vm1327_vm7, %v1304_v51, %v1011_v35  ;;  %v9298_v61 = vld [vmem:[#allocation3 + $0x78] sm:$0xff] }
 0x2a9   : > { %v1507_v30 = vrot.slane %v1506_v18, 2  ;;  %v1509_v11 = vrot.slane %v1508_v29, 4  ;;  %1784 = vst [vmem:[#allocation1] ss:$4 sm:$0xff] %v1504_v48  ;;  %2779 = vrot.lane.b32.xlu2 %v9030_v3, %s8201_s22  ;;  %v3036_v59 = vpop.permute.xlu1 %3035  ;;  %v3243_v21 = vrot.slane %v3167_v5, 2  ;;  %v3127_v51 = vadd.f32 %v9165_v49, %v2855_v4 }
 0x2aa   : > { %1785 = vst [vmem:[#allocation1 + $0x1] ss:$4 sm:$0xff] %v1505_v17  ;;  %v1511_v35 = vrot.slane %v1510_v57, 6  ;;  %v3896_v48 = vld [vmem:[#allocation3 + $0x68] sm:$0xfc]  ;;  %v3993_v1 = vrot.slane %v9298_v61, 2  ;;  %v2856_v29 = vadd.f32 %v9074_v19, %v2663_v27  ;;  %v2857_v8 = vadd.f32 %v9192_v2, %v2664_v50  ;;  %v9315_v17 = vpop.permute.xlu0 %3309 }
 0x2ab   : > { %1786 = vst [vmem:[#allocation1 + $0x2] ss:$4 sm:$0xff] %v1507_v30  ;;  %v9296_v33 = vpop.permute.xlu2 %3772  ;;  %v3245_v44 = vsel %vm1327_vm7, %v3243_v21, %v9220_v13  ;;  %v3631_v18 = vld [vmem:[#allocation3 + $0x110] sm:$0x1]  ;;  %v3399_v52 = vadd.f32 %v9200_v12, %v3127_v51  ;;  %v3992_v19 = vrot.slane %v3896_v48, 2  ;;  %v8110_v21 = vld [vmem:[#allocation3 + $0x40] sm:$0xff] }
 0x2ac   : > { %3049 = vrot.lane.b32.xlu0 %v2975_v23, %s8202_s23  ;;  %1787 = vst [vmem:[#allocation1 + $0x3] ss:$4 sm:$0xff] %v1509_v11  ;;  %v2897_v47 = vld [vmem:[#allocation3 + $0x120] sm:$0xfe]  ;;  %v3706_v12 = vrot.slane %v3631_v18, 1  ;;  %v3129_v30 = vadd.f32 %v3036_v59, %v2857_v8  ;;  %v2393_v27 = vadd.f32 %v8110_v21, %v9222_v55  ;;  %v2977_v50 = vrot.slane %v9046_v53, 1 }
 0x2ad   : > { %v1154_v31 = vpop.f32.mrf.mxu1  ;;  %2056 = vst.msk [vmem:[#allocation3 + $0x1f8] sm:$0xff] %vm1992_vm3, %v1774_v40  ;;  %v3592_v40 = vadd.f32 %v9245_v36, %v3399_v52  ;;  %v3128_v36 = vadd.f32 %v9125_v41, %v2856_v29  ;;  %v2976_v41 = vrot.slane %v2897_v47, 1  ;;  %v3898_v51 = vld [vmem:[#allocation3 + $0x88] sm:$0x3]  ;;  %v9337_v18 = vld [vmem:[#allocation3 + $0x130] sm:$0xff] }
 0x2ae   : > { %v1305_v63 = vrot.slane %v1154_v31, 6  ;;  %v1014_v37 = vpop.f32.mrf.mxu0  ;;  %v3994_v31 = vsel %vm1327_vm7, %v3992_v19, %v3993_v1  ;;  %v3401_v48 = vadd.f32 %v9226_v10, %v3129_v30  ;;  %v3632_v29 = vld [vmem:[#allocation3 + $0x120] sm:$0xfe]  ;;  %2058 = vst.msk [vmem:[#allocation3 + $0x208] sm:$0x3] %vm1997_vm8, %v9278_v28 }
 0x2af   : > { %v1782_v56 = vld.sshfl [vmem:[#allocation1 + $0x20] sm:$0xff pattern:$0x73625140]  ;;  %v1783_v24 = vld.sshfl [vmem:[#allocation1 + $0x28] sm:$0xff pattern:$0x73625140]  ;;  %3319 = vrot.lane.b32.xlu1 %v3245_v44, %s8203_s29  ;;  %v3400_v52 = vadd.f32 %v9157_v34, %v3128_v36  ;;  %v2978_v34 = vsel %vm2213_vm9, %v2976_v41, %v2977_v50 }
 0x2b0   : > { %v1513_v43 = vsel %vm1321_vm5, %v1014_v37, %v1305_v63  ;;  %v1515_v49 = vsel %vm1324_vm6, %v1014_v37, %v1305_v63  ;;  %2059 = vst [vmem:[#allocation3 + $0x210] sm:$0xff] %v1782_v56  ;;  %v1512_v62 = vsel %vm1319_vm4, %v1014_v37, %v1305_v63  ;;  %v1517_v23 = vsel %vm1327_vm7, %v1305_v63, %v1014_v37  ;;  %v9333_v63 = vld [vmem:[%s11594_s2] ss:$0 sm:$0xff] }
 0x2b1   : > { %1788 = vst [vmem:[#allocation1 + $0x20] ss:$4 sm:$0xff] %v1511_v35  ;;  %3512 = vrot.lane.b32.xlu2 %v9030_v3, %s8204_s8  ;;  %v1514_v5 = vrot.slane %v1513_v43, 2  ;;  %v1516_v11 = vrot.slane %v1515_v49, 4  ;;  %v3769_v2 = vpop.permute.xlu1 %3768  ;;  %v1518_v44 = vrot.slane %v1517_v23, 6  ;;  %v3995_v43 = vrot.slane %v3898_v51, 2 }
 0x2b2   : > { %2060 = vst.msk [vmem:[#allocation3 + $0x218] sm:$0xff] %vm1992_vm3, %v1783_v24  ;;  %v3864_v59 = vadd.f32 %v3769_v2, %v3592_v40  ;;  %v3707_v24 = vsel %vm2213_vm9, %v9233_v16, %v3706_v12  ;;  %v2665_v49 = vadd.f32 %v9099_v39, %v2393_v27  ;;  %v3708_v39 = vrot.slane %v3632_v29, 1  ;;  %v3899_v2 = vld [vmem:[#allocation3 + $0x98] sm:$0xfc]  ;;  %v9359_v36 = vld [vmem:[#allocation3 + $0xa8] sm:$0xff] }
 0x2b3   : > { %v1789_v58 = vld.sshfl [vmem:[#allocation1] sm:$0xff pattern:$0x73625140]  ;;  %v1790_v3 = vld.sshfl [vmem:[#allocation1 + $0x8] sm:$0xff pattern:$0x73625140]  ;;  %v9323_v22 = vpop.permute.xlu2 %3039  ;;  %v3593_v30 = vadd.f32 %v9269_v26, %v3400_v52 }
 0x2b4   : > { %2781 = vrot.lane.b32.xlu0 %v9046_v53, %s8201_s22  ;;  %2061 = vst [vmem:[#allocation3 + $0x220] sm:$0xff] %v1789_v58  ;;  %v4104_v37 = vadd.f32 %v3994_v31, %v3864_v59  ;;  %v9355_v12 = vrot.slane %v9337_v18, 1  ;;  %v9369_v59 = vpop.permute.xlu0 %2576  ;;  %v3997_v27 = vrot.slane %v3899_v2, 2  ;;  %v3249_v29 = vrot.slane %v9046_v53, 2  ;;  %v2146_v53 = vld [vmem:[#allocation3 + $0x140] sm:$0x1] }
 0x2b5   : > { %v1157_v57 = vpop.f32.mrf.mxu1  ;;  %1793 = vst [vmem:[#allocation1] ss:$4 sm:$0xff] %v1512_v62  ;;  %v3594_v62 = vadd.f32 %v9249_v38, %v3401_v48  ;;  %v2858_v38 = vadd.f32 %v9230_v20, %v2665_v49 }
 0x2b6   : > { %v1306_v4 = vrot.slane %v1157_v57, 6  ;;  %v1017_v35 = vpop.f32.mrf.mxu0  ;;  %1794 = vst [vmem:[#allocation1 + $0x1] ss:$4 sm:$0xff] %v1514_v5  ;;  %v4140_v40 = vadd.f32 %v9333_v63, %v4104_v37  ;;  %v3710_v26 = vsel %vm2213_vm9, %v3708_v39, %v9355_v12 }
 0x2b7   : > { %1795 = vst [vmem:[#allocation1 + $0x2] ss:$4 sm:$0xff] %v1516_v11  ;;  %3782 = vrot.lane.b32.xlu1 %v3707_v24, %s8205_s9  ;;  %v3866_v41 = vadd.f32 %v9296_v33, %v3594_v62  ;;  %v3130_v20 = vadd.f32 %v9284_v25, %v2858_v38  ;;  %v3901_v38 = vld [vmem:[#allocation3 + $0xb8] sm:$0x3] }
 0x2b8   : > { %v1520_v55 = vsel %vm1321_vm5, %v1017_v35, %v1306_v4  ;;  %v1522_v56 = vsel %vm1324_vm6, %v1017_v35, %v1306_v4  ;;  %v1791_v8 = vld.sshfl [vmem:[#allocation1 + $0x20] sm:$0xff pattern:$0x73625140]  ;;  %v9344_v10 = vld.sshfl [vmem:[#allocation1 + $0x28] sm:$0xff pattern:$0x73625140]  ;;  %v1524_v19 = vsel %vm1327_vm7, %v1306_v4, %v1017_v35  ;;  %v1519_v47 = vsel %vm1319_vm4, %v1017_v35, %v1306_v4 }
 0x2b9   : > { %2063 = vst [vmem:[#allocation3 + $0x230] sm:$0x3] %v1791_v8  ;;  %v1521_v16 = vrot.slane %v1520_v55, 2  ;;  %3051 = vrot.lane.b32.xlu2 %v2978_v34, %s8202_s23  ;;  %v1523_v5 = vrot.slane %v1522_v56, 4  ;;  %v3771_v11 = vpop.permute.xlu1 %3770  ;;  %v1525_v58 = vrot.slane %v1524_v19, 6  ;;  %v9364_v57 = vmax.f32 %v4140_v40, 0.0 }
 0x2ba   : > { %1796 = vst [vmem:[#allocation1 + $0x3] ss:$4 sm:$0xff] %v1518_v44  ;;  %v3865_v31 = vadd.f32 %v3771_v11, %v3593_v30  ;;  %v3998_v4 = vrot.slane %v9359_v36, 2  ;;  %v3169_v35 = vld [vmem:[#allocation3 + $0x120] sm:$0xfc]  ;;  %v3402_v33 = vadd.f32 %v9315_v17, %v3130_v20 }
 0x2bb   : > { %2062 = vst.msk [vmem:[#allocation3 + $0x228] sm:$0xff] %vm1992_vm3, %v1790_v3  ;;  %v9362_v23 = vpop.permute.xlu2 %3311  ;;  %v3996_v3 = vsel %vm1327_vm7, %v3993_v1, %v3995_v43  ;;  %v4236_v48 = vrot.slane %v9364_v57, 2  ;;  %v4237_v61 = vrot.slane %v9364_v57, 4  ;;  %v4238_v1 = vrot.slane %v9364_v57, 6  ;;  %v3168_v20 = vld [vmem:[#allocation3 + $0x110] sm:$0x3] }
 0x2bc   : > { %1797 = vst [vmem:[#allocation1 + $0x20] ss:$4 sm:$0xff] %v1519_v47  ;;  %3784 = vrot.lane.b32.xlu0 %v3710_v26, %s8205_s9  ;;  %v4105_v37 = vadd.f32 %v3996_v3, %v3865_v31  ;;  %v3999_v25 = vsel %vm1327_vm7, %v3997_v27, %v3998_v4  ;;  %v3248_v49 = vrot.slane %v3169_v35, 2  ;;  %v7817_v42 = vrot.slane %v9364_v57, 9  ;;  %v9419_v26 = vpop.permute.xlu0 %2767 }
 0x2bd   : > { %1798 = vst [vmem:[#allocation1 + $0x21] ss:$4 sm:$0xff] %v1521_v16  ;;  %v1160_v21 = vpop.f32.mrf.mxu1  ;;  %v4106_v8 = vadd.f32 %v3999_v25, %v3866_v41  ;;  %v7818_v19 = vrot.slane %v4236_v48, 9  ;;  %v7819_v34 = vrot.slane %v4237_v61, 9  ;;  %v7820_v47 = vrot.slane %v4238_v1, 9 }
 0x2be   : > { %1799 = vst [vmem:[#allocation1 + $0x22] ss:$4 sm:$0xff] %v1523_v5  ;;  %v1307_v51 = vrot.slane %v1160_v21, 6  ;;  %v4141_v44 = vadd.f32 %v9333_v63, %v4105_v37  ;;  %v1020_v52 = vpop.f32.mrf.mxu0  ;;  %v3250_v30 = vsel %vm1327_vm7, %v3248_v49, %v3249_v29  ;;  %v3595_v62 = vadd.f32 %v9272_v9, %v3402_v33  ;;  %v2434_v33 = vld [vmem:[#allocation3 + $0x120] sm:$0xfc] }
 0x2bf   : > { %1800 = vst [vmem:[#allocation1 + $0x23] ss:$4 sm:$0xff] %v1525_v58  ;;  %v4142_v5 = vadd.f32 %v9333_v63, %v4106_v8  ;;  %v9417_v6 = vmax.f32 %v9364_v57, %v7817_v42  ;;  %v4813_v3 = vmax.f32 %v4236_v48, %v7818_v19  ;;  %v4000_v41 = vrot.slane %v3901_v38, 2 }
 0x2c0   : > { %v9389_v24 = vmax.f32 %v4141_v44, 0.0  ;;  %v9392_v43 = vsel %vm1321_vm5, %v1020_v52, %v1307_v51  ;;  %v9397_v17 = vsel %vm1324_vm6, %v1020_v52, %v1307_v51  ;;  %v9400_v40 = vsel %vm1327_vm7, %v1307_v51, %v1020_v52  ;;  %2064 = vst.msk [vmem:[#allocation3 + $0x238] sm:$0x3] %vm1997_vm8, %v9344_v10 }
 0x2c1   : > { %v1801_v55 = vld.sshfl [vmem:[#allocation1] sm:$0xff pattern:$0x73625140]  ;;  %v1802_v56 = vld.sshfl [vmem:[#allocation1 + $0x8] sm:$0xff pattern:$0x73625140]  ;;  %3323 = vrot.lane.b32.xlu2 %v3250_v30, %s8203_s29  ;;  %v9422_v9 = vsel %vm1319_vm4, %v1020_v52, %v1307_v51  ;;  %v4814_v35 = vmax.f32 %v4237_v61, %v7819_v34  ;;  %v9426_v57 = vmax.f32 %v4238_v1, %v7820_v47  ;;  %v4001_v48 = vsel %vm1327_vm7, %v3998_v4, %v4000_v41 }
 0x2c2   : > { %2065 = vst [vmem:[#allocation3 + $0x240] sm:$0xff] %v1801_v55  ;;  %v1528_v39 = vrot.slane %v9392_v43, 2  ;;  %v4239_v2 = vrot.slane %v9389_v24, 2  ;;  %v1530_v58 = vrot.slane %v9397_v17, 4  ;;  %v1532_v32 = vrot.slane %v9400_v40, 6 }
 0x2c3   : > { %2066 = vst.msk [vmem:[#allocation3 + $0x248] sm:$0xff] %vm1992_vm3, %v1802_v56  ;;  %v3775_v16 = vpop.permute.xlu2 %3774  ;;  %v7821_v27 = vrot.slane %v9389_v24, 9  ;;  %v4174_v37 = vmax.f32 %v4142_v5, 0.0  ;;  %v4240_v44 = vrot.slane %v9389_v24, 4  ;;  %v3246_v51 = vrot.slane %v3168_v20, 2 }
 0x2c4   : > { %v3867_v21 = vadd.f32 %v3775_v16, %v3595_v62  ;;  %v4241_v1 = vrot.slane %v9389_v24, 6  ;;  %v2516_v42 = vrot.slane %v2434_v33, 2  ;;  %v7822_v19 = vrot.slane %v4239_v2, 9  ;;  %v9470_v38 = vpop.permute.xlu0 %2769  ;;  %1805 = vst [vmem:[#allocation1] ss:$4 sm:$0xff] %v9422_v9 }
 0x2c5   : > { %v4242_v55 = vrot.slane %v4174_v37, 2  ;;  %v4243_v52 = vrot.slane %v4174_v37, 4  ;;  %v4244_v61 = vrot.slane %v4174_v37, 6  ;;  %v7825_v25 = vrot.slane %v4174_v37, 9  ;;  %v1163_v16 = vpop.f32.mrf.mxu1 }
 0x2c6   : > { %v1803_v11 = vld.sshfl [vmem:[#allocation1 + $0x20] sm:$0xff pattern:$0x73625140]  ;;  %v1804_v31 = vld.sshfl [vmem:[#allocation1 + $0x28] sm:$0xff pattern:$0x73625140]  ;;  %v4107_v15 = vadd.f32 %v4001_v48, %v3867_v21  ;;  %v3247_v56 = vsel %vm1327_vm7, %v9220_v13, %v3246_v51  ;;  %v9442_v54 = vmax.f32 %v9389_v24, %v7821_v27  ;;  %v9475_v51 = vpop.permute.xlu1 %2308  ;;  %v1023_v33 = vpop.f32.mrf.mxu0  ;;  %v4817_v48 = vmax.f32 %v4239_v2, %v7822_v19 }
 0x2c7   : > { %2067 = vst [vmem:[#allocation3 + $0x250] sm:$0xff] %v1803_v11  ;;  %v7826_v36 = vrot.slane %v4242_v55, 9  ;;  %v7827_v4 = vrot.slane %v4243_v52, 9  ;;  %v7828_v49 = vrot.slane %v4244_v61, 9  ;;  %3321 = vrot.lane.b32.xlu1 %v3247_v56, %s8203_s29  ;;  %v4820_v45 = vmax.f32 %v4174_v37, %v7825_v25  ;;  %v3170_v56 = vld [vmem:[#allocation3 + $0x140] sm:$0x3] }
 0x2c8   : > { %2068 = vst.msk [vmem:[#allocation3 + $0x258] sm:$0xff] %vm1992_vm3, %v1804_v31  ;;  %v4143_v8 = vadd.f32 %v9333_v63, %v4107_v15  ;;  %v2517_v13 = vrot.slane %v9337_v18, 2  ;;  %v7823_v14 = vrot.slane %v4240_v44, 9  ;;  %v7824_v5 = vrot.slane %v4241_v1, 9 }
 0x2c9   : > { %v4821_v34 = vmax.f32 %v4242_v55, %v7826_v36  ;;  %v4822_v47 = vmax.f32 %v4243_v52, %v7827_v4  ;;  %v4823_v28 = vmax.f32 %v4244_v61, %v7828_v49  ;;  %v4940_v63 = vmax.f32 %v9417_v6, %v4820_v45  ;;  %1808 = vst [vmem:[#allocation1 + $0x20] ss:$4 sm:$0xff] %v1528_v39 }
 0x2ca   : > { %v4175_v30 = vmax.f32 %v4143_v8, 0.0  ;;  %v2518_v62 = vsel %vm1327_vm7, %v2516_v42, %v2517_v13  ;;  %v9465_v31 = vrot.slane %v1163_v16, 6  ;;  %v4818_v61 = vmax.f32 %v4240_v44, %v7823_v14  ;;  %1809 = vst [vmem:[#allocation1 + $0x21] ss:$4 sm:$0xff] %v1530_v58 }
 0x2cb   : > { %v4941_v10 = vmax.f32 %v4813_v3, %v4821_v34  ;;  %v4942_v11 = vmax.f32 %v4814_v35, %v4822_v47  ;;  %2590 = vrot.lane.b32.xlu0 %v2518_v62, %s8200_s21  ;;  %v4943_v6 = vmax.f32 %v9426_v57, %v4823_v28  ;;  %v5088_v37 = vperm.slane %v4940_v63, 0  ;;  %v3442_v34 = vld [vmem:[#allocation3 + $0x150] sm:$0xff]  ;;  %1810 = vst [vmem:[#allocation1 + $0x22] ss:$4 sm:$0xff] %v1532_v32  ;;  %v2145_v28 = vld [vmem:[#allocation3 + $0x120] sm:$0xfe]  ;;  %v9513_v32 = vpop.permute.xlu2 %3504 }
 0x2cc   : > { %v4245_v21 = vrot.slane %v4175_v30, 2  ;;  %v4246_v27 = vrot.slane %v4175_v30, 4  ;;  %v4247_v41 = vrot.slane %v4175_v30, 6  ;;  %v7829_v35 = vrot.slane %v4175_v30, 9  ;;  %v9511_v40 = vpop.permute.xlu0 %2306  ;;  %v2898_v62 = vld [vmem:[#allocation3 + $0x140] sm:$0x1] }
 0x2cd   : > { %v5089_v3 = vperm.slane %v4941_v10, 0  ;;  %v5090_v20 = vperm.slane %v4942_v11, 0  ;;  %v4819_v2 = vmax.f32 %v4241_v1, %v7824_v5  ;;  %v5091_v24 = vperm.slane %v4943_v6, 0  ;;  %v1166_v47 = vpop.f32.mrf.mxu1 }
 0x2ce   : > { %v7830_v57 = vrot.slane %v4245_v21, 9  ;;  %v7831_v55 = vrot.slane %v4246_v27, 9  ;;  %v7832_v52 = vrot.slane %v4247_v41, 9  ;;  %v4824_v15 = vmax.f32 %v4175_v30, %v7829_v35  ;;  %v9518_v11 = vpop.permute.xlu1 %2578  ;;  %v1026_v6 = vpop.f32.mrf.mxu0 }
 0x2cf   : > { %v5153_v25 = vsel %vm5152_vm10, %v5089_v3, %v5088_v37  ;;  %3514 = vrot.lane.b32.xlu1 %v9337_v18, %s8204_s8  ;;  %v1533_v8 = vsel %vm1319_vm4, %v1023_v33, %v9465_v31  ;;  %v3251_v14 = vrot.slane %v3170_v56, 2  ;;  %v1309_v37 = vrot.slane %v1166_v47, 6  ;;  %v2435_v47 = vld [vmem:[#allocation3 + $0x140] sm:$0x3] }
 0x2d0   : > { %v4825_v36 = vmax.f32 %v4245_v21, %v7830_v57  ;;  %v4826_v4 = vmax.f32 %v4246_v27, %v7831_v55  ;;  %v4827_v49 = vmax.f32 %v4247_v41, %v7832_v52  ;;  %v5155_v44 = vsel %vm5154_vm11, %v5090_v20, %v5153_v25  ;;  %1811 = vst [vmem:[#allocation1 + $0x23] ss:$4 sm:$0xff] %v1533_v8  ;;  %v1806_v21 = vld.sshfl [vmem:[#allocation1] sm:$0xff pattern:$0x73625140] }
 0x2d1   : > { %v4944_v45 = vmax.f32 %v9442_v54, %v4824_v15  ;;  %v1534_v54 = vsel %vm1321_vm5, %v1023_v33, %v9465_v31  ;;  %v5157_v43 = vsel %vm5156_vm12, %v5091_v24, %v5155_v44  ;;  %v3252_v17 = vsel %vm1327_vm7, %v3249_v29, %v3251_v14  ;;  %v1807_v20 = vld.sshfl [vmem:[#allocation1 + $0x8] sm:$0xff pattern:$0x73625140]  ;;  %2069 = vst [vmem:[#allocation3 + $0x260] sm:$0x3] %v1806_v21 }
 0x2d2   : > { %v4945_v1 = vmax.f32 %v4817_v48, %v4825_v36  ;;  %v4946_v42 = vmax.f32 %v4818_v61, %v4826_v4  ;;  %v4947_v19 = vmax.f32 %v4819_v2, %v4827_v49  ;;  %3325 = vrot.lane.b32.xlu2 %v3252_v17, %s8203_s29  ;;  %v1535_v10 = vrot.slane %v1534_v54, 2  ;;  %2070 = vst.msk [vmem:[#allocation3 + $0x268] sm:$0x3] %vm1997_vm8, %v1807_v20  ;;  %v9535_v36 = vld [vmem:[#allocation3 + $0x160] sm:$0xff]  ;;  %v2147_v44 = vld [vmem:[#allocation3 + $0x150] sm:$0xfe] }
 0x2d3   : > { %v5092_v9 = vperm.slane %v4944_v45, 0  ;;  %3516 = vrot.lane.b32.xlu0 %v3442_v34, %s8204_s8  ;;  %v1536_v29 = vsel %vm1324_vm6, %v1023_v33, %v9465_v31  ;;  %v1538_v41 = vsel %vm1327_vm7, %v9465_v31, %v1023_v33  ;;  %v2244_v3 = vrot.slane %v2145_v28, 1  ;;  %v3633_v33 = vld [vmem:[#allocation3 + $0x140] sm:$0x1]  ;;  %v9539_v49 = vpop.permute.xlu2 %2310 }
 0x2d4   : > { %v5093_v39 = vperm.slane %v4945_v1, 0  ;;  %v5094_v16 = vperm.slane %v4946_v42, 0  ;;  %v5095_v63 = vperm.slane %v4947_v19, 0  ;;  %v2979_v35 = vrot.slane %v2898_v62, 1  ;;  %1814 = vst [vmem:[#allocation1] ss:$4 sm:$0xff] %v1535_v10  ;;  %v9537_v4 = vpop.permute.xlu0 %3041 }
 0x2d5   : > { %v5159_v58 = vsel %vm5158_vm13, %v5092_v9, %v5157_v43  ;;  %v1537_v48 = vrot.slane %v1536_v29, 4  ;;  %v1539_v57 = vrot.slane %v1538_v41, 6  ;;  %v1541_v52 = vsel %vm1321_vm5, %v1026_v6, %v1309_v37  ;;  %v1169_v25 = vpop.f32.mrf.mxu1  ;;  %v3634_v43 = vld [vmem:[#allocation3 + $0x150] sm:$0xfe] }
 0x2d6   : > { %v5161_v30 = vsel %vm5160_vm14, %v5093_v39, %v5159_v58  ;;  %v2980_v55 = vsel %vm2213_vm9, %v2977_v50, %v2979_v35  ;;  %v2246_v31 = vsel %vm2213_vm9, %v2244_v3, %v9355_v12  ;;  %v1540_v50 = vsel %vm1319_vm4, %v1026_v6, %v1309_v37  ;;  %v9545_v8 = vpop.permute.xlu1 %2580  ;;  %v1029_v1 = vpop.f32.mrf.mxu0 }
 0x2d7   : > { %v5163_v5 = vsel %vm5162_vm15, %v5094_v16, %v5161_v30  ;;  %3053 = vrot.lane.b32.xlu1 %v2980_v55, %s8202_s23  ;;  %v1812_v61 = vld.sshfl [vmem:[#allocation1 + $0x20] sm:$0xff pattern:$0x73625140]  ;;  %v1813_v15 = vld.sshfl [vmem:[#allocation1 + $0x28] sm:$0xff pattern:$0x73625140]  ;;  %v1543_v14 = vsel %vm1324_vm6, %v1026_v6, %v1309_v37  ;;  %v1545_v54 = vsel %vm1327_vm7, %v1309_v37, %v1026_v6 }
 0x2d8   : > { %v5165_v27 = vsel %vm5164_vm0, %v5095_v63, %v5163_v5  ;;  %1815 = vst [vmem:[#allocation1 + $0x1] ss:$4 sm:$0xff] %v1537_v48  ;;  %v1542_v56 = vrot.slane %v1541_v52, 2  ;;  %v2247_v2 = vrot.slane %v2146_v53, 1  ;;  %v3711_v24 = vrot.slane %v3633_v33, 1 }
 0x2d9   : > { %5224 = vst.msk [vmem:[#allocation4 + $0x11] sm:$0xff] %vm1992_vm3, %v5165_v27  ;;  %v9542_v45 = vrot.slane %v9535_v36, 1  ;;  %v2249_v42 = vrot.slane %v2147_v44, 1  ;;  %v1544_v39 = vrot.slane %v1543_v14, 4  ;;  %v1310_v16 = vrot.slane %v1169_v25, 6 }
 0x2da   : > { %2318 = vrot.lane.b32.xlu2 %v2246_v31, %s8199_s20  ;;  %1816 = vst [vmem:[#allocation1 + $0x2] ss:$4 sm:$0xff] %v1539_v57  ;;  %v2248_v19 = vsel %vm2213_vm9, %v9355_v12, %v2247_v2  ;;  %v3713_v58 = vrot.slane %v3634_v43, 1  ;;  %v1546_v28 = vrot.slane %v1545_v54, 6  ;;  %v2519_v63 = vrot.slane %v2435_v47, 2 }
 0x2db   : > { %2783 = vrot.lane.b32.xlu0 %v3442_v34, %s8201_s22  ;;  %2071 = vst [vmem:[#allocation3 + $0x270] sm:$0xff] %v1812_v61  ;;  %v3712_v34 = vsel %vm2213_vm9, %v9355_v12, %v3711_v24  ;;  %v2251_v9 = vsel %vm2213_vm9, %v2249_v42, %v9542_v45  ;;  %v3635_v12 = vld [vmem:[#allocation3 + $0x170] sm:$0x1]  ;;  %v9560_v10 = vpop.permute.xlu2 %3776  ;;  %v1548_v29 = vsel %vm1321_vm5, %v1029_v1, %v1310_v16  ;;  %v2436_v33 = vld [vmem:[#allocation3 + $0x150] sm:$0xfc]  ;;  %v9581_v61 = vrot.slane %v9535_v36, 2 }
 0x2dc   : > { %2072 = vst.msk [vmem:[#allocation3 + $0x278] sm:$0xff] %vm1992_vm3, %v1813_v15  ;;  %v9558_v5 = vpop.permute.xlu0 %3313  ;;  %v3715_v41 = vsel %vm2213_vm9, %v3713_v58, %v9542_v45  ;;  %v3716_v37 = vrot.slane %v3635_v12, 1  ;;  %v1550_v3 = vsel %vm1324_vm6, %v1029_v1, %v1310_v16  ;;  %v2520_v20 = vsel %vm1327_vm7, %v2517_v13, %v2519_v63  ;;  %v2437_v53 = vld [vmem:[#allocation3 + $0x170] sm:$0x3] }
 0x2dd   : > { %1817 = vst [vmem:[#allocation1 + $0x3] ss:$4 sm:$0xff] %v1540_v50  ;;  %v1172_v17 = vpop.f32.mrf.mxu1  ;;  %v1552_v48 = vsel %vm1327_vm7, %v1310_v16, %v1029_v1  ;;  %v1547_v55 = vsel %vm1319_vm4, %v1029_v1, %v1310_v16  ;;  %v1549_v52 = vrot.slane %v1548_v29, 2  ;;  %v1551_v18 = vrot.slane %v1550_v3, 4 }
 0x2de   : > { %1818 = vst [vmem:[#allocation1 + $0x20] ss:$4 sm:$0xff] %v1542_v56  ;;  %v1311_v6 = vrot.slane %v1172_v17, 6  ;;  %v9563_v21 = vpop.permute.xlu1 %2771  ;;  %v1032_v27 = vpop.f32.mrf.mxu0  ;;  %v3717_v31 = vsel %vm2213_vm9, %v9542_v45, %v3716_v37  ;;  %v1553_v25 = vrot.slane %v1552_v48, 6  ;;  %v2521_v15 = vrot.slane %v2436_v33, 2 }
 0x2df   : > { %2320 = vrot.lane.b32.xlu1 %v2248_v19, %s8199_s20  ;;  %v2524_v24 = vrot.slane %v2437_v53, 2  ;;  %v2899_v33 = vld [vmem:[#allocation3 + $0x150] sm:$0xfe] }
 0x2e0   : > { %v1555_v13 = vsel %vm1321_vm5, %v1032_v27, %v1311_v6  ;;  %v1554_v56 = vsel %vm1319_vm4, %v1032_v27, %v1311_v6  ;;  %v2523_v44 = vsel %vm1327_vm7, %v2521_v15, %v9581_v61  ;;  %v1557_v19 = vsel %vm1324_vm6, %v1032_v27, %v1311_v6 }
 0x2e1   : > { %v1556_v2 = vrot.slane %v1555_v13, 2  ;;  %v1559_v54 = vsel %vm1327_vm7, %v1311_v6, %v1032_v27  ;;  %v1558_v43 = vrot.slane %v1557_v19, 4  ;;  %v2981_v15 = vrot.slane %v2899_v33, 1  ;;  %v2105_v33 = vld [vmem:[#allocation3 + $0x60] sm:$0xff] }
 0x2e2   : > { %3786 = vrot.lane.b32.xlu2 %v3712_v34, %s8205_s9  ;;  %v1560_v17 = vrot.slane %v1559_v54, 6 }
 0x2e3   : > { %2322 = vrot.lane.b32.xlu0 %v2251_v9, %s8199_s20  ;;  %v9589_v42 = vpop.permute.xlu2 %2584  ;;  %v2525_v9 = vsel %vm1327_vm7, %v9581_v61, %v2524_v24  ;;  %v2983_v24 = vsel %vm2213_vm9, %v2981_v15, %v9542_v45 }
 0x2e4   : > { %v1819_v30 = vld.sshfl [vmem:[#allocation1] sm:$0xff pattern:$0x73625140]  ;;  %v1820_v62 = vld.sshfl [vmem:[#allocation1 + $0x8] sm:$0xff pattern:$0x73625140]  ;;  %v9587_v1 = vpop.permute.xlu0 %3506 }
 0x2e5   : > { %1823 = vst [vmem:[#allocation1] ss:$4 sm:$0xff] %v1544_v39  ;;  %v1821_v35 = vld.sshfl [vmem:[#allocation1 + $0x20] sm:$0xff pattern:$0x73625140]  ;;  %v1175_v50 = vpop.f32.mrf.mxu1 }
 0x2e6   : > { %1824 = vst [vmem:[#allocation1 + $0x1] ss:$4 sm:$0xff] %v1546_v28  ;;  %v1822_v57 = vld.sshfl [vmem:[#allocation1 + $0x28] sm:$0xff pattern:$0x73625140]  ;;  %v9593_v14 = vpop.permute.xlu1 %2773  ;;  %v1035_v34 = vpop.f32.mrf.mxu0  ;;  %v1312_v47 = vrot.slane %v1175_v50, 6 }
 0x2e7   : > { %3788 = vrot.lane.b32.xlu1 %v3715_v41, %s8205_s9  ;;  %2073 = vst [vmem:[#allocation3 + $0x280] sm:$0xff] %v1819_v30 }
 0x2e8   : > { %2074 = vst.msk [vmem:[#allocation3 + $0x288] sm:$0xff] %vm1992_vm3, %v1820_v62  ;;  %v1562_v58 = vsel %vm1321_vm5, %v1035_v34, %v1312_v47  ;;  %v1561_v30 = vsel %vm1319_vm4, %v1035_v34, %v1312_v47  ;;  %v1564_v41 = vsel %vm1324_vm6, %v1035_v34, %v1312_v47 }
 0x2e9   : > { %2075 = vst [vmem:[#allocation3 + $0x290] sm:$0x3] %v1821_v35  ;;  %v1563_v62 = vrot.slane %v1562_v58, 2 }
 0x2ea   : > { %2592 = vrot.lane.b32.xlu2 %v2520_v20, %s8200_s21  ;;  %2076 = vst.msk [vmem:[#allocation3 + $0x298] sm:$0x3] %vm1997_vm8, %v1822_v57  ;;  %v1566_v20 = vsel %vm1327_vm7, %v1312_v47, %v1035_v34 }
 0x2eb   : > { %3790 = vrot.lane.b32.xlu0 %v3717_v31, %s8205_s9  ;;  %1825 = vst [vmem:[#allocation1 + $0x2] ss:$4 sm:$0xff] %v1547_v55  ;;  %v9608_v6 = vpop.permute.xlu2 %2777  ;;  %v1567_v57 = vrot.slane %v1566_v20, 6  ;;  %v3171_v20 = vld [vmem:[#allocation3 + $0x150] sm:$0xfc] }
 0x2ec   : > { %1826 = vst [vmem:[#allocation1 + $0x3] ss:$4 sm:$0xff] %v1549_v52  ;;  %v9606_v29 = vpop.permute.xlu0 %3043 }
 0x2ed   : > { %1827 = vst [vmem:[#allocation1 + $0x20] ss:$4 sm:$0xff] %v1551_v18  ;;  %v1178_v28 = vpop.f32.mrf.mxu1 }
 0x2ee   : > { %1828 = vst [vmem:[#allocation1 + $0x21] ss:$4 sm:$0xff] %v1553_v25  ;;  %v1313_v27 = vrot.slane %v1178_v28, 6  ;;  %v9611_v37 = vpop.permute.xlu1 %2582  ;;  %v1038_v3 = vpop.f32.mrf.mxu0  ;;  %v9619_v25 = vld [vmem:[#allocation3 + $0x190] sm:$0xff] }
 0x2ef   : > { %2594 = vrot.lane.b32.xlu1 %v2523_v44, %s8200_s21  ;;  %1829 = vst [vmem:[#allocation1 + $0x22] ss:$4 sm:$0xff] %v1554_v56 }
 0x2f0   : > { %1830 = vst [vmem:[#allocation1 + $0x23] ss:$4 sm:$0xff] %v1556_v2  ;;  %v1569_v35 = vsel %vm1321_vm5, %v1038_v3, %v1313_v27  ;;  %v1571_v55 = vsel %vm1324_vm6, %v1038_v3, %v1313_v27  ;;  %v1568_v31 = vsel %vm1319_vm4, %v1038_v3, %v1313_v27  ;;  %v1573_v2 = vsel %vm1327_vm7, %v1313_v27, %v1038_v3 }
 0x2f1   : > { %v1570_v18 = vrot.slane %v1569_v35, 2  ;;  %v1572_v13 = vrot.slane %v1571_v55, 4 }
 0x2f2   : > { %3518 = vrot.lane.b32.xlu2 %v9535_v36, %s8204_s8 }
 0x2f3   : > { %2596 = vrot.lane.b32.xlu0 %v2525_v9, %s8200_s21  ;;  %v1831_v39 = vld.sshfl [vmem:[#allocation1] sm:$0xff pattern:$0x73625140]  ;;  %v1832_v16 = vld.sshfl [vmem:[#allocation1 + $0x8] sm:$0xff pattern:$0x73625140]  ;;  %v9625_v56 = vpop.permute.xlu2 %2586 }
 0x2f4   : > { %2077 = vst [vmem:[#allocation3 + $0x2a0] sm:$0xff] %v1831_v39  ;;  %v9623_v50 = vpop.permute.xlu0 %3315  ;;  %v1574_v9 = vrot.slane %v1573_v2, 6 }
 0x2f5   : > { %2078 = vst.msk [vmem:[#allocation3 + $0x2a8] sm:$0xff] %vm1992_vm3, %v1832_v16  ;;  %v1181_v53 = vpop.f32.mrf.mxu1 }
 0x2f6   : > { %1835 = vst [vmem:[#allocation1] ss:$4 sm:$0xff] %v1558_v43  ;;  %v1314_v44 = vrot.slane %v1181_v53, 6  ;;  %v9630_v19 = vpop.permute.xlu1 %3045  ;;  %v1041_v34 = vpop.f32.mrf.mxu0  ;;  %v2394_v53 = vadd.f32 %v9182_v7, %v2105_v33 }
 0x2f7   : > { %v1833_v63 = vld.sshfl [vmem:[#allocation1 + $0x20] sm:$0xff pattern:$0x73625140]  ;;  %v1834_v12 = vld.sshfl [vmem:[#allocation1 + $0x28] sm:$0xff pattern:$0x73625140]  ;;  %3055 = vrot.lane.b32.xlu1 %v2983_v24, %s8202_s23  ;;  %v1184_v43 = vpop.f32.mrf.mxu3 }
 0x2f8   : > { %1838 = vst [vmem:[#allocation1 + $0x20] ss:$4 sm:$0xff] %v1560_v17  ;;  %v1576_v39 = vsel %vm1321_vm5, %v1041_v34, %v1314_v44  ;;  %v1315_v16 = vrot.slane %v1184_v43, 6  ;;  %v1578_v17 = vsel %vm1324_vm6, %v1041_v34, %v1314_v44 }
 0x2f9   : > { %2079 = vst [vmem:[#allocation3 + $0x2b0] sm:$0xff] %v1833_v63  ;;  %v1577_v58 = vrot.slane %v1576_v39, 2  ;;  %v2900_v39 = vld [vmem:[#allocation3 + $0x170] sm:$0x1] }
 0x2fa   : > { %2785 = vrot.lane.b32.xlu2 %v9535_v36, %s8201_s22  ;;  %2080 = vst.msk [vmem:[#allocation3 + $0x2b8] sm:$0xff] %vm1992_vm3, %v1834_v12  ;;  %v1565_v36 = vrot.slane %v1564_v41, 4  ;;  %v1044_v12 = vpop.f32.mrf.mxu2  ;;  %v2148_v41 = vld [vmem:[#allocation3 + $0x170] sm:$0x1] }
 0x2fb   : > { %1839 = vst [vmem:[#allocation1 + $0x21] ss:$4 sm:$0xff] %v1561_v30  ;;  %2789 = vrot.lane.b32.xlu0 %v9619_v25, %s8201_s22  ;;  %v1575_v30 = vsel %vm1319_vm4, %v1041_v34, %v1314_v44  ;;  %v9641_v3 = vpop.permute.xlu2 %2316  ;;  %v2252_v35 = vrot.slane %v2148_v41, 1  ;;  %v1585_v55 = vsel %vm1324_vm6, %v1044_v12, %v1315_v16 }
 0x2fc   : > { %1840 = vst [vmem:[#allocation1 + $0x22] ss:$4 sm:$0xff] %v1563_v62  ;;  %v1579_v62 = vrot.slane %v1578_v17, 4  ;;  %v9639_v27 = vpop.permute.xlu0 %2312  ;;  %v3172_v17 = vld [vmem:[#allocation3 + $0x170] sm:$0x3] }
 0x2fd   : > { %v1836_v48 = vld.sshfl [vmem:[#allocation1] sm:$0xff pattern:$0x73625140]  ;;  %v1837_v52 = vld.sshfl [vmem:[#allocation1 + $0x8] sm:$0xff pattern:$0x73625140] }
 0x2fe   : > { %2081 = vst [vmem:[#allocation3 + $0x2c0] sm:$0x3] %v1836_v48  ;;  %v3253_v48 = vrot.slane %v3171_v20, 2 }
 0x2ff   : > { %2082 = vst.msk [vmem:[#allocation3 + $0x2c8] sm:$0x3] %vm1997_vm8, %v1837_v52  ;;  %v1587_v52 = vsel %vm1327_vm7, %v1315_v16, %v1044_v12 }
 0x300   : > { %1841 = vst [vmem:[#allocation1 + $0x23] ss:$4 sm:$0xff] %v1565_v36  ;;  %v1583_v36 = vsel %vm1321_vm5, %v1044_v12, %v1315_v16 }
 0x301   : > { %1844 = vst [vmem:[#allocation1] ss:$4 sm:$0xff] %v1567_v57  ;;  %v9645_v57 = vpop.permute.xlu1 %3317  ;;  %v1584_v15 = vrot.slane %v1583_v36, 2 }
 0x302   : > { %1845 = vst [vmem:[#allocation1 + $0x1] ss:$4 sm:$0xff] %v1568_v31  ;;  %v1580_v31 = vsel %vm1327_vm7, %v1314_v44, %v1041_v34  ;;  %v1582_v44 = vsel %vm1319_vm4, %v1044_v12, %v1315_v16  ;;  %v1187_v34 = vpop.f32.mrf.mxu3  ;;  %v3256_v16 = vrot.slane %v3172_v17, 2  ;;  %v2149_v12 = vld [vmem:[#allocation3 + $0x180] sm:$0xfe]  ;;  %v1047_v20 = vpop.f32.mrf.mxu2 }
 0x303   : > { %1846 = vst [vmem:[#allocation1 + $0x2] ss:$4 sm:$0xff] %v1570_v18  ;;  %3522 = vrot.lane.b32.xlu0 %v9619_v25, %s8204_s8  ;;  %v2253_v18 = vsel %vm2213_vm9, %v9542_v45, %v2252_v35  ;;  %v1581_v43 = vrot.slane %v1580_v31, 6  ;;  %v2107_v35 = vld [vmem:[#allocation3 + $0x90] sm:$0xff] }
 0x304   : > { %1847 = vst [vmem:[#allocation1 + $0x3] ss:$4 sm:$0xff] %v1572_v13  ;;  %v3255_v13 = vsel %vm1327_vm7, %v3253_v48, %v9581_v61  ;;  %2324 = vrot.lane.b32.xlu2 %v2253_v18, %s8199_s20  ;;  %v9663_v7 = vpop.permute.xlu0 %3778  ;;  %v3257_v36 = vsel %vm1327_vm7, %v9581_v61, %v3256_v16  ;;  %v1316_v48 = vrot.slane %v1187_v34, 6 }
 0x305   : > { %3327 = vrot.lane.b32.xlu1 %v3255_v13, %s8203_s29  ;;  %v9685_v13 = vld [vmem:[#allocation3 + $0xd8] sm:$0xff] }
 0x306   : > { %v1594_v16 = vsel %vm1327_vm7, %v1316_v48, %v1047_v20 }
 0x307   : > { %v1842_v54 = vld.sshfl [vmem:[#allocation1 + $0x20] sm:$0xff pattern:$0x73625140]  ;;  %v1843_v47 = vld.sshfl [vmem:[#allocation1 + $0x28] sm:$0xff pattern:$0x73625140] }
 0x308   : > { %2083 = vst [vmem:[#allocation3 + $0x2d0] sm:$0xff] %v1842_v54  ;;  %v1588_v54 = vrot.slane %v1587_v52, 6  ;;  %v9679_v52 = vld [vmem:[#allocation3 + $0xc8] sm:$0xfc] }
 0x309   : > { %2084 = vst.msk [vmem:[#allocation3 + $0x2d8] sm:$0xff] %vm1992_vm3, %v1843_v47  ;;  %v9659_v47 = vrot.slane %v9619_v25, 1  ;;  %v4002_v33 = vrot.slane %v9679_v52, 2 }
 0x30a   : > { %1848 = vst [vmem:[#allocation1 + $0x20] ss:$4 sm:$0xff] %v1574_v9  ;;  %v1586_v9 = vrot.slane %v1585_v55, 4  ;;  %v1190_v31 = vpop.f32.mrf.mxu3 }
 0x30b   : > { %v1849_v28 = vld.sshfl [vmem:[#allocation1] sm:$0xff pattern:$0x73625140]  ;;  %v1850_v63 = vld.sshfl [vmem:[#allocation1 + $0x8] sm:$0xff pattern:$0x73625140] }
 0x30c   : > { %2085 = vst [vmem:[#allocation3 + $0x2e0] sm:$0xff] %v1849_v28  ;;  %v2984_v28 = vrot.slane %v2900_v39, 1 }
 0x30d   : > { %2086 = vst.msk [vmem:[#allocation3 + $0x2e8] sm:$0xff] %vm1992_vm3, %v1850_v63  ;;  %v9665_v63 = vpop.permute.xlu2 %2779  ;;  %3329 = vrot.lane.b32.xlu1 %v3257_v36, %s8203_s29  ;;  %v1050_v36 = vpop.f32.mrf.mxu2 }
 0x30e   : > { %1853 = vst [vmem:[#allocation1] ss:$4 sm:$0xff] %v1575_v30  ;;  %v9667_v30 = vpop.permute.xlu1 %2775 }
 0x30f   : > { %1854 = vst [vmem:[#allocation1 + $0x1] ss:$4 sm:$0xff] %v1577_v58  ;;  %v2666_v58 = vadd.f32 %v9255_v60, %v2394_v53  ;;  %v2985_v60 = vsel %vm2213_vm9, %v9542_v45, %v2984_v28  ;;  %v3509_v53 = vpop.permute.xlu0 %3508 }
 0x310   : > { %1855 = vst [vmem:[#allocation1 + $0x2] ss:$4 sm:$0xff] %v1579_v62  ;;  %v2254_v62 = vrot.slane %v2149_v12, 1  ;;  %3057 = vrot.lane.b32.xlu2 %v2985_v60, %s8202_s23  ;;  %v2709_v12 = vld [vmem:[#allocation3 + $0x180] sm:$0xff]  ;;  %v1317_v60 = vrot.slane %v1190_v31, 6  ;;  %v5302_v31 = vld [vmem:[%s11595_s3] sm:$0xff] }
 0x311   : > { %v1851_v2 = vld.sshfl [vmem:[#allocation1 + $0x20] sm:$0xff pattern:$0x73625140]  ;;  %v1852_v24 = vld.sshfl [vmem:[#allocation1 + $0x28] sm:$0xff pattern:$0x73625140]  ;;  %v2859_v41 = vadd.f32 %v9419_v26, %v2666_v58  ;;  %v2396_v26 = vadd.f32 %v9511_v40, %v2107_v35  ;;  %v1592_v58 = vsel %vm1324_vm6, %v1047_v20, %v1316_v48 }
 0x312   : > { %2087 = vst [vmem:[#allocation3 + $0x2f0] sm:$0x3] %v1851_v2  ;;  %v2256_v55 = vsel %vm2213_vm9, %v2254_v62, %v9659_v47  ;;  %v8111_v40 = vld [vmem:[#allocation3 + $0x70] sm:$0xff] }
 0x313   : > { %2088 = vst.msk [vmem:[#allocation3 + $0x2f8] sm:$0x3] %vm1997_vm8, %v1852_v24  ;;  %2326 = vrot.lane.b32.xlu0 %v2256_v55, %s8199_s20  ;;  %v3131_v45 = vadd.f32 %v9323_v22, %v2859_v41  ;;  %v2668_v61 = vadd.f32 %v9518_v11, %v2396_v26  ;;  %v2395_v24 = vadd.f32 %v8111_v40, %v9207_v46  ;;  %v9694_v22 = vrot.slane %v9619_v25, 2  ;;  %v2901_v11 = vld [vmem:[#allocation3 + $0x180] sm:$0xfe] }
 0x314   : > { %1857 = vst [vmem:[#allocation1 + $0x20] ss:$4 sm:$0xff] %v1582_v44  ;;  %v2986_v35 = vrot.slane %v2901_v11, 1  ;;  %v1593_v55 = vrot.slane %v1592_v58, 4  ;;  %v1596_v11 = vsel %vm1319_vm4, %v1050_v36, %v1317_v60 }
 0x315   : > { %1858 = vst [vmem:[#allocation1 + $0x21] ss:$4 sm:$0xff] %v1584_v15  ;;  %v3403_v18 = vadd.f32 %v9362_v23, %v3131_v45  ;;  %v1590_v15 = vsel %vm1321_vm5, %v1047_v20, %v1316_v48  ;;  %v9689_v2 = vpop.permute.xlu2 %3512  ;;  %v2861_v44 = vadd.f32 %v9563_v21, %v2668_v61  ;;  %v2438_v23 = vld [vmem:[#allocation3 + $0x180] sm:$0xfc]  ;;  %v2667_v46 = vadd.f32 %v9369_v59, %v2395_v24 }
 0x316   : > { %1859 = vst [vmem:[#allocation1 + $0x22] ss:$4 sm:$0xff] %v1586_v9  ;;  %v9696_v34 = vpop.permute.xlu1 %3510  ;;  %v3905_v9 = vld [vmem:[#allocation3 + $0xf8] sm:$0xfc]  ;;  %v1591_v28 = vrot.slane %v1590_v15, 2  ;;  %2787 = vrot.lane.b32.xlu1 %v2709_v12, %s8201_s22  ;;  %v4003_v59 = vrot.slane %v9685_v13, 2 }
 0x317   : > { %1860 = vst [vmem:[#allocation1 + $0x23] ss:$4 sm:$0xff] %v1588_v54  ;;  %v9698_v54 = vld [vmem:[#allocation3 + $0x108] sm:$0xff]  ;;  %v3133_v21 = vadd.f32 %v9606_v29, %v2861_v44  ;;  %v2526_v26 = vrot.slane %v2438_v23, 2  ;;  %v1595_v45 = vrot.slane %v1594_v16, 6  ;;  %v5303_v44 = vld [vmem:[%s11595_s3 + $0x8] sm:$0xff]  ;;  %v3781_v23 = vpop.permute.xlu0 %3780  ;;  %v1599_v16 = vsel %vm1324_vm6, %v1050_v36, %v1317_v60 }
 0x318   : > { %1856 = vst [vmem:[#allocation1 + $0x3] ss:$4 sm:$0xff] %v1581_v43  ;;  %v3596_v43 = vadd.f32 %v9513_v32, %v3403_v18  ;;  %v1589_v32 = vsel %vm1319_vm4, %v1047_v20, %v1316_v48  ;;  %v2988_v20 = vsel %vm2213_vm9, %v2986_v35, %v9659_v47  ;;  %v4007_v48 = vrot.slane %v3905_v9, 2  ;;  %v3173_v24 = vld [vmem:[#allocation3 + $0x180] sm:$0xfc] }
 0x319   : > { %v3405_v29 = vadd.f32 %v9623_v50, %v3133_v21  ;;  %v4008_v61 = vrot.slane %v9698_v54, 2  ;;  %v5306_v50 = vld [vmem:[%s11595_s3 + $0x20] sm:$0xff]  ;;  %v2860_v18 = vadd.f32 %v9470_v38, %v2667_v46  ;;  %3059 = vrot.lane.b32.xlu2 %v2988_v20, %s8202_s23  ;;  %v2528_v40 = vsel %vm1327_vm7, %v2526_v26, %v9694_v22  ;;  %v1193_v21 = vpop.f32.mrf.mxu3  ;;  %v1053_v20 = vpop.f32.mrf.mxu2  ;;  %v8113_v13 = vld [vmem:[#allocation3 + $0xa0] sm:$0xff] }
 0x31a   : > { %v3868_v62 = vadd.f32 %v9560_v10, %v3596_v43  ;;  %v5305_v10 = vld [vmem:[%s11595_s3 + $0x18] sm:$0xff]  ;;  %5474 = vmatpush.msrb.mxu3 %v5306_v50  ;;  %v4004_v43 = vsel %vm1327_vm7, %v4002_v33, %v4003_v59  ;;  %v1597_v46 = vsel %vm1321_vm5, %v1050_v36, %v1317_v60  ;;  %v1318_v35 = vrot.slane %v1193_v21, 6 }
 0x31b   : > { %5418 = vmatpush.msrb.mxu2 %v5305_v10  ;;  %v3598_v15 = vadd.f32 %v3509_v53, %v3405_v29  ;;  %2598 = vrot.lane.b32.xlu0 %v2528_v40, %s8200_s21  ;;  %v3636_v53 = vld [vmem:[#allocation3 + $0x180] sm:$0xfe]  ;;  %v3132_v9 = vadd.f32 %v9537_v4, %v2860_v18  ;;  %v4009_v4 = vsel %vm1327_vm7, %v4007_v48, %v4008_v61  ;;  %v9754_v29 = vld [vmem:[%s11594_s2] ss:$0 sm:$0xff]  ;;  %v2902_v40 = vld [vmem:[#allocation3 + $0x1a0] sm:$0x1] }
 0x31c   : > { %5475 = vmatpush.msrb.mxu3 %v5303_v44  ;;  %v4108_v58 = vadd.f32 %v4004_v43, %v3868_v62  ;;  %v3718_v52 = vrot.slane %v3636_v53, 1  ;;  %v1598_v62 = vrot.slane %v1597_v46, 2  ;;  %v3174_v50 = vld [vmem:[#allocation3 + $0x1a0] sm:$0x3]  ;;  %v2989_v43 = vrot.slane %v2902_v40, 1 }
 0x31d   : > { %v9733_v38 = vpop.permute.xlu2 %3051  ;;  %5419 = vmatpush.msrb.mxu2 %v5302_v31  ;;  %v3404_v33 = vadd.f32 %v9558_v5, %v3132_v9  ;;  %v3261_v53 = vrot.slane %v3174_v50, 2  ;;  %v9781_v9 = vld [vmem:[#allocation3 + $0x1c0] sm:$0xff]  ;;  %v1603_v46 = vsel %vm1319_vm4, %v1053_v20, %v1318_v35 }
 0x31e   : > { %v1863_v39 = vld.sshfl [vmem:[#allocation1 + $0x20] sm:$0xff pattern:$0x73625140]  ;;  %v1864_v17 = vld.sshfl [vmem:[#allocation1 + $0x28] sm:$0xff pattern:$0x73625140]  ;;  %3520 = vrot.lane.b32.xlu1 %v2709_v12, %s8204_s8  ;;  %v4144_v26 = vadd.f32 %v9754_v29, %v4108_v58  ;;  %v3720_v48 = vsel %vm2213_vm9, %v3718_v52, %v9659_v47 }
 0x31f   : > { %2091 = vst [vmem:[#allocation3 + $0x310] sm:$0xff] %v1863_v39  ;;  %v1861_v25 = vld.sshfl [vmem:[#allocation1] sm:$0xff pattern:$0x73625140]  ;;  %v3870_v39 = vadd.f32 %v3781_v23, %v3598_v15  ;;  %v3597_v5 = vadd.f32 %v9587_v1, %v3404_v33  ;;  %v9767_v18 = vpop.permute.xlu0 %2588  ;;  %v3262_v33 = vsel %vm1327_vm7, %v9694_v22, %v3261_v53 }
 0x320   : > { %2092 = vst.msk [vmem:[#allocation3 + $0x318] sm:$0xff] %vm1992_vm3, %v1864_v17  ;;  %v1862_v41 = vld.sshfl [vmem:[#allocation1 + $0x8] sm:$0xff pattern:$0x73625140]  ;;  %v9741_v17 = vpop.permute.xlu1 %2314  ;;  %v9776_v23 = vmax.f32 %v4144_v26, 0.0 }
 0x321   : > { %2089 = vst [vmem:[#allocation3 + $0x300] sm:$0xff] %v1861_v25  ;;  %v3258_v25 = vrot.slane %v3173_v24, 2  ;;  %v3869_v1 = vadd.f32 %v9663_v7, %v3597_v5  ;;  %v1604_v24 = vsel %vm1321_vm5, %v1053_v20, %v1318_v35  ;;  %v2150_v26 = vld [vmem:[#allocation3 + $0x1a0] sm:$0x1] }
 0x322   : > { %2090 = vst.msk [vmem:[#allocation3 + $0x308] sm:$0xff] %vm1992_vm3, %v1862_v41  ;;  %v3904_v41 = vld [vmem:[#allocation3 + $0xe8] sm:$0x3]  ;;  %v1605_v21 = vrot.slane %v1604_v24, 2  ;;  %v4248_v52 = vrot.slane %v9776_v23, 2  ;;  %v9807_v20 = vld [vmem:[#allocation4] sm:$0xff] }
 0x323   : > { %1865 = vst [vmem:[#allocation1] ss:$4 sm:$0xff] %v1589_v32  ;;  %v1601_v32 = vsel %vm1327_vm7, %v1317_v60, %v1050_v36  ;;  %v3260_v12 = vsel %vm1327_vm7, %v3258_v25, %v9694_v22  ;;  %v1600_v60 = vrot.slane %v1599_v16, 4  ;;  %v4005_v36 = vrot.slane %v3904_v41, 2  ;;  %3792 = vrot.lane.b32.xlu0 %v3720_v48, %s8205_s9 }
 0x324   : > { %1868 = vst [vmem:[#allocation1 + $0x20] ss:$4 sm:$0xff] %v1591_v28  ;;  %v4110_v28 = vadd.f32 %v4009_v4, %v3870_v39  ;;  %3331 = vrot.lane.b32.xlu2 %v3260_v12, %s8203_s29  ;;  %v1602_v31 = vrot.slane %v1601_v32, 6  ;;  %v4249_v16 = vrot.slane %v9776_v23, 4  ;;  %v2990_v41 = vsel %vm2213_vm9, %v9659_v47, %v2989_v43 }
 0x325   : > { %1869 = vst [vmem:[#allocation1 + $0x21] ss:$4 sm:$0xff] %v1593_v55  ;;  %v9769_v15 = vpop.permute.xlu2 %3323  ;;  %v4006_v7 = vsel %vm1327_vm7, %v4003_v59, %v4005_v36  ;;  %v2397_v59 = vadd.f32 %v8113_v13, %v9475_v51  ;;  %v7834_v36 = vrot.slane %v4248_v52, 9  ;;  %v2257_v24 = vrot.slane %v2150_v26, 1 }
 0x326   : > { %1870 = vst [vmem:[#allocation1 + $0x22] ss:$4 sm:$0xff] %v1595_v45  ;;  %v4146_v55 = vadd.f32 %v9754_v29, %v4110_v28  ;;  %v4109_v58 = vadd.f32 %v4006_v7, %v3869_v1  ;;  %3526 = vrot.lane.b32.xlu1 %v9781_v9, %s8204_s8  ;;  %v9787_v28 = vld [vmem:[#allocation4 + $0x10] sm:$0xff]  ;;  %v7835_v1 = vrot.slane %v4249_v16, 9  ;;  %v5272_v43 = vrot.slane %v9807_v20, 2 }
 0x327   : > { %1871 = vst [vmem:[#allocation1 + $0x23] ss:$4 sm:$0xff] %v1596_v11  ;;  %v2669_v32 = vadd.f32 %v9545_v8, %v2397_v59  ;;  %v9801_v35 = vpop.permute.xlu0 %3049  ;;  %v5275_v5 = vrot.slane %v9787_v28, 2  ;;  %v3907_v8 = vld [vmem:[#allocation3 + $0x118] sm:$0x3]  ;;  %v9825_v13 = vrot.slane %v9781_v9, 1  ;;  %v2258_v26 = vsel %vm2213_vm9, %v9659_v47, %v2257_v24 }
 0x328   : > { %v9772_v44 = vmax.f32 %v4146_v55, 0.0  ;;  %v9774_v11 = vpop.permute.xlu1 %3047  ;;  %v4145_v51 = vadd.f32 %v9754_v29, %v4109_v58  ;;  %v2109_v58 = vld [vmem:[#allocation3 + $0xc0] sm:$0xff] }
 0x329   : > { %v2862_v48 = vadd.f32 %v9593_v14, %v2669_v32  ;;  %v4010_v14 = vrot.slane %v3907_v8, 2  ;;  %v2398_v59 = vadd.f32 %v9539_v49, %v2109_v58  ;;  %v5274_v8 = vrot.slane %v9807_v20, 6 }
 0x32a   : > { %v1866_v10 = vld.sshfl [vmem:[#allocation1] sm:$0xff pattern:$0x73625140]  ;;  %v1867_v45 = vld.sshfl [vmem:[#allocation1 + $0x8] sm:$0xff pattern:$0x73625140] }
 0x32b   : > { %2093 = vst [vmem:[#allocation3 + $0x320] sm:$0x3] %v1866_v10  ;;  %v4254_v25 = vrot.slane %v9772_v44, 2  ;;  %3061 = vrot.lane.b32.xlu0 %v2990_v41, %s8202_s23  ;;  %v4255_v10 = vrot.slane %v9772_v44, 4  ;;  %v7841_v40 = vrot.slane %v9772_v44, 9  ;;  %v3134_v53 = vadd.f32 %v9630_v19, %v2862_v48 }
 0x32c   : > { %2094 = vst.msk [vmem:[#allocation3 + $0x328] sm:$0x3] %vm1997_vm8, %v1867_v45  ;;  %3333 = vrot.lane.b32.xlu2 %v3262_v33, %s8203_s29  ;;  %v9818_v7 = vmax.f32 %v4145_v51, 0.0  ;;  %v4829_v19 = vmax.f32 %v4248_v52, %v7834_v36  ;;  %v4256_v51 = vrot.slane %v9772_v44, 6  ;;  %v5276_v52 = vrot.slane %v9787_v28, 4 }
 0x32d   : > { %1874 = vst [vmem:[#allocation1] ss:$4 sm:$0xff] %v1598_v62  ;;  %v2439_v62 = vld [vmem:[#allocation3 + $0x1a0] sm:$0x3]  ;;  %v9803_v55 = vpop.permute.xlu2 %3325  ;;  %v7842_v45 = vrot.slane %v4254_v25, 9  ;;  %v3406_v33 = vadd.f32 %v9645_v57, %v3134_v53 }
 0x32e   : > { %1875 = vst [vmem:[#allocation1 + $0x1] ss:$4 sm:$0xff] %v1600_v60  ;;  %v1872_v39 = vld.sshfl [vmem:[#allocation1 + $0x20] sm:$0xff pattern:$0x73625140]  ;;  %v4250_v60 = vrot.slane %v9776_v23, 6  ;;  %2793 = vrot.lane.b32.xlu1 %v9781_v9, %s8201_s22 }
 0x32f   : > { %1876 = vst [vmem:[#allocation1 + $0x2] ss:$4 sm:$0xff] %v1602_v31  ;;  %v1873_v4 = vld.sshfl [vmem:[#allocation1 + $0x28] sm:$0xff pattern:$0x73625140]  ;;  %v2529_v50 = vrot.slane %v2439_v62, 2 }
 0x330   : > { %2095 = vst [vmem:[#allocation3 + $0x330] sm:$0xff] %v1872_v39  ;;  %v9809_v12 = vpop.permute.xlu1 %3319  ;;  %v7833_v31 = vrot.slane %v9776_v23, 9  ;;  %v2151_v39 = vld [vmem:[#allocation3 + $0x1b0] sm:$0xfe]  ;;  %v7836_v57 = vrot.slane %v4250_v60, 9 }
 0x331   : > { %2096 = vst.msk [vmem:[#allocation3 + $0x338] sm:$0xff] %vm1992_vm3, %v1873_v4  ;;  %v5273_v4 = vrot.slane %v9807_v20, 4  ;;  %v2530_v32 = vsel %vm1327_vm7, %v9694_v22, %v2529_v50  ;;  %v2259_v49 = vrot.slane %v2151_v39, 1  ;;  %v3599_v22 = vadd.f32 %v9696_v34, %v3406_v33  ;;  %v5233_v36 = vld [vmem:[#allocation4 + $0x8] sm:$0x3] }
 0x332   : > { %1877 = vst [vmem:[#allocation1 + $0x3] ss:$4 sm:$0xff] %v1603_v46  ;;  %v7843_v46 = vrot.slane %v4255_v10, 9  ;;  %v4828_v50 = vmax.f32 %v9776_v23, %v7833_v31  ;;  %v4830_v34 = vmax.f32 %v4249_v16, %v7835_v1  ;;  %v4252_v31 = vrot.slane %v9818_v7, 4 }
 0x333   : > { %1878 = vst [vmem:[#allocation1 + $0x20] ss:$4 sm:$0xff] %v1605_v21  ;;  %v4837_v21 = vmax.f32 %v4254_v25, %v7842_v45  ;;  %v4836_v25 = vmax.f32 %v9772_v44, %v7841_v40  ;;  %v3637_v45 = vld [vmem:[#allocation3 + $0x1a0] sm:$0x1]  ;;  %2328 = vrot.lane.b32.xlu0 %v2258_v26, %s8199_s20  ;;  %v9843_v44 = vpop.permute.xlu0 %2781  ;;  %v4251_v40 = vrot.slane %v9818_v7, 2  ;;  %v7844_v26 = vrot.slane %v4256_v51, 9 }
 0x334   : > { %2600 = vrot.lane.b32.xlu2 %v2530_v32, %s8200_s21  ;;  %v4838_v24 = vmax.f32 %v4255_v10, %v7843_v46  ;;  %v5277_v46 = vrot.slane %v9787_v28, 6  ;;  %v4253_v16 = vrot.slane %v9818_v7, 6  ;;  %v7837_v1 = vrot.slane %v9818_v7, 9 }
 0x335   : > { %v9845_v48 = vpop.permute.xlu2 %2318  ;;  %v4949_v53 = vmax.f32 %v4829_v19, %v4837_v21  ;;  %v4948_v10 = vmax.f32 %v4828_v50, %v4836_v25  ;;  %v8114_v19 = vld [vmem:[#allocation3 + $0xd0] sm:$0xff]  ;;  %v4839_v23 = vmax.f32 %v4256_v51, %v7844_v26 }
 0x336   : > { %v2399_v25 = vadd.f32 %v8114_v19, %v9639_v27  ;;  %v4832_v27 = vmax.f32 %v9818_v7, %v7837_v1  ;;  %v2441_v26 = vld [vmem:[#allocation3 + $0x1d0] sm:$0x3] }
 0x337   : > { %v5097_v21 = vperm.slane %v4949_v53, 0  ;;  %v3638_v19 = vld [vmem:[#allocation3 + $0x1b0] sm:$0xfe] }
 0x338   : > { %v3783_v58 = vpop.permute.xlu1 %3782 }
 0x339   : > { %v1879_v41 = vld.sshfl [vmem:[#allocation1] sm:$0xff pattern:$0x73625140]  ;;  %v1880_v62 = vld.sshfl [vmem:[#allocation1 + $0x8] sm:$0xff pattern:$0x73625140]  ;;  %v3871_v32 = vadd.f32 %v3783_v58, %v3599_v22 }
 0x33a   : > { %2097 = vst [vmem:[#allocation3 + $0x340] sm:$0xff] %v1879_v41  ;;  %v1881_v39 = vld.sshfl [vmem:[#allocation1 + $0x20] sm:$0xff pattern:$0x73625140]  ;;  %v3721_v41 = vrot.slane %v3637_v45, 1  ;;  %v7839_v22 = vrot.slane %v4252_v31, 9 }
 0x33b   : > { %2098 = vst.msk [vmem:[#allocation3 + $0x348] sm:$0xff] %vm1992_vm3, %v1880_v62  ;;  %v1882_v33 = vld.sshfl [vmem:[#allocation1 + $0x28] sm:$0xff pattern:$0x73625140]  ;;  %v4011_v62 = vsel %vm1327_vm7, %v4008_v61, %v4010_v14  ;;  %v9864_v61 = vmax.f32 %v4250_v60, %v7836_v57  ;;  %v4950_v14 = vmax.f32 %v4830_v34, %v4838_v24  ;;  %v5096_v60 = vperm.slane %v4948_v10, 0 }
 0x33c   : > { %5308 = vst [vmem:[#allocation1] ss:$4 sm:$0xff] %v9807_v20  ;;  %v2261_v20 = vsel %vm2213_vm9, %v2259_v49, %v9825_v13  ;;  %v4111_v54 = vadd.f32 %v4011_v62, %v3871_v32  ;;  %v3722_v45 = vsel %vm2213_vm9, %v9659_v47, %v3721_v41  ;;  %v9875_v57 = vrot.slane %v9781_v9, 2  ;;  %v2440_v24 = vld [vmem:[#allocation3 + $0x1b0] sm:$0xfc] }
 0x33d   : > { %5310 = vst [vmem:[#allocation1 + $0x1] ss:$4 sm:$0xff] %v5272_v43  ;;  %2330 = vrot.lane.b32.xlu1 %v2261_v20, %s8199_s20  ;;  %v7838_v43 = vrot.slane %v4251_v40, 9  ;;  %3794 = vrot.lane.b32.xlu2 %v3722_v45, %s8205_s9  ;;  %v9882_v51 = vpop.permute.xlu2 %3786  ;;  %v5235_v58 = vld [vmem:[#allocation4 + $0x18] sm:$0x3]  ;;  %v4834_v41 = vmax.f32 %v4252_v31, %v7839_v22  ;;  %v4951_v62 = vmax.f32 %v9864_v61, %v4839_v23  ;;  %v2534_v22 = vrot.slane %v2441_v26, 2 }
 0x33e   : > { %5312 = vst [vmem:[#allocation1 + $0x2] ss:$4 sm:$0xff] %v5273_v4  ;;  %v2670_v4 = vadd.f32 %v9611_v37, %v2398_v59  ;;  %v4147_v49 = vadd.f32 %v9754_v29, %v4111_v54  ;;  %v7840_v37 = vrot.slane %v4253_v16, 9  ;;  %v2671_v45 = vadd.f32 %v9589_v42, %v2399_v25  ;;  %v2903_v26 = vld [vmem:[#allocation3 + $0x1b0] sm:$0xfe] }
 0x33f   : > { %5314 = vst [vmem:[#allocation1 + $0x3] ss:$4 sm:$0xff] %v5274_v8  ;;  %v3175_v8 = vld [vmem:[#allocation3 + $0x1b0] sm:$0xfc]  ;;  %v4833_v50 = vmax.f32 %v4251_v40, %v7838_v43 }
 0x340   : > { %5316 = vst [vmem:[#allocation1 + $0x20] ss:$4 sm:$0xff] %v5233_v36  ;;  %v2863_v59 = vadd.f32 %v9667_v30, %v2670_v4  ;;  %v4179_v47 = vmax.f32 %v4147_v49, 0.0  ;;  %v9880_v36 = vpop.permute.xlu0 %3784  ;;  %v3263_v9 = vrot.slane %v3175_v8, 2  ;;  %v9885_v53 = vpop.permute.xlu1 %3321  ;;  %v4835_v1 = vmax.f32 %v4253_v16, %v7840_v37  ;;  %v3446_v4 = vld [vmem:[#allocation3 + $0x1b0] sm:$0xff] }
 0x341   : > { %5318 = vst [vmem:[#allocation1 + $0x21] ss:$4 sm:$0xff] %v9787_v28  ;;  %v5098_v28 = vperm.slane %v4950_v14, 0  ;;  %v5099_v49 = vperm.slane %v4951_v62, 0  ;;  %v3639_v62 = vld [vmem:[#allocation3 + $0x1d0] sm:$0x1] }
 0x342   : > { %5320 = vst [vmem:[#allocation1 + $0x22] ss:$4 sm:$0xff] %v5275_v5  ;;  %v5166_v5 = vsel %vm5152_vm10, %v5097_v21, %v5096_v60  ;;  %v4257_v30 = vrot.slane %v4179_v47, 2  ;;  %v4258_v7 = vrot.slane %v4179_v47, 4  ;;  %v7845_v34 = vrot.slane %v4179_v47, 9 }
 0x343   : > { %5322 = vst [vmem:[#allocation1 + $0x23] ss:$4 sm:$0xff] %v5276_v52  ;;  %v4259_v52 = vrot.slane %v4179_v47, 6  ;;  %v3265_v40 = vsel %vm1327_vm7, %v3263_v9, %v9875_v57  ;;  %v5167_v54 = vsel %vm5154_vm11, %v5098_v28, %v5166_v5  ;;  %v3135_v16 = vadd.f32 %v9774_v11, %v2863_v59 }
 0x344   : > { %2099 = vst [vmem:[#allocation3 + $0x350] sm:$0x3] %v1881_v39  ;;  %v2531_v39 = vrot.slane %v2440_v24, 2  ;;  %v7847_v10 = vrot.slane %v4258_v7, 9  ;;  %v4840_v31 = vmax.f32 %v4179_v47, %v7845_v34  ;;  %3335 = vrot.lane.b32.xlu0 %v3265_v40, %s8203_s29  ;;  %v3723_v5 = vrot.slane %v3638_v19, 1 }
 0x345   : > { %2100 = vst.msk [vmem:[#allocation3 + $0x358] sm:$0x3] %vm1997_vm8, %v1882_v33  ;;  %v7846_v33 = vrot.slane %v4257_v30, 9  ;;  %v7848_v20 = vrot.slane %v4259_v52, 9  ;;  %3524 = vrot.lane.b32.xlu2 %v3446_v4, %s8204_s8  ;;  %v9908_v28 = vpop.permute.xlu2 %2592  ;;  %v3407_v42 = vadd.f32 %v9809_v12, %v3135_v16  ;;  %v2864_v59 = vadd.f32 %v9608_v6, %v2671_v45 }
 0x346   : > { %v9889_v32 = vld.sshfl [vmem:[#allocation1] sm:$0xff pattern:$0x73625140]  ;;  %v2533_v61 = vsel %vm1327_vm7, %v2531_v39, %v9875_v57  ;;  %v4842_v14 = vmax.f32 %v4258_v7, %v7847_v10  ;;  %v2535_v12 = vsel %vm1327_vm7, %v9875_v57, %v2534_v22  ;;  %vm5956_vm8 = vcmask 254976  }
 0x347   : > { %7945 = vmatmul.msk.f32.vlgmr.msrb.gmra.mxu2 %vm1992_vm3, %v9889_v32  ;;  %5325 = vst [vmem:[#allocation1] ss:$4 sm:$0xff] %v5277_v46  ;;  %7958 = vmatmul.msk.f32.vlgmr.msrb.gmra.mxu3 %vm1992_vm3, %v9889_v32  ;;  %v4841_v43 = vmax.f32 %v4257_v30, %v7846_v33  ;;  %v4843_v21 = vmax.f32 %v4259_v52, %v7848_v20  ;;  %v3908_v7 = vld [vmem:[#allocation3 + $0x128] sm:$0xfc]  ;;  %v3909_v52 = vld [vmem:[#allocation3 + $0x138] sm:$0xff]  ;;  %v2111_v33 = vld [vmem:[#allocation3 + $0xf0] sm:$0xff] }
 0x348   : > { %5326 = vst [vmem:[#allocation1 + $0x1] ss:$4 sm:$0xff] %v5235_v58  ;;  %v4952_v46 = vmax.f32 %v4832_v27, %v4840_v31  ;;  %2602 = vrot.lane.b32.xlu1 %v2533_v61, %s8200_s21  ;;  %v4954_v60 = vmax.f32 %v4834_v41, %v4842_v14  ;;  %v9905_v8 = vpop.permute.xlu0 %2590  ;;  %v5168_v27 = vsel %vm5156_vm12, %v5099_v49, %v5167_v54  ;;  %v3515_v9 = vpop.permute.xlu1 %3514  ;;  %v4012_v10 = vrot.slane %v3908_v7, 2  ;;  %v3176_v31 = vld [vmem:[#allocation3 + $0x1d0] sm:$0x3] }
 0x349   : > { %v4953_v23 = vmax.f32 %v4833_v50, %v4841_v43  ;;  %v4955_v37 = vmax.f32 %v4835_v1, %v4843_v21  ;;  %v3136_v34 = vadd.f32 %v9801_v35, %v2864_v59  ;;  %v3725_v41 = vsel %vm2213_vm9, %v3723_v5, %v9825_v13 }
 0x34a   : > { %v5100_v47 = vperm.slane %v4952_v46, 0  ;;  %v5102_v24 = vperm.slane %v4954_v60, 0  ;;  %v9913_v50 = vld.sshfl [vmem:[#allocation1 + $0x20] sm:$0xff pattern:$0x73625140]  ;;  %v3600_v39 = vadd.f32 %v9689_v2, %v3407_v42  ;;  %v4013_v35 = vrot.slane %v3909_v52, 2 }
 0x34b   : > { %v5101_v25 = vperm.slane %v4953_v23, 0  ;;  %v5103_v58 = vperm.slane %v4955_v37, 0  ;;  %v3408_v20 = vadd.f32 %v9885_v53, %v3136_v34  ;;  %v2400_v1 = vadd.f32 %v9741_v17, %v2111_v33  ;;  %v3910_v2 = vld [vmem:[#allocation3 + $0x148] sm:$0x3]  ;;  %v2904_v23 = vld [vmem:[#allocation3 + $0x1d0] sm:$0x1] }
 0x34c   : > { %v5169_v11 = vsel %vm5158_vm13, %v5100_v47, %v5168_v27  ;;  %2604 = vrot.lane.b32.xlu0 %v2535_v12, %s8200_s21  ;;  %v3872_v54 = vadd.f32 %v9880_v36, %v3600_v39  ;;  %v3726_v61 = vrot.slane %v3639_v62, 1  ;;  %v2991_v21 = vrot.slane %v2903_v26, 1  ;;  %v3448_v39 = vld [vmem:[#allocation3 + $0x1e0] sm:$0xff] }
 0x34d   : > { %v5170_v30 = vsel %vm5160_vm14, %v5101_v25, %v5169_v11  ;;  %2791 = vrot.lane.b32.xlu2 %v3446_v4, %s8201_s22  ;;  %v3601_v14 = vadd.f32 %v3515_v9, %v3408_v20  ;;  %v3266_v19 = vrot.slane %v3176_v31, 2  ;;  %v4014_v45 = vsel %vm1327_vm7, %v4012_v10, %v4013_v35  ;;  %v9936_v49 = vpop.permute.xlu2 %3518 }
 0x34e   : > { %v5171_v6 = vsel %vm5162_vm15, %v5102_v24, %v5170_v30  ;;  %v2672_v53 = vadd.f32 %v9625_v56, %v2400_v1  ;;  %v4112_v16 = vadd.f32 %v4014_v45, %v3872_v54  ;;  %v4015_v4 = vrot.slane %v3910_v2, 2  ;;  %v2152_v56 = vld [vmem:[#allocation3 + $0x1d0] sm:$0x1] }
 0x34f   : > { %7946 = vmatmul.msk.f32.gmra.mxu2 %vm1992_vm3, %v9913_v50  ;;  %7959 = vmatmul.msk.f32.gmra.mxu3 %vm1992_vm3, %v9913_v50  ;;  %v5172_v40 = vsel %vm5164_vm0, %v5103_v58, %v5171_v6  ;;  %v3727_v17 = vsel %vm2213_vm9, %v9825_v13, %v3726_v61  ;;  %v3873_v36 = vadd.f32 %v9882_v51, %v3601_v14  ;;  %v2994_v24 = vrot.slane %v2904_v23, 1  ;;  %v3911_v6 = vld [vmem:[#allocation3 + $0x158] sm:$0xfc]  ;;  %v3913_v61 = vld [vmem:[#allocation3 + $0x178] sm:$0x3]  ;;  %v2714_v14 = vld [vmem:[#allocation3 + $0x1f0] sm:$0xff] }
 0x350   : > { %3796 = vrot.lane.b32.xlu1 %v3725_v41, %s8205_s9  ;;  %5225 = vst.msk [vmem:[#allocation4 + $0x21] sm:$0xff] %vm1992_vm3, %v5172_v40  ;;  %v3517_v43 = vpop.permute.xlu0 %3516  ;;  %v3054_v46 = vpop.permute.xlu1 %3053  ;;  %v2993_v22 = vsel %vm2213_vm9, %v2991_v21, %v9825_v13  ;;  %v3267_v47 = vsel %vm1327_vm7, %v9875_v57, %v3266_v19  ;;  %v2865_v51 = vadd.f32 %v9665_v63, %v2672_v53  ;;  %v8115_v57 = vld [vmem:[#allocation3 + $0x100] sm:$0xff]  ;;  %v2262_v30 = vrot.slane %v2152_v56, 1  ;;  %v3912_v41 = vld [vmem:[#allocation3 + $0x168] sm:$0xff] }
 0x351   : > { %v4148_v42 = vadd.f32 %v9754_v29, %v4112_v16  ;;  %v4016_v25 = vsel %vm1327_vm7, %v4013_v35, %v4015_v4  ;;  %v2401_v59 = vadd.f32 %v8115_v57, %v9641_v3  ;;  %v2995_v34 = vsel %vm2213_vm9, %v9825_v13, %v2994_v24  ;;  %v3178_v53 = vld [vmem:[#allocation3 + $0x200] sm:$0x3] }
 0x352   : > { %v4113_v58 = vadd.f32 %v4016_v25, %v3873_v36  ;;  %v3137_v63 = vadd.f32 %v9733_v38, %v2865_v51  ;;  %v4017_v33 = vrot.slane %v3911_v6, 2  ;;  %v4018_v10 = vrot.slane %v3912_v41, 2 }
 0x353   : > { %v2673_v52 = vadd.f32 %v9767_v18, %v2401_v59  ;;  %v9959_v12 = vmax.f32 %v4148_v42, 0.0  ;;  %v2263_v18 = vsel %vm2213_vm9, %v9825_v13, %v2262_v30  ;;  %v4020_v4 = vrot.slane %v3913_v61, 2 }
 0x354   : > { %3798 = vrot.lane.b32.xlu0 %v3727_v17, %s8205_s9  ;;  %v4149_v62 = vadd.f32 %v9754_v29, %v4113_v58  ;;  %v3409_v38 = vadd.f32 %v9769_v15, %v3137_v63  ;;  %v9991_v36 = vrot.slane %v2714_v14, 2 }
 0x355   : > { %3337 = vrot.lane.b32.xlu2 %v3267_v47, %s8203_s29  ;;  %v2866_v3 = vadd.f32 %v9843_v44, %v2673_v52  ;;  %v9966_v40 = vpop.permute.xlu2 %2785  ;;  %v4260_v35 = vrot.slane %v9959_v12, 2  ;;  %v4261_v15 = vrot.slane %v9959_v12, 4  ;;  %v4262_v21 = vrot.slane %v9959_v12, 6 }
 0x356   : > { %v3602_v20 = vadd.f32 %v3517_v43, %v3409_v38  ;;  %v9978_v1 = vmax.f32 %v4149_v62, 0.0  ;;  %v4019_v43 = vsel %vm1327_vm7, %v4017_v33, %v4018_v10  ;;  %v4021_v24 = vsel %vm1327_vm7, %v4018_v10, %v4020_v4  ;;  %v2905_v4 = vld [vmem:[#allocation3 + $0x1e0] sm:$0xfe] }
 0x357   : > { %v5236_v60 = vld [vmem:[#allocation4 + $0x20] sm:$0xff]  ;;  %v5237_v37 = vld [vmem:[#allocation4 + $0x28] sm:$0x3]  ;;  %v3138_v26 = vadd.f32 %v3054_v46, %v2866_v3  ;;  %v7849_v46 = vrot.slane %v9959_v12, 9  ;;  %v7850_v19 = vrot.slane %v4260_v35, 9  ;;  %v7851_v17 = vrot.slane %v4261_v15, 9 }
 0x358   : > { %3063 = vrot.lane.b32.xlu1 %v2993_v22, %s8202_s23  ;;  %v5278_v27 = vrot.slane %v5236_v60, 2  ;;  %v5279_v5 = vrot.slane %v5236_v60, 4  ;;  %v5280_v9 = vrot.slane %v5236_v60, 6  ;;  %5327 = vst [vmem:[#allocation1 + $0x2] ss:$4 sm:$0xff] %v5236_v60  ;;  %v9952_v11 = vpop.permute.xlu0 %2783  ;;  %v9955_v7 = vpop.permute.xlu1 %2320  ;;  %v4263_v16 = vrot.slane %v9978_v1, 2 }
 0x359   : > { %5331 = vst [vmem:[#allocation1 + $0x22] ss:$4 sm:$0xff] %v5237_v37  ;;  %v3410_v2 = vadd.f32 %v9803_v55, %v3138_v26  ;;  %v4264_v22 = vrot.slane %v9978_v1, 4  ;;  %v4265_v23 = vrot.slane %v9978_v1, 6  ;;  %v3271_v37 = vrot.slane %v3178_v53, 2 }
 0x35a   : > { %5328 = vst [vmem:[#allocation1 + $0x3] ss:$4 sm:$0xff] %v5278_v27  ;;  %v7852_v56 = vrot.slane %v4262_v21, 9  ;;  %v4844_v27 = vmax.f32 %v9959_v12, %v7849_v46  ;;  %v7853_v42 = vrot.slane %v9978_v1, 9  ;;  %v7854_v25 = vrot.slane %v4263_v16, 9 }
 0x35b   : > { %5329 = vst [vmem:[#allocation1 + $0x20] ss:$4 sm:$0xff] %v5279_v5  ;;  %v3603_v47 = vadd.f32 %v9936_v49, %v3410_v2  ;;  %v4845_v5 = vmax.f32 %v4260_v35, %v7850_v19  ;;  %v7855_v63 = vrot.slane %v4264_v22, 9  ;;  %v3272_v49 = vsel %vm1327_vm7, %v9991_v36, %v3271_v37 }
 0x35c   : > { %5330 = vst [vmem:[#allocation1 + $0x21] ss:$4 sm:$0xff] %v5280_v9  ;;  %3065 = vrot.lane.b32.xlu0 %v2995_v34, %s8202_s23  ;;  %v7856_v34 = vrot.slane %v4265_v23, 9  ;;  %v4847_v38 = vmax.f32 %v4262_v21, %v7852_v56 }
 0x35d   : > { %3528 = vrot.lane.b32.xlu2 %v3448_v39, %s8204_s8  ;;  %v4850_v61 = vmax.f32 %v4264_v22, %v7855_v63 }
 0x35e   : > { %v9998_v60 = vpop.permute.xlu2 %2324 }
 0x360   : > { %2332 = vrot.lane.b32.xlu1 %v2263_v18, %s8199_s20  ;;  %v9976_v31 = vpop.permute.xlu0 %2322  ;;  %v3789_v13 = vpop.permute.xlu1 %3788  ;;  %v4846_v18 = vmax.f32 %v4261_v15, %v7851_v17 }
 0x361   : > { %v9973_v44 = vld.sshfl [vmem:[#allocation1] sm:$0xff pattern:$0x73625140]  ;;  %v3874_v54 = vadd.f32 %v3789_v13, %v3602_v20  ;;  %v4848_v13 = vmax.f32 %v9978_v1, %v7853_v42  ;;  %v2996_v1 = vrot.slane %v2905_v4, 1  ;;  %v3450_v4 = vld [vmem:[#allocation3 + $0x210] sm:$0xff] }
 0x362   : > { %7947 = vmatmul.msk.f32.gmra.mxu2 %vm1992_vm3, %v9973_v44  ;;  %7960 = vmatmul.msk.f32.gmra.mxu3 %vm1992_vm3, %v9973_v44 }
 0x363   : > { %v4114_v45 = vadd.f32 %v4019_v43, %v3874_v54  ;;  %v4849_v54 = vmax.f32 %v4263_v16, %v7854_v25  ;;  %v4851_v43 = vmax.f32 %v4265_v23, %v7856_v34  ;;  %v3177_v16 = vld [vmem:[#allocation3 + $0x1e0] sm:$0xfc] }
 0x364   : > { %2795 = vrot.lane.b32.xlu0 %v3448_v39, %s8201_s22  ;;  %v10006_v39 = vrot.slane %v2714_v14, 1  ;;  %v3268_v25 = vrot.slane %v3177_v16, 2 }
 0x365   : > { %v4150_v55 = vadd.f32 %v9754_v29, %v4114_v45  ;;  %2797 = vrot.lane.b32.xlu2 %v2714_v14, %s8201_s22 }
 0x366   : > { %v2998_v42 = vsel %vm2213_vm9, %v2996_v1, %v10006_v39  ;;  %v3270_v34 = vsel %vm1327_vm7, %v3268_v25, %v9991_v36 }
 0x367   : > { %v4182_v9 = vmax.f32 %v4150_v55, 0.0 }
 0x368   : > { %3530 = vrot.lane.b32.xlu1 %v2714_v14, %s8204_s8  ;;  %v3791_v51 = vpop.permute.xlu0 %3790 }
 0x369   : > { %v3875_v57 = vadd.f32 %v3791_v51, %v3603_v47  ;;  %v4266_v59 = vrot.slane %v4182_v9, 2  ;;  %v4267_v58 = vrot.slane %v4182_v9, 4  ;;  %v4268_v30 = vrot.slane %v4182_v9, 6 }
 0x36a   : > { %v7857_v52 = vrot.slane %v4182_v9, 9  ;;  %v10011_v17 = vpop.permute.xlu2 %3057 }
 0x36b   : > { %v4115_v6 = vadd.f32 %v4021_v24, %v3875_v57  ;;  %v7858_v12 = vrot.slane %v4266_v59, 9  ;;  %v7859_v41 = vrot.slane %v4267_v58, 9  ;;  %v7860_v3 = vrot.slane %v4268_v30, 9 }
 0x36c   : > { %v4852_v62 = vmax.f32 %v4182_v9, %v7857_v52  ;;  %3341 = vrot.lane.b32.xlu0 %v3272_v49, %s8203_s29  ;;  %v2153_v52 = vld [vmem:[#allocation3 + $0x1e0] sm:$0xfe] }
 0x36d   : > { %v4151_v26 = vadd.f32 %v9754_v29, %v4115_v6  ;;  %v4853_v33 = vmax.f32 %v4266_v59, %v7858_v12  ;;  %v4854_v10 = vmax.f32 %v4267_v58, %v7859_v41  ;;  %v4855_v35 = vmax.f32 %v4268_v30, %v7860_v3  ;;  %v10013_v29 = vpop.permute.xlu1 %2594  ;;  %3067 = vrot.lane.b32.xlu2 %v2998_v42, %s8202_s23  ;;  %v2443_v30 = vld [vmem:[#allocation3 + $0x200] sm:$0x3]  ;;  %v2442_v3 = vld [vmem:[#allocation3 + $0x1e0] sm:$0xfc] }
 0x36e   : > { %v4956_v20 = vmax.f32 %v4844_v27, %v4852_v62 }
 0x36f   : > { %v4183_v2 = vmax.f32 %v4151_v26, 0.0  ;;  %v4957_v46 = vmax.f32 %v4845_v5, %v4853_v33  ;;  %v4958_v19 = vmax.f32 %v4846_v18, %v4854_v10  ;;  %v4959_v15 = vmax.f32 %v4847_v38, %v4855_v35 }
 0x370   : > { %v5104_v55 = vperm.slane %v4956_v20, 0  ;;  %v10015_v22 = vpop.permute.xlu0 %2596  ;;  %3339 = vrot.lane.b32.xlu1 %v3270_v34, %s8203_s29  ;;  %v2539_v18 = vrot.slane %v2443_v30, 2  ;;  %v2264_v38 = vrot.slane %v2153_v52, 1  ;;  %v2156_v30 = vld [vmem:[#allocation3 + $0x230] sm:$0x1] }
 0x371   : > { %v4269_v21 = vrot.slane %v4183_v2, 2  ;;  %v4270_v14 = vrot.slane %v4183_v2, 4  ;;  %v4271_v45 = vrot.slane %v4183_v2, 6  ;;  %v7861_v53 = vrot.slane %v4183_v2, 9  ;;  %v3640_v34 = vld [vmem:[#allocation3 + $0x1e0] sm:$0xfe] }
 0x372   : > { %v5105_v37 = vperm.slane %v4957_v46, 0  ;;  %v5106_v47 = vperm.slane %v4958_v19, 0  ;;  %v5107_v9 = vperm.slane %v4959_v15, 0  ;;  %v2266_v19 = vsel %vm2213_vm9, %v2264_v38, %v10006_v39 }
 0x373   : > { %v7862_v23 = vrot.slane %v4269_v21, 9  ;;  %v7863_v56 = vrot.slane %v4270_v14, 9  ;;  %v7864_v27 = vrot.slane %v4271_v45, 9  ;;  %v4856_v5 = vmax.f32 %v4183_v2, %v7861_v53  ;;  %v10026_v33 = vpop.permute.xlu2 %3059 }
 0x374   : > { %v5173_v51 = vsel %vm5152_vm10, %v5105_v37, %v5104_v55 }
 0x375   : > { %v5174_v24 = vsel %vm5154_vm11, %v5106_v47, %v5173_v51  ;;  %v4857_v57 = vmax.f32 %v4269_v21, %v7862_v23  ;;  %v4858_v59 = vmax.f32 %v4270_v14, %v7863_v56  ;;  %v4859_v58 = vmax.f32 %v4271_v45, %v7864_v27  ;;  %v10028_v10 = vpop.permute.xlu1 %3055  ;;  %2334 = vrot.lane.b32.xlu2 %v2266_v19, %s8199_s20  ;;  %v2906_v14 = vld [vmem:[#allocation3 + $0x200] sm:$0x1]  ;;  %v2444_v23 = vld [vmem:[#allocation3 + $0x210] sm:$0xfc] }
 0x376   : > { %v4960_v63 = vmax.f32 %v4848_v13, %v4856_v5  ;;  %v5175_v49 = vsel %vm5156_vm12, %v5107_v9, %v5174_v24  ;;  %v2540_v13 = vsel %vm1327_vm7, %v9991_v36, %v2539_v18  ;;  %v2999_v55 = vrot.slane %v2906_v14, 1  ;;  %v3451_v47 = vld [vmem:[#allocation3 + $0x220] sm:$0xff]  ;;  %v2155_v18 = vld [vmem:[#allocation3 + $0x210] sm:$0xfe] }
 0x377   : > { %v4961_v6 = vmax.f32 %v4849_v54, %v4857_v57  ;;  %v4962_v12 = vmax.f32 %v4850_v61, %v4858_v59  ;;  %v4963_v41 = vmax.f32 %v4851_v43, %v4859_v58  ;;  %v2536_v54 = vrot.slane %v2442_v3, 2  ;;  %2608 = vrot.lane.b32.xlu0 %v2540_v13, %s8200_s21  ;;  %v2154_v9 = vld [vmem:[#allocation3 + $0x200] sm:$0x1]  ;;  %v10101_v19 = vld [vmem:[#allocation3 + $0x250] sm:$0xff] }
 0x378   : > { %v5108_v62 = vperm.slane %v4960_v63, 0  ;;  %v10033_v61 = vpop.permute.xlu0 %2789  ;;  %v3000_v5 = vsel %vm2213_vm9, %v10006_v39, %v2999_v55  ;;  %v2541_v51 = vrot.slane %v2444_v23, 2  ;;  %v10057_v42 = vrot.slane %v3451_v47, 2 }
 0x379   : > { %v5109_v26 = vperm.slane %v4961_v6, 0  ;;  %v5110_v35 = vperm.slane %v4962_v12, 0  ;;  %v5111_v2 = vperm.slane %v4963_v41, 0  ;;  %v2538_v21 = vsel %vm1327_vm7, %v2536_v54, %v9991_v36  ;;  %v3641_v54 = vld [vmem:[#allocation3 + $0x200] sm:$0x1] }
 0x37a   : > { %v5176_v20 = vsel %vm5158_vm13, %v5108_v62, %v5175_v49  ;;  %2606 = vrot.lane.b32.xlu1 %v2538_v21, %s8200_s21  ;;  %v2267_v57 = vrot.slane %v2154_v9, 1  ;;  %v2543_v58 = vsel %vm1327_vm7, %v2541_v51, %v10057_v42  ;;  %v2272_v49 = vrot.slane %v2156_v30, 1  ;;  %v3179_v30 = vld [vmem:[#allocation3 + $0x210] sm:$0xfc] }
 0x37b   : > { %v5177_v43 = vsel %vm5160_vm14, %v5109_v26, %v5176_v20  ;;  %v10082_v41 = vrot.slane %v3451_v47, 1  ;;  %v3728_v3 = vrot.slane %v3640_v34, 1  ;;  %v3642_v26 = vld [vmem:[#allocation3 + $0x210] sm:$0xfe]  ;;  %v2269_v13 = vrot.slane %v2155_v18, 1 }
 0x37c   : > { %v5178_v46 = vsel %vm5162_vm15, %v5110_v35, %v5177_v43  ;;  %v2268_v52 = vsel %vm2213_vm9, %v10006_v39, %v2267_v57  ;;  %v3731_v14 = vrot.slane %v3641_v54, 1  ;;  %v3181_v57 = vld [vmem:[#allocation3 + $0x240] sm:$0xfc]  ;;  %v10133_v18 = vrot.slane %v10101_v19, 2 }
 0x37d   : > { %v5179_v15 = vsel %vm5164_vm0, %v5111_v2, %v5178_v46  ;;  %v10048_v53 = vpop.permute.xlu1 %3327  ;;  %3534 = vrot.lane.b32.xlu2 %v3451_v47, %s8204_s8  ;;  %v2273_v38 = vsel %vm2213_vm9, %v10082_v41, %v2272_v49  ;;  %v3730_v20 = vsel %vm2213_vm9, %v3728_v3, %v10006_v39  ;;  %v3733_v2 = vrot.slane %v3642_v26, 1 }
 0x37e   : > { %5226 = vst.msk [vmem:[#allocation4 + $0x31] sm:$0xff] %vm1992_vm3, %v5179_v15  ;;  %v10046_v45 = vpop.permute.xlu2 %3331  ;;  %v2909_v15 = vld [vmem:[#allocation3 + $0x240] sm:$0xfe]  ;;  %v2271_v21 = vsel %vm2213_vm9, %v2269_v13, %v10082_v41  ;;  %v3732_v23 = vsel %vm2213_vm9, %v10006_v39, %v3731_v14  ;;  %v3278_v3 = vrot.slane %v3181_v57, 2 }
 0x37f   : > { %3532 = vrot.lane.b32.xlu0 %v3450_v4, %s8204_s8  ;;  %v3735_v55 = vsel %vm2213_vm9, %v3733_v2, %v10082_v41 }
 0x380   : > { %v10050_v37 = vpop.permute.xlu0 %3522 }
 0x382   : > { %3069 = vrot.lane.b32.xlu1 %v3000_v5, %s8202_s23 }
 0x385   : > { %v5238_v1 = vld [vmem:[#allocation4 + $0x30] sm:$0xff]  ;;  %v5239_v16 = vld [vmem:[#allocation4 + $0x38] sm:$0x3]  ;;  %v10061_v24 = vpop.permute.xlu1 %3329  ;;  %2610 = vrot.lane.b32.xlu2 %v2543_v58, %s8200_s21 }
 0x386   : > { %v5281_v36 = vrot.slane %v5238_v1, 2  ;;  %v5282_v56 = vrot.slane %v5238_v1, 4  ;;  %v5283_v27 = vrot.slane %v5238_v1, 6  ;;  %5338 = vst [vmem:[#allocation1 + $0x3] ss:$4 sm:$0xff] %v5239_v16  ;;  %v10059_v25 = vpop.permute.xlu2 %3333 }
 0x387   : > { %5332 = vst [vmem:[#allocation1 + $0x23] ss:$4 sm:$0xff] %v5238_v1  ;;  %2799 = vrot.lane.b32.xlu0 %v3450_v4, %s8201_s22  ;;  %v10111_v1 = vrot.slane %v10101_v19, 1  ;;  %v2907_v16 = vld [vmem:[#allocation3 + $0x210] sm:$0xfe] }
 0x388   : > { %5335 = vst [vmem:[#allocation1] ss:$4 sm:$0xff] %v5281_v36  ;;  %v10063_v59 = vpop.permute.xlu0 %2326  ;;  %v2445_v36 = vld [vmem:[#allocation3 + $0x230] sm:$0x3] }
 0x389   : > { %5336 = vst [vmem:[#allocation1 + $0x1] ss:$4 sm:$0xff] %v5282_v56  ;;  %v2544_v51 = vrot.slane %v2445_v36, 2 }
 0x38a   : > { %5337 = vst [vmem:[#allocation1 + $0x2] ss:$4 sm:$0xff] %v5283_v27  ;;  %2336 = vrot.lane.b32.xlu1 %v2268_v52, %s8199_s20  ;;  %v3001_v27 = vrot.slane %v2907_v16, 1  ;;  %v8116_v52 = vld [vmem:[#allocation3 + $0x130] sm:$0xff]  ;;  %v10154_v16 = vld [vmem:[#allocation3 + $0x240] sm:$0xff] }
 0x38b   : > { %v2403_v34 = vadd.f32 %v8116_v52, %v9955_v7  ;;  %v2545_v49 = vsel %vm1327_vm7, %v10057_v42, %v2544_v51 }
 0x38c   : > { %v3003_v39 = vsel %vm2213_vm9, %v3001_v27, %v10082_v41  ;;  %v2115_v27 = vld [vmem:[#allocation3 + $0x150] sm:$0xff] }
 0x38d   : > { %v10080_v12 = vpop.permute.xlu1 %2787  ;;  %2340 = vrot.lane.b32.xlu2 %v2273_v38, %s8199_s20  ;;  %v2113_v38 = vld [vmem:[#allocation3 + $0x120] sm:$0xff]  ;;  %v2675_v7 = vadd.f32 %v9908_v28, %v2403_v34  ;;  %v2404_v57 = vadd.f32 %v9976_v31, %v2115_v27  ;;  %v3918_v27 = vld [vmem:[#allocation3 + $0x1c8] sm:$0xff] }
 0x38e   : > { %v10071_v63 = vld.sshfl [vmem:[#allocation1 + $0x20] sm:$0xff pattern:$0x73625140]  ;;  %v10078_v6 = vpop.permute.xlu2 %2600  ;;  %v2402_v26 = vadd.f32 %v9845_v48, %v2113_v38 }
 0x38f   : > { %7948 = vmatmul.msk.f32.gmra.mxu2 %vm1992_vm3, %v10071_v63  ;;  %7961 = vmatmul.msk.f32.gmra.mxu3 %vm1992_vm3, %v10071_v63 }
 0x390   : > { %v10084_v62 = vpop.permute.xlu0 %2598  ;;  %2801 = vrot.lane.b32.xlu0 %v3451_v47, %s8201_s22  ;;  %v3006_v47 = vrot.slane %v2909_v15, 1  ;;  %v2674_v2 = vadd.f32 %v9905_v8, %v2402_v26  ;;  %v3280_v15 = vsel %vm1327_vm7, %v3278_v3, %v10133_v18  ;;  %v2868_v8 = vadd.f32 %v9966_v40, %v2675_v7 }
 0x391   : > { %v10090_v35 = vld.sshfl [vmem:[#allocation1] sm:$0xff pattern:$0x73625140] }
 0x392   : > { %3800 = vrot.lane.b32.xlu1 %v3730_v20, %s8205_s9  ;;  %v3008_v56 = vsel %vm2213_vm9, %v3006_v47, %v10111_v1  ;;  %v3273_v20 = vrot.slane %v3179_v30, 2  ;;  %v2867_v14 = vadd.f32 %v9952_v11, %v2674_v2  ;;  %v3643_v47 = vld [vmem:[#allocation3 + $0x230] sm:$0x1]  ;;  %v3140_v11 = vadd.f32 %v10011_v17, %v2868_v8  ;;  %v3914_v30 = vld [vmem:[#allocation3 + $0x188] sm:$0xfc] }
 0x393   : > { %v2446_v17 = vld [vmem:[#allocation3 + $0x240] sm:$0xfc]  ;;  %v4022_v38 = vrot.slane %v3914_v30, 2 }
 0x394   : > { %v3275_v48 = vsel %vm1327_vm7, %v3273_v20, %v10057_v42  ;;  %v3139_v28 = vadd.f32 %v10028_v10, %v2867_v14  ;;  %v3412_v40 = vadd.f32 %v10061_v24, %v3140_v11  ;;  %v2908_v24 = vld [vmem:[#allocation3 + $0x230] sm:$0x1]  ;;  %v2546_v2 = vrot.slane %v2446_v17, 2  ;;  %v8117_v14 = vld [vmem:[#allocation3 + $0x160] sm:$0xff] }
 0x395   : > { %v3521_v46 = vpop.permute.xlu1 %3520  ;;  %3804 = vrot.lane.b32.xlu2 %v3735_v55, %s8205_s9 }
 0x396   : > { %v3411_v36 = vadd.f32 %v10048_v53, %v3139_v28  ;;  %v2676_v53 = vadd.f32 %v10013_v29, %v2404_v57  ;;  %v3605_v26 = vadd.f32 %v10050_v37, %v3412_v40  ;;  %v2548_v8 = vsel %vm1327_vm7, %v2546_v2, %v10133_v18  ;;  %v3180_v57 = vld [vmem:[#allocation3 + $0x230] sm:$0x3] }
 0x397   : > { %7949 = vmatmul.msk.f32.gmra.mxu2 %vm1992_vm3, %v10090_v35  ;;  %7962 = vmatmul.msk.f32.gmra.mxu3 %vm1992_vm3, %v10090_v35  ;;  %v10099_v43 = vpop.permute.xlu2 %3794 }
 0x398   : > { %v10105_v4 = vpop.permute.xlu0 %3792  ;;  %2338 = vrot.lane.b32.xlu0 %v2271_v21, %s8199_s20  ;;  %v2157_v21 = vld [vmem:[#allocation3 + $0x240] sm:$0xfe]  ;;  %v3604_v10 = vadd.f32 %v3521_v46, %v3411_v36  ;;  %v2869_v46 = vadd.f32 %v10080_v12, %v2676_v53 }
 0x39a   : > { %3802 = vrot.lane.b32.xlu1 %v3732_v23, %s8205_s9  ;;  %v2274_v23 = vrot.slane %v2157_v21, 1  ;;  %v3876_v20 = vadd.f32 %v10105_v4, %v3604_v10  ;;  %v3004_v21 = vrot.slane %v2908_v24, 1  ;;  %v3141_v37 = vadd.f32 %v10026_v33, %v2869_v46  ;;  %v3919_v24 = vld [vmem:[#allocation3 + $0x1d8] sm:$0x3] }
 0x39c   : > { %v2276_v52 = vsel %vm2213_vm9, %v2274_v23, %v10111_v1 }
 0x39d   : > { %v10121_v9 = vpop.permute.xlu1 %3526  ;;  %3071 = vrot.lane.b32.xlu2 %v3003_v39, %s8202_s23  ;;  %v3915_v39 = vld [vmem:[#allocation3 + $0x198] sm:$0xff] }
 0x39e   : > { %v4023_v31 = vrot.slane %v3915_v39, 2  ;;  %v3413_v39 = vadd.f32 %v10046_v45, %v3141_v37 }
 0x39f   : > { %v10119_v5 = vpop.permute.xlu2 %3524 }
 0x3a0   : > { %3075 = vrot.lane.b32.xlu0 %v3008_v56, %s8202_s23  ;;  %v10124_v58 = vpop.permute.xlu0 %3061  ;;  %v3736_v56 = vrot.slane %v3643_v47, 1  ;;  %v4024_v47 = vsel %vm1327_vm7, %v4022_v38, %v4023_v31  ;;  %v3606_v53 = vadd.f32 %v10119_v5, %v3413_v39 }
 0x3a1   : > { %v4116_v4 = vadd.f32 %v4024_v47, %v3876_v20 }
 0x3a2   : > { %2612 = vrot.lane.b32.xlu1 %v2545_v49, %s8200_s21  ;;  %v3916_v49 = vld [vmem:[#allocation3 + $0x1a8] sm:$0x3]  ;;  %v3737_v3 = vsel %vm2213_vm9, %v10082_v41, %v3736_v56  ;;  %v3917_v56 = vld [vmem:[#allocation3 + $0x1b8] sm:$0xfc] }
 0x3a3   : > { %v4025_v7 = vrot.slane %v3916_v49, 2  ;;  %v3276_v49 = vrot.slane %v3180_v57, 2 }
 0x3a5   : > { %v10139_v54 = vpop.permute.xlu1 %2793  ;;  %3343 = vrot.lane.b32.xlu2 %v3275_v48, %s8203_s29  ;;  %v2405_v48 = vadd.f32 %v8117_v14, %v9998_v60  ;;  %v4026_v23 = vsel %vm1327_vm7, %v4023_v31, %v4025_v7  ;;  %v3005_v60 = vsel %vm2213_vm9, %v10082_v41, %v3004_v21  ;;  %v3277_v5 = vsel %vm1327_vm7, %v10057_v42, %v3276_v49 }
 0x3a6   : > { %v4030_v7 = vrot.slane %v3919_v24, 2 }
 0x3a7   : > { %v10137_v13 = vpop.permute.xlu2 %2791  ;;  %v2677_v28 = vadd.f32 %v10015_v22, %v2405_v48  ;;  %v10200_v22 = vld [vmem:[%s11594_s2] ss:$0 sm:$0xff] }
 0x3a8   : > { %3347 = vrot.lane.b32.xlu0 %v3280_v15, %s8203_s29  ;;  %v10150_v55 = vpop.permute.xlu0 %2328  ;;  %v3877_v15 = vadd.f32 %v10099_v43, %v3605_v26  ;;  %v2910_v43 = vld [vmem:[#allocation3 + $0x260] sm:$0x1]  ;;  %v4152_v40 = vadd.f32 %v10200_v22, %v4116_v4 }
 0x3a9   : > { %v2870_v33 = vadd.f32 %v10033_v61, %v2677_v28  ;;  %v3009_v10 = vrot.slane %v2910_v43, 1  ;;  %v4027_v61 = vrot.slane %v3917_v56, 2  ;;  %v3182_v26 = vld [vmem:[#allocation3 + $0x260] sm:$0x3] }
 0x3aa   : > { %2803 = vrot.lane.b32.xlu1 %v10154_v16, %s8201_s22  ;;  %v4117_v11 = vadd.f32 %v4026_v23, %v3877_v15  ;;  %v4184_v31 = vmax.f32 %v4152_v40, 0.0  ;;  %v3281_v48 = vrot.slane %v3182_v26, 2 }
 0x3ab   : > { %v3142_v41 = vadd.f32 %v10124_v58, %v2870_v33  ;;  %v3010_v45 = vsel %vm2213_vm9, %v10111_v1, %v3009_v10 }
 0x3ac   : > { %v4153_v17 = vadd.f32 %v10200_v22, %v4117_v11  ;;  %v4272_v15 = vrot.slane %v4184_v31, 2  ;;  %v4273_v21 = vrot.slane %v4184_v31, 4  ;;  %v4274_v4 = vrot.slane %v4184_v31, 6 }
 0x3ad   : > { %3806 = vrot.lane.b32.xlu2 %v3737_v3, %s8205_s9  ;;  %v3414_v58 = vadd.f32 %v10059_v25, %v3142_v41  ;;  %v7865_v42 = vrot.slane %v4184_v31, 9 }
 0x3ae   : > { %v10216_v20 = vmax.f32 %v4153_v17, 0.0  ;;  %v7867_v33 = vrot.slane %v4273_v21, 9  ;;  %v7868_v41 = vrot.slane %v4274_v4, 9 }
 0x3af   : > { %v10160_v51 = vpop.permute.xlu1 %2330  ;;  %v10166_v34 = vpop.permute.xlu2 %3337  ;;  %v3607_v47 = vadd.f32 %v10121_v9, %v3414_v58  ;;  %v2158_v58 = vld [vmem:[#allocation3 + $0x260] sm:$0x1] }
 0x3b0   : > { %2342 = vrot.lane.b32.xlu0 %v2276_v52, %s8199_s20  ;;  %v4028_v52 = vrot.slane %v3918_v27, 2  ;;  %v4275_v37 = vrot.slane %v10216_v20, 2  ;;  %v4276_v23 = vrot.slane %v10216_v20, 4  ;;  %v4277_v43 = vrot.slane %v10216_v20, 6 }
 0x3b1   : > { %v7869_v56 = vrot.slane %v10216_v20, 9  ;;  %v7866_v27 = vrot.slane %v4272_v15, 9  ;;  %v4862_v26 = vmax.f32 %v4273_v21, %v7867_v33 }
 0x3b2   : > { %3536 = vrot.lane.b32.xlu1 %v10154_v16, %s8204_s8  ;;  %v4029_v46 = vsel %vm1327_vm7, %v4027_v61, %v4028_v52  ;;  %v4031_v11 = vsel %vm1327_vm7, %v4028_v52, %v4030_v7  ;;  %v7870_v10 = vrot.slane %v4275_v37, 9  ;;  %v4860_v61 = vmax.f32 %v4184_v31, %v7865_v42  ;;  %v3644_v52 = vld [vmem:[#allocation3 + $0x240] sm:$0xfe] }
 0x3b3   : > { %v4864_v33 = vmax.f32 %v10216_v20, %v7869_v56  ;;  %v3455_v20 = vld [vmem:[#allocation3 + $0x280] sm:$0xff] }
 0x3b5   : > { %3073 = vrot.lane.b32.xlu2 %v3005_v60, %s8202_s23 }
 0x3b6   : > { %v10178_v29 = vpop.permute.xlu0 %3335 }
 0x3b7   : > { %v10193_v36 = vpop.permute.xlu2 %3528 }
 0x3b8   : > { %2614 = vrot.lane.b32.xlu0 %v2548_v8, %s8200_s21 }
 0x3ba   : > { %v10183_v12 = vpop.permute.xlu1 %2602  ;;  %2805 = vrot.lane.b32.xlu1 %v10101_v19, %s8201_s22 }
 0x3bd   : > { %3345 = vrot.lane.b32.xlu2 %v3277_v5, %s8203_s29 }
 0x3be   : > { %v10207_v30 = vpop.permute.xlu0 %2604 }
 0x3bf   : > { %v10221_v14 = vpop.permute.xlu2 %2797 }
 0x3c0   : > { %3077 = vrot.lane.b32.xlu0 %v3010_v45, %s8202_s23 }
 0x3c2   : > { %v3797_v3 = vpop.permute.xlu1 %3796  ;;  %3538 = vrot.lane.b32.xlu1 %v10101_v19, %s8204_s8  ;;  %v3282_v19 = vsel %vm1327_vm7, %v10133_v18, %v3281_v48 }
 0x3c3   : > { %v3878_v38 = vadd.f32 %v3797_v3, %v3606_v53  ;;  %v10235_v53 = vld [vmem:[#allocation3 + $0x270] sm:$0xff] }
 0x3c5   : > { %v4118_v2 = vadd.f32 %v4029_v46, %v3878_v38  ;;  %3540 = vrot.lane.b32.xlu2 %v10235_v53, %s8204_s8  ;;  %v4861_v46 = vmax.f32 %v4272_v15, %v7866_v27  ;;  %v7872_v27 = vrot.slane %v4277_v43, 9 }
 0x3c6   : > { %v3799_v28 = vpop.permute.xlu0 %3798 }
 0x3c7   : > { %v4154_v25 = vadd.f32 %v10200_v22, %v4118_v2  ;;  %v3879_v60 = vadd.f32 %v3799_v28, %v3607_v47  ;;  %v3738_v2 = vrot.slane %v3644_v52, 1  ;;  %v4863_v47 = vmax.f32 %v4274_v4, %v7868_v41  ;;  %v10242_v28 = vpop.permute.xlu2 %3067 }
 0x3c8   : > { %3349 = vrot.lane.b32.xlu0 %v3282_v19, %s8203_s29  ;;  %v7871_v19 = vrot.slane %v4276_v23, 9  ;;  %v4865_v4 = vmax.f32 %v4275_v37, %v7870_v10  ;;  %v2447_v10 = vld [vmem:[#allocation3 + $0x260] sm:$0x3] }
 0x3c9   : > { %v4186_v8 = vmax.f32 %v4154_v25, 0.0  ;;  %v4119_v17 = vadd.f32 %v4031_v11, %v3879_v60  ;;  %v2277_v11 = vrot.slane %v2158_v58, 1 }
 0x3ca   : > { %v10237_v49 = vpop.permute.xlu1 %3063 }
 0x3cb   : > { %v4278_v9 = vrot.slane %v4186_v8, 2  ;;  %v4279_v57 = vrot.slane %v4186_v8, 4  ;;  %v4280_v40 = vrot.slane %v4186_v8, 6  ;;  %v7873_v39 = vrot.slane %v4186_v8, 9 }
 0x3cc   : > { %v4155_v5 = vadd.f32 %v10200_v22, %v4119_v17 }
 0x3cd   : > { %v7874_v3 = vrot.slane %v4278_v9, 9  ;;  %v7875_v45 = vrot.slane %v4279_v57, 9  ;;  %v7876_v38 = vrot.slane %v4280_v40, 9  ;;  %v4868_v24 = vmax.f32 %v4186_v8, %v7873_v39  ;;  %2807 = vrot.lane.b32.xlu2 %v10235_v53, %s8201_s22 }
 0x3ce   : > { %v4187_v42 = vmax.f32 %v4155_v5, 0.0  ;;  %v3740_v8 = vsel %vm2213_vm9, %v3738_v2, %v10111_v1  ;;  %v10246_v60 = vpop.permute.xlu0 %3065 }
 0x3cf   : > { %v4869_v31 = vmax.f32 %v4278_v9, %v7874_v3  ;;  %v4870_v7 = vmax.f32 %v4279_v57, %v7875_v45  ;;  %v4871_v25 = vmax.f32 %v4280_v40, %v7876_v38  ;;  %v4964_v48 = vmax.f32 %v4860_v61, %v4868_v24  ;;  %3808 = vrot.lane.b32.xlu1 %v3740_v8, %s8205_s9  ;;  %v3645_v57 = vld [vmem:[#allocation3 + $0x260] sm:$0x1] }
 0x3d0   : > { %v4281_v61 = vrot.slane %v4187_v42, 2  ;;  %v4282_v17 = vrot.slane %v4187_v42, 4  ;;  %v4283_v52 = vrot.slane %v4187_v42, 6  ;;  %v7877_v3 = vrot.slane %v4187_v42, 9 }
 0x3d1   : > { %v4965_v15 = vmax.f32 %v4861_v46, %v4869_v31  ;;  %v4966_v21 = vmax.f32 %v4862_v26, %v4870_v7  ;;  %v4967_v9 = vmax.f32 %v4863_v47, %v4871_v25  ;;  %v5112_v40 = vperm.slane %v4964_v48, 0 }
 0x3d2   : > { %v2278_v45 = vsel %vm2213_vm9, %v10111_v1, %v2277_v11  ;;  %v4866_v38 = vmax.f32 %v4276_v23, %v7871_v19  ;;  %v7878_v58 = vrot.slane %v4281_v61, 9  ;;  %v3741_v37 = vrot.slane %v3645_v57, 1  ;;  %v10258_v56 = vpop.permute.xlu1 %2332  ;;  %v10265_v11 = vpop.permute.xlu2 %2334 }
 0x3d3   : > { %v5113_v39 = vperm.slane %v4965_v15, 0  ;;  %v5114_v41 = vperm.slane %v4966_v21, 0  ;;  %2344 = vrot.lane.b32.xlu0 %v2278_v45, %s8199_s20  ;;  %v7879_v26 = vrot.slane %v4282_v17, 9  ;;  %v7880_v5 = vrot.slane %v4283_v52, 9 }
 0x3d4   : > { %v4872_v2 = vmax.f32 %v4187_v42, %v7877_v3  ;;  %v4867_v23 = vmax.f32 %v4277_v43, %v7872_v27  ;;  %v5115_v31 = vperm.slane %v4967_v9, 0  ;;  %v4873_v7 = vmax.f32 %v4281_v61, %v7878_v58  ;;  %v2159_v43 = vld [vmem:[#allocation3 + $0x270] sm:$0xfe] }
 0x3d5   : > { %v5180_v24 = vsel %vm5152_vm10, %v5113_v39, %v5112_v40  ;;  %v3742_v25 = vsel %vm2213_vm9, %v10111_v1, %v3741_v37  ;;  %v4874_v48 = vmax.f32 %v4282_v17, %v7879_v26  ;;  %v4875_v47 = vmax.f32 %v4283_v52, %v7880_v5  ;;  %3542 = vrot.lane.b32.xlu2 %v3455_v20, %s8204_s8  ;;  %v3646_v52 = vld [vmem:[#allocation3 + $0x270] sm:$0xfe] }
 0x3d6   : > { %v5181_v46 = vsel %vm5154_vm11, %v5114_v41, %v5180_v24  ;;  %v4968_v8 = vmax.f32 %v4864_v33, %v4872_v2  ;;  %v2549_v19 = vrot.slane %v2447_v10, 2  ;;  %v4969_v21 = vmax.f32 %v4865_v4, %v4873_v7  ;;  %v10269_v42 = vpop.permute.xlu0 %2795  ;;  %v2448_v37 = vld [vmem:[#allocation3 + $0x270] sm:$0xfc] }
 0x3d7   : > { %v5182_v15 = vsel %vm5156_vm12, %v5115_v31, %v5181_v46  ;;  %3810 = vrot.lane.b32.xlu1 %v3742_v25, %s8205_s9  ;;  %v4970_v27 = vmax.f32 %v4866_v38, %v4874_v48  ;;  %v4971_v9 = vmax.f32 %v4867_v23, %v4875_v47  ;;  %v10274_v41 = vrot.slane %v3455_v20, 1  ;;  %v2911_v2 = vld [vmem:[#allocation3 + $0x270] sm:$0xfe] }
 0x3d8   : > { %v5116_v57 = vperm.slane %v4968_v8, 0  ;;  %v5117_v40 = vperm.slane %v4969_v21, 0  ;;  %v2550_v1 = vsel %vm1327_vm7, %v10133_v18, %v2549_v19  ;;  %v2279_v61 = vrot.slane %v2159_v43, 1  ;;  %v2160_v21 = vld [vmem:[#allocation3 + $0x290] sm:$0x1] }
 0x3d9   : > { %v5118_v33 = vperm.slane %v4970_v27, 0  ;;  %v5119_v4 = vperm.slane %v4971_v9, 0  ;;  %v3743_v58 = vrot.slane %v3646_v52, 1  ;;  %v10291_v46 = vrot.slane %v3455_v20, 2  ;;  %v2449_v52 = vld [vmem:[#allocation3 + $0x290] sm:$0x3] }
 0x3da   : > { %v5183_v39 = vsel %vm5158_vm13, %v5116_v57, %v5182_v15  ;;  %v10281_v38 = vpop.permute.xlu1 %3530  ;;  %v10284_v18 = vpop.permute.xlu2 %3534  ;;  %v2281_v24 = vsel %vm2213_vm9, %v2279_v61, %v10274_v41  ;;  %v2551_v5 = vrot.slane %v2448_v37, 2  ;;  %v3011_v7 = vrot.slane %v2911_v2, 1  ;;  %v3183_v57 = vld [vmem:[#allocation3 + $0x270] sm:$0xfc]  ;;  %v3647_v37 = vld [vmem:[#allocation3 + $0x290] sm:$0x1] }
 0x3db   : > { %v5184_v17 = vsel %vm5160_vm14, %v5117_v40, %v5183_v39  ;;  %2616 = vrot.lane.b32.xlu0 %v2550_v1, %s8200_s21  ;;  %v3745_v26 = vsel %vm2213_vm9, %v3743_v58, %v10274_v41  ;;  %v2282_v27 = vrot.slane %v2160_v21, 1  ;;  %v8119_v40 = vld [vmem:[#allocation3 + $0x1b0] sm:$0xff]  ;;  %v3283_v61 = vrot.slane %v3183_v57, 2  ;;  %v10329_v2 = vld [vmem:[#allocation3 + $0x228] sm:$0xff] }
 0x3dc   : > { %v5185_v3 = vsel %vm5162_vm15, %v5118_v33, %v5184_v17  ;;  %v2553_v19 = vsel %vm1327_vm7, %v2551_v5, %v10291_v46  ;;  %v3013_v43 = vsel %vm2213_vm9, %v3011_v7, %v10274_v41  ;;  %v2408_v1 = vadd.f32 %v8119_v40, %v10160_v51  ;;  %v10326_v58 = vld [vmem:[#allocation3 + $0x2b0] sm:$0xff]  ;;  %v3923_v5 = vld [vmem:[#allocation3 + $0x218] sm:$0xfc] }
 0x3dd   : > { %v5186_v45 = vsel %vm5164_vm0, %v5119_v4, %v5185_v3  ;;  %3812 = vrot.lane.b32.xlu2 %v3745_v26, %s8205_s9  ;;  %v2283_v39 = vsel %vm2213_vm9, %v10274_v41, %v2282_v27  ;;  %v2554_v51 = vrot.slane %v2449_v52, 2  ;;  %v4037_v57 = vrot.slane %v3923_v5, 2 }
 0x3de   : > { %5227 = vst.msk [vmem:[#allocation4 + $0x41] sm:$0xff] %vm1992_vm3, %v5186_v45  ;;  %v10289_v10 = vpop.permute.xlu0 %3341  ;;  %v2680_v4 = vadd.f32 %v10183_v12, %v2408_v1  ;;  %v4038_v40 = vrot.slane %v10329_v2, 2  ;;  %v10356_v5 = vrot.slane %v10326_v58, 2 }
 0x3df   : > { %2346 = vrot.lane.b32.xlu1 %v2281_v24, %s8199_s20  ;;  %v3285_v24 = vsel %vm1327_vm7, %v3283_v61, %v10291_v46 }
 0x3e0   : > { %v2873_v3 = vadd.f32 %v10269_v42, %v2680_v4  ;;  %v2913_v42 = vld [vmem:[#allocation3 + $0x2a0] sm:$0xfe] }
 0x3e1   : > { %v3016_v7 = vrot.slane %v2913_v42, 1 }
 0x3e2   : > { %v10297_v8 = vpop.permute.xlu2 %2610  ;;  %v3340_v15 = vpop.permute.xlu1 %3339  ;;  %v3145_v26 = vadd.f32 %v10242_v28, %v2873_v3  ;;  %v2912_v28 = vld [vmem:[#allocation3 + $0x290] sm:$0x1]  ;;  %v3185_v3 = vld [vmem:[#allocation3 + $0x2a0] sm:$0xfc] }
 0x3e3   : > { %2809 = vrot.lane.b32.xlu0 %v3455_v20, %s8201_s22  ;;  %v2721_v20 = vld [vmem:[#allocation3 + $0x2a0] sm:$0xff]  ;;  %v3014_v61 = vrot.slane %v2912_v28, 1 }
 0x3e4   : > { %v3417_v21 = vadd.f32 %v3340_v15, %v3145_v26  ;;  %v8121_v15 = vld [vmem:[#allocation3 + $0x1c0] sm:$0xff]  ;;  %v3288_v26 = vrot.slane %v3185_v3, 2  ;;  %v3925_v3 = vld [vmem:[#allocation3 + $0x238] sm:$0x3] }
 0x3e5   : > { %v5240_v23 = vld [vmem:[#allocation4 + $0x40] sm:$0xff]  ;;  %v5241_v31 = vld [vmem:[#allocation4 + $0x48] sm:$0x3]  ;;  %3079 = vrot.lane.b32.xlu2 %v3013_v43, %s8202_s23  ;;  %v2409_v4 = vadd.f32 %v8121_v15, %v10258_v56  ;;  %v3015_v56 = vsel %vm2213_vm9, %v10274_v41, %v3014_v61 }
 0x3e6   : > { %v5284_v25 = vrot.slane %v5240_v23, 2  ;;  %v5285_v48 = vrot.slane %v5240_v23, 4  ;;  %v5286_v47 = vrot.slane %v5240_v23, 6  ;;  %5339 = vst [vmem:[#allocation1 + $0x20] ss:$4 sm:$0xff] %v5240_v23 }
 0x3e7   : > { %5345 = vst [vmem:[#allocation1] ss:$4 sm:$0xff] %v5241_v31  ;;  %2618 = vrot.lane.b32.xlu1 %v2553_v19, %s8200_s21  ;;  %v2555_v31 = vsel %vm1327_vm7, %v10291_v46, %v2554_v51  ;;  %v8122_v51 = vld [vmem:[#allocation3 + $0x190] sm:$0xff] }
 0x3e8   : > { %5340 = vst [vmem:[#allocation1 + $0x21] ss:$4 sm:$0xff] %v5284_v25  ;;  %v10334_v25 = vrot.slane %v10326_v58, 1 }
 0x3e9   : > { %5341 = vst [vmem:[#allocation1 + $0x22] ss:$4 sm:$0xff] %v5285_v48  ;;  %v10305_v9 = vpop.permute.xlu0 %2608  ;;  %v3746_v48 = vrot.slane %v3647_v37, 1 }
 0x3ea   : > { %5342 = vst [vmem:[#allocation1 + $0x23] ss:$4 sm:$0xff] %v5286_v47  ;;  %v10309_v33 = vpop.permute.xlu2 %2340  ;;  %v8120_v47 = vld [vmem:[#allocation3 + $0x180] sm:$0xff]  ;;  %v3018_v1 = vsel %vm2213_vm9, %v3016_v7, %v10334_v25 }
 0x3eb   : > { %2811 = vrot.lane.b32.xlu0 %v2721_v20, %s8201_s22  ;;  %v2406_v19 = vadd.f32 %v8120_v47, %v10063_v59 }
 0x3ec   : > { %v2607_v17 = vpop.permute.xlu1 %2606 }
 0x3ed   : > { %3351 = vrot.lane.b32.xlu2 %v3285_v24, %s8203_s29  ;;  %v2678_v43 = vadd.f32 %v10084_v62, %v2406_v19  ;;  %v3184_v24 = vld [vmem:[#allocation3 + $0x290] sm:$0x3] }
 0x3ef   : > { %2348 = vrot.lane.b32.xlu1 %v2283_v39, %s8199_s20  ;;  %v3747_v39 = vsel %vm2213_vm9, %v10274_v41, %v3746_v48  ;;  %v2871_v59 = vadd.f32 %v10137_v13, %v2678_v43  ;;  %v4039_v13 = vsel %vm1327_vm7, %v4037_v57, %v4038_v40  ;;  %v3920_v43 = vld [vmem:[#allocation3 + $0x1e8] sm:$0xfc] }
 0x3f1   : > { %v10316_v45 = vld.sshfl [vmem:[#allocation1 + $0x20] sm:$0xff pattern:$0x73625140]  ;;  %v3533_v12 = vpop.permute.xlu0 %3532  ;;  %v3143_v42 = vadd.f32 %v10237_v49, %v2871_v59 }
 0x3f2   : > { %7950 = vmatmul.msk.f32.gmra.mxu2 %vm1992_vm3, %v10316_v45  ;;  %7963 = vmatmul.msk.f32.gmra.mxu3 %vm1992_vm3, %v10316_v45  ;;  %v3805_v23 = vpop.permute.xlu2 %3804  ;;  %v3610_v27 = vadd.f32 %v3533_v12, %v3417_v21  ;;  %v2407_v12 = vadd.f32 %v8122_v51, %v10150_v55  ;;  %v2681_v55 = vadd.f32 %v10207_v30, %v2409_v4 }
 0x3f3   : > { %3544 = vrot.lane.b32.xlu0 %v2721_v20, %s8204_s8  ;;  %v3415_v41 = vadd.f32 %v10178_v29, %v3143_v42  ;;  %v3290_v21 = vsel %vm1327_vm7, %v3288_v26, %v10356_v5 }
 0x3f4   : > { %v3070_v20 = vpop.permute.xlu1 %3069  ;;  %v3882_v52 = vadd.f32 %v3805_v23, %v3610_v27  ;;  %v3286_v23 = vrot.slane %v3184_v24, 2  ;;  %v2679_v19 = vadd.f32 %v10078_v6, %v2407_v12  ;;  %v2874_v27 = vadd.f32 %v10221_v14, %v2681_v55  ;;  %v3186_v6 = vld [vmem:[#allocation3 + $0x2c0] sm:$0x3] }
 0x3f5   : > { %3814 = vrot.lane.b32.xlu2 %v3747_v39, %s8205_s9  ;;  %v4032_v39 = vrot.slane %v3920_v43, 2  ;;  %v3608_v15 = vadd.f32 %v10193_v36, %v3415_v41  ;;  %v3291_v4 = vrot.slane %v3186_v6, 2  ;;  %v3648_v24 = vld [vmem:[#allocation3 + $0x2a0] sm:$0xfe] }
 0x3f6   : > { %v4122_v48 = vadd.f32 %v4039_v13, %v3882_v52  ;;  %v3287_v28 = vsel %vm1327_vm7, %v10291_v46, %v3286_v23  ;;  %v3146_v29 = vadd.f32 %v3070_v20, %v2874_v27  ;;  %v2872_v46 = vadd.f32 %v10139_v54, %v2679_v19 }
 0x3f7   : > { %2620 = vrot.lane.b32.xlu1 %v2555_v31, %s8200_s21  ;;  %v8123_v31 = vld [vmem:[#allocation3 + $0x1e0] sm:$0xff]  ;;  %v3292_v36 = vsel %vm1327_vm7, %v10356_v5, %v3291_v4  ;;  %v4040_v13 = vrot.slane %v3925_v3, 2 }
 0x3f8   : > { %v2410_v7 = vadd.f32 %v8123_v31, %v10265_v11  ;;  %v3921_v11 = vld [vmem:[#allocation3 + $0x1f8] sm:$0xff]  ;;  %v4158_v30 = vadd.f32 %v10200_v22, %v4122_v48  ;;  %v3144_v20 = vadd.f32 %v10246_v60, %v2872_v46  ;;  %v3418_v12 = vadd.f32 %v10289_v10, %v3146_v29 }
 0x3f9   : > { %v2800_v62 = vpop.permute.xlu0 %2799  ;;  %v4033_v61 = vrot.slane %v3921_v11, 2  ;;  %v4041_v41 = vsel %vm1327_vm7, %v4038_v40, %v4040_v13  ;;  %v2914_v13 = vld [vmem:[#allocation3 + $0x2c0] sm:$0x1] }
 0x3fa   : > { %v3072_v37 = vpop.permute.xlu2 %3071  ;;  %v2682_v47 = vadd.f32 %v2607_v17, %v2410_v7  ;;  %v4190_v52 = vmax.f32 %v4158_v30, 0.0  ;;  %v3416_v60 = vadd.f32 %v10166_v34, %v3144_v20  ;;  %v3611_v55 = vadd.f32 %v10284_v18, %v3418_v12 }
 0x3fb   : > { %3083 = vrot.lane.b32.xlu0 %v3018_v1, %s8202_s23  ;;  %v4034_v54 = vsel %vm1327_vm7, %v4032_v39, %v4033_v61 }
 0x3fc   : > { %v10361_v49 = vpop.permute.xlu1 %2336  ;;  %v2875_v57 = vadd.f32 %v2800_v62, %v2682_v47  ;;  %v4290_v26 = vrot.slane %v4190_v52, 2  ;;  %v4291_v23 = vrot.slane %v4190_v52, 4  ;;  %v4292_v7 = vrot.slane %v4190_v52, 6 }
 0x3fd   : > { %3353 = vrot.lane.b32.xlu2 %v3287_v28, %s8203_s29  ;;  %v3609_v47 = vadd.f32 %v10281_v38, %v3416_v60 }
 0x3fe   : > { %v3147_v1 = vadd.f32 %v3072_v37, %v2875_v57  ;;  %v3748_v37 = vrot.slane %v3648_v24, 1  ;;  %v7890_v43 = vrot.slane %v4290_v26, 9  ;;  %v7891_v34 = vrot.slane %v4291_v23, 9 }
 0x3ff   : > { %3081 = vrot.lane.b32.xlu1 %v3015_v56, %s8202_s23  ;;  %v3922_v56 = vld [vmem:[#allocation3 + $0x208] sm:$0x3]  ;;  %v7892_v6 = vrot.slane %v4292_v7, 9 }
 0x400   : > { %v4035_v48 = vrot.slane %v3922_v56, 2  ;;  %v3750_v28 = vsel %vm2213_vm9, %v3748_v37, %v10334_v25  ;;  %v4885_v3 = vmax.f32 %v4290_v26, %v7890_v43  ;;  %v4886_v24 = vmax.f32 %v4291_v23, %v7891_v34 }
 0x401   : > { %v4887_v37 = vmax.f32 %v4292_v7, %v7892_v6 }
 0x402   : > { %v10372_v17 = vpop.permute.xlu0 %2801  ;;  %v3344_v59 = vpop.permute.xlu2 %3343  ;;  %v4036_v2 = vsel %vm1327_vm7, %v4033_v61, %v4035_v48  ;;  %v2161_v61 = vld [vmem:[#allocation3 + $0x2a0] sm:$0xfe] }
 0x403   : > { %3355 = vrot.lane.b32.xlu0 %v3290_v21, %s8203_s29  ;;  %v10377_v14 = vadd.f32 %v3344_v59, %v3147_v1 }
 0x404   : > { %v3801_v62 = vpop.permute.xlu1 %3800 }
 0x405   : > { %v3880_v51 = vadd.f32 %v3801_v62, %v3608_v15  ;;  %3546 = vrot.lane.b32.xlu2 %v10326_v58, %s8204_s8 }
 0x407   : > { %2813 = vrot.lane.b32.xlu1 %v10326_v58, %s8201_s22  ;;  %v4120_v42 = vadd.f32 %v4034_v54, %v3880_v51  ;;  %v7889_v58 = vrot.slane %v4190_v52, 9 }
 0x409   : > { %v4156_v10 = vadd.f32 %v10200_v22, %v4120_v42  ;;  %v4884_v15 = vmax.f32 %v4190_v52, %v7889_v58 }
 0x40a   : > { %v10387_v31 = vpop.permute.xlu0 %2338  ;;  %v3807_v21 = vpop.permute.xlu2 %3806 }
 0x40b   : > { %3357 = vrot.lane.b32.xlu0 %v3292_v36, %s8203_s29  ;;  %v4188_v19 = vmax.f32 %v4156_v10, 0.0  ;;  %v3883_v11 = vadd.f32 %v3807_v21, %v3611_v55  ;;  %v2284_v21 = vrot.slane %v2161_v61, 1 }
 0x40c   : > { %v3803_v30 = vpop.permute.xlu1 %3802 }
 0x40d   : > { %v4284_v18 = vrot.slane %v4188_v19, 2  ;;  %v4285_v27 = vrot.slane %v4188_v19, 4  ;;  %v4286_v57 = vrot.slane %v4188_v19, 6  ;;  %v7881_v38 = vrot.slane %v4188_v19, 9 }
 0x40e   : > { %v4123_v29 = vadd.f32 %v4041_v41, %v3883_v11  ;;  %v3881_v40 = vadd.f32 %v3803_v30, %v3609_v47 }
 0x40f   : > { %3816 = vrot.lane.b32.xlu1 %v3750_v28, %s8205_s9  ;;  %v7882_v1 = vrot.slane %v4284_v18, 9  ;;  %v7883_v39 = vrot.slane %v4285_v27, 9  ;;  %v7884_v46 = vrot.slane %v4286_v57, 9  ;;  %v4876_v59 = vmax.f32 %v4188_v19, %v7881_v38 }
 0x410   : > { %v4159_v4 = vadd.f32 %v10200_v22, %v4123_v29  ;;  %v4121_v62 = vadd.f32 %v4036_v2, %v3881_v40  ;;  %v3019_v28 = vrot.slane %v2914_v13, 1  ;;  %v2450_v2 = vld [vmem:[#allocation3 + $0x2a0] sm:$0xfc] }
 0x411   : > { %v4877_v20 = vmax.f32 %v4284_v18, %v7882_v1  ;;  %v4878_v51 = vmax.f32 %v4285_v27, %v7883_v39  ;;  %v4972_v54 = vmax.f32 %v4876_v59, %v4884_v15  ;;  %v4879_v56 = vmax.f32 %v4286_v57, %v7884_v46 }
 0x412   : > { %v10403_v12 = vpop.permute.xlu0 %3075  ;;  %v4191_v42 = vmax.f32 %v4159_v4, 0.0  ;;  %v4157_v36 = vadd.f32 %v10200_v22, %v4121_v62  ;;  %v10406_v52 = vpop.permute.xlu2 %3073  ;;  %v2286_v62 = vsel %vm2213_vm9, %v2284_v21, %v10334_v25 }
 0x413   : > { %v4973_v60 = vmax.f32 %v4877_v20, %v4885_v3  ;;  %v4974_v10 = vmax.f32 %v4878_v51, %v4886_v24  ;;  %v5120_v58 = vperm.slane %v4972_v54, 0  ;;  %v4975_v7 = vmax.f32 %v4879_v56, %v4887_v37  ;;  %2350 = vrot.lane.b32.xlu0 %v2286_v62, %s8199_s20 }
 0x414   : > { %v4293_v55 = vrot.slane %v4191_v42, 2  ;;  %v4294_v48 = vrot.slane %v4191_v42, 4  ;;  %v4295_v26 = vrot.slane %v4191_v42, 6  ;;  %v7893_v23 = vrot.slane %v4191_v42, 9  ;;  %v10408_v47 = vpop.permute.xlu1 %2612 }
 0x415   : > { %v5121_v19 = vperm.slane %v4973_v60, 0  ;;  %v4189_v41 = vmax.f32 %v4157_v36, 0.0  ;;  %v5122_v57 = vperm.slane %v4974_v10, 0  ;;  %v3020_v3 = vsel %vm2213_vm9, %v10334_v25, %v3019_v28  ;;  %v2162_v36 = vld [vmem:[#allocation3 + $0x2c0] sm:$0x1] }
 0x416   : > { %v7894_v43 = vrot.slane %v4293_v55, 9  ;;  %v7895_v34 = vrot.slane %v4294_v48, 9  ;;  %v7896_v11 = vrot.slane %v4295_v26, 9  ;;  %v4888_v6 = vmax.f32 %v4191_v42, %v7893_v23  ;;  %3085 = vrot.lane.b32.xlu2 %v3020_v3, %s8202_s23  ;;  %v3649_v42 = vld [vmem:[#allocation3 + $0x2c0] sm:$0x1]  ;;  %v8124_v3 = vld [vmem:[#allocation3 + $0x210] sm:$0xff] }
 0x417   : > { %v4287_v30 = vrot.slane %v4189_v41, 2  ;;  %v4288_v18 = vrot.slane %v4189_v41, 4  ;;  %v4289_v27 = vrot.slane %v4189_v41, 6  ;;  %v5187_v38 = vsel %vm5152_vm10, %v5121_v19, %v5120_v58 }
 0x418   : > { %v4889_v29 = vmax.f32 %v4293_v55, %v7894_v43  ;;  %v4890_v40 = vmax.f32 %v4294_v48, %v7895_v34  ;;  %v7885_v1 = vrot.slane %v4189_v41, 9  ;;  %v4891_v15 = vmax.f32 %v4295_v26, %v7896_v11 }
 0x419   : > { %v7886_v39 = vrot.slane %v4287_v30, 9  ;;  %v7887_v46 = vrot.slane %v4288_v18, 9  ;;  %v7888_v4 = vrot.slane %v4289_v27, 9  ;;  %v2556_v54 = vrot.slane %v2450_v2, 2 }
 0x41a   : > { %v10411_v59 = vpop.permute.xlu0 %3347  ;;  %v4880_v24 = vmax.f32 %v4189_v41, %v7885_v1  ;;  %v10419_v61 = vpop.permute.xlu2 %3345  ;;  %v5188_v13 = vsel %vm5154_vm11, %v5122_v57, %v5187_v38  ;;  %v5123_v26 = vperm.slane %v4975_v7, 0  ;;  %v3751_v19 = vrot.slane %v3649_v42, 1  ;;  %v2451_v38 = vld [vmem:[#allocation3 + $0x2c0] sm:$0x3]  ;;  %v2452_v42 = vld [vmem:[#allocation3 + $0x2d0] sm:$0xfc] }
 0x41b   : > { %v4881_v20 = vmax.f32 %v4287_v30, %v7886_v39  ;;  %v4882_v51 = vmax.f32 %v4288_v18, %v7887_v46  ;;  %v4883_v37 = vmax.f32 %v4289_v27, %v7888_v4  ;;  %v2558_v48 = vsel %vm1327_vm7, %v2556_v54, %v10356_v5  ;;  %v10443_v39 = vld [vmem:[#allocation3 + $0x2d0] sm:$0xff] }
 0x41c   : > { %v2804_v56 = vpop.permute.xlu1 %2803  ;;  %v4976_v60 = vmax.f32 %v4880_v24, %v4888_v6  ;;  %2622 = vrot.lane.b32.xlu1 %v2558_v48, %s8200_s21  ;;  %v2287_v41 = vrot.slane %v2162_v36, 1  ;;  %v5189_v43 = vsel %vm5156_vm12, %v5123_v26, %v5188_v13  ;;  %v3752_v27 = vsel %vm2213_vm9, %v10334_v25, %v3751_v19  ;;  %v10435_v6 = vld [vmem:[#allocation3 + $0x2e0] sm:$0xff] }
 0x41d   : > { %v4977_v10 = vmax.f32 %v4881_v20, %v4889_v29  ;;  %v4978_v55 = vmax.f32 %v4882_v51, %v4890_v40  ;;  %v4979_v23 = vmax.f32 %v4883_v37, %v4891_v15  ;;  %3818 = vrot.lane.b32.xlu0 %v3752_v27, %s8205_s9  ;;  %v3650_v29 = vld [vmem:[#allocation3 + $0x2d0] sm:$0xfe]  ;;  %v10448_v15 = vrot.slane %v10435_v6, 1 }
 0x41e   : > { %v5124_v21 = vperm.slane %v4976_v60, 0  ;;  %v2288_v7 = vsel %vm2213_vm9, %v10334_v25, %v2287_v41  ;;  %v2559_v25 = vrot.slane %v2451_v38, 2  ;;  %v3753_v46 = vrot.slane %v3650_v29, 1 }
 0x41f   : > { %v5125_v28 = vperm.slane %v4977_v10, 0  ;;  %v5126_v58 = vperm.slane %v4978_v55, 0  ;;  %v5127_v30 = vperm.slane %v4979_v23, 0  ;;  %2352 = vrot.lane.b32.xlu2 %v2288_v7, %s8199_s20  ;;  %v2412_v24 = vadd.f32 %v8124_v3, %v10387_v31  ;;  %v8125_v7 = vld [vmem:[#allocation3 + $0x1f0] sm:$0xff] }
 0x420   : > { %v5190_v34 = vsel %vm5158_vm13, %v5124_v21, %v5189_v43  ;;  %v2560_v20 = vsel %vm1327_vm7, %v10356_v5, %v2559_v25  ;;  %v3755_v51 = vsel %vm2213_vm9, %v3753_v46, %v10448_v15  ;;  %v2561_v48 = vrot.slane %v2452_v42, 2  ;;  %v2915_v21 = vld [vmem:[#allocation3 + $0x2d0] sm:$0xfe]  ;;  %v3926_v46 = vld [vmem:[#allocation3 + $0x248] sm:$0xfc] }
 0x421   : > { %v5191_v18 = vsel %vm5160_vm14, %v5125_v28, %v5190_v34  ;;  %v2684_v5 = vadd.f32 %v10297_v8, %v2412_v24  ;;  %v10466_v26 = vrot.slane %v10435_v6, 2  ;;  %v2164_v8 = vld [vmem:[#allocation3 + $0x2f0] sm:$0x1]  ;;  %v3187_v3 = vld [vmem:[#allocation3 + $0x2d0] sm:$0xfc]  ;;  %v4042_v42 = vrot.slane %v3926_v46, 2 }
 0x422   : > { %v2343_v11 = vpop.permute.xlu0 %2342  ;;  %v5192_v57 = vsel %vm5162_vm15, %v5126_v58, %v5191_v18  ;;  %v10437_v2 = vpop.permute.xlu2 %3540  ;;  %v2292_v34 = vrot.slane %v2164_v8, 1  ;;  %v10482_v18 = vld [vmem:[#allocation3 + $0x288] sm:$0xff]  ;;  %v2916_v24 = vld [vmem:[#allocation3 + $0x2f0] sm:$0x1] }
 0x423   : > { %v5193_v40 = vsel %vm5164_vm0, %v5127_v30, %v5192_v57  ;;  %v2414_v4 = vadd.f32 %v10154_v16, %v2343_v11  ;;  %v2877_v23 = vadd.f32 %v2804_v56, %v2684_v5  ;;  %v2563_v41 = vsel %vm1327_vm7, %v2561_v48, %v10466_v26  ;;  %v2163_v56 = vld [vmem:[#allocation3 + $0x2d0] sm:$0xfe]  ;;  %v3929_v30 = vld [vmem:[#allocation3 + $0x278] sm:$0xfc] }
 0x424   : > { %v10440_v1 = vpop.permute.xlu1 %3536  ;;  %5228 = vst.msk [vmem:[#allocation4 + $0x51] sm:$0xff] %vm1992_vm3, %v5193_v40  ;;  %3548 = vrot.lane.b32.xlu1 %v10443_v39, %s8204_s8  ;;  %v3021_v11 = vrot.slane %v2915_v21, 1  ;;  %v2411_v57 = vadd.f32 %v8125_v7, %v10361_v49  ;;  %v4047_v40 = vrot.slane %v3929_v30, 2  ;;  %v4048_v25 = vrot.slane %v10482_v18, 2  ;;  %v3928_v21 = vld [vmem:[#allocation3 + $0x268] sm:$0x3] }
 0x425   : > { %2624 = vrot.lane.b32.xlu0 %v2560_v20, %s8200_s21  ;;  %v3149_v58 = vadd.f32 %v10403_v12, %v2877_v23  ;;  %v2289_v12 = vrot.slane %v2163_v56, 1  ;;  %v2293_v49 = vsel %vm2213_vm9, %v10448_v15, %v2292_v34  ;;  %v8126_v7 = vld [vmem:[#allocation3 + $0x220] sm:$0xff] }
 0x427   : > { %3820 = vrot.lane.b32.xlu2 %v3755_v51, %s8205_s9  ;;  %v3421_v38 = vadd.f32 %v10411_v59, %v3149_v58  ;;  %v3023_v59 = vsel %vm2213_vm9, %v3021_v11, %v10448_v15  ;;  %v2683_v51 = vadd.f32 %v10305_v9, %v2411_v57  ;;  %v3651_v9 = vld [vmem:[#allocation3 + $0x2f0] sm:$0x1] }
 0x429   : > { %v2876_v23 = vadd.f32 %v10372_v17, %v2683_v51  ;;  %v2413_v17 = vadd.f32 %v8126_v7, %v10309_v33  ;;  %v10540_v51 = vld [vmem:[#allocation3 + $0x310] sm:$0xff] }
 0x42a   : > { %v2615_v62 = vpop.permute.xlu0 %2614  ;;  %v2808_v36 = vpop.permute.xlu2 %2807 }
 0x42b   : > { %v2686_v54 = vadd.f32 %v2615_v62, %v2414_v4  ;;  %v5242_v13 = vld [vmem:[#allocation4 + $0x50] sm:$0xff]  ;;  %v5243_v37 = vld [vmem:[#allocation4 + $0x58] sm:$0x3]  ;;  %v3614_v62 = vadd.f32 %v10437_v2, %v3421_v38  ;;  %v3612_v2 = vadd.f32 %v10440_v1, %v10377_v14  ;;  %v3756_v1 = vrot.slane %v3651_v9, 1 }
 0x42c   : > { %v10460_v60 = vpop.permute.xlu1 %2805  ;;  %v5287_v31 = vrot.slane %v5242_v13, 2  ;;  %v5288_v10 = vrot.slane %v5242_v13, 4  ;;  %v5289_v55 = vrot.slane %v5242_v13, 6  ;;  %5346 = vst [vmem:[#allocation1 + $0x1] ss:$4 sm:$0xff] %v5242_v13  ;;  %2815 = vrot.lane.b32.xlu1 %v10443_v39, %s8201_s22  ;;  %v10495_v4 = vld [vmem:[#allocation3 + $0x258] sm:$0xff]  ;;  %v2291_v13 = vsel %vm2213_vm9, %v2289_v12, %v10448_v15 }
 0x42d   : > { %v10458_v16 = vadd.f32 %v2808_v36, %v2686_v54  ;;  %5350 = vst [vmem:[#allocation1 + $0x21] ss:$4 sm:$0xff] %v5243_v37  ;;  %3550 = vrot.lane.b32.xlu0 %v10435_v6, %s8204_s8  ;;  %v4043_v36 = vrot.slane %v10495_v4, 2  ;;  %v4049_v37 = vsel %vm1327_vm7, %v4047_v40, %v4048_v25  ;;  %v3148_v58 = vadd.f32 %v10406_v52, %v2876_v23  ;;  %v3188_v38 = vld [vmem:[#allocation3 + $0x2f0] sm:$0x3] }
 0x42e   : > { %5347 = vst [vmem:[#allocation1 + $0x2] ss:$4 sm:$0xff] %v5287_v31  ;;  %v3293_v31 = vrot.slane %v3187_v3, 2  ;;  %v4045_v40 = vrot.slane %v3928_v21, 2  ;;  %v2685_v46 = vadd.f32 %v10408_v47, %v2413_v17  ;;  %v3757_v4 = vsel %vm2213_vm9, %v10448_v15, %v3756_v1  ;;  %v2453_v3 = vld [vmem:[#allocation3 + $0x2f0] sm:$0x3] }
 0x42f   : > { %5348 = vst [vmem:[#allocation1 + $0x3] ss:$4 sm:$0xff] %v5288_v10  ;;  %2626 = vrot.lane.b32.xlu2 %v2563_v41, %s8200_s21  ;;  %v3024_v10 = vrot.slane %v2916_v24, 1  ;;  %v4044_v14 = vsel %vm1327_vm7, %v4042_v42, %v4043_v36  ;;  %v3420_v12 = vadd.f32 %v10419_v61, %v3148_v58  ;;  %v2564_v42 = vrot.slane %v2453_v3, 2  ;;  %v3931_v58 = vld [vmem:[#allocation3 + $0x298] sm:$0x3] }
 0x430   : > { %5349 = vst [vmem:[#allocation1 + $0x20] ss:$4 sm:$0xff] %v5289_v55  ;;  %v3295_v56 = vsel %vm1327_vm7, %v3293_v31, %v10466_v26  ;;  %v2878_v61 = vadd.f32 %v10460_v60, %v2685_v46  ;;  %v2918_v46 = vld [vmem:[#allocation3 + $0x320] sm:$0x1] }
 0x431   : > { %v3025_v34 = vsel %vm2213_vm9, %v10448_v15, %v3024_v10  ;;  %v2917_v15 = vld [vmem:[#allocation3 + $0x300] sm:$0xfe]  ;;  %v2565_v21 = vsel %vm1327_vm7, %v10466_v26, %v2564_v42 }
 0x432   : > { %v10468_v19 = vpop.permute.xlu0 %3077  ;;  %v10475_v28 = vpop.permute.xlu2 %3542 }
 0x434   : > { %v10478_v43 = vpop.permute.xlu1 %3538  ;;  %2817 = vrot.lane.b32.xlu1 %v10435_v6, %s8201_s22 }
 0x435   : > { %2356 = vrot.lane.b32.xlu0 %v2293_v49, %s8199_s20  ;;  %v3613_v49 = vadd.f32 %v10478_v43, %v3420_v12  ;;  %v4046_v43 = vsel %vm1327_vm7, %v4043_v36, %v4045_v40 }
 0x436   : > { %v10484_v27 = vld.sshfl [vmem:[#allocation1] sm:$0xff pattern:$0x73625140] }
 0x437   : > { %7951 = vmatmul.msk.f32.gmra.mxu2 %vm1992_vm3, %v10484_v27  ;;  %7964 = vmatmul.msk.f32.gmra.mxu3 %vm1992_vm3, %v10484_v27 }
 0x438   : > { %3087 = vrot.lane.b32.xlu2 %v3023_v59, %s8202_s23 }
 0x43a   : > { %v10492_v29 = vpop.permute.xlu0 %3349  ;;  %v3813_v20 = vpop.permute.xlu2 %3812 }
 0x43b   : > { %v3886_v54 = vadd.f32 %v3813_v20, %v3614_v62 }
 0x43c   : > { %2354 = vrot.lane.b32.xlu1 %v2291_v13, %s8199_s20 }
 0x43d   : > { %v4126_v55 = vadd.f32 %v4049_v37, %v3886_v54  ;;  %3359 = vrot.lane.b32.xlu0 %v3295_v56, %s8203_s29  ;;  %v8127_v37 = vld [vmem:[#allocation3 + $0x250] sm:$0xff] }
 0x43f   : > { %v4162_v41 = vadd.f32 %v10200_v22, %v4126_v55  ;;  %v3150_v55 = vadd.f32 %v10468_v19, %v2878_v61 }
 0x440   : > { %3089 = vrot.lane.b32.xlu2 %v3025_v34, %s8202_s23 }
 0x441   : > { %v3809_v5 = vpop.permute.xlu1 %3808  ;;  %v10522_v11 = vmax.f32 %v4162_v41, 0.0 }
 0x442   : > { %v3884_v48 = vadd.f32 %v3809_v5, %v3612_v2  ;;  %v3080_v52 = vpop.permute.xlu2 %3079  ;;  %v3026_v5 = vrot.slane %v2917_v15, 1 }
 0x443   : > { %v3151_v33 = vadd.f32 %v3080_v52, %v10458_v16  ;;  %v4302_v59 = vrot.slane %v10522_v11, 2  ;;  %v4303_v54 = vrot.slane %v10522_v11, 4  ;;  %v2725_v16 = vld [vmem:[#allocation3 + $0x300] sm:$0xff]  ;;  %v7905_v36 = vrot.slane %v10522_v11, 9 }
 0x444   : > { %v4124_v8 = vadd.f32 %v4044_v14, %v3884_v48  ;;  %3822 = vrot.lane.b32.xlu1 %v3757_v4, %s8205_s9  ;;  %v10550_v48 = vrot.slane %v10540_v51, 1  ;;  %v4050_v52 = vrot.slane %v3931_v58, 2  ;;  %v4304_v12 = vrot.slane %v10522_v11, 6 }
 0x445   : > { %v2345_v30 = vpop.permute.xlu0 %2344  ;;  %v7906_v2 = vrot.slane %v4302_v59, 9  ;;  %v7907_v19 = vrot.slane %v4303_v54, 9 }
 0x446   : > { %v4160_v57 = vadd.f32 %v10200_v22, %v4124_v8  ;;  %v3296_v22 = vrot.slane %v3188_v38, 2  ;;  %v2415_v31 = vadd.f32 %v8127_v37, %v2345_v30  ;;  %v3422_v8 = vadd.f32 %v10492_v29, %v3150_v55  ;;  %v10564_v30 = vld [vmem:[%s11594_s2] ss:$0 sm:$0xff] }
 0x447   : > { %v4901_v56 = vmax.f32 %v4302_v59, %v7906_v2  ;;  %v4900_v29 = vmax.f32 %v10522_v11, %v7905_v36  ;;  %v4902_v40 = vmax.f32 %v4303_v54, %v7907_v19  ;;  %v3029_v11 = vrot.slane %v2918_v46, 1  ;;  %v10589_v36 = vld [vmem:[#allocation3 + $0x340] sm:$0xff] }
 0x448   : > { %v10532_v62 = vmax.f32 %v4160_v57, 0.0  ;;  %v3297_v13 = vsel %vm1327_vm7, %v10466_v26, %v3296_v22  ;;  %2819 = vrot.lane.b32.xlu2 %v2725_v16, %s8201_s22  ;;  %v3028_v26 = vsel %vm2213_vm9, %v3026_v5, %v10550_v48  ;;  %v3615_v4 = vadd.f32 %v10475_v28, %v3422_v8 }
 0x449   : > { %v3811_v24 = vpop.permute.xlu1 %3810  ;;  %3361 = vrot.lane.b32.xlu0 %v3297_v13, %s8203_s29  ;;  %v4051_v28 = vsel %vm1327_vm7, %v4048_v25, %v4050_v52  ;;  %v7908_v54 = vrot.slane %v4304_v12, 9  ;;  %v3030_v25 = vsel %vm2213_vm9, %v10550_v48, %v3029_v11 }
 0x44a   : > { %v4296_v47 = vrot.slane %v10532_v62, 2  ;;  %v3885_v20 = vadd.f32 %v3811_v24, %v3613_v49  ;;  %v4297_v9 = vrot.slane %v10532_v62, 4  ;;  %v3352_v23 = vpop.permute.xlu2 %3351  ;;  %v7897_v34 = vrot.slane %v10532_v62, 9  ;;  %v3652_v24 = vld [vmem:[#allocation3 + $0x300] sm:$0xfe] }
 0x44b   : > { %v10554_v1 = vadd.f32 %v3352_v23, %v3151_v33  ;;  %v4298_v33 = vrot.slane %v10532_v62, 6  ;;  %v3758_v2 = vrot.slane %v3652_v24, 1  ;;  %v3189_v24 = vld [vmem:[#allocation3 + $0x300] sm:$0xfc] }
 0x44c   : > { %v4125_v10 = vadd.f32 %v4046_v43, %v3885_v20  ;;  %v7898_v41 = vrot.slane %v4296_v47, 9  ;;  %2628 = vrot.lane.b32.xlu1 %v2565_v21, %s8200_s21  ;;  %v7899_v57 = vrot.slane %v4297_v9, 9  ;;  %v4892_v49 = vmax.f32 %v10532_v62, %v7897_v34 }
 0x44d   : > { %v2617_v60 = vpop.permute.xlu0 %2616  ;;  %v7900_v13 = vrot.slane %v4298_v33, 9 }
 0x44e   : > { %v2687_v14 = vadd.f32 %v2617_v60, %v2415_v31  ;;  %v4161_v7 = vadd.f32 %v10564_v30, %v4125_v10  ;;  %v4893_v38 = vmax.f32 %v4296_v47, %v7898_v41  ;;  %v4894_v61 = vmax.f32 %v4297_v9, %v7899_v57 }
 0x44f   : > { %v4980_v15 = vmax.f32 %v4892_v49, %v4900_v29  ;;  %v4903_v41 = vmax.f32 %v4304_v12, %v7908_v54  ;;  %v4895_v19 = vmax.f32 %v4298_v33, %v7900_v13  ;;  %v3764_v57 = vrot.slane %v10589_v36, 1 }
 0x450   : > { %v4981_v59 = vmax.f32 %v4893_v38, %v4901_v56  ;;  %v4193_v22 = vmax.f32 %v4161_v7, 0.0  ;;  %2821 = vrot.lane.b32.xlu2 %v10540_v51, %s8201_s22  ;;  %v4982_v42 = vmax.f32 %v4894_v61, %v4902_v40  ;;  %v3299_v13 = vrot.slane %v10540_v51, 2  ;;  %s7730_s22 = sshll.u32 %s269_s13, 2 }
 0x451   : > { %v2347_v17 = vpop.permute.xlu1 %2346  ;;  %3091 = vrot.lane.b32.xlu0 %v3028_v26, %s8202_s23  ;;  %v5128_v18 = vperm.slane %v4980_v15, 0  ;;  %v4983_v40 = vmax.f32 %v4895_v19, %v4903_v41  ;;  %v3190_v19 = vld [vmem:[#allocation3 + $0x320] sm:$0x3]  ;;  %s271_s16 = scalar_lea.vmem [#allocation8], %s7730_s22  ;;  %s8154_s22 = scalar_lea.hbm %s11599_s7, 8 }
 0x452   : > { %v3815_v20 = vpop.permute.xlu2 %3814  ;;  %v2416_v43 = vadd.f32 %v10235_v53, %v2347_v17  ;;  %v5129_v37 = vperm.slane %v4981_v59, 0  ;;  %v4299_v31 = vrot.slane %v4193_v22, 2  ;;  %v4300_v55 = vrot.slane %v4193_v22, 4  ;;  %v3654_v53 = vld [vmem:[#allocation3 + $0x330] sm:$0xfe] }
 0x453   : > { %v3887_v62 = vadd.f32 %v3815_v20, %v3615_v4  ;;  %v4301_v9 = vrot.slane %v4193_v22, 6  ;;  %v7901_v8 = vrot.slane %v4193_v22, 9  ;;  %v3763_v17 = vrot.slane %v3654_v53, 1 }
 0x454   : > { %3552 = vrot.lane.b32.xlu1 %v2725_v16, %s8204_s8  ;;  %v3760_v16 = vsel %vm2213_vm9, %v3758_v2, %v10550_v48  ;;  %v5194_v21 = vsel %vm5152_vm10, %v5129_v37, %v5128_v18  ;;  %v7902_v58 = vrot.slane %v4299_v31, 9  ;;  %v7903_v34 = vrot.slane %v4300_v55, 9 }
 0x455   : > { %v2810_v3 = vpop.permute.xlu0 %2809  ;;  %v4127_v10 = vadd.f32 %v4051_v28, %v3887_v62  ;;  %v7904_v7 = vrot.slane %v4301_v9, 9  ;;  %v4896_v4 = vmax.f32 %v4193_v22, %v7901_v8  ;;  %v3765_v28 = vsel %vm2213_vm9, %v3763_v17, %v3764_v57 }
 0x456   : > { %v10575_v47 = vadd.f32 %v2810_v3, %v2687_v14  ;;  %v5130_v14 = vperm.slane %v4982_v42, 0  ;;  %v4897_v20 = vmax.f32 %v4299_v31, %v7902_v58  ;;  %v4898_v15 = vmax.f32 %v4300_v55, %v7903_v34  ;;  %v3462_v55 = vld [vmem:[#allocation3 + $0x330] sm:$0xff] }
 0x457   : > { %v4163_v23 = vadd.f32 %v10564_v30, %v4127_v10  ;;  %v4899_v11 = vmax.f32 %v4301_v9, %v7904_v7  ;;  %v3298_v2 = vrot.slane %v3189_v24, 2  ;;  %v3653_v9 = vld [vmem:[#allocation3 + $0x320] sm:$0x1]  ;;  %v3301_v34 = vrot.slane %v3190_v19, 2 }
 0x458   : > { %3824 = vrot.lane.b32.xlu2 %v3760_v16, %s8205_s9  ;;  %v5195_v46 = vsel %vm5154_vm11, %v5130_v14, %v5194_v21  ;;  %v3761_v16 = vrot.slane %v3653_v9, 1 }
 0x459   : > { %v2619_v60 = vpop.permute.xlu1 %2618  ;;  %v4195_v56 = vmax.f32 %v4163_v23, 0.0  ;;  %3093 = vrot.lane.b32.xlu0 %v3030_v25, %s8202_s23  ;;  %v3300_v41 = vsel %vm1327_vm7, %v3298_v2, %v3299_v13 }
 0x45a   : > { %v10584_v5 = vadd.f32 %v2619_v60, %v2416_v43  ;;  %v5131_v43 = vperm.slane %v4983_v40, 0  ;;  %v3762_v7 = vsel %vm2213_vm9, %v10550_v48, %v3761_v16  ;;  %v10622_v17 = vpop.permute.xlu2 %3353 }
 0x45b   : > { %v4305_v38 = vrot.slane %v4195_v56, 2  ;;  %v4306_v26 = vrot.slane %v4195_v56, 4  ;;  %v4307_v52 = vrot.slane %v4195_v56, 6  ;;  %v7909_v12 = vrot.slane %v4195_v56, 9 }
 0x45c   : > { %3554 = vrot.lane.b32.xlu1 %v10540_v51, %s8204_s8  ;;  %v5196_v31 = vsel %vm5156_vm12, %v5131_v43, %v5195_v46 }
 0x45d   : > { %v10596_v29 = vpop.permute.xlu0 %2811  ;;  %v7910_v33 = vrot.slane %v4305_v38, 9  ;;  %v7911_v49 = vrot.slane %v4306_v26, 9  ;;  %v7912_v59 = vrot.slane %v4307_v52, 9  ;;  %v4904_v3 = vmax.f32 %v4195_v56, %v7909_v12 }
 0x45e   : > { %v2881_v9 = vadd.f32 %v10596_v29, %v10584_v5 }
 0x45f   : > { %v4905_v62 = vmax.f32 %v4305_v38, %v7910_v33  ;;  %v4906_v54 = vmax.f32 %v4306_v26, %v7911_v49  ;;  %v4907_v22 = vmax.f32 %v4307_v52, %v7912_v59  ;;  %v4984_v42 = vmax.f32 %v4896_v4, %v4904_v3  ;;  %v3655_v26 = vld [vmem:[#allocation3 + $0x350] sm:$0x1] }
 0x460   : > { %3556 = vrot.lane.b32.xlu2 %v3462_v55, %s8204_s8  ;;  %v3302_v38 = vsel %vm1327_vm7, %v3299_v13, %v3301_v34  ;;  %v3766_v48 = vrot.slane %v3655_v26, 1 }
 0x461   : > { %v10602_v61 = vpop.permute.xlu1 %2348  ;;  %v4985_v37 = vmax.f32 %v4897_v20, %v4905_v62  ;;  %v4986_v10 = vmax.f32 %v4898_v15, %v4906_v54  ;;  %v4987_v60 = vmax.f32 %v4899_v11, %v4907_v22  ;;  %v5132_v18 = vperm.slane %v4984_v42, 0  ;;  %3828 = vrot.lane.b32.xlu0 %v3765_v28, %s8205_s9  ;;  %v10649_v54 = vld [vmem:[#allocation3 + $0x2b8] sm:$0xff] }
 0x462   : > { %v10629_v59 = vpop.permute.xlu2 %3546  ;;  %v3767_v3 = vsel %vm2213_vm9, %v3764_v57, %v3766_v48  ;;  %v3932_v57 = vld [vmem:[#allocation3 + $0x2a8] sm:$0xfc]  ;;  %v4053_v43 = vrot.slane %v10649_v54, 2 }
 0x463   : > { %v5133_v25 = vperm.slane %v4985_v37, 0  ;;  %v5134_v23 = vperm.slane %v4986_v10, 0  ;;  %v5197_v53 = vsel %vm5158_vm13, %v5132_v18, %v5196_v31  ;;  %v5135_v51 = vperm.slane %v4987_v60, 0  ;;  %v2129_v37 = vld [vmem:[#allocation3 + $0x2a0] sm:$0xff] }
 0x464   : > { %3363 = vrot.lane.b32.xlu1 %v3300_v41, %s8203_s29  ;;  %v4052_v42 = vrot.slane %v3932_v57, 2  ;;  %v10660_v41 = vld [vmem:[#allocation3 + $0x2e8] sm:$0xff] }
 0x465   : > { %v3545_v14 = vpop.permute.xlu0 %3544  ;;  %v5198_v8 = vsel %vm5160_vm14, %v5133_v25, %v5197_v53  ;;  %v3935_v53 = vld [vmem:[#allocation3 + $0x2d8] sm:$0xfc]  ;;  %v4058_v19 = vrot.slane %v10660_v41, 2 }
 0x466   : > { %v5199_v21 = vsel %vm5162_vm15, %v5134_v23, %v5198_v8  ;;  %v3616_v22 = vadd.f32 %v3545_v14, %v10554_v1  ;;  %v4054_v18 = vsel %vm1327_vm7, %v4052_v42, %v4053_v43  ;;  %v4057_v8 = vrot.slane %v3935_v53, 2 }
 0x467   : > { %v5200_v58 = vsel %vm5164_vm0, %v5135_v51, %v5199_v21 }
 0x468   : > { %5229 = vst.msk [vmem:[#allocation4 + $0x61] sm:$0xff] %vm1992_vm3, %v5200_v58  ;;  %3558 = vrot.lane.b32.xlu2 %v10589_v36, %s8204_s8  ;;  %v4059_v5 = vsel %vm1327_vm7, %v4057_v8, %v4058_v19 }
 0x469   : > { %v10617_v56 = vpop.permute.xlu1 %2620  ;;  %3826 = vrot.lane.b32.xlu0 %v3762_v7, %s8205_s9 }
 0x46c   : > { %3365 = vrot.lane.b32.xlu1 %v3302_v38, %s8203_s29  ;;  %s8055_s29 = sshll.u32 %s8268_s28, 2  ;;  %s7661_s28 = sshll.u32 %s271_s16, 4  ;;  %s7662_s28 = int_to_ptr.vmem [resolvable:$true] %s7661_s28 }
 0x46d   : > { %v3084_v52 = vpop.permute.xlu0 %3083  ;;  %s7660_s15 = scalar_lea.hbm %s11599_s7, %s8055_s29 }
 0x46e   : > { %v3153_v1 = vadd.f32 %v3084_v52, %v2881_v9 }
 0x46f   : > { %v5244_v12 = vld [vmem:[#allocation4 + $0x60] sm:$0xff]  ;;  %v5245_v40 = vld [vmem:[#allocation4 + $0x68] sm:$0x3] }
 0x470   : > { %v5290_v46 = vrot.slane %v5244_v12, 2  ;;  %v5291_v4 = vrot.slane %v5244_v12, 4  ;;  %v5292_v33 = vrot.slane %v5244_v12, 6  ;;  %5351 = vst [vmem:[#allocation1 + $0x22] ss:$4 sm:$0xff] %v5244_v12  ;;  %v10643_v11 = vpop.permute.xlu2 %3085 }
 0x471   : > { %5357 = vst [vmem:[#allocation1 + $0x2] ss:$4 sm:$0xff] %v5245_v40  ;;  %v3082_v49 = vpop.permute.xlu1 %3081 }
 0x472   : > { %5352 = vst [vmem:[#allocation1 + $0x23] ss:$4 sm:$0xff] %v5290_v46  ;;  %v3152_v48 = vadd.f32 %v3082_v49, %v10575_v47 }
 0x473   : > { %5355 = vst [vmem:[#allocation1] ss:$4 sm:$0xff] %v5291_v4 }
 0x474   : > { %5356 = vst [vmem:[#allocation1 + $0x1] ss:$4 sm:$0xff] %v5292_v33  ;;  %3830 = vrot.lane.b32.xlu1 %v3767_v3, %s8205_s9  ;;  %v3424_v9 = vadd.f32 %v10622_v17, %v3152_v48 }
 0x475   : > { %v3356_v24 = vpop.permute.xlu0 %3355 }
 0x476   : > { %v3425_v51 = vadd.f32 %v3356_v24, %v3153_v1  ;;  %v3617_v17 = vadd.f32 %v10629_v59, %v3424_v9 }
 0x479   : > { %v10635_v20 = vld.sshfl [vmem:[#allocation1 + $0x20] sm:$0xff pattern:$0x73625140]  ;;  %v10641_v15 = vpop.permute.xlu1 %2813  ;;  %v10647_v62 = vpop.permute.xlu2 %2352 }
 0x47a   : > { %7952 = vmatmul.msk.f32.gmra.mxu2 %vm1992_vm3, %v10635_v20  ;;  %7965 = vmatmul.msk.f32.gmra.mxu3 %vm1992_vm3, %v10635_v20 }
 0x47d   : > { %v10645_v28 = vpop.permute.xlu0 %3357 }
 0x481   : > { %v3817_v36 = vpop.permute.xlu1 %3816  ;;  %v3821_v25 = vpop.permute.xlu2 %3820 }
 0x482   : > { %v3888_v13 = vadd.f32 %v3817_v36, %v3616_v22 }
 0x484   : > { %v4128_v55 = vadd.f32 %v4054_v18, %v3888_v13 }
 0x485   : > { %v2351_v2 = vpop.permute.xlu0 %2350 }
 0x486   : > { %v2418_v10 = vadd.f32 %v2351_v2, %v2129_v37  ;;  %v4164_v14 = vadd.f32 %v10564_v30, %v4128_v55 }
 0x488   : > { %v4196_v58 = vmax.f32 %v4164_v14, 0.0  ;;  %v3934_v14 = vld [vmem:[#allocation3 + $0x2c8] sm:$0x3] }
 0x489   : > { %v10667_v29 = vpop.permute.xlu2 %2626 }
 0x48a   : > { %v4308_v26 = vrot.slane %v4196_v58, 2  ;;  %v4309_v52 = vrot.slane %v4196_v58, 4  ;;  %v4310_v12 = vrot.slane %v4196_v58, 6  ;;  %v7913_v46 = vrot.slane %v4196_v58, 9 }
 0x48c   : > { %v7914_v3 = vrot.slane %v4308_v26, 9  ;;  %v7915_v24 = vrot.slane %v4309_v52, 9  ;;  %v7916_v36 = vrot.slane %v4310_v12, 9  ;;  %v4908_v13 = vmax.f32 %v4196_v58, %v7913_v46  ;;  %v8129_v58 = vld [vmem:[#allocation3 + $0x280] sm:$0xff] }
 0x48e   : > { %v2623_v60 = vpop.permute.xlu1 %2622  ;;  %v4910_v1 = vmax.f32 %v4309_v52, %v7915_v24  ;;  %v4911_v53 = vmax.f32 %v4310_v12, %v7916_v36 }
 0x48f   : > { %v10656_v31 = vadd.f32 %v2623_v60, %v2418_v10  ;;  %v3819_v23 = vpop.permute.xlu0 %3818 }
 0x490   : > { %v3889_v48 = vadd.f32 %v3819_v23, %v3617_v17 }
 0x492   : > { %v10676_v47 = vpop.permute.xlu2 %3087 }
 0x496   : > { %v3549_v16 = vpop.permute.xlu1 %3548 }
 0x497   : > { %v3618_v21 = vadd.f32 %v3549_v16, %v3425_v51  ;;  %v10669_v38 = vpop.permute.xlu0 %2624 }
 0x499   : > { %v3890_v34 = vadd.f32 %v3821_v25, %v3618_v21  ;;  %v4909_v25 = vmax.f32 %v4308_v26, %v7914_v3  ;;  %v4055_v26 = vrot.slane %v3934_v14, 2 }
 0x49b   : > { %v4130_v7 = vadd.f32 %v4059_v5, %v3890_v34  ;;  %v2417_v34 = vadd.f32 %v8129_v58, %v10602_v61  ;;  %v4056_v59 = vsel %vm1327_vm7, %v4053_v43, %v4055_v26 }
 0x49d   : > { %v4166_v40 = vadd.f32 %v10564_v30, %v4130_v7  ;;  %v2689_v52 = vadd.f32 %v10617_v56, %v2417_v34  ;;  %v4129_v56 = vadd.f32 %v4056_v59, %v3889_v48 }
 0x49e   : > { %v10672_v4 = vpop.permute.xlu1 %2815 }
 0x49f   : > { %v4198_v33 = vmax.f32 %v4166_v40, 0.0  ;;  %v3551_v55 = vpop.permute.xlu0 %3550  ;;  %v2882_v3 = vadd.f32 %v10641_v15, %v2689_v52  ;;  %v3937_v15 = vld [vmem:[#allocation3 + $0x2f8] sm:$0x3] }
 0x4a1   : > { %v4314_v57 = vrot.slane %v4198_v33, 2  ;;  %v4315_v22 = vrot.slane %v4198_v33, 4  ;;  %v4316_v42 = vrot.slane %v4198_v33, 6  ;;  %v7921_v2 = vrot.slane %v4198_v33, 9 }
 0x4a2   : > { %v3154_v23 = vadd.f32 %v10643_v11, %v2882_v3  ;;  %v5307_v11 = vld [vmem:[%s11595_s3 + $0x28] sm:$0xff] }
 0x4a3   : > { %v7922_v37 = vrot.slane %v4314_v57, 9  ;;  %v7923_v10 = vrot.slane %v4315_v22, 9  ;;  %v7924_v60 = vrot.slane %v4316_v42, 9  ;;  %v4916_v18 = vmax.f32 %v4198_v33, %v7921_v2  ;;  %v10695_v2 = vpop.permute.xlu2 %3089  ;;  %5530 = vmatpush.msra.mxu2 %v5307_v11 }
 0x4a5   : > { %v4917_v49 = vmax.f32 %v4314_v57, %v7922_v37  ;;  %v4918_v51 = vmax.f32 %v4315_v22, %v7923_v10  ;;  %v4919_v8 = vmax.f32 %v4316_v42, %v7924_v60  ;;  %v4988_v16 = vmax.f32 %v4908_v13, %v4916_v18 }
 0x4a6   : > { %v10678_v21 = vpop.permute.xlu1 %2817  ;;  %v4165_v13 = vadd.f32 %v10564_v30, %v4129_v56  ;;  %v3426_v37 = vadd.f32 %v10645_v28, %v3154_v23  ;;  %v4060_v60 = vrot.slane %v3937_v15, 2 }
 0x4a7   : > { %v4989_v5 = vmax.f32 %v4909_v25, %v4917_v49  ;;  %v4990_v7 = vmax.f32 %v4910_v1, %v4918_v51  ;;  %v4991_v40 = vmax.f32 %v4911_v53, %v4919_v8  ;;  %v5136_v12 = vperm.slane %v4988_v16, 0  ;;  %v10685_v57 = vpop.permute.xlu0 %2356 }
 0x4a8   : > { %v3619_v18 = vadd.f32 %v3551_v55, %v3426_v37  ;;  %v4197_v54 = vmax.f32 %v4165_v13, 0.0  ;;  %v4061_v25 = vsel %vm1327_vm7, %v4058_v19, %v4060_v60 }
 0x4a9   : > { %v5137_v46 = vperm.slane %v4989_v5, 0  ;;  %v5138_v33 = vperm.slane %v4990_v7, 0  ;;  %v5139_v24 = vperm.slane %v4991_v40, 0 }
 0x4aa   : > { %v4311_v14 = vrot.slane %v4197_v54, 2  ;;  %v4312_v28 = vrot.slane %v4197_v54, 4  ;;  %v4313_v49 = vrot.slane %v4197_v54, 6  ;;  %v7917_v8 = vrot.slane %v4197_v54, 9 }
 0x4ab   : > { %v5201_v36 = vsel %vm5152_vm10, %v5137_v46, %v5136_v12  ;;  %v10705_v1 = vpop.permute.xlu2 %2819 }
 0x4ac   : > { %v5202_v61 = vsel %vm5154_vm11, %v5138_v33, %v5201_v36  ;;  %v7918_v41 = vrot.slane %v4311_v14, 9  ;;  %v7919_v58 = vrot.slane %v4312_v28, 9  ;;  %v7920_v19 = vrot.slane %v4313_v49, 9 }
 0x4ad   : > { %v5203_v22 = vsel %vm5156_vm12, %v5139_v24, %v5202_v61  ;;  %v4912_v26 = vmax.f32 %v4197_v54, %v7917_v8  ;;  %v2883_v36 = vadd.f32 %v10672_v4, %v10656_v31 }
 0x4ae   : > { %v10692_v42 = vpop.permute.xlu1 %2354  ;;  %v4913_v48 = vmax.f32 %v4311_v14, %v7918_v41  ;;  %v4914_v3 = vmax.f32 %v4312_v28, %v7919_v58  ;;  %v4915_v24 = vmax.f32 %v4313_v49, %v7920_v19  ;;  %v3938_v49 = vld [vmem:[#allocation3 + $0x308] sm:$0xfc] }
 0x4af   : > { %v3360_v10 = vpop.permute.xlu0 %3359  ;;  %v4062_v19 = vrot.slane %v3938_v49, 2 }
 0x4b3   : > { %v10714_v61 = vpop.permute.xlu2 %2821 }
 0x4b6   : > { %v3823_v9 = vpop.permute.xlu1 %3822 }
 0x4b7   : > { %v3891_v43 = vadd.f32 %v3823_v9, %v3619_v18  ;;  %v3155_v9 = vadd.f32 %v10676_v47, %v2883_v36 }
 0x4b9   : > { %v4131_v53 = vadd.f32 %v4061_v25, %v3891_v43  ;;  %v3427_v14 = vadd.f32 %v3360_v10, %v3155_v9  ;;  %v8130_v10 = vld [vmem:[#allocation3 + $0x2b0] sm:$0xff] }
 0x4bb   : > { %v4167_v55 = vadd.f32 %v10564_v30, %v4131_v53  ;;  %v10708_v51 = vpop.permute.xlu0 %3361  ;;  %v3825_v58 = vpop.permute.xlu2 %3824 }
 0x4bd   : > { %v4199_v16 = vmax.f32 %v4167_v55, 0.0  ;;  %v3939_v55 = vld [vmem:[#allocation3 + $0x318] sm:$0xff] }
 0x4be   : > { %v10710_v34 = vpop.permute.xlu1 %2628 }
 0x4bf   : > { %v4317_v5 = vrot.slane %v4199_v16, 2  ;;  %v4318_v7 = vrot.slane %v4199_v16, 4  ;;  %v4319_v40 = vrot.slane %v4199_v16, 6  ;;  %v7925_v17 = vrot.slane %v4199_v16, 9 }
 0x4c1   : > { %v7926_v52 = vrot.slane %v4317_v5, 9  ;;  %v7927_v12 = vrot.slane %v4318_v7, 9  ;;  %v7928_v46 = vrot.slane %v4319_v40, 9  ;;  %v4920_v33 = vmax.f32 %v4199_v16, %v7925_v17 }
 0x4c2   : > { %v2420_v16 = vadd.f32 %v10443_v39, %v10692_v42 }
 0x4c3   : > { %v4921_v59 = vmax.f32 %v4317_v5, %v7926_v52  ;;  %v4922_v56 = vmax.f32 %v4318_v7, %v7927_v12  ;;  %v4923_v23 = vmax.f32 %v4319_v40, %v7928_v46  ;;  %v4992_v15 = vmax.f32 %v4912_v26, %v4920_v33  ;;  %v3092_v13 = vpop.permute.xlu0 %3091 }
 0x4c4   : > { %v2419_v5 = vadd.f32 %v8130_v10, %v10647_v62  ;;  %v2692_v17 = vadd.f32 %v10667_v29, %v2420_v16  ;;  %v10730_v29 = vld [vmem:[#allocation3 + $0x348] sm:$0xff] }
 0x4c5   : > { %v4993_v37 = vmax.f32 %v4913_v48, %v4921_v59  ;;  %v4994_v60 = vmax.f32 %v4914_v3, %v4922_v56  ;;  %v4995_v18 = vmax.f32 %v4915_v24, %v4923_v23  ;;  %v5140_v54 = vperm.slane %v4992_v15, 0  ;;  %v3941_v59 = vld [vmem:[#allocation3 + $0x338] sm:$0xfc]  ;;  %v3940_v23 = vld [vmem:[#allocation3 + $0x328] sm:$0x3] }
 0x4c6   : > { %v3553_v43 = vpop.permute.xlu1 %3552  ;;  %v2691_v26 = vadd.f32 %v10669_v38, %v2419_v5  ;;  %v2885_v33 = vadd.f32 %v10705_v1, %v2692_v17  ;;  %v2421_v1 = vadd.f32 %v10435_v6, %v10685_v57  ;;  %v4065_v9 = vrot.slane %v3940_v23, 2 }
 0x4c7   : > { %v5141_v25 = vperm.slane %v4993_v37, 0  ;;  %v5142_v11 = vperm.slane %v4994_v60, 0  ;;  %v5204_v53 = vsel %vm5158_vm13, %v5140_v54, %v5203_v22  ;;  %v5143_v31 = vperm.slane %v4995_v18, 0  ;;  %v3557_v60 = vpop.permute.xlu2 %3556 }
 0x4c8   : > { %v3620_v8 = vadd.f32 %v3553_v43, %v3427_v14  ;;  %v4063_v22 = vrot.slane %v3939_v55, 2  ;;  %v2884_v39 = vadd.f32 %v10678_v21, %v2691_v26  ;;  %v3157_v62 = vadd.f32 %v3092_v13, %v2885_v33 }
 0x4c9   : > { %v5205_v4 = vsel %vm5160_vm14, %v5141_v25, %v5204_v53  ;;  %v4067_v13 = vrot.slane %v3941_v59, 2  ;;  %v4068_v18 = vrot.slane %v10730_v29, 2 }
 0x4ca   : > { %v5206_v28 = vsel %vm5162_vm15, %v5142_v11, %v5205_v4  ;;  %v3892_v7 = vadd.f32 %v3825_v58, %v3620_v8  ;;  %v4064_v52 = vsel %vm1327_vm7, %v4062_v19, %v4063_v22  ;;  %v3156_v38 = vadd.f32 %v10695_v2, %v2884_v39  ;;  %v3943_v19 = vld [vmem:[#allocation3 + $0x358] sm:$0x3] }
 0x4cb   : > { %v5207_v41 = vsel %vm5164_vm0, %v5143_v31, %v5206_v28  ;;  %v3094_v47 = vpop.permute.xlu0 %3093  ;;  %v2693_v2 = vadd.f32 %v10710_v34, %v2421_v1  ;;  %v4069_v6 = vsel %vm1327_vm7, %v4067_v13, %v4068_v18  ;;  %v4066_v31 = vsel %vm1327_vm7, %v4063_v22, %v4065_v9  ;;  %v5304_v13 = vld [vmem:[%s11595_s3 + $0x10] sm:$0xff] }
 0x4cc   : > { %5230 = vst.msk [vmem:[#allocation4 + $0x71] sm:$0xff] %vm1992_vm3, %v5207_v41  ;;  %v4132_v42 = vadd.f32 %v4064_v52, %v3892_v7  ;;  %v3428_v37 = vadd.f32 %v10708_v51, %v3156_v38  ;;  %5531 = vmatpush.msra.mxu2 %v5304_v13 }
 0x4cd   : > { %v2886_v4 = vadd.f32 %v10714_v61, %v2693_v2 }
 0x4ce   : > { %v3555_v40 = vpop.permute.xlu1 %3554  ;;  %v4168_v21 = vadd.f32 %v10564_v30, %v4132_v42 }
 0x4cf   : > { %v3621_v25 = vadd.f32 %v3555_v40, %v3428_v37  ;;  %v3158_v16 = vadd.f32 %v3094_v47, %v2886_v4  ;;  %v4070_v47 = vrot.slane %v3943_v19, 2  ;;  %v3559_v39 = vpop.permute.xlu2 %3558 }
 0x4d0   : > { %v10739_v43 = vmax.f32 %v4168_v21, 0.0 }
 0x4d2   : > { %v4320_v34 = vrot.slane %v10739_v43, 2  ;;  %v4321_v8 = vrot.slane %v10739_v43, 4  ;;  %v7929_v10 = vrot.slane %v10739_v43, 9 }
 0x4d3   : > { %v5246_v12 = vld [vmem:[#allocation4 + $0x70] sm:$0xff]  ;;  %v5247_v46 = vld [vmem:[#allocation4 + $0x78] sm:$0x3]  ;;  %v3829_v48 = vpop.permute.xlu0 %3828 }
 0x4d4   : > { %v5293_v3 = vrot.slane %v5246_v12, 2  ;;  %v5294_v24 = vrot.slane %v5246_v12, 4  ;;  %v5295_v36 = vrot.slane %v5246_v12, 6  ;;  %5358 = vst [vmem:[#allocation1 + $0x3] ss:$4 sm:$0xff] %v5246_v12  ;;  %v7930_v5 = vrot.slane %v4320_v34, 9 }
 0x4d5   : > { %5362 = vst [vmem:[#allocation1 + $0x23] ss:$4 sm:$0xff] %v5247_v46  ;;  %v7931_v61 = vrot.slane %v4321_v8, 9 }
 0x4d6   : > { %5359 = vst [vmem:[#allocation1 + $0x20] ss:$4 sm:$0xff] %v5293_v3  ;;  %v3364_v56 = vpop.permute.xlu1 %3363 }
 0x4d7   : > { %5360 = vst [vmem:[#allocation1 + $0x21] ss:$4 sm:$0xff] %v5294_v24  ;;  %v3429_v15 = vadd.f32 %v3364_v56, %v3157_v62  ;;  %v4925_v62 = vmax.f32 %v4320_v34, %v7930_v5  ;;  %v4926_v38 = vmax.f32 %v4321_v8, %v7931_v61  ;;  %v4071_v56 = vsel %vm1327_vm7, %v4068_v18, %v4070_v47 }
 0x4d8   : > { %5361 = vst [vmem:[#allocation1 + $0x22] ss:$4 sm:$0xff] %v5295_v36  ;;  %v4924_v36 = vmax.f32 %v10739_v43, %v7929_v10 }
 0x4d9   : > { %v3622_v54 = vadd.f32 %v3557_v60, %v3429_v15 }
 0x4db   : > { %v3894_v11 = vadd.f32 %v3829_v48, %v3622_v54  ;;  %v3827_v53 = vpop.permute.xlu0 %3826  ;;  %v10741_v14 = vld.sshfl [vmem:[#allocation1] sm:$0xff pattern:$0x73625140]  ;;  %v4322_v48 = vrot.slane %v10739_v43, 6 }
 0x4dc   : > { %v3893_v57 = vadd.f32 %v3827_v53, %v3621_v25  ;;  %7953 = vmatmul.msk.f32.gmra.mxu2 %vm1992_vm3, %v10741_v14  ;;  %7966 = vmatmul.msk.f32.gmra.mxu3 %vm1992_vm3, %v10741_v14 }
 0x4dd   : > { %v4134_v51 = vadd.f32 %v4069_v6, %v3894_v11  ;;  %v7932_v9 = vrot.slane %v4322_v48, 9 }
 0x4de   : > { %v4133_v28 = vadd.f32 %v4066_v31, %v3893_v57  ;;  %v3366_v49 = vpop.permute.xlu1 %3365 }
 0x4df   : > { %v4170_v55 = vadd.f32 %v10564_v30, %v4134_v51  ;;  %v3430_v7 = vadd.f32 %v3366_v49, %v3158_v16  ;;  %v10755_v26 = vld.sshfl [vmem:[#allocation1 + $0x20] sm:$0xff pattern:$0x73625140]  ;;  %v4927_v34 = vmax.f32 %v4322_v48, %v7932_v9 }
 0x4e0   : > { %v4169_v41 = vadd.f32 %v10564_v30, %v4133_v28 }
 0x4e1   : > { %v4202_v58 = vmax.f32 %v4170_v55, 0.0  ;;  %v3623_v3 = vadd.f32 %v3559_v39, %v3430_v7  ;;  %v5250_v7 = vld [vmem:[#allocation4 + $0x90] sm:$0xff] }
 0x4e2   : > { %v4201_v52 = vmax.f32 %v4169_v41, 0.0  ;;  %5370 = vst [vmem:[#allocation1 + $0x21] ss:$4 sm:$0xff] %v5250_v7  ;;  %v5299_v39 = vrot.slane %v5250_v7, 2 }
 0x4e3   : > { %v4326_v22 = vrot.slane %v4202_v58, 2  ;;  %v4327_v40 = vrot.slane %v4202_v58, 4  ;;  %v7937_v17 = vrot.slane %v4202_v58, 9  ;;  %v4328_v42 = vrot.slane %v4202_v58, 6 }
 0x4e4   : > { %7954 = vmatmul.msk.f32.gmra.mxu2 %vm1992_vm3, %v10755_v26  ;;  %7967 = vmatmul.msk.f32.gmra.mxu3 %vm1992_vm3, %v10755_v26  ;;  %v4323_v21 = vrot.slane %v4201_v52, 2  ;;  %v4324_v60 = vrot.slane %v4201_v52, 4  ;;  %v4325_v25 = vrot.slane %v4201_v52, 6  ;;  %v7933_v11 = vrot.slane %v4201_v52, 9  ;;  %5371 = vst [vmem:[#allocation1 + $0x22] ss:$4 sm:$0xff] %v5299_v39 }
 0x4e5   : > { %v7938_v12 = vrot.slane %v4326_v22, 9  ;;  %v7939_v46 = vrot.slane %v4327_v40, 9  ;;  %v4932_v33 = vmax.f32 %v4202_v58, %v7937_v17  ;;  %v7940_v15 = vrot.slane %v4328_v42, 9 }
 0x4e6   : > { %v3831_v24 = vpop.permute.xlu1 %3830  ;;  %v7934_v57 = vrot.slane %v4323_v21, 9  ;;  %v7935_v51 = vrot.slane %v4324_v60, 9  ;;  %v7936_v49 = vrot.slane %v4325_v25, 9  ;;  %v4928_v19 = vmax.f32 %v4201_v52, %v7933_v11 }
 0x4e7   : > { %v4933_v59 = vmax.f32 %v4326_v22, %v7938_v12  ;;  %v4934_v29 = vmax.f32 %v4327_v40, %v7939_v46  ;;  %v3895_v23 = vadd.f32 %v3831_v24, %v3623_v3  ;;  %v4996_v1 = vmax.f32 %v4924_v36, %v4932_v33 }
 0x4e8   : > { %v4935_v6 = vmax.f32 %v4328_v42, %v7940_v15  ;;  %v4929_v10 = vmax.f32 %v4323_v21, %v7934_v57  ;;  %v4930_v5 = vmax.f32 %v4324_v60, %v7935_v51  ;;  %v4931_v61 = vmax.f32 %v4325_v25, %v7936_v49 }
 0x4e9   : > { %v4997_v37 = vmax.f32 %v4925_v62, %v4933_v59  ;;  %v4135_v54 = vadd.f32 %v4071_v56, %v3895_v23  ;;  %v4998_v2 = vmax.f32 %v4926_v38, %v4934_v29  ;;  %v5144_v18 = vperm.slane %v4996_v1, 0 }
 0x4ea   : > { %v4999_v58 = vmax.f32 %v4927_v34, %v4935_v6  ;;  %v5300_v42 = vrot.slane %v5250_v7, 4  ;;  %v5421_v6 = vpop.f32.mrf.mxu2 }
 0x4eb   : > { %v5145_v43 = vperm.slane %v4997_v37, 0  ;;  %v4171_v53 = vadd.f32 %v10564_v30, %v4135_v54  ;;  %v5146_v4 = vperm.slane %v4998_v2, 0  ;;  %v5301_v2 = vrot.slane %v5250_v7, 6 }
 0x4ec   : > { %v5147_v3 = vperm.slane %v4999_v58, 0  ;;  %5372 = vst [vmem:[#allocation1 + $0x23] ss:$4 sm:$0xff] %v5300_v42 }
 0x4ed   : > { %v4203_v31 = vmax.f32 %v4171_v53, 0.0  ;;  %v5208_v28 = vsel %vm5152_vm10, %v5145_v43, %v5144_v18  ;;  %v5251_v43 = vld [vmem:[#allocation4 + $0x98] sm:$0x3] }
 0x4ee   : > { %v5209_v47 = vsel %vm5154_vm11, %v5146_v4, %v5208_v28 }
 0x4ef   : > { %v4329_v55 = vrot.slane %v4203_v31, 2  ;;  %v4330_v8 = vrot.slane %v4203_v31, 4  ;;  %v4331_v16 = vrot.slane %v4203_v31, 6  ;;  %v7941_v41 = vrot.slane %v4203_v31, 9 }
 0x4f0   : > { %v5210_v59 = vsel %vm5156_vm12, %v5147_v3, %v5209_v47 }
 0x4f1   : > { %v7942_v30 = vrot.slane %v4329_v55, 9  ;;  %v7943_v22 = vrot.slane %v4330_v8, 9  ;;  %v7944_v40 = vrot.slane %v4331_v16, 9  ;;  %v4936_v17 = vmax.f32 %v4203_v31, %v7941_v41 }
 0x4f2   : > { %v5424_v18 = vpop.f32.mrf.mxu2 }
 0x4f3   : > { %v4937_v12 = vmax.f32 %v4329_v55, %v7942_v30  ;;  %v4938_v46 = vmax.f32 %v4330_v8, %v7943_v22  ;;  %v4939_v33 = vmax.f32 %v4331_v16, %v7944_v40  ;;  %v5000_v48 = vmax.f32 %v4928_v19, %v4936_v17 }
 0x4f5   : > { %v5001_v52 = vmax.f32 %v4929_v10, %v4937_v12  ;;  %v5002_v24 = vmax.f32 %v4930_v5, %v4938_v46  ;;  %v5003_v36 = vmax.f32 %v4931_v61, %v4939_v33  ;;  %v5148_v62 = vperm.slane %v5000_v48, 0 }
 0x4f7   : > { %v5149_v29 = vperm.slane %v5001_v52, 0  ;;  %v5150_v38 = vperm.slane %v5002_v24, 0  ;;  %v5211_v21 = vsel %vm5158_vm13, %v5148_v62, %v5210_v59  ;;  %v5151_v56 = vperm.slane %v5003_v36, 0 }
 0x4f8   : > { %vm6834_vm13 = vcmask 259072  }
 0x4f9   : > { %v5212_v23 = vsel %vm5160_vm14, %v5149_v29, %v5211_v21  ;;  %6835 = vst.msk [vmem:[#allocation6] sm:$0x3f] %vm6834_vm13, %v8198_v0  ;;  %vm6890_vm14 = vcmask 257024  }
 0x4fa   : > { %v5213_v15 = vsel %vm5162_vm15, %v5150_v38, %v5212_v23  ;;  %v10792_v57 = vpop.f32.mrf.mxu2  ;;  %6836 = vst.msk [vmem:[#allocation6 + $0x8] sm:$0x3f] %vm6834_vm13, %v8198_v0 }
 0x4fb   : > { %v5214_v1 = vsel %vm5164_vm0, %v5151_v56, %v5213_v15  ;;  %6840 = vst.msk [vmem:[#allocation6 + $0x28] sm:$0x3f] %vm6834_vm13, %v8198_v0 }
 0x4fc   : > { %5231 = vst.msk [vmem:[#allocation4 + $0x81] sm:$0xff] %vm1992_vm3, %v5214_v1 }
 0x4fd   : > { %6837 = vst.msk [vmem:[#allocation6 + $0x10] sm:$0x3f] %vm6834_vm13, %v8198_v0 }
 0x4fe   : > { %6838 = vst.msk [vmem:[#allocation6 + $0x18] sm:$0x3f] %vm6834_vm13, %v8198_v0 }
 0x4ff   : > { %6839 = vst.msk [vmem:[#allocation6 + $0x20] sm:$0x3f] %vm6834_vm13, %v8198_v0 }
 0x503   : > { %v5248_v37 = vld [vmem:[#allocation4 + $0x80] sm:$0xff]  ;;  %v5249_v60 = vld [vmem:[#allocation4 + $0x88] sm:$0x3] }
 0x504   : > { %v5296_v13 = vrot.slane %v5248_v37, 2  ;;  %v5297_v54 = vrot.slane %v5248_v37, 4  ;;  %v5298_v9 = vrot.slane %v5248_v37, 6  ;;  %5365 = vst [vmem:[#allocation1] ss:$4 sm:$0xff] %v5248_v37 }
 0x505   : > { %5369 = vst [vmem:[#allocation1 + $0x20] ss:$4 sm:$0xff] %v5249_v60 }
 0x506   : > { %5366 = vst [vmem:[#allocation1 + $0x1] ss:$4 sm:$0xff] %v5296_v13 }
 0x507   : > { %5367 = vst [vmem:[#allocation1 + $0x2] ss:$4 sm:$0xff] %v5297_v54 }
 0x508   : > { %5368 = vst [vmem:[#allocation1 + $0x3] ss:$4 sm:$0xff] %v5298_v9 }
 0x50c   : > { %v5374_v11 = vld.sshfl [vmem:[#allocation1 + $0x20] sm:$0xff pattern:$0x73625140] }
 0x50f   : > { %v5373_v25 = vld.sshfl [vmem:[#allocation1] sm:$0xff pattern:$0x73625140] }
 0x510   : > { %7955 = vmatmul.msk.f32.gmra.mxu2 %vm1992_vm3, %v5373_v25  ;;  %7968 = vmatmul.msk.f32.gmra.mxu3 %vm1992_vm3, %v5373_v25  ;;  %5375 = vst [vmem:[#allocation1] ss:$4 sm:$0xff] %v5301_v2 }
 0x511   : > { %5376 = vst [vmem:[#allocation1 + $0x1] ss:$4 sm:$0xff] %v5251_v43 }
 0x518   : > { %7956 = vmatmul.msk.f32.gmra.mxu2 %vm1992_vm3, %v5374_v11  ;;  %7969 = vmatmul.msk.f32.gmra.mxu3 %vm1992_vm3, %v5374_v11  ;;  %v5377_v53 = vld.sshfl [vmem:[#allocation1] sm:$0xff pattern:$0x73625140] }
 0x520   : > { %7957 = vmatmul.msk.f32.gmra.mxu2 %vm1992_vm3, %v5377_v53  ;;  %7970 = vmatmul.msk.f32.gmra.mxu3 %vm1992_vm3, %v5377_v53 }
 0x528   : > { %7971 = vmatmul.msk.f32.vlgmr.msra.gmra.mxu2 %vm1992_vm3, %v9889_v32  ;;  %v10796_v32 = vpop.f32.mrf.mxu2 }
 0x530   : > { %7972 = vmatmul.msk.f32.gmra.mxu2 %vm1992_vm3, %v9913_v50  ;;  %v10802_v50 = vpop.f32.mrf.mxu2 }
 0x538   : > { %7973 = vmatmul.msk.f32.gmra.mxu2 %vm1992_vm3, %v9973_v44  ;;  %v10806_v44 = vpop.f32.mrf.mxu2 }
 0x540   : > { %7974 = vmatmul.msk.f32.gmra.mxu2 %vm1992_vm3, %v10071_v63  ;;  %v10810_v63 = vpop.f32.mrf.mxu2 }
 0x548   : > { %7975 = vmatmul.msk.f32.gmra.mxu2 %vm1992_vm3, %v10090_v35  ;;  %v10813_v35 = vpop.f32.mrf.mxu2 }
 0x550   : > { %7976 = vmatmul.msk.f32.gmra.mxu2 %vm1992_vm3, %v10316_v45 }
 0x558   : > { %7977 = vmatmul.msk.f32.gmra.mxu2 %vm1992_vm3, %v10484_v27 }
 0x55f   : > { %v10816_v45 = vpop.f32.mrf.mxu2 }
 0x560   : > { %7978 = vmatmul.msk.f32.gmra.mxu2 %vm1992_vm3, %v10635_v20 }
 0x567   : > { %v10819_v27 = vpop.f32.mrf.mxu2 }
 0x568   : > { %7979 = vmatmul.msk.f32.gmra.mxu2 %vm1992_vm3, %v10741_v14 }
 0x570   : > { %7980 = vmatmul.msk.f32.gmra.mxu2 %vm1992_vm3, %v10755_v26  ;;  %v5477_v26 = vpop.f32.mrf.mxu3 }
 0x571   : > { %v5611_v31 = vrot.slane %v5477_v26, 6 }
 0x573   : > { %v5637_v28 = vsel %vm1319_vm4, %v5421_v6, %v5611_v31  ;;  %v5640_v49 = vsel %vm1321_vm5, %v5421_v6, %v5611_v31  ;;  %v5644_v55 = vsel %vm1324_vm6, %v5421_v6, %v5611_v31  ;;  %v5647_v8 = vsel %vm1327_vm7, %v5611_v31, %v5421_v6 }
 0x578   : > { %7981 = vmatmul.msk.f32.gmra.mxu2 %vm1992_vm3, %v5373_v25  ;;  %v5480_v16 = vpop.f32.mrf.mxu3 }
 0x579   : > { %v5613_v22 = vrot.slane %v5480_v16, 6 }
 0x57b   : > { %v5650_v61 = vsel %vm1319_vm4, %v5424_v18, %v5613_v22  ;;  %v5652_v47 = vsel %vm1321_vm5, %v5424_v18, %v5613_v22  ;;  %v5655_v39 = vsel %vm1324_vm6, %v5424_v18, %v5613_v22  ;;  %v5658_v3 = vsel %vm1327_vm7, %v5613_v22, %v5424_v18 }
 0x580   : > { %7982 = vmatmul.msk.f32.gmra.mxu2 %vm1992_vm3, %v5374_v11  ;;  %v5483_v42 = vpop.f32.mrf.mxu3 }
 0x581   : > { %v5615_v52 = vrot.slane %v5483_v42, 6 }
 0x583   : > { %v5663_v38 = vsel %vm1321_vm5, %v10792_v57, %v5615_v52  ;;  %v5661_v56 = vsel %vm1319_vm4, %v10792_v57, %v5615_v52  ;;  %v5666_v9 = vsel %vm1324_vm6, %v10792_v57, %v5615_v52  ;;  %v5669_v43 = vsel %vm1327_vm7, %v5615_v52, %v10792_v57 }
 0x588   : > { %7983 = vmatmul.msk.f32.gmra.mxu2 %vm1992_vm3, %v5377_v53  ;;  %v5486_v60 = vpop.f32.mrf.mxu3  ;;  %vm5952_vm3 = vcmask 261120  }
 0x589   : > { %v5617_v13 = vrot.slane %v5486_v60, 6 }
 0x58b   : > { %v5674_v18 = vsel %vm1321_vm5, %v10796_v32, %v5617_v13 }
 0x593   : > { %v10821_v20 = vpop.f32.mrf.mxu2 }
 0x59b   : > { %v10823_v14 = vpop.f32.mrf.mxu2 }
 0x5a3   : > { %v10825_v51 = vpop.f32.mrf.mxu2 }
 0x5ab   : > { %v5533_v34 = vpop.f32.mrf.mxu2 }
 0x5ac   : > { %v5612_v4 = vrot.slane %v5533_v34, 4 }
 0x5ae   : > { %v5639_v41 = vsel %vm5638_vm1, %v5637_v28, %v5612_v4  ;;  %v5642_v58 = vsel %vm5641_vm2, %v5640_v49, %v5612_v4  ;;  %v5645_v19 = vsel %vm5638_vm1, %v5612_v4, %v5644_v55  ;;  %v5648_v10 = vsel %vm5641_vm2, %v5612_v4, %v5647_v8 }
 0x5af   : > { %v5643_v5 = vrot.slane %v5642_v58, 2  ;;  %v5646_v7 = vrot.slane %v5645_v19, 4  ;;  %v5649_v30 = vrot.slane %v5648_v10, 6  ;;  %5776 = vst [vmem:[#allocation1] ss:$4 sm:$0xff] %v5639_v41  ;;  %v5672_v41 = vsel %vm1319_vm4, %v10796_v32, %v5617_v13 }
 0x5b0   : > { %v5677_v58 = vsel %vm1324_vm6, %v10796_v32, %v5617_v13 }
 0x5b1   : > { %5778 = vst [vmem:[#allocation1 + $0x1] ss:$4 sm:$0xff] %v5643_v5 }
 0x5b2   : > { %5780 = vst [vmem:[#allocation1 + $0x2] ss:$4 sm:$0xff] %v5646_v7 }
 0x5b3   : > { %5782 = vst [vmem:[#allocation1 + $0x3] ss:$4 sm:$0xff] %v5649_v30  ;;  %v5536_v40 = vpop.f32.mrf.mxu2 }
 0x5b4   : > { %v5614_v17 = vrot.slane %v5536_v40, 4 }
 0x5b6   : > { %v5651_v12 = vsel %vm5638_vm1, %v5650_v61, %v5614_v17  ;;  %v5653_v46 = vsel %vm5641_vm2, %v5652_v47, %v5614_v17  ;;  %v5656_v33 = vsel %vm5638_vm1, %v5614_v17, %v5655_v39  ;;  %v5659_v36 = vsel %vm5641_vm2, %v5614_v17, %v5658_v3  ;;  %v5489_v39 = vpop.f32.mrf.mxu3 }
 0x5b7   : > { %5784 = vst [vmem:[#allocation1 + $0x20] ss:$4 sm:$0xff] %v5651_v12  ;;  %v5654_v48 = vrot.slane %v5653_v46, 2  ;;  %v5657_v24 = vrot.slane %v5656_v33, 4  ;;  %v5660_v21 = vrot.slane %v5659_v36, 6  ;;  %v5619_v42 = vrot.slane %v5489_v39, 6 }
 0x5b9   : > { %v5691_v60 = vsel %vm1327_vm7, %v5619_v42, %v10802_v50 }
 0x5ba   : > { %v5785_v62 = vld.sshfl [vmem:[#allocation1] sm:$0xff pattern:$0x73625140] }
 0x5bb   : > { %v5539_v59 = vpop.f32.mrf.mxu2  ;;  %5950 = vst [vmem:[#allocation5] sm:$0xff] %v5785_v62 }
 0x5bc   : > { %v5616_v29 = vrot.slane %v5539_v59, 4  ;;  %5791 = vst [vmem:[#allocation1] ss:$4 sm:$0xff] %v5654_v48  ;;  %v5680_v48 = vsel %vm1327_vm7, %v5617_v13, %v10796_v32  ;;  %v5688_v59 = vsel %vm1324_vm6, %v10802_v50, %v5619_v42 }
 0x5bd   : > { %5792 = vst [vmem:[#allocation1 + $0x1] ss:$4 sm:$0xff] %v5657_v24  ;;  %v5685_v24 = vsel %vm1321_vm5, %v10802_v50, %v5619_v42 }
 0x5be   : > { %v5664_v23 = vsel %vm5641_vm2, %v5663_v38, %v5616_v29  ;;  %v5788_v15 = vld.sshfl [vmem:[#allocation1 + $0x20] sm:$0xff pattern:$0x73625140]  ;;  %v5662_v1 = vsel %vm5638_vm1, %v5661_v56, %v5616_v29  ;;  %5793 = vst [vmem:[#allocation1 + $0x2] ss:$4 sm:$0xff] %v5660_v21  ;;  %v5667_v25 = vsel %vm5638_vm1, %v5616_v29, %v5666_v9  ;;  %v5670_v53 = vsel %vm5641_vm2, %v5616_v29, %v5669_v43  ;;  %v5492_v36 = vpop.f32.mrf.mxu3 }
 0x5bf   : > { %v5665_v37 = vrot.slane %v5664_v23, 2  ;;  %5954 = vst [vmem:[#allocation5 + $0x18] sm:$0x3] %v5788_v15  ;;  %v5668_v31 = vrot.slane %v5667_v25, 4  ;;  %v5671_v55 = vrot.slane %v5670_v53, 6 }
 0x5c0   : > { %5794 = vst [vmem:[#allocation1 + $0x3] ss:$4 sm:$0xff] %v5662_v1 }
 0x5c1   : > { %5795 = vst [vmem:[#allocation1 + $0x20] ss:$4 sm:$0xff] %v5665_v37 }
 0x5c2   : > { %v6108_v11 = vld [vmem:[#allocation5] sm:$0xfc] }
 0x5c3   : > { %v5542_v54 = vpop.f32.mrf.mxu2  ;;  %v6020_v6 = vld [vmem:[#allocation5] sm:$0xfe]  ;;  %v6140_v4 = vrot.slane %v6108_v11, 2 }
 0x5c4   : > { %v5618_v2 = vrot.slane %v5542_v54, 4  ;;  %v6052_v8 = vrot.slane %v6020_v6, 1  ;;  %v5683_v6 = vsel %vm1319_vm4, %v10802_v50, %v5619_v42 }
 0x5c6   : > { %v6109_v26 = vld [vmem:[#allocation5 + $0x18] sm:$0x3]  ;;  %v5675_v34 = vsel %vm5641_vm2, %v5674_v18, %v5618_v2  ;;  %v5673_v5 = vsel %vm5638_vm1, %v5672_v41, %v5618_v2  ;;  %v5678_v30 = vsel %vm5638_vm1, %v5618_v2, %v5677_v58  ;;  %v5681_v62 = vsel %vm5641_vm2, %v5618_v2, %v5680_v48 }
 0x5c7   : > { %v6141_v28 = vrot.slane %v6109_v26, 2  ;;  %v6021_v49 = vld [vmem:[#allocation5 + $0x18] sm:$0x1]  ;;  %v10858_v57 = vld.sshfl [vmem:[#allocation1] sm:$0xff pattern:$0x73625140] }
 0x5c8   : > { %v6053_v16 = vrot.slane %v6021_v49, 1  ;;  %v5797_v10 = vld.sshfl [vmem:[#allocation1 + $0x8] sm:$0xff pattern:$0x73625140]  ;;  %6213 = vrot.lane.b32.xlu0 %v10858_v57, %s8204_s8  ;;  %v5676_v7 = vrot.slane %v5675_v34, 2  ;;  %5958 = vst [vmem:[#allocation5 + $0x30] sm:$0xff] %v10858_v57 }
 0x5c9   : > { %v6142_v19 = vsel %vm1327_vm7, %v6140_v4, %v6141_v28  ;;  %5802 = vst [vmem:[#allocation1] ss:$4 sm:$0xff] %v5668_v31  ;;  %v5799_v17 = vld.sshfl [vmem:[#allocation1 + $0x20] sm:$0xff pattern:$0x73625140]  ;;  %v5679_v61 = vrot.slane %v5678_v30, 4 }
 0x5ca   : > { %6164 = vrot.lane.b32.xlu1 %v6142_v19, %s8202_s23  ;;  %v6054_v22 = vsel %vm2213_vm9, %v6052_v8, %v6053_v16  ;;  %5803 = vst [vmem:[#allocation1 + $0x1] ss:$4 sm:$0xff] %v5671_v55  ;;  %v5800_v47 = vld.sshfl [vmem:[#allocation1 + $0x28] sm:$0xff pattern:$0x73625140]  ;;  %v5682_v13 = vrot.slane %v5681_v62, 6  ;;  %v5495_v16 = vpop.f32.mrf.mxu3 }
 0x5cb   : > { %v5545_v40 = vpop.f32.mrf.mxu2  ;;  %6076 = vrot.lane.b32.xlu2 %v6054_v22, %s8200_s21  ;;  %5804 = vst [vmem:[#allocation1 + $0x2] ss:$4 sm:$0xff] %v5673_v5  ;;  %v5621_v34 = vrot.slane %v5492_v36, 6 }
 0x5cc   : > { %5805 = vst [vmem:[#allocation1 + $0x3] ss:$4 sm:$0xff] %v5676_v7  ;;  %v5620_v46 = vrot.slane %v5545_v40, 4 }
 0x5cd   : > { %5959 = vst [vmem:[#allocation5 + $0x38] sm:$0xff] %v5797_v10  ;;  %v5696_v5 = vsel %vm1321_vm5, %v10806_v44, %v5621_v34  ;;  %v5699_v22 = vsel %vm1324_vm6, %v10806_v44, %v5621_v34  ;;  %v5702_v48 = vsel %vm1327_vm7, %v5621_v34, %v10806_v44 }
 0x5ce   : > { %5961 = vst [vmem:[#allocation5 + $0x48] sm:$0x3] %v5799_v17  ;;  %v5686_v29 = vsel %vm5641_vm2, %v5685_v24, %v5620_v46  ;;  %v5689_v32 = vsel %vm5638_vm1, %v5620_v46, %v5688_v59  ;;  %v5692_v2 = vsel %vm5641_vm2, %v5620_v46, %v5691_v60  ;;  %v5684_v4 = vsel %vm5638_vm1, %v5683_v6, %v5620_v46 }
 0x5cf   : > { %5806 = vst [vmem:[#allocation1 + $0x20] ss:$4 sm:$0xff] %v5679_v61  ;;  %v6110_v33 = vld [vmem:[#allocation5 + $0x30] sm:$0xfc]  ;;  %v5687_v9 = vrot.slane %v5686_v29, 2  ;;  %v5690_v18 = vrot.slane %v5689_v32, 4 }
 0x5d0   : > { %5962 = vst [vmem:[#allocation5 + $0x50] sm:$0x3] %v5800_v47  ;;  %v6022_v3 = vld [vmem:[#allocation5 + $0x30] sm:$0xfe]  ;;  %v6143_v21 = vrot.slane %v6110_v33, 2  ;;  %v5693_v55 = vrot.slane %v5692_v2, 6 }
 0x5d1   : > { %v6055_v15 = vrot.slane %v6022_v3, 1  ;;  %v5623_v3 = vrot.slane %v5495_v16, 6 }
 0x5d2   : > { %v5498_v62 = vpop.f32.mrf.mxu3 }
 0x5d3   : > { %v5548_v12 = vpop.f32.mrf.mxu2  ;;  %v5807_v52 = vld.sshfl [vmem:[#allocation1] sm:$0xff pattern:$0x73625140]  ;;  %v10885_v54 = vld.sshfl [vmem:[#allocation1 + $0x10] sm:$0xff pattern:$0x73625140] }
 0x5d4   : > { %5964 = vst [vmem:[#allocation5 + $0x60] sm:$0xff] %v5807_v52  ;;  %6215 = vrot.lane.b32.xlu1 %v5807_v52, %s8204_s8  ;;  %v5808_v53 = vld.sshfl [vmem:[#allocation1 + $0x8] sm:$0xff pattern:$0x73625140]  ;;  %v6317_v26 = vld [vmem:[#allocation5 + $0x38] sm:$0xfc] }
 0x5d5   : > { %v6111_v38 = vld [vmem:[#allocation5 + $0x48] sm:$0x3]  ;;  %5965 = vst [vmem:[#allocation5 + $0x68] sm:$0xff] %v5808_v53  ;;  %v5622_v50 = vrot.slane %v5548_v12, 4  ;;  %v6349_v10 = vrot.slane %v6317_v26, 2 }
 0x5d6   : > { %v6023_v56 = vld [vmem:[#allocation5 + $0x48] sm:$0x1]  ;;  %v6144_v23 = vrot.slane %v6111_v38, 2  ;;  %v10895_v28 = vld.sshfl [vmem:[#allocation1 + $0x30] sm:$0xff pattern:$0x73625140] }
 0x5d7   : > { %v6056_v1 = vrot.slane %v6023_v56, 1  ;;  %v5810_v37 = vld.sshfl [vmem:[#allocation1 + $0x20] sm:$0xff pattern:$0x73625140]  ;;  %v6318_v31 = vld [vmem:[#allocation5 + $0x50] sm:$0x3]  ;;  %v5697_v47 = vsel %vm5641_vm2, %v5696_v5, %v5622_v50  ;;  %v5700_v39 = vsel %vm5638_vm1, %v5622_v50, %v5699_v22  ;;  %v5703_v59 = vsel %vm5641_vm2, %v5622_v50, %v5702_v48 }
 0x5d8   : > { %5967 = vst [vmem:[#allocation5 + $0x78] sm:$0x3] %v5810_v37  ;;  %v6145_v43 = vsel %vm1327_vm7, %v6143_v21, %v6144_v23  ;;  %v5811_v49 = vld.sshfl [vmem:[#allocation1 + $0x28] sm:$0xff pattern:$0x73625140]  ;;  %v6350_v41 = vrot.slane %v6318_v31, 2  ;;  %v5694_v56 = vsel %vm1319_vm4, %v10806_v44, %v5621_v34  ;;  %v5707_v34 = vsel %vm1321_vm5, %v10810_v63, %v5623_v3 }
 0x5d9   : > { %v6057_v25 = vsel %vm2213_vm9, %v6055_v15, %v6056_v1  ;;  %6166 = vrot.lane.b32.xlu2 %v6145_v43, %s8202_s23  ;;  %5813 = vst [vmem:[#allocation1] ss:$4 sm:$0xff] %v5682_v13  ;;  %v5698_v52 = vrot.slane %v5697_v47, 2  ;;  %v5701_v24 = vrot.slane %v5700_v39, 4  ;;  %v5695_v15 = vsel %vm5638_vm1, %v5694_v56, %v5622_v50 }
 0x5da   : > { %6078 = vrot.lane.b32.xlu0 %v6057_v25, %s8200_s21  ;;  %5814 = vst [vmem:[#allocation1 + $0x1] ss:$4 sm:$0xff] %v5684_v4  ;;  %v6351_v42 = vsel %vm1327_vm7, %v6349_v10, %v6350_v41  ;;  %v5704_v13 = vrot.slane %v5703_v59, 6  ;;  %v5501_v31 = vpop.f32.mrf.mxu3  ;;  %v5710_v4 = vsel %vm1324_vm6, %v10810_v63, %v5623_v3 }
 0x5db   : > { %v5551_v11 = vpop.f32.mrf.mxu2  ;;  %v6024_v8 = vld [vmem:[#allocation5 + $0x60] sm:$0xfe]  ;;  %5815 = vst [vmem:[#allocation1 + $0x2] ss:$4 sm:$0xff] %v5687_v9 }
 0x5dc   : > { %6422 = vrot.lane.b32.xlu1 %v5808_v53, %s8202_s23  ;;  %v6112_v58 = vld [vmem:[#allocation5 + $0x60] sm:$0xfc]  ;;  %v6058_v19 = vrot.slane %v6024_v8, 1  ;;  %5816 = vst [vmem:[#allocation1 + $0x3] ss:$4 sm:$0xff] %v5690_v18  ;;  %v5624_v9 = vrot.slane %v5551_v11, 4  ;;  %v5705_v53 = vsel %vm1319_vm4, %v10810_v63, %v5623_v3 }
 0x5dd   : > { %5968 = vst [vmem:[#allocation5 + $0x80] sm:$0x3] %v5811_v49  ;;  %v6146_v17 = vrot.slane %v6112_v58, 2  ;;  %v6454_v33 = vld [vmem:[#allocation5 + $0x68] sm:$0xfe]  ;;  %v5713_v49 = vsel %vm1327_vm7, %v5623_v3, %v10810_v63  ;;  %v10937_v58 = vrot.slane %v5498_v62, 6 }
 0x5de   : > { %5817 = vst [vmem:[#allocation1 + $0x20] ss:$4 sm:$0xff] %v5693_v55  ;;  %v6486_v38 = vrot.slane %v6454_v33, 1  ;;  %v6319_v21 = vld [vmem:[#allocation5 + $0x68] sm:$0xfc]  ;;  %v5706_v11 = vsel %vm5638_vm1, %v5705_v53, %v5624_v9  ;;  %v5708_v8 = vsel %vm5641_vm2, %v5707_v34, %v5624_v9  ;;  %v5711_v16 = vsel %vm5638_vm1, %v5624_v9, %v5710_v4 }
 0x5df   : > { %v6025_v7 = vld [vmem:[#allocation5 + $0x78] sm:$0x1]  ;;  %v6352_v2 = vrot.slane %v6319_v21, 2  ;;  %v5714_v50 = vsel %vm5641_vm2, %v5624_v9, %v5713_v49  ;;  %v5709_v10 = vrot.slane %v5708_v8, 2  ;;  %v5712_v5 = vrot.slane %v5711_v16, 4  ;;  %5966 = vst.msk [vmem:[#allocation5 + $0x70] sm:$0xff] %vm5952_vm3, %v10885_v54 }
 0x5e0   : > { %v6113_v30 = vld [vmem:[#allocation5 + $0x78] sm:$0x3]  ;;  %v6059_v40 = vrot.slane %v6025_v7, 1  ;;  %v5715_v7 = vrot.slane %v5714_v50, 6  ;;  %v5718_v39 = vsel %vm1321_vm5, %v10813_v35, %v10937_v58  ;;  %v5716_v62 = vsel %vm1319_vm4, %v10813_v35, %v10937_v58  ;;  %5969 = vst.msk [vmem:[#allocation5 + $0x88] sm:$0x3] %vm5956_vm8, %v10895_v28 }
 0x5e1   : > { %v6147_v61 = vrot.slane %v6113_v30, 2  ;;  %v5724_v16 = vsel %vm1327_vm7, %v10937_v58, %v10813_v35 }
 0x5e2   : > { %v6060_v46 = vsel %vm2213_vm9, %v6058_v19, %v6059_v40  ;;  %6373 = vrot.lane.b32.xlu0 %v6351_v42, %s8200_s21  ;;  %v5504_v59 = vpop.f32.mrf.mxu3 }
 0x5e3   : > { %v5554_v12 = vpop.f32.mrf.mxu2  ;;  %6080 = vrot.lane.b32.xlu2 %v6060_v46, %s8200_s21  ;;  %v6148_v36 = vsel %vm1327_vm7, %v6146_v17, %v6147_v61  ;;  %v5818_v29 = vld.sshfl [vmem:[#allocation1] sm:$0xff pattern:$0x73625140]  ;;  %v10915_v32 = vld.sshfl [vmem:[#allocation1 + $0x10] sm:$0xff pattern:$0x73625140] }
 0x5e4   : > { %6168 = vrot.lane.b32.xlu1 %v6148_v36, %s8202_s23  ;;  %5970 = vst [vmem:[#allocation5 + $0x90] sm:$0xff] %v5818_v29  ;;  %v6455_v23 = vld [vmem:[#allocation5 + $0x80] sm:$0x1]  ;;  %v5819_v37 = vld.sshfl [vmem:[#allocation1 + $0x8] sm:$0xff pattern:$0x73625140] }
 0x5e5   : > { %v6487_v1 = vrot.slane %v6455_v23, 1  ;;  %v6320_v60 = vld [vmem:[#allocation5 + $0x80] sm:$0x3]  ;;  %5971 = vst [vmem:[#allocation5 + $0x98] sm:$0xff] %v5819_v37  ;;  %v10939_v30 = vrot.slane %v5554_v12, 4  ;;  %v10986_v34 = vrot.slane %v5504_v59, 6 }
 0x5e6   : > { %v6353_v43 = vrot.slane %v6320_v60, 2  ;;  %5824 = vst [vmem:[#allocation1] ss:$4 sm:$0xff] %v5695_v15  ;;  %v5821_v44 = vld.sshfl [vmem:[#allocation1 + $0x20] sm:$0xff pattern:$0x73625140] }
 0x5e7   : > { %v6488_v25 = vsel %vm2213_vm9, %v6486_v38, %v6487_v1  ;;  %5825 = vst [vmem:[#allocation1 + $0x1] ss:$4 sm:$0xff] %v5698_v52  ;;  %v5822_v18 = vld.sshfl [vmem:[#allocation1 + $0x28] sm:$0xff pattern:$0x73625140]  ;;  %v5719_v48 = vsel %vm5641_vm2, %v5718_v39, %v10939_v30  ;;  %v5717_v21 = vsel %vm5638_vm1, %v5716_v62, %v10939_v30 }
 0x5e8   : > { %5826 = vst [vmem:[#allocation1 + $0x2] ss:$4 sm:$0xff] %v5701_v24  ;;  %v6354_v26 = vsel %vm1327_vm7, %v6352_v2, %v6353_v43  ;;  %v10932_v55 = vld.sshfl [vmem:[#allocation1 + $0x30] sm:$0xff pattern:$0x73625140]  ;;  %v5720_v15 = vrot.slane %v5719_v48, 2 }
 0x5e9   : > { %5827 = vst [vmem:[#allocation1 + $0x3] ss:$4 sm:$0xff] %v5704_v13 }
 0x5ea   : > { %6510 = vrot.lane.b32.xlu0 %v6488_v25, %s8204_s8  ;;  %5973 = vst [vmem:[#allocation5 + $0xa8] sm:$0x3] %v5821_v44  ;;  %v5721_v44 = vsel %vm1324_vm6, %v10813_v35, %v10937_v58 }
 0x5eb   : > { %6217 = vrot.lane.b32.xlu2 %v5818_v29, %s8204_s8  ;;  %v5557_v6 = vpop.f32.mrf.mxu2  ;;  %5974 = vst [vmem:[#allocation5 + $0xb0] sm:$0x3] %v5822_v18  ;;  %v6026_v41 = vld [vmem:[#allocation5 + $0x90] sm:$0xfe]  ;;  %v5722_v18 = vsel %vm5638_vm1, %v10939_v30, %v5721_v44 }
 0x5ec   : > { %6375 = vrot.lane.b32.xlu1 %v6354_v26, %s8200_s21  ;;  %5828 = vst [vmem:[#allocation1 + $0x20] ss:$4 sm:$0xff] %v5706_v11  ;;  %v6456_v19 = vld [vmem:[#allocation5 + $0x98] sm:$0xfe]  ;;  %v6061_v63 = vrot.slane %v6026_v41, 1  ;;  %v10963_v60 = vrot.slane %v5557_v6, 4  ;;  %v10975_v6 = vpop.f32.mrf.mxu3 }
 0x5ed   : > { %v6114_v22 = vld [vmem:[#allocation5 + $0x90] sm:$0xfc]  ;;  %v6489_v47 = vrot.slane %v6456_v19, 1  ;;  %v6321_v38 = vld [vmem:[#allocation5 + $0x98] sm:$0xfc]  ;;  %v5723_v4 = vrot.slane %v5722_v18, 4 }
 0x5ee   : > { %v6149_v3 = vrot.slane %v6114_v22, 2  ;;  %v6355_v9 = vrot.slane %v6321_v38, 2  ;;  %5972 = vst.msk [vmem:[#allocation5 + $0xa0] sm:$0xff] %vm5952_vm3, %v10915_v32 }
 0x5ef   : > { %5975 = vst.msk [vmem:[#allocation5 + $0xb8] sm:$0x3] %vm5956_vm8, %v10932_v55 }
 0x5f0   : > { %v10942_v40 = vld.sshfl [vmem:[#allocation1] sm:$0xff pattern:$0x73625140]  ;;  %v10948_v33 = vld.sshfl [vmem:[#allocation1 + $0x10] sm:$0xff pattern:$0x73625140] }
 0x5f1   : > { %v6027_v17 = vld [vmem:[#allocation5 + $0xa8] sm:$0x1]  ;;  %5976 = vst [vmem:[#allocation5 + $0xc0] sm:$0xff] %v10942_v40  ;;  %v5830_v36 = vld.sshfl [vmem:[#allocation1 + $0x8] sm:$0xff pattern:$0x73625140] }
 0x5f2   : > { %v6115_v61 = vld [vmem:[#allocation5 + $0xa8] sm:$0x3]  ;;  %v6062_v42 = vrot.slane %v6027_v17, 1  ;;  %v6457_v12 = vld [vmem:[#allocation5 + $0xb0] sm:$0x1]  ;;  %5977 = vst [vmem:[#allocation5 + $0xc8] sm:$0xff] %v5830_v36 }
 0x5f3   : > { %6424 = vrot.lane.b32.xlu2 %v5819_v37, %s8202_s23  ;;  %v5560_v46 = vpop.f32.mrf.mxu2  ;;  %v6150_v52 = vrot.slane %v6115_v61, 2  ;;  %v6490_v24 = vrot.slane %v6457_v12, 1  ;;  %5835 = vst [vmem:[#allocation1] ss:$4 sm:$0xff] %v5709_v10  ;;  %v6322_v1 = vld [vmem:[#allocation5 + $0xb0] sm:$0x3]  ;;  %v5725_v10 = vsel %vm5641_vm2, %v10939_v30, %v5724_v16  ;;  %v5746_v12 = vsel %vm1327_vm7, %v10986_v34, %v10819_v27 }
 0x5f4   : > { %v6063_v29 = vsel %vm2213_vm9, %v6061_v63, %v6062_v42  ;;  %v5832_v23 = vld.sshfl [vmem:[#allocation1 + $0x20] sm:$0xff pattern:$0x73625140]  ;;  %5836 = vst [vmem:[#allocation1 + $0x1] ss:$4 sm:$0xff] %v5712_v5  ;;  %v10961_v37 = vrot.slane %v5501_v31, 6  ;;  %v5743_v16 = vsel %vm1324_vm6, %v10819_v27, %v10986_v34 }
 0x5f5   : > { %6082 = vrot.lane.b32.xlu0 %v6063_v29, %s8200_s21  ;;  %v6491_v56 = vsel %vm2213_vm9, %v6489_v47, %v6490_v24  ;;  %v6151_v13 = vsel %vm1327_vm7, %v6149_v3, %v6150_v52  ;;  %5837 = vst [vmem:[#allocation1 + $0x2] ss:$4 sm:$0xff] %v5715_v7  ;;  %v5833_v2 = vld.sshfl [vmem:[#allocation1 + $0x28] sm:$0xff pattern:$0x73625140]  ;;  %v6356_v25 = vrot.slane %v6322_v1, 2  ;;  %v5510_v52 = vpop.f32.mrf.mxu3 }
 0x5f6   : > { %6512 = vrot.lane.b32.xlu1 %v6491_v56, %s8204_s8  ;;  %5838 = vst [vmem:[#allocation1 + $0x3] ss:$4 sm:$0xff] %v5717_v21  ;;  %v10967_v43 = vld.sshfl [vmem:[#allocation1 + $0x30] sm:$0xff pattern:$0x73625140]  ;;  %v5732_v53 = vsel %vm1324_vm6, %v10816_v45, %v10961_v37  ;;  %v11000_v5 = vrot.slane %v5560_v46, 4  ;;  %v5729_v63 = vsel %vm1321_vm5, %v10816_v45, %v10961_v37  ;;  %v5727_v46 = vsel %vm1319_vm4, %v10816_v45, %v10961_v37 }
 0x5f7   : > { %5979 = vst [vmem:[#allocation5 + $0xd8] sm:$0x3] %v5832_v23  ;;  %v5733_v26 = vsel %vm5638_vm1, %v10963_v60, %v5732_v53  ;;  %v6357_v31 = vsel %vm1327_vm7, %v6355_v9, %v6356_v25  ;;  %v5730_v17 = vsel %vm5641_vm2, %v5729_v63, %v10963_v60  ;;  %v5726_v39 = vrot.slane %v5725_v10, 6  ;;  %v6545_v0 = vld [vmem:[#allocation5 + $0xb8] sm:$0x3] }
 0x5f8   : > { %5839 = vst [vmem:[#allocation1 + $0x20] ss:$4 sm:$0xff] %v5720_v15  ;;  %v6116_v49 = vld [vmem:[#allocation5 + $0xc0] sm:$0xfc]  ;;  %v5734_v50 = vrot.slane %v5733_v26, 4  ;;  %v5728_v24 = vsel %vm5638_vm1, %v5727_v46, %v10963_v60  ;;  %v5747_v62 = vsel %vm5641_vm2, %v11000_v5, %v5746_v12  ;;  %v5735_v9 = vsel %vm1327_vm7, %v10961_v37, %v10816_v45 }
 0x5f9   : > { %5980 = vst [vmem:[#allocation5 + $0xe0] sm:$0x3] %v5833_v2  ;;  %v6152_v22 = vrot.slane %v6116_v49, 2  ;;  %v6028_v58 = vld [vmem:[#allocation5 + $0xc0] sm:$0xfe]  ;;  %v5748_v23 = vrot.slane %v5747_v62, 6  ;;  %v5736_v44 = vsel %vm5641_vm2, %v10963_v60, %v5735_v9  ;;  %v5740_v60 = vsel %vm1321_vm5, %v10819_v27, %v10986_v34 }
 0x5fa   : > { %v6064_v48 = vrot.slane %v6028_v58, 1  ;;  %v6458_v21 = vld [vmem:[#allocation5 + $0xc8] sm:$0xfe]  ;;  %v11036_v53 = vrot.slane %v5510_v52, 6  ;;  %v11041_v26 = vrot.slane %v10975_v6, 6  ;;  %v5737_v37 = vrot.slane %v5736_v44, 6 }
 0x5fb   : > { %6170 = vrot.lane.b32.xlu2 %v6151_v13, %s8202_s23  ;;  %v10979_v11 = vpop.f32.mrf.mxu2  ;;  %v6492_v15 = vrot.slane %v6458_v21, 1  ;;  %5978 = vst.msk [vmem:[#allocation5 + $0xd0] sm:$0xff] %vm5952_vm3, %v10948_v33 }
 0x5fc   : > { %v5760_v6 = vsel %vm1319_vm4, %v10823_v14, %v11036_v53  ;;  %5981 = vst.msk [vmem:[#allocation5 + $0xe8] sm:$0x3] %vm5956_vm8, %v10967_v43 }
 0x5fd   : > { %6219 = vrot.lane.b32.xlu0 %v10942_v40, %s8204_s8  ;;  %v10991_v8 = vld.sshfl [vmem:[#allocation1] sm:$0xff pattern:$0x73625140]  ;;  %v11017_v3 = vld.sshfl [vmem:[#allocation1 + $0x10] sm:$0xff pattern:$0x73625140]  ;;  %v11043_v45 = vpop.f32.mrf.mxu3 }
 0x5fe   : > { %6377 = vrot.lane.b32.xlu1 %v6357_v31, %s8200_s21  ;;  %v6117_v41 = vld [vmem:[#allocation5 + $0xd8] sm:$0x3]  ;;  %5982 = vst [vmem:[#allocation5 + $0xf0] sm:$0xff] %v10991_v8  ;;  %v5841_v29 = vld.sshfl [vmem:[#allocation1 + $0x8] sm:$0xff pattern:$0x73625140] }
 0x5ff   : > { %v6029_v19 = vld [vmem:[#allocation5 + $0xd8] sm:$0x1]  ;;  %v6153_v54 = vrot.slane %v6117_v41, 2  ;;  %v5843_v7 = vld.sshfl [vmem:[#allocation1 + $0x20] sm:$0xff pattern:$0x73625140] }
 0x600   : > { %v5844_v35 = vld.sshfl [vmem:[#allocation1 + $0x28] sm:$0xff pattern:$0x73625140]  ;;  %v11007_v61 = vld.sshfl [vmem:[#allocation1 + $0x30] sm:$0xff pattern:$0x73625140] }
 0x601   : > { %5985 = vst [vmem:[#allocation5 + $0x108] sm:$0x3] %v5843_v7  ;;  %v6065_v47 = vrot.slane %v6029_v19, 1  ;;  %v6154_v30 = vsel %vm1327_vm7, %v6152_v22, %v6153_v54  ;;  %v6459_v42 = vld [vmem:[#allocation5 + $0xe0] sm:$0x1]  ;;  %v5632_v41 = vrot.slane %v10979_v11, 4  ;;  %v5744_v54 = vsel %vm5638_vm1, %v11000_v5, %v5743_v16 }
 0x602   : > { %5850 = vst [vmem:[#allocation1 + $0x20] ss:$4 sm:$0xff] %v5734_v50  ;;  %v6493_v56 = vrot.slane %v6459_v42, 1  ;;  %v5741_v50 = vsel %vm5641_vm2, %v5740_v60, %v11000_v5  ;;  %v5635_v10 = vrot.slane %v11043_v45, 6  ;;  %v5751_v11 = vsel %vm1321_vm5, %v10821_v20, %v11041_v26  ;;  %v6324_v52 = vld [vmem:[#allocation5 + $0xe0] sm:$0x3] }
 0x603   : > { %6426 = vrot.lane.b32.xlu2 %v5830_v36, %s8202_s23  ;;  %5986 = vst [vmem:[#allocation5 + $0x110] sm:$0x3] %v5844_v35  ;;  %v5731_v36 = vrot.slane %v5730_v17, 2  ;;  %v5566_v59 = vpop.f32.mrf.mxu2  ;;  %v6066_v38 = vsel %vm2213_vm9, %v6064_v48, %v6065_v47  ;;  %v5742_v58 = vrot.slane %v5741_v50, 2  ;;  %v5738_v47 = vsel %vm1319_vm4, %v10819_v27, %v10986_v34  ;;  %v6323_v34 = vld [vmem:[#allocation5 + $0xc8] sm:$0xfc] }
 0x604   : > { %5846 = vst [vmem:[#allocation1] ss:$4 sm:$0xff] %v5723_v4  ;;  %v6494_v25 = vsel %vm2213_vm9, %v6492_v15, %v6493_v56  ;;  %v11038_v18 = vrot.slane %v5566_v59, 4  ;;  %v5773_v42 = vsel %vm1321_vm5, %v10825_v51, %v5635_v10  ;;  %v5739_v46 = vsel %vm5638_vm1, %v5738_v47, %v11000_v5 }
 0x605   : > { %6172 = vrot.lane.b32.xlu0 %v6154_v30, %s8202_s23  ;;  %5847 = vst [vmem:[#allocation1 + $0x1] ss:$4 sm:$0xff] %v5726_v39  ;;  %v5745_v39 = vrot.slane %v5744_v54, 4  ;;  %v5752_v30 = vsel %vm5641_vm2, %v5751_v11, %v5632_v41  ;;  %v5754_v27 = vsel %vm1324_vm6, %v10821_v20, %v11041_v26  ;;  %v6359_v62 = vrot.slane %v6324_v52, 2  ;;  %v6118_v59 = vld [vmem:[#allocation5 + $0xf0] sm:$0xfc] }
 0x606   : > { %6221 = vrot.lane.b32.xlu1 %v10991_v8, %s8204_s8  ;;  %5848 = vst [vmem:[#allocation1 + $0x2] ss:$4 sm:$0xff] %v5728_v24  ;;  %v5761_v7 = vsel %vm5638_vm1, %v5760_v6, %v11038_v18  ;;  %v5753_v48 = vrot.slane %v5752_v30, 2  ;;  %v5757_v24 = vsel %vm1327_vm7, %v11041_v26, %v10821_v20  ;;  %v6155_v56 = vrot.slane %v6118_v59, 2 }
 0x607   : > { %5849 = vst [vmem:[#allocation1 + $0x3] ss:$4 sm:$0xff] %v5731_v36  ;;  %v6358_v36 = vrot.slane %v6323_v34, 2  ;;  %v5749_v54 = vsel %vm1319_vm4, %v10821_v20, %v11041_v26  ;;  %v5771_v32 = vsel %vm1319_vm4, %v10825_v51, %v5635_v10 }
 0x608   : > { %5983 = vst [vmem:[#allocation5 + $0xf8] sm:$0xff] %v5841_v29  ;;  %v6119_v21 = vld [vmem:[#allocation5 + $0x108] sm:$0x3] }
 0x609   : > { %v5854_v1 = vld.sshfl [vmem:[#allocation1 + $0x20] sm:$0xff pattern:$0x73625140]  ;;  %v5855_v13 = vld.sshfl [vmem:[#allocation1 + $0x28] sm:$0xff pattern:$0x73625140] }
 0x60a   : > { %v11030_v2 = vld.sshfl [vmem:[#allocation1 + $0x30] sm:$0xff pattern:$0x73625140]  ;;  %5991 = vst [vmem:[#allocation5 + $0x138] sm:$0x3] %v5854_v1  ;;  %v6360_v1 = vsel %vm1327_vm7, %v6358_v36, %v6359_v62  ;;  %v6156_v9 = vrot.slane %v6119_v21, 2 }
 0x60b   : > { %6084 = vrot.lane.b32.xlu2 %v6066_v38, %s8200_s21  ;;  %5861 = vst [vmem:[#allocation1 + $0x20] ss:$4 sm:$0xff] %v5748_v23  ;;  %v11045_v31 = vpop.f32.mrf.mxu2  ;;  %v5758_v38 = vsel %vm5641_vm2, %v5632_v41, %v5757_v24  ;;  %v6030_v23 = vld [vmem:[#allocation5 + $0xf0] sm:$0xfe]  ;;  %v6461_v47 = vld [vmem:[#allocation5 + $0x110] sm:$0x1] }
 0x60c   : > { %5992 = vst [vmem:[#allocation5 + $0x140] sm:$0x3] %v5855_v13  ;;  %v5636_v63 = vrot.slane %v11045_v31, 4  ;;  %v5759_v44 = vrot.slane %v5758_v38, 6  ;;  %v6157_v60 = vsel %vm1327_vm7, %v6155_v56, %v6156_v9  ;;  %v6067_v16 = vrot.slane %v6030_v23, 1 }
 0x60d   : > { %6514 = vrot.lane.b32.xlu0 %v6494_v25, %s8204_s8  ;;  %v6496_v20 = vrot.slane %v6461_v47, 1  ;;  %v6326_v36 = vld [vmem:[#allocation5 + $0x110] sm:$0x3]  ;;  %5984 = vst.msk [vmem:[#allocation5 + $0x100] sm:$0xff] %vm5952_vm3, %v11017_v3 }
 0x60e   : > { %v11050_v4 = vld.sshfl [vmem:[#allocation1] sm:$0xff pattern:$0x73625140]  ;;  %v11052_v49 = vld.sshfl [vmem:[#allocation1 + $0x8] sm:$0xff pattern:$0x73625140]  ;;  %v5774_v12 = vsel %vm5641_vm2, %v5773_v42, %v5636_v63  ;;  %6174 = vrot.lane.b32.xlu1 %v6157_v60, %s8202_s23 }
 0x60f   : > { %v11063_v19 = vld.sshfl [vmem:[#allocation1 + $0x10] sm:$0xff pattern:$0x73625140]  ;;  %5988 = vst [vmem:[#allocation5 + $0x120] sm:$0xff] %v11050_v4  ;;  %v5775_v5 = vrot.slane %v5774_v12, 2  ;;  %v5765_v12 = vsel %vm1324_vm6, %v10823_v14, %v11036_v53  ;;  %v6362_v21 = vrot.slane %v6326_v36, 2 }
 0x610   : > { %5857 = vst [vmem:[#allocation1] ss:$4 sm:$0xff] %v5737_v37  ;;  %v6031_v37 = vld [vmem:[#allocation5 + $0x108] sm:$0x1]  ;;  %v6460_v50 = vld [vmem:[#allocation5 + $0xf8] sm:$0xfe]  ;;  %v5766_v34 = vsel %vm5638_vm1, %v11038_v18, %v5765_v12 }
 0x611   : > { %5858 = vst [vmem:[#allocation1 + $0x1] ss:$4 sm:$0xff] %v5739_v46  ;;  %v6068_v6 = vrot.slane %v6031_v37, 1  ;;  %v6121_v26 = vld [vmem:[#allocation5 + $0x138] sm:$0x3]  ;;  %v6495_v30 = vrot.slane %v6460_v50, 1  ;;  %v5772_v37 = vsel %vm5638_vm1, %v5771_v32, %v5636_v63 }
 0x612   : > { %v5865_v22 = vld.sshfl [vmem:[#allocation1 + $0x20] sm:$0xff pattern:$0x73625140]  ;;  %v5866_v35 = vld.sshfl [vmem:[#allocation1 + $0x28] sm:$0xff pattern:$0x73625140] }
 0x613   : > { %v11075_v17 = vld.sshfl [vmem:[#allocation1 + $0x30] sm:$0xff pattern:$0x73625140]  ;;  %5997 = vst [vmem:[#allocation5 + $0x168] sm:$0x3] %v5865_v22  ;;  %6379 = vrot.lane.b32.xlu2 %v6360_v1, %s8200_s21  ;;  %v6159_v46 = vrot.slane %v6121_v26, 2  ;;  %v6497_v24 = vsel %vm2213_vm9, %v6495_v30, %v6496_v20 }
 0x614   : > { %5872 = vst [vmem:[#allocation1 + $0x20] ss:$4 sm:$0xff] %v5761_v7  ;;  %v5767_v62 = vrot.slane %v5766_v34, 4  ;;  %v6033_v23 = vld [vmem:[#allocation5 + $0x138] sm:$0x1] }
 0x615   : > { %6428 = vrot.lane.b32.xlu0 %v5841_v29, %s8202_s23  ;;  %5998 = vst [vmem:[#allocation5 + $0x170] sm:$0x3] %v5866_v35  ;;  %v5755_v29 = vsel %vm5638_vm1, %v5632_v41, %v5754_v27  ;;  %v5750_v35 = vsel %vm5638_vm1, %v5749_v54, %v5632_v41  ;;  %v5762_v41 = vsel %vm1321_vm5, %v10823_v14, %v11036_v53  ;;  %v6071_v51 = vrot.slane %v6033_v23, 1  ;;  %v6328_v63 = vld [vmem:[#allocation5 + $0x140] sm:$0x3] }
 0x616   : > { %5859 = vst [vmem:[#allocation1 + $0x2] ss:$4 sm:$0xff] %v5742_v58  ;;  %v5756_v25 = vrot.slane %v5755_v29, 4  ;;  %v6069_v58 = vsel %vm2213_vm9, %v6067_v16, %v6068_v6  ;;  %v5763_v27 = vsel %vm5641_vm2, %v5762_v41, %v11038_v18  ;;  %6516 = vrot.lane.b32.xlu1 %v6497_v24, %s8204_s8  ;;  %v6032_v56 = vld [vmem:[#allocation5 + $0x120] sm:$0xfe]  ;;  %v6365_v54 = vrot.slane %v6328_v63, 2 }
 0x617   : > { %5860 = vst [vmem:[#allocation1 + $0x3] ss:$4 sm:$0xff] %v5745_v39  ;;  %v6120_v39 = vld [vmem:[#allocation5 + $0x120] sm:$0xfc]  ;;  %v6070_v45 = vrot.slane %v6032_v56, 1 }
 0x618   : > { %5989 = vst [vmem:[#allocation5 + $0x128] sm:$0xff] %v11052_v49  ;;  %v6158_v42 = vrot.slane %v6120_v39, 2  ;;  %v6246_v32 = vld [vmem:[#allocation5 + $0x50] sm:$0x1] }
 0x619   : > { %v6072_v16 = vsel %vm2213_vm9, %v6070_v45, %v6071_v51  ;;  %5987 = vst.msk [vmem:[#allocation5 + $0x118] sm:$0x3] %vm5956_vm8, %v11007_v61  ;;  %v6278_v45 = vrot.slane %v6246_v32, 1 }
 0x61a   : > { %v6035_v39 = vld [vmem:[#allocation5 + $0x168] sm:$0x1]  ;;  %5990 = vst.msk [vmem:[#allocation5 + $0x130] sm:$0xff] %vm5952_vm3, %v11063_v19 }
 0x61b   : > { %v5877_v15 = vld.sshfl [vmem:[#allocation1 + $0x28] sm:$0xff pattern:$0x73625140]  ;;  %v11101_v13 = vld.sshfl [vmem:[#allocation1 + $0x30] sm:$0xff pattern:$0x73625140]  ;;  %6223 = vrot.lane.b32.xlu2 %v11050_v4, %s8204_s8 }
 0x61c   : > { %5883 = vst [vmem:[#allocation1 + $0x20] ss:$4 sm:$0xff] %v5775_v5  ;;  %v6325_v5 = vld [vmem:[#allocation5 + $0xf8] sm:$0xfc]  ;;  %v6330_v30 = vld [vmem:[#allocation5 + $0x170] sm:$0x3] }
 0x61d   : > { %6004 = vst [vmem:[#allocation5 + $0x1a0] sm:$0x3] %v5877_v15  ;;  %6086 = vrot.lane.b32.xlu0 %v6069_v58, %s8200_s21  ;;  %v6361_v38 = vrot.slane %v6325_v5, 2  ;;  %v6123_v58 = vld [vmem:[#allocation5 + $0x168] sm:$0x3]  ;;  %v6368_v3 = vrot.slane %v6330_v30, 2 }
 0x61e   : > { %v11108_v7 = vld.sshfl [vmem:[#allocation1] sm:$0xff pattern:$0x73625140]  ;;  %v11110_v22 = vld.sshfl [vmem:[#allocation1 + $0x8] sm:$0xff pattern:$0x73625140] }
 0x61f   : > { %v11114_v11 = vld.sshfl [vmem:[#allocation1 + $0x10] sm:$0xff pattern:$0x73625140]  ;;  %5994 = vst [vmem:[#allocation5 + $0x150] sm:$0xff] %v11108_v7  ;;  %v6462_v29 = vld [vmem:[#allocation5 + $0x128] sm:$0xfe]  ;;  %v6363_v60 = vsel %vm1327_vm7, %v6361_v38, %v6362_v21 }
 0x620   : > { %5868 = vst [vmem:[#allocation1] ss:$4 sm:$0xff] %v5750_v35  ;;  %6381 = vrot.lane.b32.xlu1 %v6363_v60, %s8200_s21  ;;  %v6327_v31 = vld [vmem:[#allocation5 + $0x128] sm:$0xfc]  ;;  %v6162_v26 = vrot.slane %v6123_v58, 2 }
 0x621   : > { %5869 = vst [vmem:[#allocation1 + $0x1] ss:$4 sm:$0xff] %v5753_v48  ;;  %v5768_v48 = vsel %vm1327_vm7, %v11036_v53, %v10823_v14  ;;  %v5764_v14 = vrot.slane %v5763_v27, 2  ;;  %v6160_v53 = vsel %vm1327_vm7, %v6158_v42, %v6159_v46  ;;  %v6364_v50 = vrot.slane %v6327_v31, 2  ;;  %v6245_v60 = vld [vmem:[#allocation5 + $0x38] sm:$0xfe] }
 0x622   : > { %5870 = vst [vmem:[#allocation1 + $0x2] ss:$4 sm:$0xff] %v5756_v25  ;;  %v5769_v52 = vsel %vm5641_vm2, %v11038_v18, %v5768_v48  ;;  %v6463_v18 = vld [vmem:[#allocation5 + $0x140] sm:$0x1]  ;;  %v6498_v25 = vrot.slane %v6462_v29, 1  ;;  %v6277_v31 = vrot.slane %v6245_v60, 1 }
 0x623   : > { %5871 = vst [vmem:[#allocation1 + $0x3] ss:$4 sm:$0xff] %v5759_v44  ;;  %v5770_v59 = vrot.slane %v5769_v52, 6  ;;  %6430 = vrot.lane.b32.xlu2 %v11052_v49, %s8202_s23  ;;  %v6499_v44 = vrot.slane %v6463_v18, 1  ;;  %v6366_v43 = vsel %vm1327_vm7, %v6364_v50, %v6365_v54  ;;  %v6465_v48 = vld [vmem:[#allocation5 + $0x170] sm:$0x1] }
 0x624   : > { %5995 = vst [vmem:[#allocation5 + $0x158] sm:$0xff] %v11110_v22  ;;  %v5888_v6 = vld.sshfl [vmem:[#allocation1 + $0x28] sm:$0xff pattern:$0x73625140]  ;;  %v6502_v5 = vrot.slane %v6465_v48, 1  ;;  %v8131_v18 = vld [vmem:[#allocation5] sm:$0xff] }
 0x625   : > { %6176 = vrot.lane.b32.xlu0 %v6160_v53, %s8202_s23  ;;  %v11160_v10 = vpop.permute.xlu2 %6076  ;;  %v6500_v49 = vsel %vm2213_vm9, %v6498_v25, %v6499_v44  ;;  %6010 = vst [vmem:[#allocation5 + $0x1d0] sm:$0x3] %v5888_v6  ;;  %v5889_v52 = vld.sshfl [vmem:[#allocation1 + $0x30] sm:$0xff pattern:$0x73625140] }
 0x626   : > { %v6122_v35 = vld [vmem:[#allocation5 + $0x150] sm:$0xfc]  ;;  %5993 = vst.msk [vmem:[#allocation5 + $0x148] sm:$0x3] %vm5956_vm8, %v11030_v2  ;;  %v6332_v2 = vld [vmem:[#allocation5 + $0x1a0] sm:$0x3]  ;;  %v6100_v38 = vadd.f32 %v8131_v18, %v11160_v10 }
 0x627   : > { %v6034_v33 = vld [vmem:[#allocation5 + $0x150] sm:$0xfe]  ;;  %v6161_v20 = vrot.slane %v6122_v35, 2  ;;  %5996 = vst.msk [vmem:[#allocation5 + $0x160] sm:$0xff] %vm5952_vm3, %v11114_v11  ;;  %v6371_v53 = vrot.slane %v6332_v2, 2  ;;  %v6929_v60 = vld [vmem:[%s11597_s5 + $0x50] sm:$0xff] }
 0x628   : > { %6225 = vrot.lane.b32.xlu1 %v11108_v7, %s8204_s8  ;;  %v6073_v41 = vrot.slane %v6034_v33, 1  ;;  %5999 = vst.msk [vmem:[#allocation5 + $0x178] sm:$0x3] %vm5956_vm8, %v11075_v17  ;;  %v6467_v56 = vld [vmem:[#allocation5 + $0x1a0] sm:$0x1] }
 0x629   : > { %v6163_v46 = vsel %vm1327_vm7, %v6161_v20, %v6162_v26  ;;  %6005 = vst.msk [vmem:[#allocation5 + $0x1a8] sm:$0x3] %vm5956_vm8, %v11101_v13  ;;  %v6934_v13 = vld [vmem:[%s11597_s5 + $0x78] sm:$0xff]  ;;  %v6542_v20 = vld [vmem:[#allocation5 + $0x70] sm:$0xfc] }
 0x62a   : > { %v11143_v15 = vld.sshfl [vmem:[#allocation1] sm:$0xff pattern:$0x73625140]  ;;  %v11145_v1 = vld.sshfl [vmem:[#allocation1 + $0x8] sm:$0xff pattern:$0x73625140]  ;;  %6991 = vmatpush.msra.mxu3 %v6934_v13 }
 0x62b   : > { %v11151_v9 = vld.sshfl [vmem:[#allocation1 + $0x10] sm:$0xff pattern:$0x73625140]  ;;  %6001 = vst [vmem:[#allocation5 + $0x188] sm:$0xff] %v11145_v1  ;;  %6088 = vrot.lane.b32.xlu2 %v6072_v16, %s8200_s21  ;;  %v6543_v26 = vld [vmem:[#allocation5 + $0x88] sm:$0x3] }
 0x62c   : > { %5879 = vst [vmem:[#allocation1] ss:$4 sm:$0xff] %v5764_v14  ;;  %v6329_v42 = vld [vmem:[#allocation5 + $0x158] sm:$0xfc]  ;;  %v6469_v10 = vld [vmem:[#allocation5 + $0x1d0] sm:$0x1]  ;;  %6992 = vmatpush.msra.mxu3 %v6929_v60 }
 0x62d   : > { %5880 = vst [vmem:[#allocation1 + $0x1] ss:$4 sm:$0xff] %v5767_v62  ;;  %6518 = vrot.lane.b32.xlu0 %v6500_v49, %s8204_s8  ;;  %v6464_v12 = vld [vmem:[#allocation5 + $0x158] sm:$0xfe]  ;;  %v6367_v61 = vrot.slane %v6329_v42, 2  ;;  %v6508_v50 = vrot.slane %v6469_v10, 1 }
 0x62e   : > { %5881 = vst [vmem:[#allocation1 + $0x2] ss:$4 sm:$0xff] %v5770_v59  ;;  %v6501_v24 = vrot.slane %v6464_v12, 1  ;;  %v6247_v42 = vld [vmem:[#allocation5 + $0x68] sm:$0xfe] }
 0x62f   : > { %5882 = vst [vmem:[#allocation1 + $0x3] ss:$4 sm:$0xff] %v5772_v37  ;;  %v6369_v17 = vsel %vm1327_vm7, %v6367_v61, %v6368_v3  ;;  %v6505_v37 = vrot.slane %v6467_v56, 1  ;;  %v6280_v3 = vrot.slane %v6247_v42, 1 }
 0x630   : > { %6178 = vrot.lane.b32.xlu1 %v6163_v46, %s8202_s23  ;;  %6002 = vst.msk [vmem:[#allocation5 + $0x190] sm:$0xff] %vm5952_vm3, %v11151_v9  ;;  %v6503_v62 = vsel %vm2213_vm9, %v6501_v24, %v6502_v5 }
 0x631   : > { %6011 = vst.msk [vmem:[#allocation5 + $0x1d8] sm:$0x3] %vm5956_vm8, %v5889_v52  ;;  %v6895_v52 = vld [vmem:[#allocation6] sm:$0x3f] }
 0x632   : > { %v6331_v14 = vld [vmem:[#allocation5 + $0x188] sm:$0xfc]  ;;  %v6907_v24 = vrot.slane %v6895_v52, 2  ;;  %v6908_v5 = vrot.slane %v6895_v52, 4 }
 0x633   : > { %v11179_v55 = vpop.permute.xlu2 %6166  ;;  %6383 = vrot.lane.b32.xlu2 %v6366_v43, %s8200_s21  ;;  %v6370_v59 = vrot.slane %v6331_v14, 2  ;;  %v6466_v25 = vld [vmem:[#allocation5 + $0x188] sm:$0xfe]  ;;  %v6544_v14 = vld [vmem:[#allocation5 + $0xa0] sm:$0xfc] }
 0x634   : > { %v6504_v49 = vrot.slane %v6466_v25, 1 }
 0x635   : > { %6432 = vrot.lane.b32.xlu0 %v11110_v22, %s8202_s23  ;;  %v6074_v22 = vrot.slane %v6035_v39, 1  ;;  %v6372_v21 = vsel %vm1327_vm7, %v6370_v59, %v6371_v53  ;;  %v6578_v59 = vrot.slane %v6545_v0, 2  ;;  %v6250_v0 = vld [vmem:[#allocation5 + $0xb0] sm:$0x1] }
 0x636   : > { %v11177_v28 = vld.sshfl [vmem:[#allocation1 + $0x8] sm:$0xff pattern:$0x73625140]  ;;  %v5886_v34 = vld.sshfl [vmem:[#allocation1 + $0x10] sm:$0xff pattern:$0x73625140]  ;;  %v6506_v16 = vsel %vm2213_vm9, %v6504_v49, %v6505_v37 }
 0x637   : > { %6007 = vst [vmem:[#allocation5 + $0x1b8] sm:$0xff] %v11177_v28  ;;  %v6075_v19 = vsel %vm2213_vm9, %v6073_v41, %v6074_v22  ;;  %v6248_v41 = vld [vmem:[#allocation5 + $0x80] sm:$0x1]  ;;  %v6575_v22 = vrot.slane %v6543_v26, 2 }
 0x638   : > { %6008 = vst.msk [vmem:[#allocation5 + $0x1c0] sm:$0xff] %vm5952_vm3, %v5886_v34  ;;  %6520 = vrot.lane.b32.xlu1 %v6503_v62, %s8204_s8  ;;  %v6281_v12 = vrot.slane %v6248_v41, 1  ;;  %v6577_v62 = vrot.slane %v6544_v14, 2 }
 0x639   : > { %6939 = vst [vmem:[#allocation1] ss:$4 sm:$0xff] %v6895_v52 }
 0x63a   : > { %v6214_v27 = vpop.permute.xlu0 %6213  ;;  %6941 = vst [vmem:[#allocation1 + $0x1] ss:$4 sm:$0xff] %v6907_v24  ;;  %v6579_v56 = vsel %vm1327_vm7, %v6577_v62, %v6578_v59 }
 0x63b   : > { %6385 = vrot.lane.b32.xlu2 %v6369_v17, %s8200_s21  ;;  %6943 = vst [vmem:[#allocation1 + $0x2] ss:$4 sm:$0xff] %v6908_v5 }
 0x63c   : > { %v6165_v47 = vpop.permute.xlu1 %6164 }
 0x63d   : > { %6090 = vrot.lane.b32.xlu0 %v6075_v19, %s8200_s21  ;;  %v11206_v11 = vpop.permute.xlu2 %6080  ;;  %v6188_v23 = vadd.f32 %v6165_v47, %v6100_v38  ;;  %v6282_v19 = vsel %vm2213_vm9, %v6280_v3, %v6281_v12 }
 0x63e   : > { %v6468_v6 = vld [vmem:[#allocation5 + $0x1b8] sm:$0xfe] }
 0x63f   : > { %v6237_v51 = vadd.f32 %v6214_v27, %v6188_v23  ;;  %v11256_v27 = vld [vmem:[%s11596_s4] ss:$0 sm:$0xff] }
 0x640   : > { %6434 = vrot.lane.b32.xlu1 %v11145_v1, %s8202_s23  ;;  %v6507_v1 = vrot.slane %v6468_v6, 1 }
 0x642   : > { %v6509_v39 = vsel %vm2213_vm9, %v6507_v1, %v6508_v50 }
 0x643   : > { %6227 = vrot.lane.b32.xlu2 %v11143_v15, %s8204_s8  ;;  %v6279_v15 = vsel %vm2213_vm9, %v6277_v31, %v6278_v45 }
 0x644   : > { %v6309_v54 = vadd.f32 %v6279_v15, %v6237_v51 }
 0x645   : > { %6387 = vrot.lane.b32.xlu0 %v6372_v21, %s8200_s21  ;;  %v11224_v44 = vpop.permute.xlu2 %6217  ;;  %s7663_s21 = sshll.u32 %s7660_s15, 4  ;;  %s7664_s21 = int_to_ptr.hbm [resolvable:$true] %s7663_s21 }
 0x646   : > { %v11208_v36 = vpop.permute.xlu1 %6215  ;;  %s8148_s18 = sshra.s32 %s7664_s21, 4  ;;  %s8149_s18 = int_to_ptr.hbm [resolvable:$true] %s8148_s18 }
 0x647   : > { %s8150_s19 = scalar_lea.hbm %s8149_s18, 4  ;;  %p8155_p0 = scmp.lt.s32.totalorder %s8149_s18, %s11599_s7 }
 0x648   : > { %6524 = vrot.lane.b32.xlu1 %v6509_v39, %s8204_s8  ;;  %p8151_p11 = scmp.ne.s32.totalorder %s8149_s18, %s8150_s19  ;;  %p8156_p1 = scmp.lt.s32.totalorder %s8154_s22, %s8150_s19 }
 0x64a   : > { %p8152_p12 = pnand %p8151_p11, %p8285_p5  ;;  %p8157_p2 = por %p8156_p1, %p8155_p0 }
 0x64b   : > { %6436 = vrot.lane.b32.xlu2 %v11177_v28, %s8202_s23  ;;  %v6574_v28 = vrot.slane %v6542_v20, 2 }
 0x64c   : > { %v6079_v29 = vpop.permute.xlu0 %6078  ;;  %p8153_p13 = pneg %p8152_p12 }
 0x64d   : > { %6522 = vrot.lane.b32.xlu0 %v6506_v16, %s8204_s8  ;;  %v6101_v58 = vadd.f32 %v6079_v29, %v10858_v57  ;;  %v6425_v33 = vpop.permute.xlu2 %6424  ;;  %v6576_v61 = vsel %vm1327_vm7, %v6574_v28, %v6575_v22 }
 0x64e   : > { %v6423_v9 = vpop.permute.xlu1 %6422  ;;  %p8158_p3 = pnand %p8157_p2, %p8153_p13 }
 0x64f   : > { %v6189_v43 = vadd.f32 %v11179_v55, %v6101_v58 }
 0x651   : > { %v6238_v55 = vadd.f32 %v11208_v36, %v6189_v43 }
 0x653   : > { %v6310_v2 = vadd.f32 %v6282_v19, %v6238_v55  ;;  %v8132_v19 = vld [vmem:[#allocation5 + $0x60] sm:$0xff] }
 0x654   : > { %v6374_v63 = vpop.permute.xlu0 %6373  ;;  %v6102_v52 = vadd.f32 %v8132_v19, %v11206_v11 }
 0x655   : > { %v6397_v47 = vadd.f32 %v6374_v63, %v6309_v54  ;;  %v11259_v36 = vpop.permute.xlu2 %6170 }
 0x656   : > { %v11231_v35 = vpop.permute.xlu1 %6168 }
 0x657   : > { %v6446_v57 = vadd.f32 %v6423_v9, %v6397_v47 }
 0x65c   : > { %v6511_v30 = vpop.permute.xlu0 %6510 }
 0x65d   : > { %v6534_v46 = vadd.f32 %v6511_v30, %v6446_v57  ;;  %v11265_v32 = vpop.permute.xlu2 %6426 }
 0x65e   : > { %v6376_v48 = vpop.permute.xlu1 %6375 }
 0x65f   : > { %v6606_v34 = vadd.f32 %v6576_v61, %v6534_v46  ;;  %v6398_v17 = vadd.f32 %v6376_v48, %v6310_v2 }
 0x661   : > { %v6618_v53 = vadd.f32 %v11256_v27, %v6606_v34  ;;  %v6447_v29 = vadd.f32 %v6425_v33, %v6398_v17  ;;  %v6937_v34 = vld [vmem:[%s11597_s5 + $0x90] sm:$0xff]  ;;  %v6190_v17 = vadd.f32 %v11231_v35, %v6102_v52  ;;  %v6919_v52 = vld [vmem:[%s11597_s5] sm:$0xff] }
 0x662   : > { %7087 = vmatpush.msrb.mxu2 %v6937_v34  ;;  %v6927_v34 = vld [vmem:[%s11597_s5 + $0x40] sm:$0xff] }
 0x663   : > { %v6626_v18 = vmax.f32 %v6618_v53, 0.0  ;;  %v6249_v53 = vld [vmem:[#allocation5 + $0x98] sm:$0xfe]  ;;  %v6239_v11 = vadd.f32 %v11224_v44, %v6190_v17  ;;  %v6922_v17 = vld [vmem:[%s11597_s5 + $0x18] sm:$0xff] }
 0x665   : > { %v6642_v9 = vrot.slane %v6626_v18, 2  ;;  %v6643_v25 = vrot.slane %v6626_v18, 4  ;;  %v6644_v37 = vrot.slane %v6626_v18, 6  ;;  %v7984_v51 = vrot.slane %v6626_v18, 9  ;;  %v11273_v28 = vpop.permute.xlu2 %6084 }
 0x667   : > { %v11262_v13 = vpop.permute.xlu0 %6082  ;;  %v7985_v31 = vrot.slane %v6642_v9, 9  ;;  %v7986_v63 = vrot.slane %v6643_v25, 9  ;;  %v7987_v16 = vrot.slane %v6644_v37, 9  ;;  %v6786_v58 = vmax.f32 %v6626_v18, %v7984_v51 }
 0x668   : > { %v6513_v38 = vpop.permute.xlu1 %6512  ;;  %v6283_v18 = vrot.slane %v6249_v53, 1 }
 0x669   : > { %v6535_v21 = vadd.f32 %v6513_v38, %v6447_v29  ;;  %v6787_v20 = vmax.f32 %v6642_v9, %v7985_v31  ;;  %v6788_v26 = vmax.f32 %v6643_v25, %v7986_v63  ;;  %v6789_v43 = vmax.f32 %v6644_v37, %v7987_v16  ;;  %v6547_v37 = vld [vmem:[#allocation5 + $0xe8] sm:$0x3]  ;;  %v6546_v31 = vld [vmem:[#allocation5 + $0xd0] sm:$0xfc]  ;;  %v6252_v16 = vld [vmem:[#allocation5 + $0xe0] sm:$0x1] }
 0x66a   : > { %v6284_v29 = vrot.slane %v6250_v0, 1 }
 0x66b   : > { %v6607_v23 = vadd.f32 %v6579_v56, %v6535_v21 }
 0x66c   : > { %v6285_v21 = vsel %vm2213_vm9, %v6283_v18, %v6284_v29 }
 0x66d   : > { %v6619_v45 = vadd.f32 %v11256_v27, %v6607_v23  ;;  %v6380_v59 = vpop.permute.xlu2 %6379  ;;  %v6311_v23 = vadd.f32 %v6285_v21, %v6239_v11 }
 0x66f   : > { %v11271_v49 = vpop.permute.xlu0 %6219  ;;  %v6627_v10 = vmax.f32 %v6619_v45, 0.0  ;;  %v8133_v45 = vld [vmem:[#allocation5 + $0x90] sm:$0xff] }
 0x670   : > { %v6378_v62 = vpop.permute.xlu1 %6377  ;;  %v6103_v51 = vadd.f32 %v8133_v45, %v11262_v13 }
 0x671   : > { %v6645_v6 = vrot.slane %v6627_v10, 2  ;;  %v6646_v15 = vrot.slane %v6627_v10, 4  ;;  %v6647_v50 = vrot.slane %v6627_v10, 6  ;;  %v7988_v54 = vrot.slane %v6627_v10, 9 }
 0x672   : > { %v6399_v35 = vadd.f32 %v6378_v62, %v6311_v23  ;;  %v6254_v62 = vld [vmem:[#allocation5 + $0x110] sm:$0x1] }
 0x673   : > { %v7989_v1 = vrot.slane %v6645_v6, 9  ;;  %v7990_v47 = vrot.slane %v6646_v15, 9  ;;  %v7991_v33 = vrot.slane %v6647_v50, 9  ;;  %v6790_v39 = vmax.f32 %v6627_v10, %v7988_v54  ;;  %v6251_v54 = vld [vmem:[#allocation5 + $0xc8] sm:$0xfe] }
 0x674   : > { %v6448_v44 = vadd.f32 %v11265_v32, %v6399_v35 }
 0x675   : > { %v6791_v30 = vmax.f32 %v6645_v6, %v7989_v1  ;;  %v6792_v42 = vmax.f32 %v6646_v15, %v7990_v47  ;;  %v6793_v41 = vmax.f32 %v6647_v50, %v7991_v33  ;;  %v6818_v57 = vmax.f32 %v6786_v58, %v6790_v39  ;;  %v11291_v10 = vpop.permute.xlu2 %6223 }
 0x676   : > { %v6581_v6 = vrot.slane %v6547_v37, 2  ;;  %v6191_v50 = vadd.f32 %v11259_v36, %v6103_v51  ;;  %v6580_v58 = vrot.slane %v6546_v31, 2  ;;  %v6287_v1 = vrot.slane %v6252_v16, 1  ;;  %v6549_v36 = vld [vmem:[#allocation5 + $0x118] sm:$0x3] }
 0x677   : > { %v6819_v22 = vmax.f32 %v6787_v20, %v6791_v30  ;;  %v6820_v46 = vmax.f32 %v6788_v26, %v6792_v42  ;;  %v6821_v3 = vmax.f32 %v6789_v43, %v6793_v41  ;;  %v11275_v12 = vpop.permute.xlu0 %6172  ;;  %v6857_v55 = vperm.slane %v6818_v57, 0  ;;  %v6548_v57 = vld [vmem:[#allocation5 + $0x100] sm:$0xfc] }
 0x678   : > { %v11288_v60 = vpop.permute.xlu1 %6221  ;;  %v6240_v47 = vadd.f32 %v11271_v49, %v6191_v50  ;;  %v6582_v33 = vsel %vm1327_vm7, %v6580_v58, %v6581_v6  ;;  %v6286_v39 = vrot.slane %v6251_v54, 1 }
 0x679   : > { %v6858_v48 = vperm.slane %v6819_v22, 0  ;;  %v6859_v61 = vperm.slane %v6820_v46, 0  ;;  %v6860_v2 = vperm.slane %v6821_v3, 0  ;;  %v6584_v46 = vrot.slane %v6549_v36, 2 }
 0x67a   : > { %v6288_v20 = vsel %vm2213_vm9, %v6286_v39, %v6287_v1  ;;  %v6583_v3 = vrot.slane %v6548_v57, 2 }
 0x67b   : > { %v6873_v24 = vsel %vm5152_vm10, %v6858_v48, %v6857_v55  ;;  %v6312_v32 = vadd.f32 %v6288_v20, %v6240_v47  ;;  %v6932_v48 = vld [vmem:[%s11597_s5 + $0x68] sm:$0xff] }
 0x67c   : > { %v6874_v5 = vsel %vm5154_vm11, %v6859_v61, %v6873_v24  ;;  %v6924_v61 = vld [vmem:[%s11597_s5 + $0x28] sm:$0xff]  ;;  %7088 = vmatpush.msrb.mxu2 %v6932_v48  ;;  %v6255_v48 = vld [vmem:[#allocation5 + $0x128] sm:$0xfe] }
 0x67d   : > { %v6875_v14 = vsel %vm5156_vm12, %v6860_v2, %v6874_v5  ;;  %v11300_v43 = vpop.permute.xlu2 %6430  ;;  %v6400_v41 = vadd.f32 %v6380_v59, %v6312_v32  ;;  %6993 = vmatpush.msra.mxu3 %v6924_v61  ;;  %v6585_v5 = vsel %vm1327_vm7, %v6583_v3, %v6584_v46  ;;  %v6104_v59 = vadd.f32 %v11273_v28, %v10942_v40  ;;  %v6551_v3 = vld [vmem:[#allocation5 + $0x148] sm:$0x3] }
 0x67e   : > { %6891 = vst.msk [vmem:[#allocation6 + $0x9] sm:$0xf] %vm6890_vm14, %v6875_v14  ;;  %7089 = vmatpush.msrb.mxu2 %v6927_v34 }
 0x67f   : > { %v6515_v38 = vpop.permute.xlu0 %6514  ;;  %6994 = vmatpush.msra.mxu3 %v6919_v52  ;;  %v6192_v21 = vadd.f32 %v11275_v12, %v6104_v59 }
 0x680   : > { %v6536_v15 = vadd.f32 %v6515_v38, %v6448_v44  ;;  %v11298_v26 = vpop.permute.xlu1 %6174  ;;  %7090 = vmatpush.msrb.mxu2 %v6922_v17  ;;  %v6253_v38 = vld [vmem:[#allocation5 + $0xf8] sm:$0xfe] }
 0x681   : > { %v6241_v28 = vadd.f32 %v11288_v60, %v6192_v21  ;;  %v6289_v37 = vrot.slane %v6253_v38, 1 }
 0x682   : > { %v6608_v13 = vadd.f32 %v6582_v33, %v6536_v15 }
 0x684   : > { %v6620_v30 = vadd.f32 %v11256_v27, %v6608_v13 }
 0x685   : > { %v6896_v56 = vld [vmem:[#allocation6 + $0x8] sm:$0x3f]  ;;  %v11323_v0 = vpop.permute.xlu2 %6088 }
 0x686   : > { %v6909_v9 = vrot.slane %v6896_v56, 2  ;;  %v6910_v25 = vrot.slane %v6896_v56, 4  ;;  %6945 = vst [vmem:[#allocation1 + $0x3] ss:$4 sm:$0xff] %v6896_v56  ;;  %v6628_v22 = vmax.f32 %v6620_v30, 0.0 }
 0x687   : > { %v6429_v63 = vpop.permute.xlu0 %6428 }
 0x688   : > { %6947 = vst [vmem:[#allocation1 + $0x20] ss:$4 sm:$0xff] %v6909_v9  ;;  %v6449_v49 = vadd.f32 %v6429_v63, %v6400_v41  ;;  %v6517_v55 = vpop.permute.xlu1 %6516  ;;  %v6648_v24 = vrot.slane %v6628_v22, 2  ;;  %v6649_v29 = vrot.slane %v6628_v22, 4  ;;  %v6650_v18 = vrot.slane %v6628_v22, 6 }
 0x689   : > { %6949 = vst [vmem:[#allocation1 + $0x21] ss:$4 sm:$0xff] %v6910_v25  ;;  %v7992_v56 = vrot.slane %v6628_v22, 9  ;;  %v6290_v9 = vrot.slane %v6254_v62, 1  ;;  %v6587_v62 = vrot.slane %v6551_v3, 2 }
 0x68a   : > { %v6537_v19 = vadd.f32 %v6517_v55, %v6449_v49  ;;  %v7993_v23 = vrot.slane %v6648_v24, 9  ;;  %v7994_v35 = vrot.slane %v6649_v29, 9  ;;  %v7995_v40 = vrot.slane %v6650_v18, 9  ;;  %v6550_v49 = vld [vmem:[#allocation5 + $0x130] sm:$0xfc] }
 0x68b   : > { %v6794_v16 = vmax.f32 %v6628_v22, %v7992_v56  ;;  %v6291_v12 = vsel %vm2213_vm9, %v6289_v37, %v6290_v9 }
 0x68c   : > { %v6609_v53 = vadd.f32 %v6585_v5, %v6537_v19  ;;  %v6795_v6 = vmax.f32 %v6648_v24, %v7993_v23  ;;  %v6796_v47 = vmax.f32 %v6649_v29, %v7994_v35  ;;  %v6797_v33 = vmax.f32 %v6650_v18, %v7995_v40  ;;  %v6552_v40 = vld [vmem:[#allocation5 + $0x160] sm:$0xfc] }
 0x68d   : > { %v11315_v2 = vld.sshfl [vmem:[#allocation1] sm:$0xff pattern:$0x73625140]  ;;  %v6313_v60 = vadd.f32 %v6291_v12, %v6241_v28  ;;  %v6384_v13 = vpop.permute.xlu2 %6383  ;;  %v6292_v18 = vrot.slane %v6255_v48, 1  ;;  %v6553_v28 = vld [vmem:[#allocation5 + $0x178] sm:$0x3] }
 0x68e   : > { %8016 = vmatmul.msk.f32.vlgmr.msra.gmra.mxu3 %vm5952_vm3, %v11315_v2  ;;  %v6621_v11 = vadd.f32 %v11256_v27, %v6609_v53  ;;  %8031 = vmatmul.msk.f32.vlgmr.msrb.gmra.mxu2 %vm5952_vm3, %v11315_v2  ;;  %v6586_v53 = vrot.slane %v6550_v49, 2 }
 0x68f   : > { %v6087_v42 = vpop.permute.xlu0 %6086 }
 0x690   : > { %v6629_v25 = vmax.f32 %v6621_v11, 0.0  ;;  %v6105_v39 = vadd.f32 %v6087_v42, %v10991_v8  ;;  %v6256_v8 = vld [vmem:[#allocation5 + $0x140] sm:$0x1] }
 0x691   : > { %v6293_v11 = vrot.slane %v6256_v8, 1 }
 0x692   : > { %v6382_v45 = vpop.permute.xlu1 %6381  ;;  %v6651_v51 = vrot.slane %v6629_v25, 2  ;;  %v6652_v44 = vrot.slane %v6629_v25, 4  ;;  %v6653_v31 = vrot.slane %v6629_v25, 6  ;;  %v7996_v63 = vrot.slane %v6629_v25, 9 }
 0x693   : > { %v6401_v41 = vadd.f32 %v6382_v45, %v6313_v60  ;;  %v6193_v61 = vadd.f32 %v11298_v26, %v6105_v39  ;;  %v6294_v23 = vsel %vm2213_vm9, %v6292_v18, %v6293_v11  ;;  %v6259_v39 = vld [vmem:[#allocation5 + $0x188] sm:$0xfe] }
 0x694   : > { %v7997_v50 = vrot.slane %v6651_v51, 9  ;;  %v7998_v54 = vrot.slane %v6652_v44, 9  ;;  %v7999_v58 = vrot.slane %v6653_v31, 9  ;;  %v6798_v1 = vmax.f32 %v6629_v25, %v7996_v63 }
 0x695   : > { %v6450_v42 = vadd.f32 %v11300_v43, %v6401_v41  ;;  %v6242_v38 = vadd.f32 %v11291_v10, %v6193_v61  ;;  %v6386_v21 = vpop.permute.xlu2 %6385  ;;  %v6588_v43 = vsel %vm1327_vm7, %v6586_v53, %v6587_v62  ;;  %v6106_v10 = vadd.f32 %v11323_v0, %v11050_v4 }
 0x696   : > { %v6799_v20 = vmax.f32 %v6651_v51, %v7997_v50  ;;  %v6800_v32 = vmax.f32 %v6652_v44, %v7998_v54  ;;  %v6801_v30 = vmax.f32 %v6653_v31, %v7999_v58  ;;  %v6822_v36 = vmax.f32 %v6794_v16, %v6798_v1  ;;  %v6257_v51 = vld [vmem:[#allocation5 + $0x158] sm:$0xfe]  ;;  %v6258_v44 = vld [vmem:[#allocation5 + $0x170] sm:$0x1]  ;;  %v6260_v58 = vld [vmem:[#allocation5 + $0x1a0] sm:$0x1] }
 0x697   : > { %v11321_v14 = vpop.permute.xlu0 %6176  ;;  %v6314_v25 = vadd.f32 %v6294_v23, %v6242_v38  ;;  %v6589_v16 = vrot.slane %v6552_v40, 2  ;;  %v6295_v1 = vrot.slane %v6257_v51, 1 }
 0x698   : > { %v6823_v57 = vmax.f32 %v6795_v6, %v6799_v20  ;;  %v6824_v22 = vmax.f32 %v6796_v47, %v6800_v32  ;;  %v6825_v46 = vmax.f32 %v6797_v33, %v6801_v30  ;;  %v6861_v34 = vperm.slane %v6822_v36, 0 }
 0x699   : > { %v6402_v63 = vadd.f32 %v6384_v13, %v6314_v25  ;;  %v6590_v6 = vrot.slane %v6553_v28, 2  ;;  %v6194_v50 = vadd.f32 %v11321_v14, %v6106_v10  ;;  %v6299_v20 = vrot.slane %v6260_v58, 1  ;;  %v6557_v10 = vld [vmem:[#allocation5 + $0x1d8] sm:$0x3] }
 0x69a   : > { %v6226_v55 = vpop.permute.xlu1 %6225  ;;  %v6862_v19 = vperm.slane %v6823_v57, 0  ;;  %v6863_v52 = vperm.slane %v6824_v22, 0  ;;  %v6864_v5 = vperm.slane %v6825_v46, 0  ;;  %v6298_v57 = vrot.slane %v6259_v39, 1  ;;  %v6554_v22 = vld [vmem:[#allocation5 + $0x190] sm:$0xfc] }
 0x69b   : > { %v6243_v0 = vadd.f32 %v6226_v55, %v6194_v50  ;;  %v6591_v32 = vsel %vm1327_vm7, %v6589_v16, %v6590_v6  ;;  %v6555_v46 = vld [vmem:[#allocation5 + $0x1a8] sm:$0x3]  ;;  %v6592_v8 = vrot.slane %v6554_v22, 2  ;;  %v6596_v58 = vrot.slane %v6557_v10, 2 }
 0x69c   : > { %v6876_v17 = vsel %vm5152_vm10, %v6862_v19, %v6861_v34  ;;  %v6300_v34 = vsel %vm2213_vm9, %v6298_v57, %v6299_v20 }
 0x69d   : > { %v6877_v59 = vsel %vm5154_vm11, %v6863_v52, %v6876_v17  ;;  %v6228_v60 = vpop.permute.xlu2 %6227 }
 0x69e   : > { %v6878_v26 = vsel %vm5156_vm12, %v6864_v5, %v6877_v59 }
 0x69f   : > { %v6519_v15 = vpop.permute.xlu0 %6518  ;;  %6892 = vst.msk [vmem:[#allocation6 + $0x11] sm:$0xf] %vm6890_vm14, %v6878_v26 }
 0x6a0   : > { %v6538_v29 = vadd.f32 %v6519_v15, %v6450_v42  ;;  %v6593_v42 = vrot.slane %v6555_v46, 2 }
 0x6a2   : > { %v6610_v56 = vadd.f32 %v6588_v43, %v6538_v29  ;;  %v6179_v9 = vpop.permute.xlu1 %6178  ;;  %v6594_v25 = vsel %vm1327_vm7, %v6592_v8, %v6593_v42 }
 0x6a4   : > { %v6622_v45 = vadd.f32 %v11256_v27, %v6610_v56 }
 0x6a5   : > { %v6437_v50 = vpop.permute.xlu2 %6436 }
 0x6a6   : > { %v6897_v31 = vld [vmem:[#allocation6 + $0x10] sm:$0x3f]  ;;  %v6630_v4 = vmax.f32 %v6622_v45, 0.0 }
 0x6a7   : > { %v6433_v24 = vpop.permute.xlu0 %6432  ;;  %v6911_v12 = vrot.slane %v6897_v31, 2  ;;  %v6912_v15 = vrot.slane %v6897_v31, 4  ;;  %6951 = vst [vmem:[#allocation1 + $0x22] ss:$4 sm:$0xff] %v6897_v31 }
 0x6a8   : > { %v6451_v47 = vadd.f32 %v6433_v24, %v6402_v63  ;;  %v6654_v49 = vrot.slane %v6630_v4, 2  ;;  %v6655_v3 = vrot.slane %v6630_v4, 4  ;;  %v6656_v48 = vrot.slane %v6630_v4, 6  ;;  %v11354_v24 = vld [vmem:[#allocation6 + $0x28] sm:$0x3f] }
 0x6a9   : > { %6953 = vst [vmem:[#allocation1 + $0x23] ss:$4 sm:$0xff] %v6911_v12  ;;  %v8000_v19 = vrot.slane %v6630_v4, 9 }
 0x6aa   : > { %v6521_v33 = vpop.permute.xlu1 %6520  ;;  %6956 = vst [vmem:[#allocation1] ss:$4 sm:$0xff] %v6912_v15  ;;  %v8001_v53 = vrot.slane %v6654_v49, 9  ;;  %v8002_v62 = vrot.slane %v6655_v3, 9  ;;  %v8003_v59 = vrot.slane %v6656_v48, 9 }
 0x6ab   : > { %v6539_v13 = vadd.f32 %v6521_v33, %v6451_v47  ;;  %v6802_v56 = vmax.f32 %v6630_v4, %v8000_v19  ;;  %v6556_v15 = vld [vmem:[#allocation5 + $0x1c0] sm:$0xfc] }
 0x6ac   : > { %v6803_v45 = vmax.f32 %v6654_v49, %v8001_v53  ;;  %v6804_v51 = vmax.f32 %v6655_v3, %v8002_v62  ;;  %v6595_v33 = vrot.slane %v6556_v15, 2  ;;  %v6925_v49 = vld [vmem:[%s11597_s5 + $0x30] sm:$0xff] }
 0x6ad   : > { %v6611_v41 = vadd.f32 %v6591_v32, %v6539_v13 }
 0x6af   : > { %v6091_v35 = vpop.permute.xlu0 %6090  ;;  %v6623_v61 = vadd.f32 %v11256_v27, %v6611_v41  ;;  %v6597_v41 = vsel %vm1327_vm7, %v6595_v33, %v6596_v58 }
 0x6b0   : > { %v6107_v37 = vadd.f32 %v6091_v35, %v11108_v7  ;;  %v6296_v7 = vrot.slane %v6258_v44, 1  ;;  %v11356_v17 = vld.sshfl [vmem:[#allocation1 + $0x20] sm:$0xff pattern:$0x73625140]  ;;  %v6805_v44 = vmax.f32 %v6656_v48, %v8003_v59 }
 0x6b1   : > { %v6631_v5 = vmax.f32 %v6623_v61, 0.0  ;;  %8017 = vmatmul.msk.f32.gmra.mxu3 %vm5952_vm3, %v11356_v17  ;;  %6963 = vst [vmem:[#allocation1 + $0x23] ss:$4 sm:$0xff] %v11354_v24  ;;  %8032 = vmatmul.msk.f32.gmra.mxu2 %vm5952_vm3, %v11356_v17 }
 0x6b2   : > { %v6195_v54 = vadd.f32 %v6179_v9, %v6107_v37  ;;  %v6297_v14 = vsel %vm2213_vm9, %v6295_v1, %v6296_v7  ;;  %v6435_v18 = vpop.permute.xlu1 %6434 }
 0x6b3   : > { %v6315_v55 = vadd.f32 %v6297_v14, %v6243_v0  ;;  %v6657_v11 = vrot.slane %v6631_v5, 2  ;;  %v6658_v38 = vrot.slane %v6631_v5, 4  ;;  %v6659_v26 = vrot.slane %v6631_v5, 6 }
 0x6b4   : > { %v6244_v30 = vadd.f32 %v6228_v60, %v6195_v54  ;;  %v8004_v43 = vrot.slane %v6631_v5, 9 }
 0x6b5   : > { %v6403_v29 = vadd.f32 %v6386_v21, %v6315_v55  ;;  %v8005_v21 = vrot.slane %v6657_v11, 9  ;;  %v8006_v40 = vrot.slane %v6658_v38, 9  ;;  %v8007_v28 = vrot.slane %v6659_v26, 9 }
 0x6b6   : > { %v6316_v52 = vadd.f32 %v6300_v34, %v6244_v30  ;;  %v6806_v37 = vmax.f32 %v6631_v5, %v8004_v43  ;;  %v6935_v30 = vld [vmem:[%s11597_s5 + $0x80] sm:$0xff] }
 0x6b7   : > { %v6388_v36 = vpop.permute.xlu0 %6387  ;;  %v6452_v9 = vadd.f32 %v6435_v18, %v6403_v29  ;;  %v6807_v63 = vmax.f32 %v6657_v11, %v8005_v21  ;;  %v6808_v16 = vmax.f32 %v6658_v38, %v8006_v40  ;;  %v6809_v6 = vmax.f32 %v6659_v26, %v8007_v28  ;;  %7023 = vmatpush.msrb.mxu3 %v6935_v30  ;;  %v6920_v38 = vld [vmem:[%s11597_s5 + $0x8] sm:$0xff]  ;;  %v6933_v30 = vld [vmem:[%s11597_s5 + $0x70] sm:$0xff] }
 0x6b8   : > { %v6404_v23 = vadd.f32 %v6388_v36, %v6316_v52  ;;  %v6826_v12 = vmax.f32 %v6802_v56, %v6806_v37  ;;  %v6930_v36 = vld [vmem:[%s11597_s5 + $0x58] sm:$0xff] }
 0x6b9   : > { %v6827_v1 = vmax.f32 %v6803_v45, %v6807_v63  ;;  %v6828_v7 = vmax.f32 %v6804_v51, %v6808_v16  ;;  %v6829_v47 = vmax.f32 %v6805_v44, %v6809_v6  ;;  %7024 = vmatpush.msrb.mxu3 %v6930_v36  ;;  %v6928_v36 = vld [vmem:[%s11597_s5 + $0x48] sm:$0xff] }
 0x6ba   : > { %v6453_v4 = vadd.f32 %v6437_v50, %v6404_v23  ;;  %v6525_v39 = vpop.permute.xlu1 %6524  ;;  %v6865_v60 = vperm.slane %v6826_v12, 0 }
 0x6bb   : > { %v6866_v13 = vperm.slane %v6827_v1, 0  ;;  %v6867_v20 = vperm.slane %v6828_v7, 0  ;;  %v6868_v57 = vperm.slane %v6829_v47, 0  ;;  %7025 = vmatpush.msrb.mxu3 %v6925_v49  ;;  %v6918_v1 = vrot.slane %v11354_v24, 4  ;;  %v6936_v47 = vld [vmem:[%s11597_s5 + $0x88] sm:$0xff] }
 0x6bc   : > { %v6541_v32 = vadd.f32 %v6525_v39, %v6453_v4 }
 0x6bd   : > { %v6879_v22 = vsel %vm5152_vm10, %v6866_v13, %v6865_v60  ;;  %7026 = vmatpush.msrb.mxu3 %v6920_v38  ;;  %v6926_v60 = vld [vmem:[%s11597_s5 + $0x38] sm:$0xff] }
 0x6be   : > { %v6613_v46 = vadd.f32 %v6597_v41, %v6541_v32  ;;  %v6880_v3 = vsel %vm5154_vm11, %v6867_v20, %v6879_v22  ;;  %v6921_v20 = vld [vmem:[%s11597_s5 + $0x10] sm:$0xff]  ;;  %v6938_v32 = vld [vmem:[%s11597_s5 + $0x98] sm:$0xff] }
 0x6bf   : > { %v6523_v35 = vpop.permute.xlu0 %6522  ;;  %v6881_v34 = vsel %vm5156_vm12, %v6868_v57, %v6880_v3  ;;  %7055 = vmatpush.msra.mxu3 %v6936_v47 }
 0x6c0   : > { %v6540_v31 = vadd.f32 %v6523_v35, %v6452_v9  ;;  %v6625_v52 = vadd.f32 %v11256_v27, %v6613_v46  ;;  %6893 = vst.msk [vmem:[#allocation6 + $0x19] sm:$0xf] %vm6890_vm14, %v6881_v34 }
 0x6c2   : > { %v6612_v54 = vadd.f32 %v6594_v25, %v6540_v31  ;;  %v6633_v53 = vmax.f32 %v6625_v52, 0.0 }
 0x6c4   : > { %v6624_v0 = vadd.f32 %v11256_v27, %v6612_v54  ;;  %v6663_v59 = vrot.slane %v6633_v53, 2  ;;  %v6664_v29 = vrot.slane %v6633_v53, 4  ;;  %v6665_v18 = vrot.slane %v6633_v53, 6 }
 0x6c5   : > { %v8012_v11 = vrot.slane %v6633_v53, 9  ;;  %v6917_v54 = vrot.slane %v11354_v24, 2  ;;  %v6931_v24 = vld [vmem:[%s11597_s5 + $0x60] sm:$0xff] }
 0x6c6   : > { %v6632_v14 = vmax.f32 %v6624_v0, 0.0  ;;  %v8013_v27 = vrot.slane %v6663_v59, 9  ;;  %v8014_v23 = vrot.slane %v6664_v29, 9  ;;  %v8015_v9 = vrot.slane %v6665_v18, 9  ;;  %7056 = vmatpush.msra.mxu3 %v6931_v24 }
 0x6c7   : > { %v6814_v25 = vmax.f32 %v6633_v53, %v8012_v11  ;;  %v6898_v35 = vld [vmem:[#allocation6 + $0x18] sm:$0x3f] }
 0x6c8   : > { %v6660_v48 = vrot.slane %v6632_v14, 2  ;;  %v6661_v55 = vrot.slane %v6632_v14, 4  ;;  %v6662_v61 = vrot.slane %v6632_v14, 6  ;;  %v8008_v19 = vrot.slane %v6632_v14, 9  ;;  %6957 = vst [vmem:[#allocation1 + $0x1] ss:$4 sm:$0xff] %v6898_v35  ;;  %7057 = vmatpush.msra.mxu3 %v6926_v60 }
 0x6c9   : > { %v6815_v21 = vmax.f32 %v6663_v59, %v8013_v27  ;;  %v6816_v40 = vmax.f32 %v6664_v29, %v8014_v23  ;;  %v6817_v28 = vmax.f32 %v6665_v18, %v8015_v9  ;;  %v6913_v10 = vrot.slane %v6898_v35, 2 }
 0x6ca   : > { %v8009_v8 = vrot.slane %v6660_v48, 9  ;;  %v8010_v42 = vrot.slane %v6661_v55, 9  ;;  %v8011_v5 = vrot.slane %v6662_v61, 9  ;;  %v6810_v62 = vmax.f32 %v6632_v14, %v8008_v19  ;;  %7058 = vmatpush.msra.mxu3 %v6921_v20  ;;  %v6923_v14 = vld [vmem:[%s11597_s5 + $0x20] sm:$0xff] }
 0x6cb   : > { %v6914_v45 = vrot.slane %v6898_v35, 4  ;;  %6958 = vst [vmem:[#allocation1 + $0x2] ss:$4 sm:$0xff] %v6913_v10 }
 0x6cc   : > { %v6811_v26 = vmax.f32 %v6660_v48, %v8009_v8  ;;  %v6812_v43 = vmax.f32 %v6661_v55, %v8010_v42  ;;  %v6813_v56 = vmax.f32 %v6662_v61, %v8011_v5  ;;  %v6830_v37 = vmax.f32 %v6810_v62, %v6814_v25 }
 0x6cd   : > { %6959 = vst [vmem:[#allocation1 + $0x3] ss:$4 sm:$0xff] %v6914_v45 }
 0x6ce   : > { %v6831_v51 = vmax.f32 %v6811_v26, %v6815_v21  ;;  %v6832_v44 = vmax.f32 %v6812_v43, %v6816_v40  ;;  %v6833_v31 = vmax.f32 %v6813_v56, %v6817_v28  ;;  %v6869_v63 = vperm.slane %v6830_v37, 0 }
 0x6d0   : > { %v6870_v16 = vperm.slane %v6831_v51, 0  ;;  %v6871_v6 = vperm.slane %v6832_v44, 0  ;;  %v6872_v12 = vperm.slane %v6833_v31, 0 }
 0x6d2   : > { %v6882_v15 = vsel %vm5152_vm10, %v6870_v16, %v6869_v63 }
 0x6d3   : > { %v6883_v50 = vsel %vm5154_vm11, %v6871_v6, %v6882_v15 }
 0x6d4   : > { %v6884_v58 = vsel %vm5156_vm12, %v6872_v12, %v6883_v50  ;;  %v6964_v7 = vld.sshfl [vmem:[#allocation1] sm:$0xff pattern:$0x73625140] }
 0x6d5   : > { %6894 = vst.msk [vmem:[#allocation6 + $0x21] sm:$0xf] %vm6890_vm14, %v6884_v58  ;;  %8018 = vmatmul.msk.f32.gmra.mxu3 %vm5952_vm3, %v6964_v7  ;;  %8033 = vmatmul.msk.f32.gmra.mxu2 %vm5952_vm3, %v6964_v7 }
 0x6d6   : > { %6966 = vst [vmem:[#allocation1] ss:$4 sm:$0xff] %v6917_v54 }
 0x6d7   : > { %6967 = vst [vmem:[#allocation1 + $0x1] ss:$4 sm:$0xff] %v6918_v1 }
 0x6dc   : > { %v6899_v4 = vld [vmem:[#allocation6 + $0x20] sm:$0x3f] }
 0x6dd   : > { %v6915_v0 = vrot.slane %v6899_v4, 2  ;;  %v6916_v33 = vrot.slane %v6899_v4, 4  ;;  %6960 = vst [vmem:[#allocation1 + $0x20] ss:$4 sm:$0xff] %v6899_v4 }
 0x6de   : > { %v6968_v13 = vld.sshfl [vmem:[#allocation1] sm:$0xff pattern:$0x73625140] }
 0x6df   : > { %6961 = vst [vmem:[#allocation1 + $0x21] ss:$4 sm:$0xff] %v6915_v0 }
 0x6e0   : > { %6962 = vst [vmem:[#allocation1 + $0x22] ss:$4 sm:$0xff] %v6916_v33 }
 0x6e7   : > { %v6965_v39 = vld.sshfl [vmem:[#allocation1 + $0x20] sm:$0xff pattern:$0x73625140] }
 0x6e8   : > { %8019 = vmatmul.msk.f32.gmra.mxu3 %vm5952_vm3, %v6965_v39  ;;  %8034 = vmatmul.msk.f32.gmra.mxu2 %vm5952_vm3, %v6965_v39 }
 0x6f0   : > { %8020 = vmatmul.msk.f32.gmra.mxu3 %vm5952_vm3, %v6968_v13  ;;  %8035 = vmatmul.msk.f32.gmra.mxu2 %vm5952_vm3, %v6968_v13 }
 0x6f8   : > { %8021 = vmatmul.msk.f32.vlgmr.msrb.gmra.mxu3 %vm5952_vm3, %v11315_v2 }
 0x6f9   : > { %7119 = vmatpush.msrb.mxu3 %v6938_v32 }
 0x6fb   : > { %7120 = vmatpush.msrb.mxu3 %v6933_v30 }
 0x6fd   : > { %7121 = vmatpush.msrb.mxu3 %v6928_v36 }
 0x6ff   : > { %7122 = vmatpush.msrb.mxu3 %v6923_v14 }
 0x700   : > { %8022 = vmatmul.msk.f32.gmra.mxu3 %vm5952_vm3, %v11356_v17 }
 0x708   : > { %8023 = vmatmul.msk.f32.gmra.mxu3 %vm5952_vm3, %v6964_v7 }
 0x710   : > { %8024 = vmatmul.msk.f32.gmra.mxu3 %vm5952_vm3, %v6965_v39 }
 0x711   : > { %v6996_v41 = vpop.f32.mrf.mxu3  ;;  %v7092_v62 = vpop.f32.mrf.mxu2 }
 0x712   : > { %v7166_v18 = vrot.slane %v7092_v62, 2 }
 0x718   : > { %8025 = vmatmul.msk.f32.gmra.mxu3 %vm5952_vm3, %v6968_v13 }
 0x720   : > { %8026 = vmatmul.msk.f32.vlgmr.msra.gmra.mxu3 %vm5952_vm3, %v11315_v2 }
 0x728   : > { %8027 = vmatmul.msk.f32.gmra.mxu3 %vm5952_vm3, %v11356_v17 }
 0x730   : > { %8028 = vmatmul.msk.f32.gmra.mxu3 %vm5952_vm3, %v6964_v7 }
 0x734   : > { %v11438_v57 = vpop.f32.mrf.mxu3  ;;  %v7095_v28 = vpop.f32.mrf.mxu2 }
 0x735   : > { %v7169_v45 = vrot.slane %v7095_v28, 2 }
 0x738   : > { %8029 = vmatmul.msk.f32.gmra.mxu3 %vm5952_vm3, %v6965_v39 }
 0x740   : > { %8030 = vmatmul.msk.f32.gmra.mxu3 %vm5952_vm3, %v6968_v13 }
 0x748   : > { %8036 = vmatmul.msk.f32.vlgmr.msrb.gmra.mxu3 %vm5952_vm3, %v11315_v2 }
 0x750   : > { %8037 = vmatmul.msk.f32.gmra.mxu3 %vm5952_vm3, %v11356_v17 }
 0x758   : > { %8038 = vmatmul.msk.f32.gmra.mxu3 %vm5952_vm3, %v6964_v7  ;;  %v11441_v22 = vpop.f32.mrf.mxu3 }
 0x760   : > { %8039 = vmatmul.msk.f32.gmra.mxu3 %vm5952_vm3, %v6965_v39  ;;  %v7098_v39 = vpop.f32.mrf.mxu2 }
 0x761   : > { %v7172_v30 = vrot.slane %v7098_v39, 2 }
 0x768   : > { %8040 = vmatmul.msk.f32.gmra.mxu3 %vm5952_vm3, %v6968_v13 }
 0x76b   : > { %v7005_v46 = vpop.f32.mrf.mxu3 }
 0x773   : > { %v7008_v49 = vpop.f32.mrf.mxu3 }
 0x77b   : > { %v7028_v3 = vpop.f32.mrf.mxu3 }
 0x77c   : > { %v7164_v59 = vrot.slane %v7028_v3, 6 }
 0x77e   : > { %v7179_v38 = vsel %vm1319_vm4, %v6996_v41, %v7164_v59  ;;  %v7182_v26 = vsel %vm1321_vm5, %v6996_v41, %v7164_v59  ;;  %v7187_v43 = vsel %vm1324_vm6, %v6996_v41, %v7164_v59  ;;  %v7192_v63 = vsel %vm1327_vm7, %v7164_v59, %v6996_v41 }
 0x783   : > { %v7031_v48 = vpop.f32.mrf.mxu3 }
 0x784   : > { %v7167_v51 = vrot.slane %v7031_v48, 6 }
 0x786   : > { %v7200_v16 = vsel %vm1321_vm5, %v11438_v57, %v7167_v51  ;;  %v7197_v47 = vsel %vm1319_vm4, %v11438_v57, %v7167_v51  ;;  %v7205_v20 = vsel %vm1324_vm6, %v11438_v57, %v7167_v51  ;;  %v7210_v36 = vsel %vm1327_vm7, %v7167_v51, %v11438_v57 }
 0x78b   : > { %v11444_v55 = vpop.f32.mrf.mxu3 }
 0x793   : > { %v7037_v2 = vpop.f32.mrf.mxu3 }
 0x794   : > { %v7173_v61 = vrot.slane %v7037_v2, 6 }
 0x796   : > { %v11447_v17 = vsel %vm1319_vm4, %v7005_v46, %v7173_v61  ;;  %v11450_v34 = vsel %vm1321_vm5, %v7005_v46, %v7173_v61  ;;  %v11453_v19 = vsel %vm1324_vm6, %v7005_v46, %v7173_v61  ;;  %v11456_v52 = vsel %vm1327_vm7, %v7173_v61, %v7005_v46 }
 0x797   : > { %v7170_v46 = vrot.slane %v11444_v55, 6 }
 0x799   : > { %v7215_v57 = vsel %vm1319_vm4, %v11441_v22, %v7170_v46  ;;  %v7228_v28 = vsel %vm1327_vm7, %v7170_v46, %v11441_v22 }
 0x79b   : > { %v7040_v8 = vpop.f32.mrf.mxu3 }
 0x79c   : > { %v7176_v42 = vrot.slane %v7040_v8, 6 }
 0x79e   : > { %v11459_v5 = vsel %vm1319_vm4, %v7008_v49, %v7176_v42  ;;  %v11462_v53 = vsel %vm1321_vm5, %v7008_v49, %v7176_v42 }
 0x7a3   : > { %v7060_v29 = vpop.f32.mrf.mxu3 }
 0x7a4   : > { %v7165_v11 = vrot.slane %v7060_v29, 4 }
 0x7a6   : > { %v7180_v56 = vsel %vm1324_vm6, %v7165_v11, %v7166_v18  ;;  %v7183_v27 = vsel %vm1327_vm7, %v7166_v18, %v7165_v11  ;;  %v7188_v23 = vsel %vm1319_vm4, %v7165_v11, %v7166_v18  ;;  %v7193_v44 = vsel %vm1321_vm5, %v7165_v11, %v7166_v18 }
 0x7a7   : > { %v7181_v9 = vsel %vm5638_vm1, %v7179_v38, %v7180_v56  ;;  %v7184_v25 = vsel %vm5641_vm2, %v7182_v26, %v7183_v27  ;;  %v7189_v35 = vsel %vm5638_vm1, %v7188_v23, %v7187_v43  ;;  %v7194_v6 = vsel %vm5641_vm2, %v7193_v44, %v7192_v63 }
 0x7a8   : > { %v7185_v21 = vrot.slane %v7184_v25, 2  ;;  %v7190_v40 = vrot.slane %v7189_v35, 4  ;;  %7259 = vst [vmem:[#allocation1] ss:$4 sm:$0xff] %v7181_v9  ;;  %v7195_v1 = vrot.slane %v7194_v6, 6  ;;  %v7218_v27 = vsel %vm1321_vm5, %v11441_v22, %v7170_v46 }
 0x7a9   : > { %v7223_v25 = vsel %vm1324_vm6, %v11441_v22, %v7170_v46 }
 0x7aa   : > { %7261 = vst [vmem:[#allocation1 + $0x1] ss:$4 sm:$0xff] %v7185_v21 }
 0x7ab   : > { %7263 = vst [vmem:[#allocation1 + $0x2] ss:$4 sm:$0xff] %v7190_v40  ;;  %v7063_v37 = vpop.f32.mrf.mxu3 }
 0x7ac   : > { %v7168_v10 = vrot.slane %v7063_v37, 4 }
 0x7ae   : > { %v7201_v31 = vsel %vm1327_vm7, %v7169_v45, %v7168_v10  ;;  %v7198_v54 = vsel %vm1324_vm6, %v7168_v10, %v7169_v45  ;;  %v7206_v60 = vsel %vm1319_vm4, %v7168_v10, %v7169_v45  ;;  %v7211_v13 = vsel %vm1321_vm5, %v7168_v10, %v7169_v45 }
 0x7af   : > { %v7202_v12 = vsel %vm5641_vm2, %v7200_v16, %v7201_v31  ;;  %v7199_v4 = vsel %vm5638_vm1, %v7197_v47, %v7198_v54  ;;  %v7207_v14 = vsel %vm5638_vm1, %v7206_v60, %v7205_v20  ;;  %v7212_v49 = vsel %vm5641_vm2, %v7211_v13, %v7210_v36 }
 0x7b0   : > { %v7203_v7 = vrot.slane %v7202_v12, 2  ;;  %v7208_v48 = vrot.slane %v7207_v14, 4  ;;  %v7213_v42 = vrot.slane %v7212_v49, 6 }
 0x7b2   : > { %v7270_v15 = vld.sshfl [vmem:[#allocation1] sm:$0xff pattern:$0x73625140]  ;;  %v7271_v58 = vld.sshfl [vmem:[#allocation1 + $0x8] sm:$0xff pattern:$0x73625140] }
 0x7b3   : > { %v7066_v50 = vpop.f32.mrf.mxu3  ;;  %7360 = vst [vmem:[#allocation7] sm:$0x3f] %v7270_v15 }
 0x7b4   : > { %7275 = vst [vmem:[#allocation1] ss:$4 sm:$0xff] %v7195_v1  ;;  %v7171_v32 = vrot.slane %v7066_v50, 4  ;;  %v7101_v50 = vpop.f32.mrf.mxu2 }
 0x7b5   : > { %7276 = vst [vmem:[#allocation1 + $0x1] ss:$4 sm:$0xff] %v7199_v4  ;;  %v7175_v1 = vrot.slane %v7101_v50, 2 }
 0x7b6   : > { %7277 = vst [vmem:[#allocation1 + $0x2] ss:$4 sm:$0xff] %v7203_v7  ;;  %v7216_v2 = vsel %vm1324_vm6, %v7171_v32, %v7172_v30  ;;  %v7219_v11 = vsel %vm1327_vm7, %v7172_v30, %v7171_v32  ;;  %v7224_v56 = vsel %vm1319_vm4, %v7171_v32, %v7172_v30  ;;  %v7229_v23 = vsel %vm1321_vm5, %v7171_v32, %v7172_v30 }
 0x7b7   : > { %7361 = vst [vmem:[#allocation7 + $0x8] sm:$0x3f] %v7271_v58  ;;  %v7217_v62 = vsel %vm5638_vm1, %v7215_v57, %v7216_v2  ;;  %v7220_v35 = vsel %vm5641_vm2, %v7218_v27, %v7219_v11  ;;  %v7225_v37 = vsel %vm5638_vm1, %v7224_v56, %v7223_v25  ;;  %v7230_v45 = vsel %vm5641_vm2, %v7229_v23, %v7228_v28 }
 0x7b8   : > { %v7221_v44 = vrot.slane %v7220_v35, 2  ;;  %v7226_v31 = vrot.slane %v7225_v37, 4  ;;  %v7231_v16 = vrot.slane %v7230_v45, 6 }
 0x7ba   : > { %v7395_v33 = vld [vmem:[#allocation7] sm:$0x1e] }
 0x7bb   : > { %v11484_v0 = vpop.f32.mrf.mxu3  ;;  %v7403_v24 = vrot.slane %v7395_v33, 1 }
 0x7bc   : > { %v7174_v58 = vrot.slane %v11484_v0, 4  ;;  %v7104_v2 = vpop.f32.mrf.mxu2 }
 0x7bd   : > { %7407 = vrot.lane.b32.xlu2 %v7403_v24, %s8202_s23  ;;  %v7282_v41 = vld.sshfl [vmem:[#allocation1 + $0x8] sm:$0xff pattern:$0x73625140]  ;;  %v7283_v3 = vld.sshfl [vmem:[#allocation1 + $0x10] sm:$0xff pattern:$0x73625140] }
 0x7be   : > { %7367 = vst [vmem:[#allocation7 + $0x30] sm:$0x3f] %v7282_v41  ;;  %v7281_v8 = vld.sshfl [vmem:[#allocation1] sm:$0xff pattern:$0x73625140]  ;;  %v7237_v33 = vsel %vm1327_vm7, %v7175_v1, %v7174_v58  ;;  %v7242_v39 = vsel %vm1319_vm4, %v7174_v58, %v7175_v1  ;;  %v7234_v0 = vsel %vm1324_vm6, %v7174_v58, %v7175_v1  ;;  %v7247_v57 = vsel %vm1321_vm5, %v7174_v58, %v7175_v1 }
 0x7bf   : > { %7368 = vst [vmem:[#allocation7 + $0x38] sm:$0x3f] %v7283_v3  ;;  %v7238_v32 = vsel %vm5641_vm2, %v11450_v34, %v7237_v33  ;;  %v7243_v36 = vsel %vm5638_vm1, %v7242_v39, %v11453_v19  ;;  %v7235_v41 = vsel %vm5638_vm1, %v11447_v17, %v7234_v0  ;;  %vm7364_vm4 = vcmask 521216   ;;  %v7423_v33 = vld [vmem:[#allocation7 + $0x8] sm:$0x3c] }
 0x7c0   : > { %7366 = vst [vmem:[#allocation7 + $0x28] sm:$0x3f] %v7281_v8  ;;  %v7239_v46 = vrot.slane %v7238_v32, 2  ;;  %v7244_v49 = vrot.slane %v7243_v36, 4  ;;  %vm7645_vm5 = vcmask 517120  }
 0x7c1   : > { %7286 = vst [vmem:[#allocation1] ss:$4 sm:$0xff] %v7208_v48 }
 0x7c2   : > { %7287 = vst [vmem:[#allocation1 + $0x1] ss:$4 sm:$0xff] %v7213_v42 }
 0x7c3   : > { %v11497_v61 = vpop.f32.mrf.mxu3  ;;  %7288 = vst [vmem:[#allocation1 + $0x2] ss:$4 sm:$0xff] %v7217_v62 }
 0x7c5   : > { %v7444_v55 = vld [vmem:[#allocation7 + $0x30] sm:$0xf] }
 0x7c6   : > { %7452 = vrot.lane.b32.xlu0 %v7444_v55, %s8202_s23  ;;  %v7488_v59 = vld [vmem:[#allocation7 + $0x38] sm:$0x3c]  ;;  %v7177_v55 = vrot.slane %v11497_v61, 4 }
 0x7c7   : > { %v7496_v29 = vrot.slane %v7488_v59, 2  ;;  %v7396_v38 = vld [vmem:[#allocation7 + $0x28] sm:$0x1e]  ;;  %v7178_v59 = vrot.slane %v7104_v2, 2 }
 0x7c8   : > { %v7404_v21 = vrot.slane %v7396_v38, 1 }
 0x7c9   : > { %7500 = vrot.lane.b32.xlu1 %v7496_v29, %s8202_s23 }
 0x7ca   : > { %v7294_v9 = vld.sshfl [vmem:[#allocation1 + $0x10] sm:$0xff pattern:$0x73625140]  ;;  %v7295_v40 = vld.sshfl [vmem:[#allocation1 + $0x18] sm:$0xff pattern:$0x73625140] }
 0x7cb   : > { %v7124_v18 = vpop.f32.mrf.mxu3  ;;  %7373 = vst [vmem:[#allocation7 + $0x60] sm:$0x3f] %v7294_v9  ;;  %v7293_v10 = vld.sshfl [vmem:[#allocation1 + $0x8] sm:$0xff pattern:$0x73625140] }
 0x7cc   : > { %v7186_v26 = vrot.slane %v7124_v18, 2  ;;  %v7191_v43 = vrot.slane %v7124_v18, 4  ;;  %7265 = vst [vmem:[#allocation1 + $0x20] ss:$4 sm:$0xff] %v7124_v18  ;;  %v7196_v6 = vrot.slane %v7124_v18, 6  ;;  %v7248_v18 = vsel %vm5641_vm2, %v7247_v57, %v11456_v52 }
 0x7cd   : > { %7374 = vst [vmem:[#allocation7 + $0x68] sm:$0x3f] %v7295_v40  ;;  %v7292_v51 = vld.sshfl [vmem:[#allocation1] sm:$0xff pattern:$0x73625140]  ;;  %v7249_v27 = vrot.slane %v7248_v18, 6 }
 0x7ce   : > { %7267 = vst [vmem:[#allocation1 + $0x21] ss:$4 sm:$0xff] %v7186_v26  ;;  %7409 = vrot.lane.b32.xlu0 %v7404_v21, %s8202_s23  ;;  %v7252_v26 = vsel %vm1324_vm6, %v7177_v55, %v7178_v59 }
 0x7cf   : > { %7269 = vst [vmem:[#allocation1 + $0x22] ss:$4 sm:$0xff] %v7191_v43  ;;  %v7255_v43 = vsel %vm1327_vm7, %v7178_v59, %v7177_v55  ;;  %v7253_v23 = vsel %vm5638_vm1, %v11459_v5, %v7252_v26 }
 0x7d0   : > { %7372 = vst [vmem:[#allocation7 + $0x58] sm:$0x3f] %v7293_v10  ;;  %v7256_v52 = vsel %vm5641_vm2, %v11462_v53, %v7255_v43 }
 0x7d1   : > { %7371 = vst [vmem:[#allocation7 + $0x50] sm:$0x3f] %v7292_v51  ;;  %v7257_v40 = vrot.slane %v7256_v52, 2 }
 0x7d2   : > { %7297 = vst [vmem:[#allocation1] ss:$4 sm:$0xff] %v7221_v44  ;;  %v7489_v22 = vld [vmem:[#allocation7 + $0x60] sm:$0x3c] }
 0x7d3   : > { %v7127_v63 = vpop.f32.mrf.mxu3  ;;  %7298 = vst [vmem:[#allocation1 + $0x1] ss:$4 sm:$0xff] %v7226_v31  ;;  %v7497_v15 = vrot.slane %v7489_v22, 2  ;;  %v7469_v18 = vld [vmem:[#allocation7 + $0x60] sm:$0x1e] }
 0x7d4   : > { %v7204_v12 = vrot.slane %v7127_v63, 2  ;;  %7299 = vst [vmem:[#allocation1 + $0x2] ss:$4 sm:$0xff] %v7231_v16  ;;  %v7209_v60 = vrot.slane %v7127_v63, 4  ;;  %v7214_v13 = vrot.slane %v7127_v63, 6  ;;  %v7477_v52 = vrot.slane %v7469_v18, 1 }
 0x7d5   : > { %7278 = vst [vmem:[#allocation1 + $0x20] ss:$4 sm:$0xff] %v7196_v6  ;;  %7502 = vrot.lane.b32.xlu2 %v7497_v15, %s8202_s23  ;;  %v7525_v9 = vld [vmem:[#allocation7 + $0x68] sm:$0x1e] }
 0x7d6   : > { %7279 = vst [vmem:[#allocation1 + $0x21] ss:$4 sm:$0xff] %v7127_v63  ;;  %v7533_v28 = vrot.slane %v7525_v9, 1  ;;  %v7517_v55 = vld [vmem:[#allocation7 + $0x68] sm:$0xf] }
 0x7d7   : > { %v7445_v54 = vld [vmem:[#allocation7 + $0x58] sm:$0xf]  ;;  %7280 = vst [vmem:[#allocation1 + $0x22] ss:$4 sm:$0xff] %v7204_v12 }
 0x7d8   : > { %7454 = vrot.lane.b32.xlu1 %v7445_v54, %s8202_s23  ;;  %v7397_v7 = vld [vmem:[#allocation7 + $0x50] sm:$0x1e]  ;;  %7289 = vst [vmem:[#allocation1 + $0x20] ss:$4 sm:$0xff] %v7209_v60  ;;  %v7431_v60 = vrot.slane %v7423_v33, 2 }
 0x7d9   : > { %v7405_v20 = vrot.slane %v7397_v7, 1  ;;  %7290 = vst [vmem:[#allocation1 + $0x21] ss:$4 sm:$0xff] %v7214_v13 }
 0x7db   : > { %v7306_v47 = vld.sshfl [vmem:[#allocation1 + $0x18] sm:$0xff pattern:$0x73625140]  ;;  %v7305_v4 = vld.sshfl [vmem:[#allocation1 + $0x10] sm:$0xff pattern:$0x73625140]  ;;  %v7130_v14 = vpop.f32.mrf.mxu3 }
 0x7dc   : > { %7379 = vst [vmem:[#allocation7 + $0x90] sm:$0x3f] %v7306_v47  ;;  %v7304_v24 = vld.sshfl [vmem:[#allocation1 + $0x8] sm:$0xff pattern:$0x73625140]  ;;  %v7222_v19 = vrot.slane %v7130_v14, 2 }
 0x7dd   : > { %7378 = vst [vmem:[#allocation7 + $0x88] sm:$0x3f] %v7305_v4  ;;  %v7303_v30 = vld.sshfl [vmem:[#allocation1] sm:$0xff pattern:$0x73625140]  ;;  %v7227_v8 = vrot.slane %v7130_v14, 4 }
 0x7de   : > { %7377 = vst [vmem:[#allocation7 + $0x80] sm:$0x3f] %v7304_v24  ;;  %v7232_v17 = vrot.slane %v7130_v14, 6  ;;  %v7391_v4 = vld [vmem:[#allocation7] sm:$0xf] }
 0x7df   : > { %7291 = vst [vmem:[#allocation1 + $0x22] ss:$4 sm:$0xff] %v7130_v14 }
 0x7e0   : > { %7411 = vrot.lane.b32.xlu1 %v7405_v20, %s8202_s23  ;;  %7376 = vst [vmem:[#allocation7 + $0x78] sm:$0x3f] %v7303_v30  ;;  %v7468_v20 = vld [vmem:[#allocation7 + $0x38] sm:$0x1e] }
 0x7e1   : > { %7308 = vst [vmem:[#allocation1] ss:$4 sm:$0xff] %v7235_v41  ;;  %v7476_v36 = vrot.slane %v7468_v20, 1 }
 0x7e2   : > { %7309 = vst [vmem:[#allocation1 + $0x1] ss:$4 sm:$0xff] %v7239_v46  ;;  %v7392_v46 = vld [vmem:[#allocation7 + $0x28] sm:$0xf] }
 0x7e3   : > { %7310 = vst [vmem:[#allocation1 + $0x2] ss:$4 sm:$0xff] %v7244_v49  ;;  %v7133_v61 = vpop.f32.mrf.mxu3  ;;  %v7526_v5 = vld [vmem:[#allocation7 + $0x90] sm:$0x1e] }
 0x7e4   : > { %v7490_v3 = vld [vmem:[#allocation7 + $0x88] sm:$0x3c]  ;;  %v7240_v35 = vrot.slane %v7133_v61, 2  ;;  %v7245_v21 = vrot.slane %v7133_v61, 4  ;;  %v7250_v51 = vrot.slane %v7133_v61, 6  ;;  %v7534_v31 = vrot.slane %v7526_v5, 1 }
 0x7e5   : > { %v7498_v34 = vrot.slane %v7490_v3, 2  ;;  %v7446_v48 = vld [vmem:[#allocation7 + $0x80] sm:$0xf]  ;;  %v7424_v49 = vld [vmem:[#allocation7 + $0x30] sm:$0x3c] }
 0x7e6   : > { %7456 = vrot.lane.b32.xlu2 %v7446_v48, %s8202_s23  ;;  %v7296_v42 = vld.sshfl [vmem:[#allocation1 + $0x20] sm:$0xff pattern:$0x73625140]  ;;  %v7393_v48 = vld [vmem:[#allocation7 + $0x50] sm:$0xf]  ;;  %v7432_v2 = vrot.slane %v7424_v49, 2 }
 0x7e7   : > { %7504 = vrot.lane.b32.xlu0 %v7498_v34, %s8202_s23  ;;  %7300 = vst [vmem:[#allocation1 + $0x20] ss:$4 sm:$0xff] %v7222_v19  ;;  %v7398_v62 = vld [vmem:[#allocation7 + $0x78] sm:$0x1e] }
 0x7e8   : > { %7301 = vst [vmem:[#allocation1 + $0x21] ss:$4 sm:$0xff] %v7227_v8  ;;  %v7406_v29 = vrot.slane %v7398_v62, 1  ;;  %v7425_v34 = vld [vmem:[#allocation7 + $0x58] sm:$0x3c] }
 0x7e9   : > { %7302 = vst [vmem:[#allocation1 + $0x22] ss:$4 sm:$0xff] %v7232_v17 }
 0x7ea   : > { %v7316_v11 = vld.sshfl [vmem:[#allocation1 + $0x10] sm:$0xff pattern:$0x73625140]  ;;  %v7315_v38 = vld.sshfl [vmem:[#allocation1 + $0x8] sm:$0xff pattern:$0x73625140] }
 0x7eb   : > { %7383 = vst [vmem:[#allocation7 + $0xb0] sm:$0x3f] %v7316_v11  ;;  %v7317_v56 = vld.sshfl [vmem:[#allocation1 + $0x18] sm:$0xff pattern:$0x73625140]  ;;  %v7136_v16 = vpop.f32.mrf.mxu3 }
 0x7ec   : > { %7382 = vst [vmem:[#allocation7 + $0xa8] sm:$0x3f] %v7315_v38  ;;  %v7258_v6 = vrot.slane %v7136_v16, 2  ;;  %v7426_v38 = vld [vmem:[#allocation7 + $0x80] sm:$0x3c] }
 0x7ed   : > { %7384 = vst [vmem:[#allocation7 + $0xb8] sm:$0x3f] %v7317_v56  ;;  %v7434_v9 = vrot.slane %v7426_v38, 2 }
 0x7ee   : > { %7413 = vrot.lane.b32.xlu2 %v7406_v29, %s8202_s23  ;;  %7319 = vst [vmem:[#allocation1] ss:$4 sm:$0xff] %v7249_v27  ;;  %v7394_v29 = vld [vmem:[#allocation7 + $0x78] sm:$0xf]  ;;  %v7470_v27 = vld [vmem:[#allocation7 + $0x88] sm:$0x1e] }
 0x7ef   : > { %7320 = vst [vmem:[#allocation1 + $0x1] ss:$4 sm:$0xff] %v7253_v23 }
 0x7f0   : > { %v7307_v25 = vld.sshfl [vmem:[#allocation1 + $0x20] sm:$0xff pattern:$0x73625140]  ;;  %7321 = vst [vmem:[#allocation1 + $0x2] ss:$4 sm:$0xff] %v7257_v40 }
 0x7f1   : > { %7311 = vst [vmem:[#allocation1 + $0x20] ss:$4 sm:$0xff] %v7133_v61 }
 0x7f2   : > { %7312 = vst [vmem:[#allocation1 + $0x21] ss:$4 sm:$0xff] %v7240_v35  ;;  %v7491_v37 = vld [vmem:[#allocation7 + $0xb0] sm:$0x3c]  ;;  %v7478_v35 = vrot.slane %v7470_v27, 1 }
 0x7f3   : > { %7313 = vst [vmem:[#allocation1 + $0x22] ss:$4 sm:$0xff] %v7245_v21  ;;  %v7499_v10 = vrot.slane %v7491_v37, 2  ;;  %v7447_v45 = vld [vmem:[#allocation7 + $0xa8] sm:$0xf] }
 0x7f4   : > { %7458 = vrot.lane.b32.xlu0 %v7447_v45, %s8202_s23  ;;  %v7527_v53 = vld [vmem:[#allocation7 + $0xb8] sm:$0x1e]  ;;  %7375 = vst.msk [vmem:[#allocation7 + $0x70] sm:$0x3f] %vm7364_vm4, %v7296_v42  ;;  %v7433_v42 = vrot.slane %v7425_v34, 2 }
 0x7f5   : > { %7506 = vrot.lane.b32.xlu1 %v7499_v10, %s8202_s23  ;;  %v7535_v63 = vrot.slane %v7527_v53, 1  ;;  %7380 = vst.msk [vmem:[#allocation7 + $0x98] sm:$0x3f] %vm7364_vm4, %v7307_v25  ;;  %v7471_v21 = vld [vmem:[#allocation7 + $0xb0] sm:$0x1e] }
 0x7f6   : > { %7537 = vrot.lane.b32.xlu2 %v7533_v28, %s8202_s23  ;;  %v8108_v37 = vld [vmem:[%s11598_s6] ss:$0 sm:$0xff] }
 0x7f7   : > { %v7328_v12 = vld.sshfl [vmem:[#allocation1 + $0x18] sm:$0xff pattern:$0x73625140] }
 0x7f8   : > { %7389 = vst [vmem:[#allocation7 + $0xe0] sm:$0x3f] %v7328_v12 }
 0x7fa   : > { %v7318_v44 = vld.sshfl [vmem:[#allocation1 + $0x20] sm:$0xff pattern:$0x73625140] }
 0x7fb   : > { %7322 = vst [vmem:[#allocation1 + $0x20] ss:$4 sm:$0xff] %v7250_v51  ;;  %v7553_v56 = vld [vmem:[#allocation7 + $0x70] sm:$0x3c]  ;;  %v7479_v51 = vrot.slane %v7471_v21, 1 }
 0x7fc   : > { %7539 = vrot.lane.b32.xlu0 %v7534_v31, %s8202_s23  ;;  %7323 = vst [vmem:[#allocation1 + $0x21] ss:$4 sm:$0xff] %v7136_v16  ;;  %v7561_v25 = vrot.slane %v7553_v56, 2 }
 0x7fd   : > { %7541 = vrot.lane.b32.xlu1 %v7535_v63, %s8202_s23  ;;  %7324 = vst [vmem:[#allocation1 + $0x22] ss:$4 sm:$0xff] %v7258_v6 }
 0x7fe   : > { %7385 = vst.msk [vmem:[#allocation7 + $0xc0] sm:$0x3f] %vm7364_vm4, %v7318_v44 }
 0x7ff   : > { %v7528_v22 = vld [vmem:[#allocation7 + $0xe0] sm:$0x1e] }
 0x800   : > { %v7536_v15 = vrot.slane %v7528_v22, 1  ;;  %v7518_v22 = vld [vmem:[#allocation7 + $0x90] sm:$0xf] }
 0x802   : > { %7543 = vrot.lane.b32.xlu2 %v7536_v15, %s8202_s23  ;;  %v7520_v15 = vld [vmem:[#allocation7 + $0xe0] sm:$0xf] }
 0x804   : > { %v7329_v50 = vld.sshfl [vmem:[#allocation1 + $0x20] sm:$0xff pattern:$0x73625140] }
 0x805   : > { %7390 = vst.msk [vmem:[#allocation7 + $0xe8] sm:$0x3f] %vm7364_vm4, %v7329_v50 }
 0x80c   : > { %v7556_v50 = vld [vmem:[#allocation7 + $0xe8] sm:$0x3c] }
 0x80d   : > { %v7564_v20 = vrot.slane %v7556_v50, 2 }
 0x817   : > { %v7408_v54 = vpop.permute.xlu2 %7407 }
 0x818   : > { %v7419_v39 = vadd.f32 %v7408_v54, %v7391_v4  ;;  %v7554_v54 = vld [vmem:[#allocation7 + $0x98] sm:$0x3c] }
 0x81a   : > { %v7439_v13 = vadd.f32 %v7431_v60, %v7419_v39 }
 0x82f   : > { %v7503_v58 = vpop.permute.xlu2 %7502 }
 0x838   : > { %v7453_v7 = vpop.permute.xlu0 %7452 }
 0x839   : > { %v7464_v0 = vadd.f32 %v7453_v7, %v7439_v13  ;;  %v7519_v7 = vld [vmem:[#allocation7 + $0xb8] sm:$0xf] }
 0x83b   : > { %v7501_v1 = vpop.permute.xlu1 %7500  ;;  %v7484_v41 = vadd.f32 %v7476_v36, %v7464_v0 }
 0x83d   : > { %v7512_v8 = vadd.f32 %v7501_v1, %v7484_v41 }
 0x83f   : > { %v7521_v11 = vadd.f32 %v7517_v55, %v7512_v8 }
 0x840   : > { %v7457_v47 = vpop.permute.xlu2 %7456  ;;  %v7410_v32 = vpop.permute.xlu0 %7409 }
 0x841   : > { %v7420_v3 = vadd.f32 %v7410_v32, %v7392_v46  ;;  %v7562_v32 = vrot.slane %v7554_v54, 2 }
 0x843   : > { %v7440_v17 = vadd.f32 %v7432_v2, %v7420_v3 }
 0x848   : > { %v7414_v30 = vpop.permute.xlu2 %7413 }
 0x849   : > { %v7422_v26 = vadd.f32 %v7414_v30, %v7394_v29 }
 0x84a   : > { %v7455_v24 = vpop.permute.xlu1 %7454 }
 0x84b   : > { %v7465_v43 = vadd.f32 %v7455_v24, %v7440_v17  ;;  %v7442_v28 = vadd.f32 %v7434_v9, %v7422_v26 }
 0x84d   : > { %v7485_v40 = vadd.f32 %v7477_v52, %v7465_v43 }
 0x84f   : > { %v7513_v63 = vadd.f32 %v7503_v58, %v7485_v40 }
 0x850   : > { %v7538_v59 = vpop.permute.xlu2 %7537 }
 0x851   : > { %v7549_v61 = vadd.f32 %v7538_v59, %v7521_v11  ;;  %v7522_v4 = vadd.f32 %v7518_v22, %v7513_v63 }
 0x852   : > { %v7412_v14 = vpop.permute.xlu1 %7411 }
 0x853   : > { %v7421_v19 = vadd.f32 %v7412_v14, %v7393_v48  ;;  %v7569_v10 = vadd.f32 %v7561_v25, %v7549_v61 }
 0x855   : > { %v7441_v62 = vadd.f32 %v7433_v42, %v7421_v19  ;;  %v7577_v16 = vadd.f32 %v8108_v37, %v7569_v10 }
 0x857   : > { %v7466_v23 = vadd.f32 %v7457_v47, %v7441_v62  ;;  %v7555_v47 = vld [vmem:[#allocation7 + $0xc0] sm:$0x3c]  ;;  %v7581_v33 = vmax.f32 %v7577_v16, 0.0 }
 0x858   : > { %v7563_v36 = vrot.slane %v7555_v47, 2 }
 0x859   : > { %v7505_v57 = vpop.permute.xlu0 %7504  ;;  %v7486_v45 = vadd.f32 %v7478_v35, %v7466_v23  ;;  %v7589_v46 = vrot.slane %v7581_v33, 2  ;;  %v8041_v48 = vrot.slane %v7581_v33, 9 }
 0x85b   : > { %v7514_v6 = vadd.f32 %v7505_v57, %v7486_v45  ;;  %v8042_v42 = vrot.slane %v7589_v46, 9  ;;  %v7621_v29 = vmax.f32 %v7581_v33, %v8041_v48 }
 0x85c   : > { %v7544_v24 = vpop.permute.xlu2 %7543 }
 0x85d   : > { %v7523_v39 = vadd.f32 %v7519_v7, %v7514_v6  ;;  %v7622_v23 = vmax.f32 %v7589_v46, %v8042_v42 }
 0x866   : > { %v7459_v5 = vpop.permute.xlu0 %7458 }
 0x867   : > { %v7507_v53 = vpop.permute.xlu1 %7506  ;;  %v7467_v44 = vadd.f32 %v7459_v5, %v7442_v28 }
 0x869   : > { %v7487_v31 = vadd.f32 %v7479_v51, %v7467_v44 }
 0x86b   : > { %v7515_v12 = vadd.f32 %v7507_v53, %v7487_v31 }
 0x86d   : > { %v7524_v1 = vadd.f32 %v7520_v15, %v7515_v12 }
 0x86e   : > { %v7540_v60 = vpop.permute.xlu0 %7539 }
 0x86f   : > { %v7552_v13 = vadd.f32 %v7544_v24, %v7524_v1  ;;  %v7542_v0 = vpop.permute.xlu1 %7541  ;;  %v7550_v58 = vadd.f32 %v7540_v60, %v7522_v4 }
 0x870   : > { %v7551_v30 = vadd.f32 %v7542_v0, %v7523_v39 }
 0x871   : > { %v7572_v14 = vadd.f32 %v7564_v20, %v7552_v13  ;;  %v7570_v41 = vadd.f32 %v7562_v32, %v7550_v58 }
 0x872   : > { %v7571_v49 = vadd.f32 %v7563_v36, %v7551_v30 }
 0x873   : > { %v7580_v3 = vadd.f32 %v8108_v37, %v7572_v14  ;;  %v7578_v34 = vadd.f32 %v8108_v37, %v7570_v41 }
 0x874   : > { %v7579_v19 = vadd.f32 %v8108_v37, %v7571_v49 }
 0x875   : > { %v7584_v2 = vmax.f32 %v7580_v3, 0.0  ;;  %v7582_v8 = vmax.f32 %v7578_v34, 0.0 }
 0x876   : > { %v7583_v57 = vmax.f32 %v7579_v19, 0.0 }
 0x877   : > { %v7592_v17 = vrot.slane %v7584_v2, 2  ;;  %v8047_v62 = vrot.slane %v7584_v2, 9  ;;  %v7590_v55 = vrot.slane %v7582_v8, 2  ;;  %v8043_v59 = vrot.slane %v7582_v8, 9 }
 0x878   : > { %v7591_v18 = vrot.slane %v7583_v57, 2  ;;  %v8045_v11 = vrot.slane %v7583_v57, 9 }
 0x879   : > { %v8048_v38 = vrot.slane %v7592_v17, 9  ;;  %v7627_v26 = vmax.f32 %v7584_v2, %v8047_v62  ;;  %v8044_v43 = vrot.slane %v7590_v55, 9  ;;  %v7623_v56 = vmax.f32 %v7582_v8, %v8043_v59 }
 0x87a   : > { %v8046_v27 = vrot.slane %v7591_v18, 9  ;;  %v7625_v61 = vmax.f32 %v7583_v57, %v8045_v11 }
 0x87b   : > { %v7628_v52 = vmax.f32 %v7592_v17, %v8048_v38  ;;  %v7624_v9 = vmax.f32 %v7590_v55, %v8044_v43  ;;  %v7629_v25 = vmax.f32 %v7621_v29, %v7623_v56 }
 0x87c   : > { %v7626_v35 = vmax.f32 %v7591_v18, %v8046_v27  ;;  %v7631_v21 = vmax.f32 %v7625_v61, %v7627_v26 }
 0x87d   : > { %v7630_v40 = vmax.f32 %v7622_v23, %v7624_v9  ;;  %v7637_v37 = vperm.slane %v7629_v25, 0 }
 0x87e   : > { %v7632_v28 = vmax.f32 %v7626_v35, %v7628_v52  ;;  %v7639_v45 = vperm.slane %v7631_v21, 0 }
 0x87f   : > { %v7638_v10 = vperm.slane %v7630_v40, 0 }
 0x880   : > { %v7640_v5 = vperm.slane %v7632_v28, 0 }
 0x881   : > { %v7641_v53 = vsel %vm5152_vm10, %v7638_v10, %v7637_v37 }
 0x882   : > { %v7642_v51 = vsel %vm5152_vm10, %v7640_v5, %v7639_v45  ;;  %7646 = vst.msk [vmem:[%s271_s16] sm:$0x3] %vm7645_vm5, %v7641_v53 }
 0x883   : > { %7647 = vst.msk [vmem:[%s271_s16 + $0x2] sm:$0x3] %vm7645_vm5, %v7642_v51 }
 0x884   : > { %8161 = shalt.err (!%p8158_p3)
}
 0x885   : > { %s8206_s13 = smov 2  }
 0x886   : > { %8058 = dma.vmem_to_hbm [thread:$0]  (%p8285_p5), %s7662_s28, 64, %s7664_s21, %s7649_s17, %s8204_s8, %s8204_s8, %s8206_s13  }
 0x887 PF: > { %p8064_p4 = scmp.ge.s32.totalorder %s8196_s27, 2  ;;  %s7678_s14 = sand.u32 1, %s8184_s24  }
 0x888   : > { %s7679_s15 = scalar_lea.sflag [#allocation9], %s7678_s14 }
 0x889   : > { %p8061_p7 = pnand %p8064_p4, %p8289_p6 }
 0x88b   : > { %p8062_p8 = pneg %p8061_p7 }
 0x88d   : > { %8179 = dma.done.wait (%p8062_p8), %s7679_s15, 64  }
 0x88e   : > { %8181 = vsyncadd (%p8062_p8), %s7679_s15, 4294967232  ;;  %p17_p9 = scmp.ge.s32.totalorder %s8272_s30, 4   ;;  %s11602_s24 = smov %s8188_s25 }
 0x88f   : > { %s11603_s25 = smov %s8192_s26  ;;  %s11604_s26 = smov %s8283_s10 }
 0x890   : > { %s11605_s27 = smov %s8272_s30  ;;  %19 = sbr.rel (!%p17_p9) target bundleno = 3 (0x3), region = 129 }
 0x895   :  { %7685 = vsyncpa [#allocation9], 1 }
 0x896   :  { %7687 = vsyncpa [#allocation9 + $0x1], 1 }

</bundles_post_ra>
